<compile_context>
chip_gen: v5e
topology: v5e:2x2
jax: 0.10.0
libtpu: 0.0.40
codegen_flags: <defaults>
</compile_context>

<pallas_src>
import functools
import math

import jax
import jax.numpy as jnp
from jax.experimental import pallas as pl
from jax.experimental.pallas import tpu as pltpu

EPS = 1e-5          # PyTorch BatchNorm default eps
LANE = 128
SUBLANE = 8
LSTM_TS = 8         # timesteps per BiLSTM grid iteration


def _round_up(x, m):
    return (x + m - 1) // m * m


def _default_vmem_limit():
    # Per-generation scoped VMEM: ~3/4 of physical, capped at 100 MiB
    # (v5e/v6e: 128 MiB physical -> ~96-100 MiB; v7x: 64 MiB -> 48 MiB).
    try:
        info = pltpu.get_tpu_info()
        cap = int(getattr(info, "vmem_capacity_bytes", 0) or 0)
        if cap > 0:
            return int(min(cap * 3 // 4, 100 * 1024 * 1024))
    except Exception:
        pass
    return 48 * 1024 * 1024


VMEM_LIMIT = _default_vmem_limit()


def _cparams(sem):
    return pltpu.CompilerParams(dimension_semantics=sem,
                                vmem_limit_bytes=VMEM_LIMIT)


# ----------------------------- tiled GEMM kernel -----------------------------

def _matmul_kernel(a_ref, b_ref, o_ref, acc_ref):
    @pl.when(pl.program_id(2) == 0)
    def _():
        acc_ref[...] = jnp.zeros_like(acc_ref)

    acc_ref[...] += jnp.dot(a_ref[...], b_ref[...],
                            preferred_element_type=jnp.float32)

    # Only write back the tile on the final K step (saves the throwaway
    # cast + VMEM store on every other reduction step).
    @pl.when(pl.program_id(2) == pl.num_programs(2) - 1)
    def _():
        o_ref[...] = acc_ref[...].astype(o_ref.dtype)


def _rhs_pad_dims(K, N):
    tk = 512 if K > 512 else _round_up(K, LANE)
    tn = 512 if N > 512 else _round_up(N, LANE)
    return tk, tn, _round_up(K, tk), _round_up(N, tn)


def _pad_rhs(b):
    """One-time weight prep: bf16 cast + pad to the GEMM's (Kp, Np) tiling."""
    K, N = b.shape
    _, _, Kp, Np = _rhs_pad_dims(K, N)
    b = b.astype(jnp.bfloat16)
    if (K, N) != (Kp, Np):
        b = jnp.pad(b, ((0, Kp - K), (0, Np - N)))
    return b


def pallas_matmul(a, b, out_dtype=jnp.float32, min_rows=0):
    """Tiled (M,K)@(K,N).  Operands are cast to bf16 (f32 accumulation).  `b`
    may already be padded/bf16 (prepare_params).  The result is returned
    zero-padded to (Mp, Np) lane-dense tiles — callers slice.  `min_rows`
    guarantees Mp >= min_rows (extra rows are zeros)."""
    M, Ka = a.shape
    Kb, N = b.shape
    M_eff = max(M, min_rows)
    tm = 512 if M_eff > 512 else _round_up(M_eff, SUBLANE)
    K = max(Ka, Kb)
    tk, tn, Kp, Np = _rhs_pad_dims(K, N)
    Mp = _round_up(M_eff, tm)

    a_p = a.astype(jnp.bfloat16)
    if (M, Ka) != (Mp, Kp):
        a_p = jnp.pad(a_p, ((0, Mp - M), (0, Kp - Ka)))
    b_p = b.astype(jnp.bfloat16)
    if (Kb, N) != (Kp, Np):
        b_p = jnp.pad(b_p, ((0, Kp - Kb), (0, Np - N)))

    return pl.pallas_call(
        _matmul_kernel,
        out_shape=jax.ShapeDtypeStruct((Mp, Np), out_dtype),
        grid_spec=pltpu.PrefetchScalarGridSpec(
            num_scalar_prefetch=0,
            grid=(Mp // tm, Np // tn, Kp // tk),
            in_specs=[pl.BlockSpec((tm, tk), lambda i, j, k: (i, k)),
                      pl.BlockSpec((tk, tn), lambda i, j, k: (k, j))],
            out_specs=pl.BlockSpec((tm, tn), lambda i, j, k: (i, j)),
            scratch_shapes=[pltpu.VMEM((tm, tn), jnp.float32)]),
        compiler_params=_cparams(("parallel", "parallel", "arbitrary")),
    )(a_p, b_p)


# -------------------- BatchNorm (+Hardtanh), two-pass, row-tiled --------------

def _make_bn_stats_kernel(rows_true, group, valid, tr, rows_padded):
    need_row = rows_true < rows_padded
    need_grp = valid < group

    def kernel(y_ref, sum_ref, sq_ref):
        @pl.when(pl.program_id(1) == 0)
        def _():
            sum_ref[...] = jnp.zeros_like(sum_ref)
            sq_ref[...] = jnp.zeros_like(sq_ref)

        y = y_ref[...].astype(jnp.float32)
        if need_row or need_grp:
            ridx = pl.program_id(1) * tr + jax.lax.broadcasted_iota(
                jnp.int32, (y_ref.shape[0], 1), 0)
            mask = None
            if need_row:
                mask = ridx < rows_true
            if need_grp:
                gm = (ridx % group) < valid
                mask = gm if mask is None else jnp.logical_and(mask, gm)
            y = jnp.where(mask, y, 0.0)
        # single masked sweep: sum and sum-of-squares (var = E[x^2] - E[x]^2)
        sum_ref[...] += jnp.sum(y, axis=0, keepdims=True)
        sq_ref[...] += jnp.sum(y * y, axis=0, keepdims=True)

    return kernel


def _make_bn_apply_kernel(clip):
    def kernel(y_ref, scale_ref, shift_ref, o_ref):
        out = y_ref[...].astype(jnp.float32) * scale_ref[...] + shift_ref[...]
        if clip is not None:
            out = jnp.clip(out, clip[0], clip[1])
        o_ref[...] = out.astype(o_ref.dtype)

    return kernel


def pallas_bn_act(y, gamma, beta, clip=None, rows_true=None,
                  rows_group=None, rows_valid=None, out_dtype=jnp.bfloat16):
    """BatchNorm (training-mode batch stats) + optional Hardtanh over a
    (rows, C) slab.  Pass 1 accumulates masked per-channel sum/sumsq over
    (tr, tc) tiles; scale/shift are folded on (1, Cp) vectors; pass 2 applies
    y*scale+shift.  Stats only use rows r with r < rows_true and
    (r % rows_group) < rows_valid.  Returns (rows, Cp) — padded channels are 0."""
    rows, C = y.shape
    if rows_true is None:
        rows_true = rows
    if rows_group is None:
        rows_group, rows_valid = rows_true, rows_true
    count = (rows_true // rows_group) * rows_valid + min(rows_true % rows_group,
                                                         rows_valid)
    Cp = _round_up(C, LANE)
    if Cp != C:
        y = jnp.pad(y, ((0, 0), (0, Cp - C)))

    # Row tiling: single block when small, else the largest divisor tile;
    # pad rows only as a last resort (padded rows are masked out of the stats).
    if rows <= 1024:
        tr, Rp = rows, rows
    else:
        tr = next((t for t in (1024, 512, 256, 128, 64, 32, 16, 8)
                   if rows % t == 0), None)
        if tr is None:
            Rp = _round_up(rows, 256)
            y = jnp.pad(y, ((0, Rp - rows), (0, 0)))
            tr = 256
        else:
            Rp = rows
    tc = next(t for t in (512, 256, 128) if Cp % t == 0)

    def _prow(v):
        v = v.reshape(1, -1).astype(jnp.float32)
        return jnp.pad(v, ((0, 0), (0, Cp - v.shape[1])))

    g_p, b_p = _prow(gamma), _prow(beta)

    sums, sqs = pl.pallas_call(
        _make_bn_stats_kernel(rows_true, rows_group, rows_valid, tr, Rp),
        out_shape=(jax.ShapeDtypeStruct((1, Cp), jnp.float32),
                   jax.ShapeDtypeStruct((1, Cp), jnp.float32)),
        grid_spec=pltpu.PrefetchScalarGridSpec(
            num_scalar_prefetch=0,
            grid=(Cp // tc, Rp // tr),
            in_specs=[pl.BlockSpec((tr, tc), lambda c, r: (r, c))],
            out_specs=[pl.BlockSpec((1, tc), lambda c, r: (0, c)),
                       pl.BlockSpec((1, tc), lambda c, r: (0, c))]),
        compiler_params=_cparams(("parallel", "arbitrary")),
    )(y)

    inv_count = 1.0 / float(count)
    mean = sums * inv_count
    var = jnp.maximum(sqs * inv_count - mean * mean, 0.0)
    scale = g_p * jax.lax.rsqrt(var + EPS)
    shift = b_p - mean * scale

    out = pl.pallas_call(
        _make_bn_apply_kernel(clip),
        out_shape=jax.ShapeDtypeStruct((Rp, Cp), out_dtype),
        grid_spec=pltpu.PrefetchScalarGridSpec(
            num_scalar_prefetch=0,
            grid=(Cp // tc, Rp // tr),
            in_specs=[pl.BlockSpec((tr, tc), lambda c, r: (r, c)),
                      pl.BlockSpec((1, tc), lambda c, r: (0, c)),
                      pl.BlockSpec((1, tc), lambda c, r: (0, c))],
            out_specs=pl.BlockSpec((tr, tc), lambda c, r: (r, c))),
        compiler_params=_cparams(("parallel", "parallel")),
    )(y, scale, shift)
    return out[:rows] if Rp != rows else out


def matmul_bn_act(a, b, gamma, beta, clip=None, rows_group=None,
                  rows_valid=None, out_dtype=jnp.bfloat16):
    """GEMM (bf16) -> training-mode BN (+clip).  Returns the full padded
    (Mp, Cp) slab; callers slice rows/channels as needed."""
    M = a.shape[0]
    y = pallas_matmul(a, b, out_dtype=jnp.bfloat16)
    return pallas_bn_act(y, gamma, beta, clip=clip, rows_true=M,
                         rows_group=rows_group, rows_valid=rows_valid,
                         out_dtype=out_dtype)


# --------------------------------- conv stack --------------------------------

def _im2col_nhwc(x, kh, kw, sh, sw):
    # x: (N, H, W, C) -> (N*Ho*Wo, C*kh*kw), feature order (C, kh, kw) to match
    # the PyTorch (Co, Ci, kh, kw) weight flattening.
    # TODO(synk): replace with a direct Pallas conv kernel (manual-DMA window
    # assembly) to avoid the kh*kw HBM expansion at production shapes.
    N, H, W, C = x.shape
    Ho = (H - kh) // sh + 1
    Wo = (W - kw) // sw + 1
    cols = []
    for i in range(kh):
        for j in range(kw):
            cols.append(x[:, i:i + sh * Ho:sh, j:j + sw * Wo:sw, :])
    p = jnp.stack(cols, axis=-1)                      # (N, Ho, Wo, C, kh*kw)
    p = p.reshape(N * Ho * Wo, C * kh * kw)
    return p, Ho, Wo


def conv_bn_htanh(x_nhwc, w_prep, gamma, beta, kh, kw, stride, Co):
    # NOTE: the conv bias is a mathematical no-op under training-mode BatchNorm
    # (it shifts y and E[y] identically), so it is not applied here.
    N = x_nhwc.shape[0]
    a, Ho, Wo = _im2col_nhwc(x_nhwc, kh, kw, stride[0], stride[1])
    y = matmul_bn_act(a, w_prep, gamma, beta, clip=(0.0, 20.0),
                      out_dtype=jnp.bfloat16)
    return y[:N * Ho * Wo, :Co].reshape(N, Ho, Wo, Co)


# ------------------------------ bidirectional LSTM ----------------------------

def _bilstm_kernel(g_ref, whh_ref, o_ref, h_scr, c_scr):
    # grid = (direction, time-block).  The direction axis is "parallel" (one
    # direction per TensorCore on v7x); the time axis carries the recurrence.
    d = pl.program_id(0)

    @pl.when(pl.program_id(1) == 0)
    def _():
        h_scr[...] = jnp.zeros_like(h_scr)
        c_scr[...] = jnp.zeros_like(c_scr)

    TS, _, Hp = o_ref.shape
    whh = whh_ref[0]                                  # (Hp, 4*Hp) bf16
    for s in range(TS):                               # fully unrolled
        idx = d * (TS - 1 - 2 * s) + s                # fwd: s, bwd: TS-1-s
        gates = g_ref[idx].astype(jnp.float32) + jnp.dot(
            h_scr[...].astype(jnp.bfloat16), whh,
            preferred_element_type=jnp.float32)
        i = jax.nn.sigmoid(gates[:, 0 * Hp:1 * Hp])
        f = jax.nn.sigmoid(gates[:, 1 * Hp:2 * Hp])
        g = jnp.tanh(gates[:, 2 * Hp:3 * Hp])
        o = jax.nn.sigmoid(gates[:, 3 * Hp:4 * Hp])
        c = f * c_scr[...] + i * g
        h = o * jnp.tanh(c)
        c_scr[...] = c
        h_scr[...] = h
        o_ref[idx] = h.astype(o_ref.dtype)


def bilstm(gates, whh_pair, Hp, TS):
    # gates: (Tp, Nb, 8*Hp) bf16 = [fwd gates | bwd gates], Tp % TS == 0, padded
    # timesteps are all-zero (which keeps h=c=0 exactly).  whh_pair: (2, Hp, 4Hp).
    # The backward time reversal is driven purely by index_maps.
    Tp, Nb, _ = gates.shape
    Tb = Tp // TS
    return pl.pallas_call(
        _bilstm_kernel,
        out_shape=jax.ShapeDtypeStruct((Tp, Nb, 2 * Hp), jnp.bfloat16),
        grid_spec=pltpu.PrefetchScalarGridSpec(
            num_scalar_prefetch=0,
            grid=(2, Tb),
            in_specs=[
                pl.BlockSpec((TS, Nb, 4 * Hp),
                             lambda d, t: (t + d * (Tb - 1 - 2 * t), 0, d)),
                pl.BlockSpec((1, Hp, 4 * Hp), lambda d, t: (d, 0, 0)),
            ],
            out_specs=pl.BlockSpec((TS, Nb, Hp),
                                   lambda d, t: (t + d * (Tb - 1 - 2 * t), 0, d)),
            scratch_shapes=[pltpu.VMEM((Nb, Hp), jnp.float32),
                            pltpu.VMEM((Nb, Hp), jnp.float32)]),
        compiler_params=_cparams(("parallel", "arbitrary")),
    )(gates, whh_pair)


def _pack_ih(wih_f, wih_b, Hp):
    # PyTorch (4H, Din) weights (gate order i,f,g,o) -> (Din, 8*Hp); each gate
    # owns a 128-aligned lane slot; [0:4Hp)=fwd, [4Hp:8Hp)=bwd.
    H = wih_f.shape[0] // 4
    Din = wih_f.shape[1]
    out = jnp.zeros((Din, 8 * Hp), jnp.float32)
    for d, w in enumerate((wih_f, wih_b)):
        for g in range(4):
            col = d * 4 * Hp + g * Hp
            out = out.at[:, col:col + H].set(w[g * H:(g + 1) * H, :].T)
    return out


def _pack_hh(whh, Hp):
    H = whh.shape[1]
    out = jnp.zeros((Hp, 4 * Hp), jnp.float32)
    for g in range(4):
        out = out.at[:H, g * Hp:g * Hp + H].set(whh[g * H:(g + 1) * H, :].T)
    return out


def batch_lstm_layer(x, p, n_true, batch_norm, H):
    # x: (T, Nb, Din) bf16 (lanes >= logical feature count are zero)
    # -> (T, Nb, Hp) bidirectional-summed hidden states (lanes >= H are zero).
    T, Nb, Din = x.shape
    Hp = _round_up(H, LANE)
    Tp = _round_up(T, LSTM_TS)
    x2d = x.reshape(T * Nb, Din)
    if batch_norm:
        # SequenceWise(Linear(no bias) -> BatchNorm1d); stats exclude padded rows
        x2d = matmul_bn_act(x2d, p["w_lin"], p["bn_gamma"], p["bn_beta"],
                            rows_group=Nb, rows_valid=n_true,
                            out_dtype=jnp.bfloat16)[:T * Nb]
    # fused fwd+bwd input projection; extra (padded timestep) rows are zero
    gates = pallas_matmul(x2d, p["w_ih"], out_dtype=jnp.bfloat16,
                          min_rows=Tp * Nb)
    gates = gates[:Tp * Nb, :8 * Hp].reshape(Tp, Nb, 8 * Hp)
    out = bilstm(gates, p["whh"], Hp, LSTM_TS)
    return out[:T, :, :Hp] + out[:T, :, Hp:]          # x.view(T,N,2,-1).sum(2)


# ----------------------------------- fc --------------------------------------

def fc_layer(x, gamma, beta, w_prep, n_true, num_classes):
    # SequenceWise(BatchNorm1d -> Linear(no bias))
    T, Nb, Hin = x.shape
    x2d = x.reshape(T * Nb, Hin)
    y = pallas_bn_act(x2d, gamma, beta, rows_group=Nb, rows_valid=n_true,
                      out_dtype=jnp.bfloat16)
    logits = pallas_matmul(y, w_prep, out_dtype=jnp.float32)
    return logits[:T * Nb, :num_classes].reshape(T, Nb, num_classes)


# -------------------------------- full forward --------------------------------

def deepspeech_forward(x, prep, hidden, num_classes):
    N = x.shape[0]
    x = x.astype(jnp.bfloat16).transpose(0, 2, 3, 1)            # NCHW -> NHWC
    # conv stack: im2col -> tiled bf16 GEMM -> BN(batch stats) + Hardtanh(0,20)
    x = conv_bn_htanh(x, prep["conv1_w"], prep["bn1_gamma"], prep["bn1_beta"],
                      41, 11, (2, 2), 32)
    x = conv_bn_htanh(x, prep["conv2_w"], prep["bn2_gamma"], prep["bn2_beta"],
                      21, 11, (2, 1), 32)
    _, Hf, Tt, C = x.shape
    # (N, Hf, T, C) -> (T, N, C*Hf): same feature order (c*Hf + h) as PyTorch's
    # view(N, C*Hf, T).transpose(1,2).transpose(0,1)
    x = x.transpose(2, 0, 3, 1).reshape(Tt, N, C * Hf)
    # pad the batch to a sublane multiple; padded rows are masked from BN stats
    Nb = _round_up(N, SUBLANE)
    if Nb != N:
        x = jnp.pad(x, ((0, 0), (0, Nb - N), (0, 0)))
    # RNN stack (layer 0 has no input BatchNorm, like the PyTorch module)
    for li, p in enumerate(prep["rnns"]):
        x = batch_lstm_layer(x, p, n_true=N, batch_norm=(li > 0), H=hidden)
    # fc: SequenceWise(BatchNorm1d -> Linear)
    x = fc_layer(x, prep["fc_bn_gamma"], prep["fc_bn_beta"], prep["fc_w"],
                 n_true=N, num_classes=num_classes)
    return x[:, :N].transpose(1, 0, 2)                # (N, T, num_classes)


# --------------------------- one-time parameter prep ---------------------------

def prepare_params(params, hidden):
    """Hoists all weight packing / padding / bf16 casting out of the hot path."""
    Hp = _round_up(hidden, LANE)
    prep = {
        "conv1_w": _pad_rhs(params["conv1_w"].reshape(32, -1).T),
        "bn1_gamma": params["bn1_gamma"], "bn1_beta": params["bn1_beta"],
        "conv2_w": _pad_rhs(params["conv2_w"].reshape(32, -1).T),
        "bn2_gamma": params["bn2_gamma"], "bn2_beta": params["bn2_beta"],
        "fc_bn_gamma": params["fc_bn_gamma"], "fc_bn_beta": params["fc_bn_beta"],
        "fc_w": _pad_rhs(params["fc_w"].T),
    }
    rnns = []
    for p in params["rnns"]:
        q = {}
        if "w_lin" in p:
            q["w_lin"] = _pad_rhs(p["w_lin"].T)
            q["bn_gamma"] = p["bn_gamma"]
            q["bn_beta"] = p["bn_beta"]
        q["w_ih"] = _pad_rhs(_pack_ih(p["wih_f"], p["wih_b"], Hp))
        q["whh"] = jnp.stack([_pack_hh(p["whh_f"], Hp),
                              _pack_hh(p["whh_b"], Hp)]).astype(jnp.bfloat16)
        rnns.append(q)
    prep["rnns"] = rnns
    return prep


# --------------------------- parameter init ---------------------------------

def init_params(key, rnn_input_size, hidden, nb_layers, num_classes):
    keys = iter(jax.random.split(key, 128))

    def nrm(shape, scale):
        return scale * jax.random.normal(next(keys), shape, jnp.float32)

    params = {
        "conv1_w": nrm((32, 1, 41, 11), 0.05),
        "conv1_b": nrm((32,), 0.05),       # no-op in the forward (training BN)
        "bn1_gamma": 1.0 + nrm((32,), 0.1),
        "bn1_beta": nrm((32,), 0.1),
        "conv2_w": nrm((32, 32, 21, 11), 0.02),
        "conv2_b": nrm((32,), 0.05),       # no-op in the forward (training BN)
        "bn2_gamma": 1.0 + nrm((32,), 0.1),
        "bn2_beta": nrm((32,), 0.1),
    }
    s = 1.0 / math.sqrt(hidden)
    rnns = []
    din = rnn_input_size
    for li in range(nb_layers):
        p = {}
        if li > 0:
            p["w_lin"] = nrm((hidden, din), s)
            p["bn_gamma"] = 1.0 + nrm((hidden,), 0.1)
            p["bn_beta"] = nrm((hidden,), 0.1)
            lstm_in = hidden
        else:
            lstm_in = din
        p["wih_f"] = nrm((4 * hidden, lstm_in), s)
        p["whh_f"] = nrm((4 * hidden, hidden), s)
        p["wih_b"] = nrm((4 * hidden, lstm_in), s)
        p["whh_b"] = nrm((4 * hidden, hidden), s)
        rnns.append(p)
        din = hidden
    params["rnns"] = rnns
    params["fc_bn_gamma"] = 1.0 + nrm((hidden,), 0.1)
    params["fc_bn_beta"] = nrm((hidden,), 0.1)
    params["fc_w"] = nrm((num_classes, hidden), s)
    return params


# --------------------------------- main --------------------------------------

if __name__ == "__main__":
    key = jax.random.PRNGKey(0)
    k_x, k_p = jax.random.split(key)

    # Small but conv-valid shapes: freq must survive kernels (41, s=2) and (21, s=2);
    # time must survive kernels (11, s=2) and (11, s=1).
    N, FREQ, TIME = 2, 81, 49
    HIDDEN, NB_LAYERS, NUM_CLASSES = 32, 2, 29

    h1 = (FREQ - 41) // 2 + 1        # 21
    h2 = (h1 - 21) // 2 + 1          # 1
    t1 = (TIME - 11) // 2 + 1        # 20
    t2 = (t1 - 11) // 1 + 1          # 10
    rnn_input_size = 32 * h2         # 32

    x = jax.random.normal(k_x, (N, 1, FREQ, TIME), jnp.float32)
    params = init_params(k_p, rnn_input_size, HIDDEN, NB_LAYERS, NUM_CLASSES)

    # One-time weight packing/padding/casting outside the hot path.
    prepared = prepare_params(params, HIDDEN)

    fwd = jax.jit(functools.partial(deepspeech_forward,
                                    hidden=HIDDEN, num_classes=NUM_CLASSES))
    out = jax.block_until_ready(fwd(x, prepared))

    assert out.shape == (N, t2, NUM_CLASSES), out.shape
    assert bool(jnp.all(jnp.isfinite(out)))
    print("KERNEL_OK")
</pallas_src>

<mosaic_0001>
module attributes {stable_mosaic.version = 11 : i64} {
  func.func @_matmul_kernel(%arg0: i32, %arg1: i32, %arg2: i32, %arg3: memref<512x512xbf16, #tpu.memory_space<vmem>>, %arg4: memref<512x128xbf16, #tpu.memory_space<vmem>>, %arg5: memref<512x128xbf16, #tpu.memory_space<vmem>>, %arg6: memref<512x128xf32, #tpu.memory_space<vmem>>) attributes {dimension_semantics = [#tpu.dimension_semantics<parallel>, #tpu.dimension_semantics<parallel>, #tpu.dimension_semantics<arbitrary>], iteration_bounds = array<i64: 2, 1, 1>, scalar_prefetch = 0 : i64, scratch_operands = 1 : i64, tpu.core_type = #tpu.core_type<tc>, window_params = [{transform_indices = @transform_0, window_bounds = array<i64: 512, 512>}, {transform_indices = @transform_1, window_bounds = array<i64: 512, 128>}, {transform_indices = @transform_2, window_bounds = array<i64: 512, 128>}]} {
    %c0_i32 = arith.constant 0 : i32
    %0 = arith.cmpi eq, %arg2, %c0_i32 : i32
    %1 = arith.extui %0 : i1 to i32
    %c0_i32_0 = arith.constant 0 : i32
    %2 = arith.cmpi ne, %1, %c0_i32_0 : i32
    scf.if %2 {
      %cst_10 = arith.constant 0.000000e+00 : f32
      %12 = vector.broadcast %cst_10 : f32 to vector<512x128xf32>
      %c0_11 = arith.constant 0 : index
      %c0_12 = arith.constant 0 : index
      %13 = vector.load %arg6[%c0_11, %c0_12] : memref<512x128xf32, #tpu.memory_space<vmem>>, vector<512x128xf32>
      tpu.vector_store %arg6[%c0_11, %c0_12], %12 {strides = array<i32>} : memref<512x128xf32, #tpu.memory_space<vmem>>, vector<512x128xf32>,
    } else {
    }
    %c0 = arith.constant 0 : index
    %c0_1 = arith.constant 0 : index
    %3 = vector.load %arg6[%c0, %c0_1] : memref<512x128xf32, #tpu.memory_space<vmem>>, vector<512x128xf32>
    %c0_2 = arith.constant 0 : index
    %c0_3 = arith.constant 0 : index
    %4 = vector.load %arg3[%c0_2, %c0_3] : memref<512x512xbf16, #tpu.memory_space<vmem>>, vector<512x512xbf16>
    %c0_4 = arith.constant 0 : index
    %c0_5 = arith.constant 0 : index
    %5 = vector.load %arg4[%c0_4, %c0_5] : memref<512x128xbf16, #tpu.memory_space<vmem>>, vector<512x128xbf16>
    %cst = arith.constant dense<0.000000e+00> : vector<512x128xf32>
    %6 = tpu.matmul %4, %5, %cst {dimension_numbers = #tpu.dot_dimension_numbers<[1], [0], [0], [1], [0, 0, 1, 1], [], []>} : vector<512x512xbf16>, vector<512x128xbf16>, vector<512x128xf32> -> vector<512x128xf32>
    %7 = arith.addf %3, %6 : vector<512x128xf32>
    %c0_6 = arith.constant 0 : index
    %c0_7 = arith.constant 0 : index
    %8 = vector.load %arg6[%c0_6, %c0_7] : memref<512x128xf32, #tpu.memory_space<vmem>>, vector<512x128xf32>
    tpu.vector_store %arg6[%c0_6, %c0_7], %7 {strides = array<i32>} : memref<512x128xf32, #tpu.memory_space<vmem>>, vector<512x128xf32>,
    %c0_i32_8 = arith.constant 0 : i32
    %9 = arith.cmpi eq, %arg2, %c0_i32_8 : i32
    %10 = arith.extui %9 : i1 to i32
    %c0_i32_9 = arith.constant 0 : i32
    %11 = arith.cmpi ne, %10, %c0_i32_9 : i32
    scf.if %11 {
      %c0_10 = arith.constant 0 : index
      %c0_11 = arith.constant 0 : index
      %12 = vector.load %arg6[%c0_10, %c0_11] : memref<512x128xf32, #tpu.memory_space<vmem>>, vector<512x128xf32>
      %13 = arith.truncf %12 : vector<512x128xf32> to vector<512x128xbf16>
      %c0_12 = arith.constant 0 : index
      %c0_13 = arith.constant 0 : index
      %14 = vector.load %arg5[%c0_12, %c0_13] : memref<512x128xbf16, #tpu.memory_space<vmem>>, vector<512x128xbf16>
      tpu.vector_store %arg5[%c0_12, %c0_13], %13 {strides = array<i32>} : memref<512x128xbf16, #tpu.memory_space<vmem>>, vector<512x128xbf16>,
    } else {
    }
    return
  }
  func.func @transform_0(%arg0: i32, %arg1: i32, %arg2: i32) -> (i32, i32) {
    %c0_i32 = arith.constant 0 : i32
    return %arg0, %arg2 : i32, i32
  }
  func.func @transform_1(%arg0: i32, %arg1: i32, %arg2: i32) -> (i32, i32) {
    %c0_i32 = arith.constant 0 : i32
    return %arg2, %arg1 : i32, i32
  }
  func.func @transform_2(%arg0: i32, %arg1: i32, %arg2: i32) -> (i32, i32) {
    %c0_i32 = arith.constant 0 : i32
    return %arg0, %arg1 : i32, i32
  }
}

module attributes {stable_mosaic.version = 11 : i64} {
  func.func @kernel(%arg0: i32, %arg1: i32, %arg2: memref<1024x128xbf16, #tpu.memory_space<vmem>>, %arg3: memref<1x128xf32, #tpu.memory_space<vmem>>, %arg4: memref<1x128xf32, #tpu.memory_space<vmem>>) attributes {dimension_semantics = [#tpu.dimension_semantics<parallel>, #tpu.dimension_semantics<arbitrary>], iteration_bounds = array<i64: 1, 1>, scalar_prefetch = 0 : i64, scratch_operands = 0 : i64, tpu.core_type = #tpu.core_type<tc>, window_params = [{transform_indices = @transform_0, window_bounds = array<i64: 1024, 128>}, {transform_indices = @transform_1, window_bounds = array<i64: 1, 128>}, {transform_indices = @transform_2, window_bounds = array<i64: 1, 128>}]} {
    %c0_i32 = arith.constant 0 : i32
    %0 = arith.cmpi eq, %arg1, %c0_i32 : i32
    %1 = arith.extui %0 : i1 to i32
    %c0_i32_0 = arith.constant 0 : i32
    %2 = arith.cmpi ne, %1, %c0_i32_0 : i32
    scf.if %2 {
      %cst_12 = arith.constant 0.000000e+00 : f32
      %26 = vector.broadcast %cst_12 : f32 to vector<1x128xf32>
      %c0_13 = arith.constant 0 : index
      %c0_14 = arith.constant 0 : index
      %27 = vector.load %arg3[%c0_13, %c0_14] : memref<1x128xf32, #tpu.memory_space<vmem>>, vector<1x128xf32>
      tpu.vector_store %arg3[%c0_13, %c0_14], %26 {strides = array<i32>} : memref<1x128xf32, #tpu.memory_space<vmem>>, vector<1x128xf32>,
      %cst_15 = arith.constant 0.000000e+00 : f32
      %28 = vector.broadcast %cst_15 : f32 to vector<1x128xf32>
      %c0_16 = arith.constant 0 : index
      %c0_17 = arith.constant 0 : index
      %29 = vector.load %arg4[%c0_16, %c0_17] : memref<1x128xf32, #tpu.memory_space<vmem>>, vector<1x128xf32>
      tpu.vector_store %arg4[%c0_16, %c0_17], %28 {strides = array<i32>} : memref<1x128xf32, #tpu.memory_space<vmem>>, vector<1x128xf32>,
    } else {
    }
    %c0 = arith.constant 0 : index
    %c0_1 = arith.constant 0 : index
    %3 = vector.load %arg2[%c0, %c0_1] : memref<1024x128xbf16, #tpu.memory_space<vmem>>, vector<1024x128xbf16>
    %4 = arith.extf %3 : vector<1024x128xbf16> to vector<1024x128xf32>
    %c1024_i32 = arith.constant 1024 : i32
    %5 = arith.muli %arg1, %c1024_i32 : i32
    %6 = tpu.iota {dimensions = array<i32: 0>} : vector<1024x1xi32>
    %7 = vector.broadcast %5 : i32 to vector<1024x1xi32>
    %8 = arith.addi %7, %6 : vector<1024x1xi32>
    %c840_i32 = arith.constant 840 : i32
    %9 = vector.broadcast %c840_i32 : i32 to vector<1024x1xi32>
    %10 = arith.cmpi slt, %8, %9 : vector<1024x1xi32>
    %cst = arith.constant 0.000000e+00 : f32
    %11 = vector.shape_cast %10 : vector<1024x1xi1> to vector<1024x1xi1>
    %12 = vector.broadcast %11 : vector<1024x1xi1> to vector<1024x128xi1>
    %13 = vector.broadcast %cst : f32 to vector<1024x128xf32>
    %14 = arith.select %12, %4, %13 : vector<1024x128xi1>, vector<1024x128xf32>
    %c0_2 = arith.constant 0 : index
    %c0_3 = arith.constant 0 : index
    %15 = vector.load %arg3[%c0_2, %c0_3] : memref<1x128xf32, #tpu.memory_space<vmem>>, vector<1x128xf32>
    %cst_4 = arith.constant dense<0.000000e+00> : vector<128xf32>
    %16 = vector.multi_reduction <add>, %14, %cst_4 [0] : vector<1024x128xf32> to vector<128xf32>
    %17 = vector.shape_cast %16 : vector<128xf32> to vector<1x128xf32>
    %18 = arith.addf %15, %17 : vector<1x128xf32>
    %c0_5 = arith.constant 0 : index
    %c0_6 = arith.constant 0 : index
    %19 = vector.load %arg3[%c0_5, %c0_6] : memref<1x128xf32, #tpu.memory_space<vmem>>, vector<1x128xf32>
    tpu.vector_store %arg3[%c0_5, %c0_6], %18 {strides = array<i32>} : memref<1x128xf32, #tpu.memory_space<vmem>>, vector<1x128xf32>,
    %c0_7 = arith.constant 0 : index
    %c0_8 = arith.constant 0 : index
    %20 = vector.load %arg4[%c0_7, %c0_8] : memref<1x128xf32, #tpu.memory_space<vmem>>, vector<1x128xf32>
    %21 = arith.mulf %14, %14 : vector<1024x128xf32>
    %cst_9 = arith.constant dense<0.000000e+00> : vector<128xf32>
    %22 = vector.multi_reduction <add>, %21, %cst_9 [0] : vector<1024x128xf32> to vector<128xf32>
    %23 = vector.shape_cast %22 : vector<128xf32> to vector<1x128xf32>
    %24 = arith.addf %20, %23 : vector<1x128xf32>
    %c0_10 = arith.constant 0 : index
    %c0_11 = arith.constant 0 : index
    %25 = vector.load %arg4[%c0_10, %c0_11] : memref<1x128xf32, #tpu.memory_space<vmem>>, vector<1x128xf32>
    tpu.vector_store %arg4[%c0_10, %c0_11], %24 {strides = array<i32>} : memref<1x128xf32, #tpu.memory_space<vmem>>, vector<1x128xf32>,
    return
  }
  func.func @transform_0(%arg0: i32, %arg1: i32) -> (i32, i32) {
    %c0_i32 = arith.constant 0 : i32
    return %arg1, %arg0 : i32, i32
  }
  func.func @transform_1(%arg0: i32, %arg1: i32) -> (i32, i32) {
    %c0_i32 = arith.constant 0 : i32
    %c0_i32_0 = arith.constant 0 : i32
    return %c0_i32, %arg0 : i32, i32
  }
  func.func @transform_2(%arg0: i32, %arg1: i32) -> (i32, i32) {
    %c0_i32 = arith.constant 0 : i32
    %c0_i32_0 = arith.constant 0 : i32
    return %c0_i32, %arg0 : i32, i32
  }
}

module attributes {stable_mosaic.version = 11 : i64} {
  func.func @kernel(%arg0: i32, %arg1: i32, %arg2: memref<1024x128xbf16, #tpu.memory_space<vmem>>, %arg3: memref<1x128xf32, #tpu.memory_space<vmem>>, %arg4: memref<1x128xf32, #tpu.memory_space<vmem>>, %arg5: memref<1024x128xbf16, #tpu.memory_space<vmem>>) attributes {dimension_semantics = [#tpu.dimension_semantics<parallel>, #tpu.dimension_semantics<parallel>], iteration_bounds = array<i64: 1, 1>, scalar_prefetch = 0 : i64, scratch_operands = 0 : i64, tpu.core_type = #tpu.core_type<tc>, window_params = [{transform_indices = @transform_0, window_bounds = array<i64: 1024, 128>}, {transform_indices = @transform_1, window_bounds = array<i64: 1, 128>}, {transform_indices = @transform_2, window_bounds = array<i64: 1, 128>}, {transform_indices = @transform_3, window_bounds = array<i64: 1024, 128>}]} {
    %c0 = arith.constant 0 : index
    %c0_0 = arith.constant 0 : index
    %0 = vector.load %arg2[%c0, %c0_0] : memref<1024x128xbf16, #tpu.memory_space<vmem>>, vector<1024x128xbf16>
    %1 = arith.extf %0 : vector<1024x128xbf16> to vector<1024x128xf32>
    %c0_1 = arith.constant 0 : index
    %c0_2 = arith.constant 0 : index
    %2 = vector.load %arg3[%c0_1, %c0_2] : memref<1x128xf32, #tpu.memory_space<vmem>>, vector<1x128xf32>
    %3 = vector.broadcast %2 : vector<1x128xf32> to vector<1024x128xf32>
    %4 = arith.mulf %1, %3 : vector<1024x128xf32>
    %c0_3 = arith.constant 0 : index
    %c0_4 = arith.constant 0 : index
    %5 = vector.load %arg4[%c0_3, %c0_4] : memref<1x128xf32, #tpu.memory_space<vmem>>, vector<1x128xf32>
    %6 = vector.broadcast %5 : vector<1x128xf32> to vector<1024x128xf32>
    %7 = arith.addf %4, %6 : vector<1024x128xf32>
    %cst = arith.constant 0.000000e+00 : f32
    %cst_5 = arith.constant 2.000000e+01 : f32
    %8 = vector.broadcast %cst : f32 to vector<1024x128xf32>
    %9 = arith.maximumf %8, %7 : vector<1024x128xf32>
    %10 = vector.broadcast %cst_5 : f32 to vector<1024x128xf32>
    %11 = arith.minimumf %10, %9 : vector<1024x128xf32>
    %12 = arith.truncf %11 : vector<1024x128xf32> to vector<1024x128xbf16>
    %c0_6 = arith.constant 0 : index
    %c0_7 = arith.constant 0 : index
    %13 = vector.load %arg5[%c0_6, %c0_7] : memref<1024x128xbf16, #tpu.memory_space<vmem>>, vector<1024x128xbf16>
    tpu.vector_store %arg5[%c0_6, %c0_7], %12 {strides = array<i32>} : memref<1024x128xbf16, #tpu.memory_space<vmem>>, vector<1024x128xbf16>,
    return
  }
  func.func @transform_0(%arg0: i32, %arg1: i32) -> (i32, i32) {
    %c0_i32 = arith.constant 0 : i32
    return %arg1, %arg0 : i32, i32
  }
  func.func @transform_1(%arg0: i32, %arg1: i32) -> (i32, i32) {
    %c0_i32 = arith.constant 0 : i32
    %c0_i32_0 = arith.constant 0 : i32
    return %c0_i32, %arg0 : i32, i32
  }
  func.func @transform_2(%arg0: i32, %arg1: i32) -> (i32, i32) {
    %c0_i32 = arith.constant 0 : i32
    %c0_i32_0 = arith.constant 0 : i32
    return %c0_i32, %arg0 : i32, i32
  }
  func.func @transform_3(%arg0: i32, %arg1: i32) -> (i32, i32) {
    %c0_i32 = arith.constant 0 : i32
    return %arg1, %arg0 : i32, i32
  }
}

module attributes {stable_mosaic.version = 11 : i64} {
  func.func @_matmul_kernel(%arg0: i32, %arg1: i32, %arg2: i32, %arg3: memref<24x512xbf16, #tpu.memory_space<vmem>>, %arg4: memref<512x128xbf16, #tpu.memory_space<vmem>>, %arg5: memref<24x128xbf16, #tpu.memory_space<vmem>>, %arg6: memref<24x128xf32, #tpu.memory_space<vmem>>) attributes {dimension_semantics = [#tpu.dimension_semantics<parallel>, #tpu.dimension_semantics<parallel>, #tpu.dimension_semantics<arbitrary>], iteration_bounds = array<i64: 1, 1, 15>, scalar_prefetch = 0 : i64, scratch_operands = 1 : i64, tpu.core_type = #tpu.core_type<tc>, window_params = [{transform_indices = @transform_0, window_bounds = array<i64: 24, 512>}, {transform_indices = @transform_1, window_bounds = array<i64: 512, 128>}, {transform_indices = @transform_2, window_bounds = array<i64: 24, 128>}]} {
    %c0_i32 = arith.constant 0 : i32
    %0 = arith.cmpi eq, %arg2, %c0_i32 : i32
    %1 = arith.extui %0 : i1 to i32
    %c0_i32_0 = arith.constant 0 : i32
    %2 = arith.cmpi ne, %1, %c0_i32_0 : i32
    scf.if %2 {
      %cst_9 = arith.constant 0.000000e+00 : f32
      %12 = vector.broadcast %cst_9 : f32 to vector<24x128xf32>
      %c0_10 = arith.constant 0 : index
      %c0_11 = arith.constant 0 : index
      %13 = vector.load %arg6[%c0_10, %c0_11] : memref<24x128xf32, #tpu.memory_space<vmem>>, vector<24x128xf32>
      tpu.vector_store %arg6[%c0_10, %c0_11], %12 {strides = array<i32>} : memref<24x128xf32, #tpu.memory_space<vmem>>, vector<24x128xf32>,
    } else {
    }
    %c0 = arith.constant 0 : index
    %c0_1 = arith.constant 0 : index
    %3 = vector.load %arg6[%c0, %c0_1] : memref<24x128xf32, #tpu.memory_space<vmem>>, vector<24x128xf32>
    %c0_2 = arith.constant 0 : index
    %c0_3 = arith.constant 0 : index
    %4 = vector.load %arg3[%c0_2, %c0_3] : memref<24x512xbf16, #tpu.memory_space<vmem>>, vector<24x512xbf16>
    %c0_4 = arith.constant 0 : index
    %c0_5 = arith.constant 0 : index
    %5 = vector.load %arg4[%c0_4, %c0_5] : memref<512x128xbf16, #tpu.memory_space<vmem>>, vector<512x128xbf16>
    %cst = arith.constant dense<0.000000e+00> : vector<24x128xf32>
    %6 = tpu.matmul %4, %5, %cst {dimension_numbers = #tpu.dot_dimension_numbers<[1], [0], [0], [1], [0, 0, 1, 1], [], []>} : vector<24x512xbf16>, vector<512x128xbf16>, vector<24x128xf32> -> vector<24x128xf32>
    %7 = arith.addf %3, %6 : vector<24x128xf32>
    %c0_6 = arith.constant 0 : index
    %c0_7 = arith.constant 0 : index
    %8 = vector.load %arg6[%c0_6, %c0_7] : memref<24x128xf32, #tpu.memory_space<vmem>>, vector<24x128xf32>
    tpu.vector_store %arg6[%c0_6, %c0_7], %7 {strides = array<i32>} : memref<24x128xf32, #tpu.memory_space<vmem>>, vector<24x128xf32>,
    %c14_i32 = arith.constant 14 : i32
    %9 = arith.cmpi eq, %arg2, %c14_i32 : i32
    %10 = arith.extui %9 : i1 to i32
    %c0_i32_8 = arith.constant 0 : i32
    %11 = arith.cmpi ne, %10, %c0_i32_8 : i32
    scf.if %11 {
      %c0_9 = arith.constant 0 : index
      %c0_10 = arith.constant 0 : index
      %12 = vector.load %arg6[%c0_9, %c0_10] : memref<24x128xf32, #tpu.memory_space<vmem>>, vector<24x128xf32>
      %13 = arith.truncf %12 : vector<24x128xf32> to vector<24x128xbf16>
      %c0_11 = arith.constant 0 : index
      %c0_12 = arith.constant 0 : index
      %14 = vector.load %arg5[%c0_11, %c0_12] : memref<24x128xbf16, #tpu.memory_space<vmem>>, vector<24x128xbf16>
      tpu.vector_store %arg5[%c0_11, %c0_12], %13 {strides = array<i32>} : memref<24x128xbf16, #tpu.memory_space<vmem>>, vector<24x128xbf16>,
    } else {
    }
    return
  }
  func.func @transform_0(%arg0: i32, %arg1: i32, %arg2: i32) -> (i32, i32) {
    %c0_i32 = arith.constant 0 : i32
    return %arg0, %arg2 : i32, i32
  }
  func.func @transform_1(%arg0: i32, %arg1: i32, %arg2: i32) -> (i32, i32) {
    %c0_i32 = arith.constant 0 : i32
    return %arg2, %arg1 : i32, i32
  }
  func.func @transform_2(%arg0: i32, %arg1: i32, %arg2: i32) -> (i32, i32) {
    %c0_i32 = arith.constant 0 : i32
    return %arg0, %arg1 : i32, i32
  }
}

module attributes {stable_mosaic.version = 11 : i64} {
  func.func @kernel(%arg0: i32, %arg1: i32, %arg2: memref<24x128xbf16, #tpu.memory_space<vmem>>, %arg3: memref<1x128xf32, #tpu.memory_space<vmem>>, %arg4: memref<1x128xf32, #tpu.memory_space<vmem>>) attributes {dimension_semantics = [#tpu.dimension_semantics<parallel>, #tpu.dimension_semantics<arbitrary>], iteration_bounds = array<i64: 1, 1>, scalar_prefetch = 0 : i64, scratch_operands = 0 : i64, tpu.core_type = #tpu.core_type<tc>, window_params = [{transform_indices = @transform_0, window_bounds = array<i64: 24, 128>}, {transform_indices = @transform_1, window_bounds = array<i64: 1, 128>}, {transform_indices = @transform_2, window_bounds = array<i64: 1, 128>}]} {
    %c0_i32 = arith.constant 0 : i32
    %0 = arith.cmpi eq, %arg1, %c0_i32 : i32
    %1 = arith.extui %0 : i1 to i32
    %c0_i32_0 = arith.constant 0 : i32
    %2 = arith.cmpi ne, %1, %c0_i32_0 : i32
    scf.if %2 {
      %cst_12 = arith.constant 0.000000e+00 : f32
      %26 = vector.broadcast %cst_12 : f32 to vector<1x128xf32>
      %c0_13 = arith.constant 0 : index
      %c0_14 = arith.constant 0 : index
      %27 = vector.load %arg3[%c0_13, %c0_14] : memref<1x128xf32, #tpu.memory_space<vmem>>, vector<1x128xf32>
      tpu.vector_store %arg3[%c0_13, %c0_14], %26 {strides = array<i32>} : memref<1x128xf32, #tpu.memory_space<vmem>>, vector<1x128xf32>,
      %cst_15 = arith.constant 0.000000e+00 : f32
      %28 = vector.broadcast %cst_15 : f32 to vector<1x128xf32>
      %c0_16 = arith.constant 0 : index
      %c0_17 = arith.constant 0 : index
      %29 = vector.load %arg4[%c0_16, %c0_17] : memref<1x128xf32, #tpu.memory_space<vmem>>, vector<1x128xf32>
      tpu.vector_store %arg4[%c0_16, %c0_17], %28 {strides = array<i32>} : memref<1x128xf32, #tpu.memory_space<vmem>>, vector<1x128xf32>,
    } else {
    }
    %c0 = arith.constant 0 : index
    %c0_1 = arith.constant 0 : index
    %3 = vector.load %arg2[%c0, %c0_1] : memref<24x128xbf16, #tpu.memory_space<vmem>>, vector<24x128xbf16>
    %4 = arith.extf %3 : vector<24x128xbf16> to vector<24x128xf32>
    %c24_i32 = arith.constant 24 : i32
    %5 = arith.muli %arg1, %c24_i32 : i32
    %6 = tpu.iota {dimensions = array<i32: 0>} : vector<24x1xi32>
    %7 = vector.broadcast %5 : i32 to vector<24x1xi32>
    %8 = arith.addi %7, %6 : vector<24x1xi32>
    %c20_i32 = arith.constant 20 : i32
    %9 = vector.broadcast %c20_i32 : i32 to vector<24x1xi32>
    %10 = arith.cmpi slt, %8, %9 : vector<24x1xi32>
    %cst = arith.constant 0.000000e+00 : f32
    %11 = vector.shape_cast %10 : vector<24x1xi1> to vector<24x1xi1>
    %12 = vector.broadcast %11 : vector<24x1xi1> to vector<24x128xi1>
    %13 = vector.broadcast %cst : f32 to vector<24x128xf32>
    %14 = arith.select %12, %4, %13 : vector<24x128xi1>, vector<24x128xf32>
    %c0_2 = arith.constant 0 : index
    %c0_3 = arith.constant 0 : index
    %15 = vector.load %arg3[%c0_2, %c0_3] : memref<1x128xf32, #tpu.memory_space<vmem>>, vector<1x128xf32>
    %cst_4 = arith.constant dense<0.000000e+00> : vector<128xf32>
    %16 = vector.multi_reduction <add>, %14, %cst_4 [0] : vector<24x128xf32> to vector<128xf32>
    %17 = vector.shape_cast %16 : vector<128xf32> to vector<1x128xf32>
    %18 = arith.addf %15, %17 : vector<1x128xf32>
    %c0_5 = arith.constant 0 : index
    %c0_6 = arith.constant 0 : index
    %19 = vector.load %arg3[%c0_5, %c0_6] : memref<1x128xf32, #tpu.memory_space<vmem>>, vector<1x128xf32>
    tpu.vector_store %arg3[%c0_5, %c0_6], %18 {strides = array<i32>} : memref<1x128xf32, #tpu.memory_space<vmem>>, vector<1x128xf32>,
    %c0_7 = arith.constant 0 : index
    %c0_8 = arith.constant 0 : index
    %20 = vector.load %arg4[%c0_7, %c0_8] : memref<1x128xf32, #tpu.memory_space<vmem>>, vector<1x128xf32>
    %21 = arith.mulf %14, %14 : vector<24x128xf32>
    %cst_9 = arith.constant dense<0.000000e+00> : vector<128xf32>
    %22 = vector.multi_reduction <add>, %21, %cst_9 [0] : vector<24x128xf32> to vector<128xf32>
    %23 = vector.shape_cast %22 : vector<128xf32> to vector<1x128xf32>
    %24 = arith.addf %20, %23 : vector<1x128xf32>
    %c0_10 = arith.constant 0 : index
    %c0_11 = arith.constant 0 : index
    %25 = vector.load %arg4[%c0_10, %c0_11] : memref<1x128xf32, #tpu.memory_space<vmem>>, vector<1x128xf32>
    tpu.vector_store %arg4[%c0_10, %c0_11], %24 {strides = array<i32>} : memref<1x128xf32, #tpu.memory_space<vmem>>, vector<1x128xf32>,
    return
  }
  func.func @transform_0(%arg0: i32, %arg1: i32) -> (i32, i32) {
    %c0_i32 = arith.constant 0 : i32
    return %arg1, %arg0 : i32, i32
  }
  func.func @transform_1(%arg0: i32, %arg1: i32) -> (i32, i32) {
    %c0_i32 = arith.constant 0 : i32
    %c0_i32_0 = arith.constant 0 : i32
    return %c0_i32, %arg0 : i32, i32
  }
  func.func @transform_2(%arg0: i32, %arg1: i32) -> (i32, i32) {
    %c0_i32 = arith.constant 0 : i32
    %c0_i32_0 = arith.constant 0 : i32
    return %c0_i32, %arg0 : i32, i32
  }
}

module attributes {stable_mosaic.version = 11 : i64} {
  func.func @kernel(%arg0: i32, %arg1: i32, %arg2: memref<24x128xbf16, #tpu.memory_space<vmem>>, %arg3: memref<1x128xf32, #tpu.memory_space<vmem>>, %arg4: memref<1x128xf32, #tpu.memory_space<vmem>>, %arg5: memref<24x128xbf16, #tpu.memory_space<vmem>>) attributes {dimension_semantics = [#tpu.dimension_semantics<parallel>, #tpu.dimension_semantics<parallel>], iteration_bounds = array<i64: 1, 1>, scalar_prefetch = 0 : i64, scratch_operands = 0 : i64, tpu.core_type = #tpu.core_type<tc>, window_params = [{transform_indices = @transform_0, window_bounds = array<i64: 24, 128>}, {transform_indices = @transform_1, window_bounds = array<i64: 1, 128>}, {transform_indices = @transform_2, window_bounds = array<i64: 1, 128>}, {transform_indices = @transform_3, window_bounds = array<i64: 24, 128>}]} {
    %c0 = arith.constant 0 : index
    %c0_0 = arith.constant 0 : index
    %0 = vector.load %arg2[%c0, %c0_0] : memref<24x128xbf16, #tpu.memory_space<vmem>>, vector<24x128xbf16>
    %1 = arith.extf %0 : vector<24x128xbf16> to vector<24x128xf32>
    %c0_1 = arith.constant 0 : index
    %c0_2 = arith.constant 0 : index
    %2 = vector.load %arg3[%c0_1, %c0_2] : memref<1x128xf32, #tpu.memory_space<vmem>>, vector<1x128xf32>
    %3 = vector.broadcast %2 : vector<1x128xf32> to vector<24x128xf32>
    %4 = arith.mulf %1, %3 : vector<24x128xf32>
    %c0_3 = arith.constant 0 : index
    %c0_4 = arith.constant 0 : index
    %5 = vector.load %arg4[%c0_3, %c0_4] : memref<1x128xf32, #tpu.memory_space<vmem>>, vector<1x128xf32>
    %6 = vector.broadcast %5 : vector<1x128xf32> to vector<24x128xf32>
    %7 = arith.addf %4, %6 : vector<24x128xf32>
    %cst = arith.constant 0.000000e+00 : f32
    %cst_5 = arith.constant 2.000000e+01 : f32
    %8 = vector.broadcast %cst : f32 to vector<24x128xf32>
    %9 = arith.maximumf %8, %7 : vector<24x128xf32>
    %10 = vector.broadcast %cst_5 : f32 to vector<24x128xf32>
    %11 = arith.minimumf %10, %9 : vector<24x128xf32>
    %12 = arith.truncf %11 : vector<24x128xf32> to vector<24x128xbf16>
    %c0_6 = arith.constant 0 : index
    %c0_7 = arith.constant 0 : index
    %13 = vector.load %arg5[%c0_6, %c0_7] : memref<24x128xbf16, #tpu.memory_space<vmem>>, vector<24x128xbf16>
    tpu.vector_store %arg5[%c0_6, %c0_7], %12 {strides = array<i32>} : memref<24x128xbf16, #tpu.memory_space<vmem>>, vector<24x128xbf16>,
    return
  }
  func.func @transform_0(%arg0: i32, %arg1: i32) -> (i32, i32) {
    %c0_i32 = arith.constant 0 : i32
    return %arg1, %arg0 : i32, i32
  }
  func.func @transform_1(%arg0: i32, %arg1: i32) -> (i32, i32) {
    %c0_i32 = arith.constant 0 : i32
    %c0_i32_0 = arith.constant 0 : i32
    return %c0_i32, %arg0 : i32, i32
  }
  func.func @transform_2(%arg0: i32, %arg1: i32) -> (i32, i32) {
    %c0_i32 = arith.constant 0 : i32
    %c0_i32_0 = arith.constant 0 : i32
    return %c0_i32, %arg0 : i32, i32
  }
  func.func @transform_3(%arg0: i32, %arg1: i32) -> (i32, i32) {
    %c0_i32 = arith.constant 0 : i32
    return %arg1, %arg0 : i32, i32
  }
}

module attributes {stable_mosaic.version = 11 : i64} {
  func.func @_bilstm_kernel(%arg0: i32, %arg1: i32, %arg2: memref<8x8x512xbf16, #tpu.memory_space<vmem>>, %arg3: memref<1x128x512xbf16, #tpu.memory_space<vmem>>, %arg4: memref<8x8x128xbf16, #tpu.memory_space<vmem>>, %arg5: memref<8x128xf32, #tpu.memory_space<vmem>>, %arg6: memref<8x128xf32, #tpu.memory_space<vmem>>) attributes {dimension_semantics = [#tpu.dimension_semantics<parallel>, #tpu.dimension_semantics<arbitrary>], iteration_bounds = array<i64: 2, 2>, scalar_prefetch = 0 : i64, scratch_operands = 2 : i64, tpu.core_type = #tpu.core_type<tc>, window_params = [{transform_indices = @transform_0, window_bounds = array<i64: 8, 8, 512>}, {transform_indices = @transform_1, window_bounds = array<i64: 1, 128, 512>}, {transform_indices = @transform_2, window_bounds = array<i64: 8, 8, 128>}]} {
    %c0_i32 = arith.constant 0 : i32
    %0 = arith.cmpi eq, %arg1, %c0_i32 : i32
    %1 = arith.extui %0 : i1 to i32
    %c0_i32_0 = arith.constant 0 : i32
    %2 = arith.cmpi ne, %1, %c0_i32_0 : i32
    scf.if %2 {
      %cst_135 = arith.constant 0.000000e+00 : f32
      %349 = vector.broadcast %cst_135 : f32 to vector<8x128xf32>
      %c0_136 = arith.constant 0 : index
      %c0_137 = arith.constant 0 : index
      %350 = vector.load %arg5[%c0_136, %c0_137] : memref<8x128xf32, #tpu.memory_space<vmem>>, vector<8x128xf32>
      tpu.vector_store %arg5[%c0_136, %c0_137], %349 {strides = array<i32>} : memref<8x128xf32, #tpu.memory_space<vmem>>, vector<8x128xf32>,
      %cst_138 = arith.constant 0.000000e+00 : f32
      %351 = vector.broadcast %cst_138 : f32 to vector<8x128xf32>
      %c0_139 = arith.constant 0 : index
      %c0_140 = arith.constant 0 : index
      %352 = vector.load %arg6[%c0_139, %c0_140] : memref<8x128xf32, #tpu.memory_space<vmem>>, vector<8x128xf32>
      tpu.vector_store %arg6[%c0_139, %c0_140], %351 {strides = array<i32>} : memref<8x128xf32, #tpu.memory_space<vmem>>, vector<8x128xf32>,
    } else {
    }
    %c0 = arith.constant 0 : index
    %c0_1 = arith.constant 0 : index
    %c0_2 = arith.constant 0 : index
    %3 = vector.load %arg3[%c0, %c0_1, %c0_2] : memref<1x128x512xbf16, #tpu.memory_space<vmem>>, vector<1x128x512xbf16>
    %4 = vector.shape_cast %3 : vector<1x128x512xbf16> to vector<128x512xbf16>
    %c7_i32 = arith.constant 7 : i32
    %5 = arith.muli %arg0, %c7_i32 : i32
    %c0_i32_3 = arith.constant 0 : i32
    %6 = arith.addi %5, %c0_i32_3 : i32
    %7 = arith.index_cast %6 : i32 to index
    %c0_4 = arith.constant 0 : index
    %c0_5 = arith.constant 0 : index
    %8 = vector.load %arg2[%7, %c0_4, %c0_5] : memref<8x8x512xbf16, #tpu.memory_space<vmem>>, vector<1x8x512xbf16>
    %9 = vector.shape_cast %8 : vector<1x8x512xbf16> to vector<8x512xbf16>
    %10 = arith.extf %9 : vector<8x512xbf16> to vector<8x512xf32>
    %c0_6 = arith.constant 0 : index
    %c0_7 = arith.constant 0 : index
    %11 = vector.load %arg5[%c0_6, %c0_7] : memref<8x128xf32, #tpu.memory_space<vmem>>, vector<8x128xf32>
    %12 = arith.truncf %11 : vector<8x128xf32> to vector<8x128xbf16>
    %cst = arith.constant dense<0.000000e+00> : vector<8x512xf32>
    %13 = tpu.matmul %12, %4, %cst {dimension_numbers = #tpu.dot_dimension_numbers<[1], [0], [0], [1], [0, 0, 1, 1], [], []>} : vector<8x128xbf16>, vector<128x512xbf16>, vector<8x512xf32> -> vector<8x512xf32>
    %14 = arith.addf %10, %13 : vector<8x512xf32>
    %15 = vector.extract_strided_slice %14 {offsets = [0, 0], sizes = [8, 128], strides = [1, 1]} : vector<8x512xf32> to vector<8x128xf32>
    %16 = arith.negf %15 : vector<8x128xf32>
    %17 = math.exp %16 : vector<8x128xf32>
    %cst_8 = arith.constant 1.000000e+00 : f32
    %18 = vector.broadcast %cst_8 : f32 to vector<8x128xf32>
    %19 = arith.addf %18, %17 : vector<8x128xf32>
    %20 = arith.divf %18, %19 : vector<8x128xf32>
    %21 = vector.extract_strided_slice %14 {offsets = [0, 128], sizes = [8, 128], strides = [1, 1]} : vector<8x512xf32> to vector<8x128xf32>
    %22 = arith.negf %21 : vector<8x128xf32>
    %23 = math.exp %22 : vector<8x128xf32>
    %cst_9 = arith.constant 1.000000e+00 : f32
    %24 = vector.broadcast %cst_9 : f32 to vector<8x128xf32>
    %25 = arith.addf %24, %23 : vector<8x128xf32>
    %26 = arith.divf %24, %25 : vector<8x128xf32>
    %27 = vector.extract_strided_slice %14 {offsets = [0, 256], sizes = [8, 128], strides = [1, 1]} : vector<8x512xf32> to vector<8x128xf32>
    %28 = math.tanh %27 : vector<8x128xf32>
    %29 = vector.extract_strided_slice %14 {offsets = [0, 384], sizes = [8, 128], strides = [1, 1]} : vector<8x512xf32> to vector<8x128xf32>
    %30 = arith.negf %29 : vector<8x128xf32>
    %31 = math.exp %30 : vector<8x128xf32>
    %cst_10 = arith.constant 1.000000e+00 : f32
    %32 = vector.broadcast %cst_10 : f32 to vector<8x128xf32>
    %33 = arith.addf %32, %31 : vector<8x128xf32>
    %34 = arith.divf %32, %33 : vector<8x128xf32>
    %c0_11 = arith.constant 0 : index
    %c0_12 = arith.constant 0 : index
    %35 = vector.load %arg6[%c0_11, %c0_12] : memref<8x128xf32, #tpu.memory_space<vmem>>, vector<8x128xf32>
    %36 = arith.mulf %26, %35 : vector<8x128xf32>
    %37 = arith.mulf %20, %28 : vector<8x128xf32>
    %38 = arith.addf %36, %37 : vector<8x128xf32>
    %39 = math.tanh %38 : vector<8x128xf32>
    %40 = arith.mulf %34, %39 : vector<8x128xf32>
    %c0_13 = arith.constant 0 : index
    %c0_14 = arith.constant 0 : index
    %41 = vector.load %arg6[%c0_13, %c0_14] : memref<8x128xf32, #tpu.memory_space<vmem>>, vector<8x128xf32>
    tpu.vector_store %arg6[%c0_13, %c0_14], %38 {strides = array<i32>} : memref<8x128xf32, #tpu.memory_space<vmem>>, vector<8x128xf32>,
    %c0_15 = arith.constant 0 : index
    %c0_16 = arith.constant 0 : index
    %42 = vector.load %arg5[%c0_15, %c0_16] : memref<8x128xf32, #tpu.memory_space<vmem>>, vector<8x128xf32>
    tpu.vector_store %arg5[%c0_15, %c0_16], %40 {strides = array<i32>} : memref<8x128xf32, #tpu.memory_space<vmem>>, vector<8x128xf32>,
    %43 = arith.truncf %40 : vector<8x128xf32> to vector<8x128xbf16>
    %44 = arith.index_cast %6 : i32 to index
    %c0_17 = arith.constant 0 : index
    %c0_18 = arith.constant 0 : index
    %45 = vector.load %arg4[%44, %c0_17, %c0_18] : memref<8x8x128xbf16, #tpu.memory_space<vmem>>, vector<1x8x128xbf16>
    %46 = vector.shape_cast %45 : vector<1x8x128xbf16> to vector<8x128xbf16>
    %47 = vector.shape_cast %43 : vector<8x128xbf16> to vector<1x8x128xbf16>
    tpu.vector_store %arg4[%44, %c0_17, %c0_18], %47 {strides = array<i32>} : memref<8x8x128xbf16, #tpu.memory_space<vmem>>, vector<1x8x128xbf16>,
    %c5_i32 = arith.constant 5 : i32
    %48 = arith.muli %arg0, %c5_i32 : i32
    %c1_i32 = arith.constant 1 : i32
    %49 = arith.addi %48, %c1_i32 : i32
    %50 = arith.index_cast %49 : i32 to index
    %c0_19 = arith.constant 0 : index
    %c0_20 = arith.constant 0 : index
    %51 = vector.load %arg2[%50, %c0_19, %c0_20] : memref<8x8x512xbf16, #tpu.memory_space<vmem>>, vector<1x8x512xbf16>
    %52 = vector.shape_cast %51 : vector<1x8x512xbf16> to vector<8x512xbf16>
    %53 = arith.extf %52 : vector<8x512xbf16> to vector<8x512xf32>
    %c0_21 = arith.constant 0 : index
    %c0_22 = arith.constant 0 : index
    %54 = vector.load %arg5[%c0_21, %c0_22] : memref<8x128xf32, #tpu.memory_space<vmem>>, vector<8x128xf32>
    %55 = arith.truncf %54 : vector<8x128xf32> to vector<8x128xbf16>
    %cst_23 = arith.constant dense<0.000000e+00> : vector<8x512xf32>
    %56 = tpu.matmul %55, %4, %cst_23 {dimension_numbers = #tpu.dot_dimension_numbers<[1], [0], [0], [1], [0, 0, 1, 1], [], []>} : vector<8x128xbf16>, vector<128x512xbf16>, vector<8x512xf32> -> vector<8x512xf32>
    %57 = arith.addf %53, %56 : vector<8x512xf32>
    %58 = vector.extract_strided_slice %57 {offsets = [0, 0], sizes = [8, 128], strides = [1, 1]} : vector<8x512xf32> to vector<8x128xf32>
    %59 = arith.negf %58 : vector<8x128xf32>
    %60 = math.exp %59 : vector<8x128xf32>
    %cst_24 = arith.constant 1.000000e+00 : f32
    %61 = vector.broadcast %cst_24 : f32 to vector<8x128xf32>
    %62 = arith.addf %61, %60 : vector<8x128xf32>
    %63 = arith.divf %61, %62 : vector<8x128xf32>
    %64 = vector.extract_strided_slice %57 {offsets = [0, 128], sizes = [8, 128], strides = [1, 1]} : vector<8x512xf32> to vector<8x128xf32>
    %65 = arith.negf %64 : vector<8x128xf32>
    %66 = math.exp %65 : vector<8x128xf32>
    %cst_25 = arith.constant 1.000000e+00 : f32
    %67 = vector.broadcast %cst_25 : f32 to vector<8x128xf32>
    %68 = arith.addf %67, %66 : vector<8x128xf32>
    %69 = arith.divf %67, %68 : vector<8x128xf32>
    %70 = vector.extract_strided_slice %57 {offsets = [0, 256], sizes = [8, 128], strides = [1, 1]} : vector<8x512xf32> to vector<8x128xf32>
    %71 = math.tanh %70 : vector<8x128xf32>
    %72 = vector.extract_strided_slice %57 {offsets = [0, 384], sizes = [8, 128], strides = [1, 1]} : vector<8x512xf32> to vector<8x128xf32>
    %73 = arith.negf %72 : vector<8x128xf32>
    %74 = math.exp %73 : vector<8x128xf32>
    %cst_26 = arith.constant 1.000000e+00 : f32
    %75 = vector.broadcast %cst_26 : f32 to vector<8x128xf32>
    %76 = arith.addf %75, %74 : vector<8x128xf32>
    %77 = arith.divf %75, %76 : vector<8x128xf32>
    %c0_27 = arith.constant 0 : index
    %c0_28 = arith.constant 0 : index
    %78 = vector.load %arg6[%c0_27, %c0_28] : memref<8x128xf32, #tpu.memory_space<vmem>>, vector<8x128xf32>
    %79 = arith.mulf %69, %78 : vector<8x128xf32>
    %80 = arith.mulf %63, %71 : vector<8x128xf32>
    %81 = arith.addf %79, %80 : vector<8x128xf32>
    %82 = math.tanh %81 : vector<8x128xf32>
    %83 = arith.mulf %77, %82 : vector<8x128xf32>
    %c0_29 = arith.constant 0 : index
    %c0_30 = arith.constant 0 : index
    %84 = vector.load %arg6[%c0_29, %c0_30] : memref<8x128xf32, #tpu.memory_space<vmem>>, vector<8x128xf32>
    tpu.vector_store %arg6[%c0_29, %c0_30], %81 {strides = array<i32>} : memref<8x128xf32, #tpu.memory_space<vmem>>, vector<8x128xf32>,
    %c0_31 = arith.constant 0 : index
    %c0_32 = arith.constant 0 : index
    %85 = vector.load %arg5[%c0_31, %c0_32] : memref<8x128xf32, #tpu.memory_space<vmem>>, vector<8x128xf32>
    tpu.vector_store %arg5[%c0_31, %c0_32], %83 {strides = array<i32>} : memref<8x128xf32, #tpu.memory_space<vmem>>, vector<8x128xf32>,
    %86 = arith.truncf %83 : vector<8x128xf32> to vector<8x128xbf16>
    %87 = arith.index_cast %49 : i32 to index
    %c0_33 = arith.constant 0 : index
    %c0_34 = arith.constant 0 : index
    %88 = vector.load %arg4[%87, %c0_33, %c0_34] : memref<8x8x128xbf16, #tpu.memory_space<vmem>>, vector<1x8x128xbf16>
    %89 = vector.shape_cast %88 : vector<1x8x128xbf16> to vector<8x128xbf16>
    %90 = vector.shape_cast %86 : vector<8x128xbf16> to vector<1x8x128xbf16>
    tpu.vector_store %arg4[%87, %c0_33, %c0_34], %90 {strides = array<i32>} : memref<8x8x128xbf16, #tpu.memory_space<vmem>>, vector<1x8x128xbf16>,
    %c3_i32 = arith.constant 3 : i32
    %91 = arith.muli %arg0, %c3_i32 : i32
    %c2_i32 = arith.constant 2 : i32
    %92 = arith.addi %91, %c2_i32 : i32
    %93 = arith.index_cast %92 : i32 to index
    %c0_35 = arith.constant 0 : index
    %c0_36 = arith.constant 0 : index
    %94 = vector.load %arg2[%93, %c0_35, %c0_36] : memref<8x8x512xbf16, #tpu.memory_space<vmem>>, vector<1x8x512xbf16>
    %95 = vector.shape_cast %94 : vector<1x8x512xbf16> to vector<8x512xbf16>
    %96 = arith.extf %95 : vector<8x512xbf16> to vector<8x512xf32>
    %c0_37 = arith.constant 0 : index
    %c0_38 = arith.constant 0 : index
    %97 = vector.load %arg5[%c0_37, %c0_38] : memref<8x128xf32, #tpu.memory_space<vmem>>, vector<8x128xf32>
    %98 = arith.truncf %97 : vector<8x128xf32> to vector<8x128xbf16>
    %cst_39 = arith.constant dense<0.000000e+00> : vector<8x512xf32>
    %99 = tpu.matmul %98, %4, %cst_39 {dimension_numbers = #tpu.dot_dimension_numbers<[1], [0], [0], [1], [0, 0, 1, 1], [], []>} : vector<8x128xbf16>, vector<128x512xbf16>, vector<8x512xf32> -> vector<8x512xf32>
    %100 = arith.addf %96, %99 : vector<8x512xf32>
    %101 = vector.extract_strided_slice %100 {offsets = [0, 0], sizes = [8, 128], strides = [1, 1]} : vector<8x512xf32> to vector<8x128xf32>
    %102 = arith.negf %101 : vector<8x128xf32>
    %103 = math.exp %102 : vector<8x128xf32>
    %cst_40 = arith.constant 1.000000e+00 : f32
    %104 = vector.broadcast %cst_40 : f32 to vector<8x128xf32>
    %105 = arith.addf %104, %103 : vector<8x128xf32>
    %106 = arith.divf %104, %105 : vector<8x128xf32>
    %107 = vector.extract_strided_slice %100 {offsets = [0, 128], sizes = [8, 128], strides = [1, 1]} : vector<8x512xf32> to vector<8x128xf32>
    %108 = arith.negf %107 : vector<8x128xf32>
    %109 = math.exp %108 : vector<8x128xf32>
    %cst_41 = arith.constant 1.000000e+00 : f32
    %110 = vector.broadcast %cst_41 : f32 to vector<8x128xf32>
    %111 = arith.addf %110, %109 : vector<8x128xf32>
    %112 = arith.divf %110, %111 : vector<8x128xf32>
    %113 = vector.extract_strided_slice %100 {offsets = [0, 256], sizes = [8, 128], strides = [1, 1]} : vector<8x512xf32> to vector<8x128xf32>
    %114 = math.tanh %113 : vector<8x128xf32>
    %115 = vector.extract_strided_slice %100 {offsets = [0, 384], sizes = [8, 128], strides = [1, 1]} : vector<8x512xf32> to vector<8x128xf32>
    %116 = arith.negf %115 : vector<8x128xf32>
    %117 = math.exp %116 : vector<8x128xf32>
    %cst_42 = arith.constant 1.000000e+00 : f32
    %118 = vector.broadcast %cst_42 : f32 to vector<8x128xf32>
    %119 = arith.addf %118, %117 : vector<8x128xf32>
    %120 = arith.divf %118, %119 : vector<8x128xf32>
    %c0_43 = arith.constant 0 : index
    %c0_44 = arith.constant 0 : index
    %121 = vector.load %arg6[%c0_43, %c0_44] : memref<8x128xf32, #tpu.memory_space<vmem>>, vector<8x128xf32>
    %122 = arith.mulf %112, %121 : vector<8x128xf32>
    %123 = arith.mulf %106, %114 : vector<8x128xf32>
    %124 = arith.addf %122, %123 : vector<8x128xf32>
    %125 = math.tanh %124 : vector<8x128xf32>
    %126 = arith.mulf %120, %125 : vector<8x128xf32>
    %c0_45 = arith.constant 0 : index
    %c0_46 = arith.constant 0 : index
    %127 = vector.load %arg6[%c0_45, %c0_46] : memref<8x128xf32, #tpu.memory_space<vmem>>, vector<8x128xf32>
    tpu.vector_store %arg6[%c0_45, %c0_46], %124 {strides = array<i32>} : memref<8x128xf32, #tpu.memory_space<vmem>>, vector<8x128xf32>,
    %c0_47 = arith.constant 0 : index
    %c0_48 = arith.constant 0 : index
    %128 = vector.load %arg5[%c0_47, %c0_48] : memref<8x128xf32, #tpu.memory_space<vmem>>, vector<8x128xf32>
    tpu.vector_store %arg5[%c0_47, %c0_48], %126 {strides = array<i32>} : memref<8x128xf32, #tpu.memory_space<vmem>>, vector<8x128xf32>,
    %129 = arith.truncf %126 : vector<8x128xf32> to vector<8x128xbf16>
    %130 = arith.index_cast %92 : i32 to index
    %c0_49 = arith.constant 0 : index
    %c0_50 = arith.constant 0 : index
    %131 = vector.load %arg4[%130, %c0_49, %c0_50] : memref<8x8x128xbf16, #tpu.memory_space<vmem>>, vector<1x8x128xbf16>
    %132 = vector.shape_cast %131 : vector<1x8x128xbf16> to vector<8x128xbf16>
    %133 = vector.shape_cast %129 : vector<8x128xbf16> to vector<1x8x128xbf16>
    tpu.vector_store %arg4[%130, %c0_49, %c0_50], %133 {strides = array<i32>} : memref<8x8x128xbf16, #tpu.memory_space<vmem>>, vector<1x8x128xbf16>,
    %c1_i32_51 = arith.constant 1 : i32
    %134 = arith.muli %arg0, %c1_i32_51 : i32
    %c3_i32_52 = arith.constant 3 : i32
    %135 = arith.addi %134, %c3_i32_52 : i32
    %136 = arith.index_cast %135 : i32 to index
    %c0_53 = arith.constant 0 : index
    %c0_54 = arith.constant 0 : index
    %137 = vector.load %arg2[%136, %c0_53, %c0_54] : memref<8x8x512xbf16, #tpu.memory_space<vmem>>, vector<1x8x512xbf16>
    %138 = vector.shape_cast %137 : vector<1x8x512xbf16> to vector<8x512xbf16>
    %139 = arith.extf %138 : vector<8x512xbf16> to vector<8x512xf32>
    %c0_55 = arith.constant 0 : index
    %c0_56 = arith.constant 0 : index
    %140 = vector.load %arg5[%c0_55, %c0_56] : memref<8x128xf32, #tpu.memory_space<vmem>>, vector<8x128xf32>
    %141 = arith.truncf %140 : vector<8x128xf32> to vector<8x128xbf16>
    %cst_57 = arith.constant dense<0.000000e+00> : vector<8x512xf32>
    %142 = tpu.matmul %141, %4, %cst_57 {dimension_numbers = #tpu.dot_dimension_numbers<[1], [0], [0], [1], [0, 0, 1, 1], [], []>} : vector<8x128xbf16>, vector<128x512xbf16>, vector<8x512xf32> -> vector<8x512xf32>
    %143 = arith.addf %139, %142 : vector<8x512xf32>
    %144 = vector.extract_strided_slice %143 {offsets = [0, 0], sizes = [8, 128], strides = [1, 1]} : vector<8x512xf32> to vector<8x128xf32>
    %145 = arith.negf %144 : vector<8x128xf32>
    %146 = math.exp %145 : vector<8x128xf32>
    %cst_58 = arith.constant 1.000000e+00 : f32
    %147 = vector.broadcast %cst_58 : f32 to vector<8x128xf32>
    %148 = arith.addf %147, %146 : vector<8x128xf32>
    %149 = arith.divf %147, %148 : vector<8x128xf32>
    %150 = vector.extract_strided_slice %143 {offsets = [0, 128], sizes = [8, 128], strides = [1, 1]} : vector<8x512xf32> to vector<8x128xf32>
    %151 = arith.negf %150 : vector<8x128xf32>
    %152 = math.exp %151 : vector<8x128xf32>
    %cst_59 = arith.constant 1.000000e+00 : f32
    %153 = vector.broadcast %cst_59 : f32 to vector<8x128xf32>
    %154 = arith.addf %153, %152 : vector<8x128xf32>
    %155 = arith.divf %153, %154 : vector<8x128xf32>
    %156 = vector.extract_strided_slice %143 {offsets = [0, 256], sizes = [8, 128], strides = [1, 1]} : vector<8x512xf32> to vector<8x128xf32>
    %157 = math.tanh %156 : vector<8x128xf32>
    %158 = vector.extract_strided_slice %143 {offsets = [0, 384], sizes = [8, 128], strides = [1, 1]} : vector<8x512xf32> to vector<8x128xf32>
    %159 = arith.negf %158 : vector<8x128xf32>
    %160 = math.exp %159 : vector<8x128xf32>
    %cst_60 = arith.constant 1.000000e+00 : f32
    %161 = vector.broadcast %cst_60 : f32 to vector<8x128xf32>
    %162 = arith.addf %161, %160 : vector<8x128xf32>
    %163 = arith.divf %161, %162 : vector<8x128xf32>
    %c0_61 = arith.constant 0 : index
    %c0_62 = arith.constant 0 : index
    %164 = vector.load %arg6[%c0_61, %c0_62] : memref<8x128xf32, #tpu.memory_space<vmem>>, vector<8x128xf32>
    %165 = arith.mulf %155, %164 : vector<8x128xf32>
    %166 = arith.mulf %149, %157 : vector<8x128xf32>
    %167 = arith.addf %165, %166 : vector<8x128xf32>
    %168 = math.tanh %167 : vector<8x128xf32>
    %169 = arith.mulf %163, %168 : vector<8x128xf32>
    %c0_63 = arith.constant 0 : index
    %c0_64 = arith.constant 0 : index
    %170 = vector.load %arg6[%c0_63, %c0_64] : memref<8x128xf32, #tpu.memory_space<vmem>>, vector<8x128xf32>
    tpu.vector_store %arg6[%c0_63, %c0_64], %167 {strides = array<i32>} : memref<8x128xf32, #tpu.memory_space<vmem>>, vector<8x128xf32>,
    %c0_65 = arith.constant 0 : index
    %c0_66 = arith.constant 0 : index
    %171 = vector.load %arg5[%c0_65, %c0_66] : memref<8x128xf32, #tpu.memory_space<vmem>>, vector<8x128xf32>
    tpu.vector_store %arg5[%c0_65, %c0_66], %169 {strides = array<i32>} : memref<8x128xf32, #tpu.memory_space<vmem>>, vector<8x128xf32>,
    %172 = arith.truncf %169 : vector<8x128xf32> to vector<8x128xbf16>
    %173 = arith.index_cast %135 : i32 to index
    %c0_67 = arith.constant 0 : index
    %c0_68 = arith.constant 0 : index
    %174 = vector.load %arg4[%173, %c0_67, %c0_68] : memref<8x8x128xbf16, #tpu.memory_space<vmem>>, vector<1x8x128xbf16>
    %175 = vector.shape_cast %174 : vector<1x8x128xbf16> to vector<8x128xbf16>
    %176 = vector.shape_cast %172 : vector<8x128xbf16> to vector<1x8x128xbf16>
    tpu.vector_store %arg4[%173, %c0_67, %c0_68], %176 {strides = array<i32>} : memref<8x8x128xbf16, #tpu.memory_space<vmem>>, vector<1x8x128xbf16>,
    %c-1_i32 = arith.constant -1 : i32
    %177 = arith.muli %arg0, %c-1_i32 : i32
    %c4_i32 = arith.constant 4 : i32
    %178 = arith.addi %177, %c4_i32 : i32
    %179 = arith.index_cast %178 : i32 to index
    %c0_69 = arith.constant 0 : index
    %c0_70 = arith.constant 0 : index
    %180 = vector.load %arg2[%179, %c0_69, %c0_70] : memref<8x8x512xbf16, #tpu.memory_space<vmem>>, vector<1x8x512xbf16>
    %181 = vector.shape_cast %180 : vector<1x8x512xbf16> to vector<8x512xbf16>
    %182 = arith.extf %181 : vector<8x512xbf16> to vector<8x512xf32>
    %c0_71 = arith.constant 0 : index
    %c0_72 = arith.constant 0 : index
    %183 = vector.load %arg5[%c0_71, %c0_72] : memref<8x128xf32, #tpu.memory_space<vmem>>, vector<8x128xf32>
    %184 = arith.truncf %183 : vector<8x128xf32> to vector<8x128xbf16>
    %cst_73 = arith.constant dense<0.000000e+00> : vector<8x512xf32>
    %185 = tpu.matmul %184, %4, %cst_73 {dimension_numbers = #tpu.dot_dimension_numbers<[1], [0], [0], [1], [0, 0, 1, 1], [], []>} : vector<8x128xbf16>, vector<128x512xbf16>, vector<8x512xf32> -> vector<8x512xf32>
    %186 = arith.addf %182, %185 : vector<8x512xf32>
    %187 = vector.extract_strided_slice %186 {offsets = [0, 0], sizes = [8, 128], strides = [1, 1]} : vector<8x512xf32> to vector<8x128xf32>
    %188 = arith.negf %187 : vector<8x128xf32>
    %189 = math.exp %188 : vector<8x128xf32>
    %cst_74 = arith.constant 1.000000e+00 : f32
    %190 = vector.broadcast %cst_74 : f32 to vector<8x128xf32>
    %191 = arith.addf %190, %189 : vector<8x128xf32>
    %192 = arith.divf %190, %191 : vector<8x128xf32>
    %193 = vector.extract_strided_slice %186 {offsets = [0, 128], sizes = [8, 128], strides = [1, 1]} : vector<8x512xf32> to vector<8x128xf32>
    %194 = arith.negf %193 : vector<8x128xf32>
    %195 = math.exp %194 : vector<8x128xf32>
    %cst_75 = arith.constant 1.000000e+00 : f32
    %196 = vector.broadcast %cst_75 : f32 to vector<8x128xf32>
    %197 = arith.addf %196, %195 : vector<8x128xf32>
    %198 = arith.divf %196, %197 : vector<8x128xf32>
    %199 = vector.extract_strided_slice %186 {offsets = [0, 256], sizes = [8, 128], strides = [1, 1]} : vector<8x512xf32> to vector<8x128xf32>
    %200 = math.tanh %199 : vector<8x128xf32>
    %201 = vector.extract_strided_slice %186 {offsets = [0, 384], sizes = [8, 128], strides = [1, 1]} : vector<8x512xf32> to vector<8x128xf32>
    %202 = arith.negf %201 : vector<8x128xf32>
    %203 = math.exp %202 : vector<8x128xf32>
    %cst_76 = arith.constant 1.000000e+00 : f32
    %204 = vector.broadcast %cst_76 : f32 to vector<8x128xf32>
    %205 = arith.addf %204, %203 : vector<8x128xf32>
    %206 = arith.divf %204, %205 : vector<8x128xf32>
    %c0_77 = arith.constant 0 : index
    %c0_78 = arith.constant 0 : index
    %207 = vector.load %arg6[%c0_77, %c0_78] : memref<8x128xf32, #tpu.memory_space<vmem>>, vector<8x128xf32>
    %208 = arith.mulf %198, %207 : vector<8x128xf32>
    %209 = arith.mulf %192, %200 : vector<8x128xf32>
    %210 = arith.addf %208, %209 : vector<8x128xf32>
    %211 = math.tanh %210 : vector<8x128xf32>
    %212 = arith.mulf %206, %211 : vector<8x128xf32>
    %c0_79 = arith.constant 0 : index
    %c0_80 = arith.constant 0 : index
    %213 = vector.load %arg6[%c0_79, %c0_80] : memref<8x128xf32, #tpu.memory_space<vmem>>, vector<8x128xf32>
    tpu.vector_store %arg6[%c0_79, %c0_80], %210 {strides = array<i32>} : memref<8x128xf32, #tpu.memory_space<vmem>>, vector<8x128xf32>,
    %c0_81 = arith.constant 0 : index
    %c0_82 = arith.constant 0 : index
    %214 = vector.load %arg5[%c0_81, %c0_82] : memref<8x128xf32, #tpu.memory_space<vmem>>, vector<8x128xf32>
    tpu.vector_store %arg5[%c0_81, %c0_82], %212 {strides = array<i32>} : memref<8x128xf32, #tpu.memory_space<vmem>>, vector<8x128xf32>,
    %215 = arith.truncf %212 : vector<8x128xf32> to vector<8x128xbf16>
    %216 = arith.index_cast %178 : i32 to index
    %c0_83 = arith.constant 0 : index
    %c0_84 = arith.constant 0 : index
    %217 = vector.load %arg4[%216, %c0_83, %c0_84] : memref<8x8x128xbf16, #tpu.memory_space<vmem>>, vector<1x8x128xbf16>
    %218 = vector.shape_cast %217 : vector<1x8x128xbf16> to vector<8x128xbf16>
    %219 = vector.shape_cast %215 : vector<8x128xbf16> to vector<1x8x128xbf16>
    tpu.vector_store %arg4[%216, %c0_83, %c0_84], %219 {strides = array<i32>} : memref<8x8x128xbf16, #tpu.memory_space<vmem>>, vector<1x8x128xbf16>,
    %c-3_i32 = arith.constant -3 : i32
    %220 = arith.muli %arg0, %c-3_i32 : i32
    %c5_i32_85 = arith.constant 5 : i32
    %221 = arith.addi %220, %c5_i32_85 : i32
    %222 = arith.index_cast %221 : i32 to index
    %c0_86 = arith.constant 0 : index
    %c0_87 = arith.constant 0 : index
    %223 = vector.load %arg2[%222, %c0_86, %c0_87] : memref<8x8x512xbf16, #tpu.memory_space<vmem>>, vector<1x8x512xbf16>
    %224 = vector.shape_cast %223 : vector<1x8x512xbf16> to vector<8x512xbf16>
    %225 = arith.extf %224 : vector<8x512xbf16> to vector<8x512xf32>
    %c0_88 = arith.constant 0 : index
    %c0_89 = arith.constant 0 : index
    %226 = vector.load %arg5[%c0_88, %c0_89] : memref<8x128xf32, #tpu.memory_space<vmem>>, vector<8x128xf32>
    %227 = arith.truncf %226 : vector<8x128xf32> to vector<8x128xbf16>
    %cst_90 = arith.constant dense<0.000000e+00> : vector<8x512xf32>
    %228 = tpu.matmul %227, %4, %cst_90 {dimension_numbers = #tpu.dot_dimension_numbers<[1], [0], [0], [1], [0, 0, 1, 1], [], []>} : vector<8x128xbf16>, vector<128x512xbf16>, vector<8x512xf32> -> vector<8x512xf32>
    %229 = arith.addf %225, %228 : vector<8x512xf32>
    %230 = vector.extract_strided_slice %229 {offsets = [0, 0], sizes = [8, 128], strides = [1, 1]} : vector<8x512xf32> to vector<8x128xf32>
    %231 = arith.negf %230 : vector<8x128xf32>
    %232 = math.exp %231 : vector<8x128xf32>
    %cst_91 = arith.constant 1.000000e+00 : f32
    %233 = vector.broadcast %cst_91 : f32 to vector<8x128xf32>
    %234 = arith.addf %233, %232 : vector<8x128xf32>
    %235 = arith.divf %233, %234 : vector<8x128xf32>
    %236 = vector.extract_strided_slice %229 {offsets = [0, 128], sizes = [8, 128], strides = [1, 1]} : vector<8x512xf32> to vector<8x128xf32>
    %237 = arith.negf %236 : vector<8x128xf32>
    %238 = math.exp %237 : vector<8x128xf32>
    %cst_92 = arith.constant 1.000000e+00 : f32
    %239 = vector.broadcast %cst_92 : f32 to vector<8x128xf32>
    %240 = arith.addf %239, %238 : vector<8x128xf32>
    %241 = arith.divf %239, %240 : vector<8x128xf32>
    %242 = vector.extract_strided_slice %229 {offsets = [0, 256], sizes = [8, 128], strides = [1, 1]} : vector<8x512xf32> to vector<8x128xf32>
    %243 = math.tanh %242 : vector<8x128xf32>
    %244 = vector.extract_strided_slice %229 {offsets = [0, 384], sizes = [8, 128], strides = [1, 1]} : vector<8x512xf32> to vector<8x128xf32>
    %245 = arith.negf %244 : vector<8x128xf32>
    %246 = math.exp %245 : vector<8x128xf32>
    %cst_93 = arith.constant 1.000000e+00 : f32
    %247 = vector.broadcast %cst_93 : f32 to vector<8x128xf32>
    %248 = arith.addf %247, %246 : vector<8x128xf32>
    %249 = arith.divf %247, %248 : vector<8x128xf32>
    %c0_94 = arith.constant 0 : index
    %c0_95 = arith.constant 0 : index
    %250 = vector.load %arg6[%c0_94, %c0_95] : memref<8x128xf32, #tpu.memory_space<vmem>>, vector<8x128xf32>
    %251 = arith.mulf %241, %250 : vector<8x128xf32>
    %252 = arith.mulf %235, %243 : vector<8x128xf32>
    %253 = arith.addf %251, %252 : vector<8x128xf32>
    %254 = math.tanh %253 : vector<8x128xf32>
    %255 = arith.mulf %249, %254 : vector<8x128xf32>
    %c0_96 = arith.constant 0 : index
    %c0_97 = arith.constant 0 : index
    %256 = vector.load %arg6[%c0_96, %c0_97] : memref<8x128xf32, #tpu.memory_space<vmem>>, vector<8x128xf32>
    tpu.vector_store %arg6[%c0_96, %c0_97], %253 {strides = array<i32>} : memref<8x128xf32, #tpu.memory_space<vmem>>, vector<8x128xf32>,
    %c0_98 = arith.constant 0 : index
    %c0_99 = arith.constant 0 : index
    %257 = vector.load %arg5[%c0_98, %c0_99] : memref<8x128xf32, #tpu.memory_space<vmem>>, vector<8x128xf32>
    tpu.vector_store %arg5[%c0_98, %c0_99], %255 {strides = array<i32>} : memref<8x128xf32, #tpu.memory_space<vmem>>, vector<8x128xf32>,
    %258 = arith.truncf %255 : vector<8x128xf32> to vector<8x128xbf16>
    %259 = arith.index_cast %221 : i32 to index
    %c0_100 = arith.constant 0 : index
    %c0_101 = arith.constant 0 : index
    %260 = vector.load %arg4[%259, %c0_100, %c0_101] : memref<8x8x128xbf16, #tpu.memory_space<vmem>>, vector<1x8x128xbf16>
    %261 = vector.shape_cast %260 : vector<1x8x128xbf16> to vector<8x128xbf16>
    %262 = vector.shape_cast %258 : vector<8x128xbf16> to vector<1x8x128xbf16>
    tpu.vector_store %arg4[%259, %c0_100, %c0_101], %262 {strides = array<i32>} : memref<8x8x128xbf16, #tpu.memory_space<vmem>>, vector<1x8x128xbf16>,
    %c-5_i32 = arith.constant -5 : i32
    %263 = arith.muli %arg0, %c-5_i32 : i32
    %c6_i32 = arith.constant 6 : i32
    %264 = arith.addi %263, %c6_i32 : i32
    %265 = arith.index_cast %264 : i32 to index
    %c0_102 = arith.constant 0 : index
    %c0_103 = arith.constant 0 : index
    %266 = vector.load %arg2[%265, %c0_102, %c0_103] : memref<8x8x512xbf16, #tpu.memory_space<vmem>>, vector<1x8x512xbf16>
    %267 = vector.shape_cast %266 : vector<1x8x512xbf16> to vector<8x512xbf16>
    %268 = arith.extf %267 : vector<8x512xbf16> to vector<8x512xf32>
    %c0_104 = arith.constant 0 : index
    %c0_105 = arith.constant 0 : index
    %269 = vector.load %arg5[%c0_104, %c0_105] : memref<8x128xf32, #tpu.memory_space<vmem>>, vector<8x128xf32>
    %270 = arith.truncf %269 : vector<8x128xf32> to vector<8x128xbf16>
    %cst_106 = arith.constant dense<0.000000e+00> : vector<8x512xf32>
    %271 = tpu.matmul %270, %4, %cst_106 {dimension_numbers = #tpu.dot_dimension_numbers<[1], [0], [0], [1], [0, 0, 1, 1], [], []>} : vector<8x128xbf16>, vector<128x512xbf16>, vector<8x512xf32> -> vector<8x512xf32>
    %272 = arith.addf %268, %271 : vector<8x512xf32>
    %273 = vector.extract_strided_slice %272 {offsets = [0, 0], sizes = [8, 128], strides = [1, 1]} : vector<8x512xf32> to vector<8x128xf32>
    %274 = arith.negf %273 : vector<8x128xf32>
    %275 = math.exp %274 : vector<8x128xf32>
    %cst_107 = arith.constant 1.000000e+00 : f32
    %276 = vector.broadcast %cst_107 : f32 to vector<8x128xf32>
    %277 = arith.addf %276, %275 : vector<8x128xf32>
    %278 = arith.divf %276, %277 : vector<8x128xf32>
    %279 = vector.extract_strided_slice %272 {offsets = [0, 128], sizes = [8, 128], strides = [1, 1]} : vector<8x512xf32> to vector<8x128xf32>
    %280 = arith.negf %279 : vector<8x128xf32>
    %281 = math.exp %280 : vector<8x128xf32>
    %cst_108 = arith.constant 1.000000e+00 : f32
    %282 = vector.broadcast %cst_108 : f32 to vector<8x128xf32>
    %283 = arith.addf %282, %281 : vector<8x128xf32>
    %284 = arith.divf %282, %283 : vector<8x128xf32>
    %285 = vector.extract_strided_slice %272 {offsets = [0, 256], sizes = [8, 128], strides = [1, 1]} : vector<8x512xf32> to vector<8x128xf32>
    %286 = math.tanh %285 : vector<8x128xf32>
    %287 = vector.extract_strided_slice %272 {offsets = [0, 384], sizes = [8, 128], strides = [1, 1]} : vector<8x512xf32> to vector<8x128xf32>
    %288 = arith.negf %287 : vector<8x128xf32>
    %289 = math.exp %288 : vector<8x128xf32>
    %cst_109 = arith.constant 1.000000e+00 : f32
    %290 = vector.broadcast %cst_109 : f32 to vector<8x128xf32>
    %291 = arith.addf %290, %289 : vector<8x128xf32>
    %292 = arith.divf %290, %291 : vector<8x128xf32>
    %c0_110 = arith.constant 0 : index
    %c0_111 = arith.constant 0 : index
    %293 = vector.load %arg6[%c0_110, %c0_111] : memref<8x128xf32, #tpu.memory_space<vmem>>, vector<8x128xf32>
    %294 = arith.mulf %284, %293 : vector<8x128xf32>
    %295 = arith.mulf %278, %286 : vector<8x128xf32>
    %296 = arith.addf %294, %295 : vector<8x128xf32>
    %297 = math.tanh %296 : vector<8x128xf32>
    %298 = arith.mulf %292, %297 : vector<8x128xf32>
    %c0_112 = arith.constant 0 : index
    %c0_113 = arith.constant 0 : index
    %299 = vector.load %arg6[%c0_112, %c0_113] : memref<8x128xf32, #tpu.memory_space<vmem>>, vector<8x128xf32>
    tpu.vector_store %arg6[%c0_112, %c0_113], %296 {strides = array<i32>} : memref<8x128xf32, #tpu.memory_space<vmem>>, vector<8x128xf32>,
    %c0_114 = arith.constant 0 : index
    %c0_115 = arith.constant 0 : index
    %300 = vector.load %arg5[%c0_114, %c0_115] : memref<8x128xf32, #tpu.memory_space<vmem>>, vector<8x128xf32>
    tpu.vector_store %arg5[%c0_114, %c0_115], %298 {strides = array<i32>} : memref<8x128xf32, #tpu.memory_space<vmem>>, vector<8x128xf32>,
    %301 = arith.truncf %298 : vector<8x128xf32> to vector<8x128xbf16>
    %302 = arith.index_cast %264 : i32 to index
    %c0_116 = arith.constant 0 : index
    %c0_117 = arith.constant 0 : index
    %303 = vector.load %arg4[%302, %c0_116, %c0_117] : memref<8x8x128xbf16, #tpu.memory_space<vmem>>, vector<1x8x128xbf16>
    %304 = vector.shape_cast %303 : vector<1x8x128xbf16> to vector<8x128xbf16>
    %305 = vector.shape_cast %301 : vector<8x128xbf16> to vector<1x8x128xbf16>
    tpu.vector_store %arg4[%302, %c0_116, %c0_117], %305 {strides = array<i32>} : memref<8x8x128xbf16, #tpu.memory_space<vmem>>, vector<1x8x128xbf16>,
    %c-7_i32 = arith.constant -7 : i32
    %306 = arith.muli %arg0, %c-7_i32 : i32
    %c7_i32_118 = arith.constant 7 : i32
    %307 = arith.addi %306, %c7_i32_118 : i32
    %308 = arith.index_cast %307 : i32 to index
    %c0_119 = arith.constant 0 : index
    %c0_120 = arith.constant 0 : index
    %309 = vector.load %arg2[%308, %c0_119, %c0_120] : memref<8x8x512xbf16, #tpu.memory_space<vmem>>, vector<1x8x512xbf16>
    %310 = vector.shape_cast %309 : vector<1x8x512xbf16> to vector<8x512xbf16>
    %311 = arith.extf %310 : vector<8x512xbf16> to vector<8x512xf32>
    %c0_121 = arith.constant 0 : index
    %c0_122 = arith.constant 0 : index
    %312 = vector.load %arg5[%c0_121, %c0_122] : memref<8x128xf32, #tpu.memory_space<vmem>>, vector<8x128xf32>
    %313 = arith.truncf %312 : vector<8x128xf32> to vector<8x128xbf16>
    %cst_123 = arith.constant dense<0.000000e+00> : vector<8x512xf32>
    %314 = tpu.matmul %313, %4, %cst_123 {dimension_numbers = #tpu.dot_dimension_numbers<[1], [0], [0], [1], [0, 0, 1, 1], [], []>} : vector<8x128xbf16>, vector<128x512xbf16>, vector<8x512xf32> -> vector<8x512xf32>
    %315 = arith.addf %311, %314 : vector<8x512xf32>
    %316 = vector.extract_strided_slice %315 {offsets = [0, 0], sizes = [8, 128], strides = [1, 1]} : vector<8x512xf32> to vector<8x128xf32>
    %317 = arith.negf %316 : vector<8x128xf32>
    %318 = math.exp %317 : vector<8x128xf32>
    %cst_124 = arith.constant 1.000000e+00 : f32
    %319 = vector.broadcast %cst_124 : f32 to vector<8x128xf32>
    %320 = arith.addf %319, %318 : vector<8x128xf32>
    %321 = arith.divf %319, %320 : vector<8x128xf32>
    %322 = vector.extract_strided_slice %315 {offsets = [0, 128], sizes = [8, 128], strides = [1, 1]} : vector<8x512xf32> to vector<8x128xf32>
    %323 = arith.negf %322 : vector<8x128xf32>
    %324 = math.exp %323 : vector<8x128xf32>
    %cst_125 = arith.constant 1.000000e+00 : f32
    %325 = vector.broadcast %cst_125 : f32 to vector<8x128xf32>
    %326 = arith.addf %325, %324 : vector<8x128xf32>
    %327 = arith.divf %325, %326 : vector<8x128xf32>
    %328 = vector.extract_strided_slice %315 {offsets = [0, 256], sizes = [8, 128], strides = [1, 1]} : vector<8x512xf32> to vector<8x128xf32>
    %329 = math.tanh %328 : vector<8x128xf32>
    %330 = vector.extract_strided_slice %315 {offsets = [0, 384], sizes = [8, 128], strides = [1, 1]} : vector<8x512xf32> to vector<8x128xf32>
    %331 = arith.negf %330 : vector<8x128xf32>
    %332 = math.exp %331 : vector<8x128xf32>
    %cst_126 = arith.constant 1.000000e+00 : f32
    %333 = vector.broadcast %cst_126 : f32 to vector<8x128xf32>
    %334 = arith.addf %333, %332 : vector<8x128xf32>
    %335 = arith.divf %333, %334 : vector<8x128xf32>
    %c0_127 = arith.constant 0 : index
    %c0_128 = arith.constant 0 : index
    %336 = vector.load %arg6[%c0_127, %c0_128] : memref<8x128xf32, #tpu.memory_space<vmem>>, vector<8x128xf32>
    %337 = arith.mulf %327, %336 : vector<8x128xf32>
    %338 = arith.mulf %321, %329 : vector<8x128xf32>
    %339 = arith.addf %337, %338 : vector<8x128xf32>
    %340 = math.tanh %339 : vector<8x128xf32>
    %341 = arith.mulf %335, %340 : vector<8x128xf32>
    %c0_129 = arith.constant 0 : index
    %c0_130 = arith.constant 0 : index
    %342 = vector.load %arg6[%c0_129, %c0_130] : memref<8x128xf32, #tpu.memory_space<vmem>>, vector<8x128xf32>
    tpu.vector_store %arg6[%c0_129, %c0_130], %339 {strides = array<i32>} : memref<8x128xf32, #tpu.memory_space<vmem>>, vector<8x128xf32>,
    %c0_131 = arith.constant 0 : index
    %c0_132 = arith.constant 0 : index
    %343 = vector.load %arg5[%c0_131, %c0_132] : memref<8x128xf32, #tpu.memory_space<vmem>>, vector<8x128xf32>
    tpu.vector_store %arg5[%c0_131, %c0_132], %341 {strides = array<i32>} : memref<8x128xf32, #tpu.memory_space<vmem>>, vector<8x128xf32>,
    %344 = arith.truncf %341 : vector<8x128xf32> to vector<8x128xbf16>
    %345 = arith.index_cast %307 : i32 to index
    %c0_133 = arith.constant 0 : index
    %c0_134 = arith.constant 0 : index
    %346 = vector.load %arg4[%345, %c0_133, %c0_134] : memref<8x8x128xbf16, #tpu.memory_space<vmem>>, vector<1x8x128xbf16>
    %347 = vector.shape_cast %346 : vector<1x8x128xbf16> to vector<8x128xbf16>
    %348 = vector.shape_cast %344 : vector<8x128xbf16> to vector<1x8x128xbf16>
    tpu.vector_store %arg4[%345, %c0_133, %c0_134], %348 {strides = array<i32>} : memref<8x8x128xbf16, #tpu.memory_space<vmem>>, vector<1x8x128xbf16>,
    return
  }
  func.func @transform_0(%arg0: i32, %arg1: i32) -> (i32, i32, i32) {
    %c2_i32 = arith.constant 2 : i32
    %0 = arith.muli %c2_i32, %arg1 : i32
    %c1_i32 = arith.constant 1 : i32
    %1 = arith.subi %c1_i32, %0 : i32
    %2 = arith.muli %arg0, %1 : i32
    %3 = arith.addi %arg1, %2 : i32
    %c0_i32 = arith.constant 0 : i32
    %c0_i32_0 = arith.constant 0 : i32
    return %3, %c0_i32, %arg0 : i32, i32, i32
  }
  func.func @transform_1(%arg0: i32, %arg1: i32) -> (i32, i32, i32) {
    %c0_i32 = arith.constant 0 : i32
    %c0_i32_0 = arith.constant 0 : i32
    %c0_i32_1 = arith.constant 0 : i32
    return %arg0, %c0_i32, %c0_i32_0 : i32, i32, i32
  }
  func.func @transform_2(%arg0: i32, %arg1: i32) -> (i32, i32, i32) {
    %c2_i32 = arith.constant 2 : i32
    %0 = arith.muli %c2_i32, %arg1 : i32
    %c1_i32 = arith.constant 1 : i32
    %1 = arith.subi %c1_i32, %0 : i32
    %2 = arith.muli %arg0, %1 : i32
    %3 = arith.addi %arg1, %2 : i32
    %c0_i32 = arith.constant 0 : i32
    %c0_i32_0 = arith.constant 0 : i32
    return %3, %c0_i32, %arg0 : i32, i32, i32
  }
}

module attributes {stable_mosaic.version = 11 : i64} {
  func.func @_matmul_kernel(%arg0: i32, %arg1: i32, %arg2: i32, %arg3: memref<128x128xbf16, #tpu.memory_space<vmem>>, %arg4: memref<128x512xbf16, #tpu.memory_space<vmem>>, %arg5: memref<128x512xbf16, #tpu.memory_space<vmem>>, %arg6: memref<128x512xf32, #tpu.memory_space<vmem>>) attributes {dimension_semantics = [#tpu.dimension_semantics<parallel>, #tpu.dimension_semantics<parallel>, #tpu.dimension_semantics<arbitrary>], iteration_bounds = array<i64: 1, 2, 1>, scalar_prefetch = 0 : i64, scratch_operands = 1 : i64, tpu.core_type = #tpu.core_type<tc>, window_params = [{transform_indices = @transform_0, window_bounds = array<i64: 128, 128>}, {transform_indices = @transform_1, window_bounds = array<i64: 128, 512>}, {transform_indices = @transform_2, window_bounds = array<i64: 128, 512>}]} {
    %c0_i32 = arith.constant 0 : i32
    %0 = arith.cmpi eq, %arg2, %c0_i32 : i32
    %1 = arith.extui %0 : i1 to i32
    %c0_i32_0 = arith.constant 0 : i32
    %2 = arith.cmpi ne, %1, %c0_i32_0 : i32
    scf.if %2 {
      %cst_10 = arith.constant 0.000000e+00 : f32
      %12 = vector.broadcast %cst_10 : f32 to vector<128x512xf32>
      %c0_11 = arith.constant 0 : index
      %c0_12 = arith.constant 0 : index
      %13 = vector.load %arg6[%c0_11, %c0_12] : memref<128x512xf32, #tpu.memory_space<vmem>>, vector<128x512xf32>
      tpu.vector_store %arg6[%c0_11, %c0_12], %12 {strides = array<i32>} : memref<128x512xf32, #tpu.memory_space<vmem>>, vector<128x512xf32>,
    } else {
    }
    %c0 = arith.constant 0 : index
    %c0_1 = arith.constant 0 : index
    %3 = vector.load %arg6[%c0, %c0_1] : memref<128x512xf32, #tpu.memory_space<vmem>>, vector<128x512xf32>
    %c0_2 = arith.constant 0 : index
    %c0_3 = arith.constant 0 : index
    %4 = vector.load %arg3[%c0_2, %c0_3] : memref<128x128xbf16, #tpu.memory_space<vmem>>, vector<128x128xbf16>
    %c0_4 = arith.constant 0 : index
    %c0_5 = arith.constant 0 : index
    %5 = vector.load %arg4[%c0_4, %c0_5] : memref<128x512xbf16, #tpu.memory_space<vmem>>, vector<128x512xbf16>
    %cst = arith.constant dense<0.000000e+00> : vector<128x512xf32>
    %6 = tpu.matmul %4, %5, %cst {dimension_numbers = #tpu.dot_dimension_numbers<[1], [0], [0], [1], [0, 0, 1, 1], [], []>} : vector<128x128xbf16>, vector<128x512xbf16>, vector<128x512xf32> -> vector<128x512xf32>
    %7 = arith.addf %3, %6 : vector<128x512xf32>
    %c0_6 = arith.constant 0 : index
    %c0_7 = arith.constant 0 : index
    %8 = vector.load %arg6[%c0_6, %c0_7] : memref<128x512xf32, #tpu.memory_space<vmem>>, vector<128x512xf32>
    tpu.vector_store %arg6[%c0_6, %c0_7], %7 {strides = array<i32>} : memref<128x512xf32, #tpu.memory_space<vmem>>, vector<128x512xf32>,
    %c0_i32_8 = arith.constant 0 : i32
    %9 = arith.cmpi eq, %arg2, %c0_i32_8 : i32
    %10 = arith.extui %9 : i1 to i32
    %c0_i32_9 = arith.constant 0 : i32
    %11 = arith.cmpi ne, %10, %c0_i32_9 : i32
    scf.if %11 {
      %c0_10 = arith.constant 0 : index
      %c0_11 = arith.constant 0 : index
      %12 = vector.load %arg6[%c0_10, %c0_11] : memref<128x512xf32, #tpu.memory_space<vmem>>, vector<128x512xf32>
      %13 = arith.truncf %12 : vector<128x512xf32> to vector<128x512xbf16>
      %c0_12 = arith.constant 0 : index
      %c0_13 = arith.constant 0 : index
      %14 = vector.load %arg5[%c0_12, %c0_13] : memref<128x512xbf16, #tpu.memory_space<vmem>>, vector<128x512xbf16>
      tpu.vector_store %arg5[%c0_12, %c0_13], %13 {strides = array<i32>} : memref<128x512xbf16, #tpu.memory_space<vmem>>, vector<128x512xbf16>,
    } else {
    }
    return
  }
  func.func @transform_0(%arg0: i32, %arg1: i32, %arg2: i32) -> (i32, i32) {
    %c0_i32 = arith.constant 0 : i32
    return %arg0, %arg2 : i32, i32
  }
  func.func @transform_1(%arg0: i32, %arg1: i32, %arg2: i32) -> (i32, i32) {
    %c0_i32 = arith.constant 0 : i32
    return %arg2, %arg1 : i32, i32
  }
  func.func @transform_2(%arg0: i32, %arg1: i32, %arg2: i32) -> (i32, i32) {
    %c0_i32 = arith.constant 0 : i32
    return %arg0, %arg1 : i32, i32
  }
}

module attributes {stable_mosaic.version = 11 : i64} {
  func.func @_matmul_kernel(%arg0: i32, %arg1: i32, %arg2: i32, %arg3: memref<80x128xbf16, #tpu.memory_space<vmem>>, %arg4: memref<128x128xbf16, #tpu.memory_space<vmem>>, %arg5: memref<80x128xbf16, #tpu.memory_space<vmem>>, %arg6: memref<80x128xf32, #tpu.memory_space<vmem>>) attributes {dimension_semantics = [#tpu.dimension_semantics<parallel>, #tpu.dimension_semantics<parallel>, #tpu.dimension_semantics<arbitrary>], iteration_bounds = array<i64: 1, 1, 1>, scalar_prefetch = 0 : i64, scratch_operands = 1 : i64, tpu.core_type = #tpu.core_type<tc>, window_params = [{transform_indices = @transform_0, window_bounds = array<i64: 80, 128>}, {transform_indices = @transform_1, window_bounds = array<i64: 128, 128>}, {transform_indices = @transform_2, window_bounds = array<i64: 80, 128>}]} {
    %c0_i32 = arith.constant 0 : i32
    %0 = arith.cmpi eq, %arg2, %c0_i32 : i32
    %1 = arith.extui %0 : i1 to i32
    %c0_i32_0 = arith.constant 0 : i32
    %2 = arith.cmpi ne, %1, %c0_i32_0 : i32
    scf.if %2 {
      %cst_10 = arith.constant 0.000000e+00 : f32
      %12 = vector.broadcast %cst_10 : f32 to vector<80x128xf32>
      %c0_11 = arith.constant 0 : index
      %c0_12 = arith.constant 0 : index
      %13 = vector.load %arg6[%c0_11, %c0_12] : memref<80x128xf32, #tpu.memory_space<vmem>>, vector<80x128xf32>
      tpu.vector_store %arg6[%c0_11, %c0_12], %12 {strides = array<i32>} : memref<80x128xf32, #tpu.memory_space<vmem>>, vector<80x128xf32>,
    } else {
    }
    %c0 = arith.constant 0 : index
    %c0_1 = arith.constant 0 : index
    %3 = vector.load %arg6[%c0, %c0_1] : memref<80x128xf32, #tpu.memory_space<vmem>>, vector<80x128xf32>
    %c0_2 = arith.constant 0 : index
    %c0_3 = arith.constant 0 : index
    %4 = vector.load %arg3[%c0_2, %c0_3] : memref<80x128xbf16, #tpu.memory_space<vmem>>, vector<80x128xbf16>
    %c0_4 = arith.constant 0 : index
    %c0_5 = arith.constant 0 : index
    %5 = vector.load %arg4[%c0_4, %c0_5] : memref<128x128xbf16, #tpu.memory_space<vmem>>, vector<128x128xbf16>
    %cst = arith.constant dense<0.000000e+00> : vector<80x128xf32>
    %6 = tpu.matmul %4, %5, %cst {dimension_numbers = #tpu.dot_dimension_numbers<[1], [0], [0], [1], [0, 0, 1, 1], [], []>} : vector<80x128xbf16>, vector<128x128xbf16>, vector<80x128xf32> -> vector<80x128xf32>
    %7 = arith.addf %3, %6 : vector<80x128xf32>
    %c0_6 = arith.constant 0 : index
    %c0_7 = arith.constant 0 : index
    %8 = vector.load %arg6[%c0_6, %c0_7] : memref<80x128xf32, #tpu.memory_space<vmem>>, vector<80x128xf32>
    tpu.vector_store %arg6[%c0_6, %c0_7], %7 {strides = array<i32>} : memref<80x128xf32, #tpu.memory_space<vmem>>, vector<80x128xf32>,
    %c0_i32_8 = arith.constant 0 : i32
    %9 = arith.cmpi eq, %arg2, %c0_i32_8 : i32
    %10 = arith.extui %9 : i1 to i32
    %c0_i32_9 = arith.constant 0 : i32
    %11 = arith.cmpi ne, %10, %c0_i32_9 : i32
    scf.if %11 {
      %c0_10 = arith.constant 0 : index
      %c0_11 = arith.constant 0 : index
      %12 = vector.load %arg6[%c0_10, %c0_11] : memref<80x128xf32, #tpu.memory_space<vmem>>, vector<80x128xf32>
      %13 = arith.truncf %12 : vector<80x128xf32> to vector<80x128xbf16>
      %c0_12 = arith.constant 0 : index
      %c0_13 = arith.constant 0 : index
      %14 = vector.load %arg5[%c0_12, %c0_13] : memref<80x128xbf16, #tpu.memory_space<vmem>>, vector<80x128xbf16>
      tpu.vector_store %arg5[%c0_12, %c0_13], %13 {strides = array<i32>} : memref<80x128xbf16, #tpu.memory_space<vmem>>, vector<80x128xbf16>,
    } else {
    }
    return
  }
  func.func @transform_0(%arg0: i32, %arg1: i32, %arg2: i32) -> (i32, i32) {
    %c0_i32 = arith.constant 0 : i32
    return %arg0, %arg2 : i32, i32
  }
  func.func @transform_1(%arg0: i32, %arg1: i32, %arg2: i32) -> (i32, i32) {
    %c0_i32 = arith.constant 0 : i32
    return %arg2, %arg1 : i32, i32
  }
  func.func @transform_2(%arg0: i32, %arg1: i32, %arg2: i32) -> (i32, i32) {
    %c0_i32 = arith.constant 0 : i32
    return %arg0, %arg1 : i32, i32
  }
}

module attributes {stable_mosaic.version = 11 : i64} {
  func.func @kernel(%arg0: i32, %arg1: i32, %arg2: memref<80x128xbf16, #tpu.memory_space<vmem>>, %arg3: memref<1x128xf32, #tpu.memory_space<vmem>>, %arg4: memref<1x128xf32, #tpu.memory_space<vmem>>) attributes {dimension_semantics = [#tpu.dimension_semantics<parallel>, #tpu.dimension_semantics<arbitrary>], iteration_bounds = array<i64: 1, 1>, scalar_prefetch = 0 : i64, scratch_operands = 0 : i64, tpu.core_type = #tpu.core_type<tc>, window_params = [{transform_indices = @transform_0, window_bounds = array<i64: 80, 128>}, {transform_indices = @transform_1, window_bounds = array<i64: 1, 128>}, {transform_indices = @transform_2, window_bounds = array<i64: 1, 128>}]} {
    %c0_i32 = arith.constant 0 : i32
    %0 = arith.cmpi eq, %arg1, %c0_i32 : i32
    %1 = arith.extui %0 : i1 to i32
    %c0_i32_0 = arith.constant 0 : i32
    %2 = arith.cmpi ne, %1, %c0_i32_0 : i32
    scf.if %2 {
      %cst_16 = arith.constant 0.000000e+00 : f32
      %42 = vector.broadcast %cst_16 : f32 to vector<1x128xf32>
      %c0_17 = arith.constant 0 : index
      %c0_18 = arith.constant 0 : index
      %43 = vector.load %arg3[%c0_17, %c0_18] : memref<1x128xf32, #tpu.memory_space<vmem>>, vector<1x128xf32>
      tpu.vector_store %arg3[%c0_17, %c0_18], %42 {strides = array<i32>} : memref<1x128xf32, #tpu.memory_space<vmem>>, vector<1x128xf32>,
      %cst_19 = arith.constant 0.000000e+00 : f32
      %44 = vector.broadcast %cst_19 : f32 to vector<1x128xf32>
      %c0_20 = arith.constant 0 : index
      %c0_21 = arith.constant 0 : index
      %45 = vector.load %arg4[%c0_20, %c0_21] : memref<1x128xf32, #tpu.memory_space<vmem>>, vector<1x128xf32>
      tpu.vector_store %arg4[%c0_20, %c0_21], %44 {strides = array<i32>} : memref<1x128xf32, #tpu.memory_space<vmem>>, vector<1x128xf32>,
    } else {
    }
    %c0 = arith.constant 0 : index
    %c0_1 = arith.constant 0 : index
    %3 = vector.load %arg2[%c0, %c0_1] : memref<80x128xbf16, #tpu.memory_space<vmem>>, vector<80x128xbf16>
    %4 = arith.extf %3 : vector<80x128xbf16> to vector<80x128xf32>
    %c80_i32 = arith.constant 80 : i32
    %5 = arith.muli %arg1, %c80_i32 : i32
    %6 = tpu.iota {dimensions = array<i32: 0>} : vector<80x1xi32>
    %7 = vector.broadcast %5 : i32 to vector<80x1xi32>
    %8 = arith.addi %7, %6 : vector<80x1xi32>
    %c8_i32 = arith.constant 8 : i32
    %c0_i32_2 = arith.constant 0 : i32
    %9 = arith.cmpi eq, %c8_i32, %c0_i32_2 : i32
    %c1_i32 = arith.constant 1 : i32
    %10 = arith.select %9, %c1_i32, %c8_i32 : i32
    %11 = vector.broadcast %10 : i32 to vector<80x1xi32>
    %12 = arith.remsi %8, %11 : vector<80x1xi32>
    %c0_i32_3 = arith.constant 0 : i32
    %13 = vector.broadcast %c0_i32_3 : i32 to vector<80x1xi32>
    %14 = arith.cmpi ne, %12, %13 : vector<80x1xi32>
    %c0_i32_4 = arith.constant 0 : i32
    %15 = vector.broadcast %c0_i32_4 : i32 to vector<80x1xi32>
    %16 = arith.cmpi slt, %12, %15 : vector<80x1xi32>
    %c0_i32_5 = arith.constant 0 : i32
    %17 = arith.cmpi slt, %10, %c0_i32_5 : i32
    %18 = vector.broadcast %17 : i1 to vector<80x1xi1>
    %19 = vector.broadcast %18 : vector<80x1xi1> to vector<80x1xi1>
    %20 = arith.xori %16, %19 : vector<80x1xi1>
    %21 = arith.andi %20, %14 : vector<80x1xi1>
    %22 = vector.broadcast %10 : i32 to vector<80x1xi32>
    %23 = arith.addi %12, %22 : vector<80x1xi32>
    %24 = arith.select %21, %23, %12 : vector<80x1xi1>, vector<80x1xi32>
    %c2_i32 = arith.constant 2 : i32
    %25 = vector.broadcast %c2_i32 : i32 to vector<80x1xi32>
    %26 = arith.cmpi slt, %24, %25 : vector<80x1xi32>
    %cst = arith.constant 0.000000e+00 : f32
    %27 = vector.shape_cast %26 : vector<80x1xi1> to vector<80x1xi1>
    %28 = vector.broadcast %27 : vector<80x1xi1> to vector<80x128xi1>
    %29 = vector.broadcast %cst : f32 to vector<80x128xf32>
    %30 = arith.select %28, %4, %29 : vector<80x128xi1>, vector<80x128xf32>
    %c0_6 = arith.constant 0 : index
    %c0_7 = arith.constant 0 : index
    %31 = vector.load %arg3[%c0_6, %c0_7] : memref<1x128xf32, #tpu.memory_space<vmem>>, vector<1x128xf32>
    %cst_8 = arith.constant dense<0.000000e+00> : vector<128xf32>
    %32 = vector.multi_reduction <add>, %30, %cst_8 [0] : vector<80x128xf32> to vector<128xf32>
    %33 = vector.shape_cast %32 : vector<128xf32> to vector<1x128xf32>
    %34 = arith.addf %31, %33 : vector<1x128xf32>
    %c0_9 = arith.constant 0 : index
    %c0_10 = arith.constant 0 : index
    %35 = vector.load %arg3[%c0_9, %c0_10] : memref<1x128xf32, #tpu.memory_space<vmem>>, vector<1x128xf32>
    tpu.vector_store %arg3[%c0_9, %c0_10], %34 {strides = array<i32>} : memref<1x128xf32, #tpu.memory_space<vmem>>, vector<1x128xf32>,
    %c0_11 = arith.constant 0 : index
    %c0_12 = arith.constant 0 : index
    %36 = vector.load %arg4[%c0_11, %c0_12] : memref<1x128xf32, #tpu.memory_space<vmem>>, vector<1x128xf32>
    %37 = arith.mulf %30, %30 : vector<80x128xf32>
    %cst_13 = arith.constant dense<0.000000e+00> : vector<128xf32>
    %38 = vector.multi_reduction <add>, %37, %cst_13 [0] : vector<80x128xf32> to vector<128xf32>
    %39 = vector.shape_cast %38 : vector<128xf32> to vector<1x128xf32>
    %40 = arith.addf %36, %39 : vector<1x128xf32>
    %c0_14 = arith.constant 0 : index
    %c0_15 = arith.constant 0 : index
    %41 = vector.load %arg4[%c0_14, %c0_15] : memref<1x128xf32, #tpu.memory_space<vmem>>, vector<1x128xf32>
    tpu.vector_store %arg4[%c0_14, %c0_15], %40 {strides = array<i32>} : memref<1x128xf32, #tpu.memory_space<vmem>>, vector<1x128xf32>,
    return
  }
  func.func @transform_0(%arg0: i32, %arg1: i32) -> (i32, i32) {
    %c0_i32 = arith.constant 0 : i32
    return %arg1, %arg0 : i32, i32
  }
  func.func @transform_1(%arg0: i32, %arg1: i32) -> (i32, i32) {
    %c0_i32 = arith.constant 0 : i32
    %c0_i32_0 = arith.constant 0 : i32
    return %c0_i32, %arg0 : i32, i32
  }
  func.func @transform_2(%arg0: i32, %arg1: i32) -> (i32, i32) {
    %c0_i32 = arith.constant 0 : i32
    %c0_i32_0 = arith.constant 0 : i32
    return %c0_i32, %arg0 : i32, i32
  }
}

module attributes {stable_mosaic.version = 11 : i64} {
  func.func @kernel(%arg0: i32, %arg1: i32, %arg2: memref<80x128xbf16, #tpu.memory_space<vmem>>, %arg3: memref<1x128xf32, #tpu.memory_space<vmem>>, %arg4: memref<1x128xf32, #tpu.memory_space<vmem>>, %arg5: memref<80x128xbf16, #tpu.memory_space<vmem>>) attributes {dimension_semantics = [#tpu.dimension_semantics<parallel>, #tpu.dimension_semantics<parallel>], iteration_bounds = array<i64: 1, 1>, scalar_prefetch = 0 : i64, scratch_operands = 0 : i64, tpu.core_type = #tpu.core_type<tc>, window_params = [{transform_indices = @transform_0, window_bounds = array<i64: 80, 128>}, {transform_indices = @transform_1, window_bounds = array<i64: 1, 128>}, {transform_indices = @transform_2, window_bounds = array<i64: 1, 128>}, {transform_indices = @transform_3, window_bounds = array<i64: 80, 128>}]} {
    %c0 = arith.constant 0 : index
    %c0_0 = arith.constant 0 : index
    %0 = vector.load %arg2[%c0, %c0_0] : memref<80x128xbf16, #tpu.memory_space<vmem>>, vector<80x128xbf16>
    %1 = arith.extf %0 : vector<80x128xbf16> to vector<80x128xf32>
    %c0_1 = arith.constant 0 : index
    %c0_2 = arith.constant 0 : index
    %2 = vector.load %arg3[%c0_1, %c0_2] : memref<1x128xf32, #tpu.memory_space<vmem>>, vector<1x128xf32>
    %3 = vector.broadcast %2 : vector<1x128xf32> to vector<80x128xf32>
    %4 = arith.mulf %1, %3 : vector<80x128xf32>
    %c0_3 = arith.constant 0 : index
    %c0_4 = arith.constant 0 : index
    %5 = vector.load %arg4[%c0_3, %c0_4] : memref<1x128xf32, #tpu.memory_space<vmem>>, vector<1x128xf32>
    %6 = vector.broadcast %5 : vector<1x128xf32> to vector<80x128xf32>
    %7 = arith.addf %4, %6 : vector<80x128xf32>
    %8 = arith.truncf %7 : vector<80x128xf32> to vector<80x128xbf16>
    %c0_5 = arith.constant 0 : index
    %c0_6 = arith.constant 0 : index
    %9 = vector.load %arg5[%c0_5, %c0_6] : memref<80x128xbf16, #tpu.memory_space<vmem>>, vector<80x128xbf16>
    tpu.vector_store %arg5[%c0_5, %c0_6], %8 {strides = array<i32>} : memref<80x128xbf16, #tpu.memory_space<vmem>>, vector<80x128xbf16>,
    return
  }
  func.func @transform_0(%arg0: i32, %arg1: i32) -> (i32, i32) {
    %c0_i32 = arith.constant 0 : i32
    return %arg1, %arg0 : i32, i32
  }
  func.func @transform_1(%arg0: i32, %arg1: i32) -> (i32, i32) {
    %c0_i32 = arith.constant 0 : i32
    %c0_i32_0 = arith.constant 0 : i32
    return %c0_i32, %arg0 : i32, i32
  }
  func.func @transform_2(%arg0: i32, %arg1: i32) -> (i32, i32) {
    %c0_i32 = arith.constant 0 : i32
    %c0_i32_0 = arith.constant 0 : i32
    return %c0_i32, %arg0 : i32, i32
  }
  func.func @transform_3(%arg0: i32, %arg1: i32) -> (i32, i32) {
    %c0_i32 = arith.constant 0 : i32
    return %arg1, %arg0 : i32, i32
  }
}

module attributes {stable_mosaic.version = 11 : i64} {
  func.func @_matmul_kernel(%arg0: i32, %arg1: i32, %arg2: i32, %arg3: memref<80x128xbf16, #tpu.memory_space<vmem>>, %arg4: memref<128x128xbf16, #tpu.memory_space<vmem>>, %arg5: memref<80x128xf32, #tpu.memory_space<vmem>>, %arg6: memref<80x128xf32, #tpu.memory_space<vmem>>) attributes {dimension_semantics = [#tpu.dimension_semantics<parallel>, #tpu.dimension_semantics<parallel>, #tpu.dimension_semantics<arbitrary>], iteration_bounds = array<i64: 1, 1, 1>, scalar_prefetch = 0 : i64, scratch_operands = 1 : i64, tpu.core_type = #tpu.core_type<tc>, window_params = [{transform_indices = @transform_0, window_bounds = array<i64: 80, 128>}, {transform_indices = @transform_1, window_bounds = array<i64: 128, 128>}, {transform_indices = @transform_2, window_bounds = array<i64: 80, 128>}]} {
    %c0_i32 = arith.constant 0 : i32
    %0 = arith.cmpi eq, %arg2, %c0_i32 : i32
    %1 = arith.extui %0 : i1 to i32
    %c0_i32_0 = arith.constant 0 : i32
    %2 = arith.cmpi ne, %1, %c0_i32_0 : i32
    scf.if %2 {
      %cst_10 = arith.constant 0.000000e+00 : f32
      %12 = vector.broadcast %cst_10 : f32 to vector<80x128xf32>
      %c0_11 = arith.constant 0 : index
      %c0_12 = arith.constant 0 : index
      %13 = vector.load %arg6[%c0_11, %c0_12] : memref<80x128xf32, #tpu.memory_space<vmem>>, vector<80x128xf32>
      tpu.vector_store %arg6[%c0_11, %c0_12], %12 {strides = array<i32>} : memref<80x128xf32, #tpu.memory_space<vmem>>, vector<80x128xf32>,
    } else {
    }
    %c0 = arith.constant 0 : index
    %c0_1 = arith.constant 0 : index
    %3 = vector.load %arg6[%c0, %c0_1] : memref<80x128xf32, #tpu.memory_space<vmem>>, vector<80x128xf32>
    %c0_2 = arith.constant 0 : index
    %c0_3 = arith.constant 0 : index
    %4 = vector.load %arg3[%c0_2, %c0_3] : memref<80x128xbf16, #tpu.memory_space<vmem>>, vector<80x128xbf16>
    %c0_4 = arith.constant 0 : index
    %c0_5 = arith.constant 0 : index
    %5 = vector.load %arg4[%c0_4, %c0_5] : memref<128x128xbf16, #tpu.memory_space<vmem>>, vector<128x128xbf16>
    %cst = arith.constant dense<0.000000e+00> : vector<80x128xf32>
    %6 = tpu.matmul %4, %5, %cst {dimension_numbers = #tpu.dot_dimension_numbers<[1], [0], [0], [1], [0, 0, 1, 1], [], []>} : vector<80x128xbf16>, vector<128x128xbf16>, vector<80x128xf32> -> vector<80x128xf32>
    %7 = arith.addf %3, %6 : vector<80x128xf32>
    %c0_6 = arith.constant 0 : index
    %c0_7 = arith.constant 0 : index
    %8 = vector.load %arg6[%c0_6, %c0_7] : memref<80x128xf32, #tpu.memory_space<vmem>>, vector<80x128xf32>
    tpu.vector_store %arg6[%c0_6, %c0_7], %7 {strides = array<i32>} : memref<80x128xf32, #tpu.memory_space<vmem>>, vector<80x128xf32>,
    %c0_i32_8 = arith.constant 0 : i32
    %9 = arith.cmpi eq, %arg2, %c0_i32_8 : i32
    %10 = arith.extui %9 : i1 to i32
    %c0_i32_9 = arith.constant 0 : i32
    %11 = arith.cmpi ne, %10, %c0_i32_9 : i32
    scf.if %11 {
      %c0_10 = arith.constant 0 : index
      %c0_11 = arith.constant 0 : index
      %12 = vector.load %arg6[%c0_10, %c0_11] : memref<80x128xf32, #tpu.memory_space<vmem>>, vector<80x128xf32>
      %c0_12 = arith.constant 0 : index
      %c0_13 = arith.constant 0 : index
      %13 = vector.load %arg5[%c0_12, %c0_13] : memref<80x128xf32, #tpu.memory_space<vmem>>, vector<80x128xf32>
      tpu.vector_store %arg5[%c0_12, %c0_13], %12 {strides = array<i32>} : memref<80x128xf32, #tpu.memory_space<vmem>>, vector<80x128xf32>,
    } else {
    }
    return
  }
  func.func @transform_0(%arg0: i32, %arg1: i32, %arg2: i32) -> (i32, i32) {
    %c0_i32 = arith.constant 0 : i32
    return %arg0, %arg2 : i32, i32
  }
  func.func @transform_1(%arg0: i32, %arg1: i32, %arg2: i32) -> (i32, i32) {
    %c0_i32 = arith.constant 0 : i32
    return %arg2, %arg1 : i32, i32
  }
  func.func @transform_2(%arg0: i32, %arg1: i32, %arg2: i32) -> (i32, i32) {
    %c0_i32 = arith.constant 0 : i32
    return %arg0, %arg1 : i32, i32
  }
}

</mosaic_0001>

<bundles_post_ra>
// kernel: deepspeech_forward.17
= control target key start
LH: loop header
LB: loop body
LE: loop exit
PB: predicated region body
PF: predicated region fallthrough
CT: control target
= control target key end

     0   :  { %v1711_v0 = vmov 0.0   ;;  %s1904_s1 = inlined_call_operand.vmem [shape: f32[1,128], index: 1, kind: output, shape index: {0}]   ;;  %s1905_s2 = inlined_call_operand.vmem [shape: f32[1,128], index: 2, kind: output, shape index: {1}]   ;;  %s1906_s0 = inlined_call_operand.vmem [shape: bf16[1024,128], index: 0, kind: input, shape index: {}]  }
   0x1   :  { %14 = vst [vmem:[%s1904_s1] sm:$0x1] %v1711_v0  ;;  %v1452_v1 = vld [vmem:[%s1906_s0] sm:$0xff]   ;;  %v1659_v2 = vld [vmem:[%s1906_s0 + $0x8] sm:$0xff]   ;;  %v1660_v7 = vld [vmem:[%s1906_s0 + $0x10] sm:$0xff]  }
   0x2   :  { %15 = vst [vmem:[%s1905_s2] sm:$0x1] %v1711_v0  ;;  %v1453_v3 = vunpack.c.l.bf16 %v1452_v1  ;;  %v1454_v4 = vunpack.c.h.bf16 %v1452_v1  ;;  %v1457_v5 = vunpack.c.l.bf16 %v1659_v2  ;;  %v1458_v8 = vunpack.c.h.bf16 %v1659_v2  ;;  %v1661_v15 = vld [vmem:[%s1906_s0 + $0x18] sm:$0xff]   ;;  %v1662_v24 = vld [vmem:[%s1906_s0 + $0x20] sm:$0xff]   ;;  %v1663_v33 = vld [vmem:[%s1906_s0 + $0x28] sm:$0xff]  }
   0x3   :  { %v1461_v12 = vunpack.c.l.bf16 %v1660_v7  ;;  %v1462_v16 = vunpack.c.h.bf16 %v1660_v7  ;;  %v1465_v20 = vunpack.c.l.bf16 %v1661_v15  ;;  %v1466_v25 = vunpack.c.h.bf16 %v1661_v15  ;;  %v1664_v42 = vld [vmem:[%s1906_s0 + $0x30] sm:$0xff]   ;;  %v1665_v51 = vld [vmem:[%s1906_s0 + $0x38] sm:$0xff]   ;;  %v1666_v60 = vld [vmem:[%s1906_s0 + $0x40] sm:$0xff]  }
   0x4   :  { %v1044_v6 = vadd.f32 %v1454_v4, %v1453_v3  ;;  %v1180_v10 = vmul.f32 %v1453_v3, %v1453_v3  ;;  %v1181_v11 = vmul.f32 %v1454_v4, %v1454_v4  ;;  %v1182_v14 = vmul.f32 %v1457_v5, %v1457_v5 }
   0x5   :  { %v1183_v18 = vmul.f32 %v1458_v8, %v1458_v8  ;;  %v1184_v22 = vmul.f32 %v1461_v12, %v1461_v12  ;;  %v1185_v27 = vmul.f32 %v1462_v16, %v1462_v16  ;;  %v1469_v29 = vunpack.c.l.bf16 %v1662_v24 }
   0x6   :  { %v1045_v9 = vadd.f32 %v1457_v5, %v1044_v6  ;;  %v1308_v19 = vadd.f32 %v1181_v11, %v1180_v10  ;;  %v1186_v31 = vmul.f32 %v1465_v20, %v1465_v20  ;;  %v1470_v34 = vunpack.c.h.bf16 %v1662_v24  ;;  %v1667_v5 = vld [vmem:[%s1906_s0 + $0x48] sm:$0xff]  }
   0x7   :  { %v1187_v36 = vmul.f32 %v1466_v25, %v1466_v25  ;;  %v1473_v38 = vunpack.c.l.bf16 %v1663_v33  ;;  %v1188_v40 = vmul.f32 %v1469_v29, %v1469_v29  ;;  %v1474_v43 = vunpack.c.h.bf16 %v1663_v33 }
   0x8   :  { %v1046_v13 = vadd.f32 %v1458_v8, %v1045_v9  ;;  %v1309_v23 = vadd.f32 %v1308_v19, %v1182_v14  ;;  %v1189_v45 = vmul.f32 %v1470_v34, %v1470_v34  ;;  %v1477_v47 = vunpack.c.l.bf16 %v1664_v42  ;;  %v1668_v14 = vld [vmem:[%s1906_s0 + $0x50] sm:$0xff]  }
   0x9   :  { %v1190_v49 = vmul.f32 %v1473_v38, %v1473_v38  ;;  %v1478_v52 = vunpack.c.h.bf16 %v1664_v42  ;;  %v1191_v54 = vmul.f32 %v1474_v43, %v1474_v43  ;;  %v1481_v56 = vunpack.c.l.bf16 %v1665_v51 }
   0xa   :  { %v1047_v17 = vadd.f32 %v1461_v12, %v1046_v13  ;;  %v1310_v28 = vadd.f32 %v1309_v23, %v1183_v18  ;;  %v1192_v58 = vmul.f32 %v1477_v47, %v1477_v47  ;;  %v1482_v61 = vunpack.c.h.bf16 %v1665_v51  ;;  %v1669_v23 = vld [vmem:[%s1906_s0 + $0x58] sm:$0xff]  }
   0xb   :  { %v1193_v63 = vmul.f32 %v1478_v52, %v1478_v52  ;;  %v1485_v1 = vunpack.c.l.bf16 %v1666_v60  ;;  %v1194_v3 = vmul.f32 %v1481_v56, %v1481_v56  ;;  %v1486_v6 = vunpack.c.h.bf16 %v1666_v60 }
   0xc   :  { %v1048_v21 = vadd.f32 %v1462_v16, %v1047_v17  ;;  %v1311_v32 = vadd.f32 %v1310_v28, %v1184_v22  ;;  %v1195_v8 = vmul.f32 %v1482_v61, %v1482_v61  ;;  %v1489_v10 = vunpack.c.l.bf16 %v1667_v5 }
   0xd   :  { %v1196_v12 = vmul.f32 %v1485_v1, %v1485_v1  ;;  %v1490_v15 = vunpack.c.h.bf16 %v1667_v5  ;;  %v1197_v17 = vmul.f32 %v1486_v6, %v1486_v6  ;;  %v1493_v19 = vunpack.c.l.bf16 %v1668_v14 }
   0xe   :  { %v1049_v26 = vadd.f32 %v1465_v20, %v1048_v21  ;;  %v1312_v37 = vadd.f32 %v1311_v32, %v1185_v27  ;;  %v1198_v21 = vmul.f32 %v1489_v10, %v1489_v10  ;;  %v1494_v24 = vunpack.c.h.bf16 %v1668_v14  ;;  %v1670_v32 = vld [vmem:[%s1906_s0 + $0x60] sm:$0xff]  }
   0xf   :  { %v1497_v28 = vunpack.c.l.bf16 %v1669_v23  ;;  %v1498_v33 = vunpack.c.h.bf16 %v1669_v23  ;;  %v1502_v42 = vunpack.c.h.bf16 %v1670_v32 }
  0x10   :  { %v1050_v30 = vadd.f32 %v1466_v25, %v1049_v26  ;;  %v1313_v41 = vadd.f32 %v1312_v37, %v1186_v31  ;;  %v1199_v26 = vmul.f32 %v1490_v15, %v1490_v15  ;;  %v1501_v37 = vunpack.c.l.bf16 %v1670_v32 }
  0x12   :  { %v1051_v35 = vadd.f32 %v1469_v29, %v1050_v30  ;;  %v1314_v46 = vadd.f32 %v1313_v41, %v1187_v36  ;;  %v1200_v30 = vmul.f32 %v1493_v19, %v1493_v19  ;;  %v1671_v41 = vld [vmem:[%s1906_s0 + $0x68] sm:$0xff]  }
  0x13   :  { %v1506_v51 = vunpack.c.h.bf16 %v1671_v41 }
  0x14   :  { %v1052_v39 = vadd.f32 %v1470_v34, %v1051_v35  ;;  %v1315_v50 = vadd.f32 %v1314_v46, %v1188_v40  ;;  %v1201_v35 = vmul.f32 %v1494_v24, %v1494_v24  ;;  %v1505_v46 = vunpack.c.l.bf16 %v1671_v41 }
  0x16   :  { %v1053_v44 = vadd.f32 %v1473_v38, %v1052_v39  ;;  %v1316_v55 = vadd.f32 %v1315_v50, %v1189_v45  ;;  %v1202_v39 = vmul.f32 %v1497_v28, %v1497_v28  ;;  %v1672_v50 = vld [vmem:[%s1906_s0 + $0x70] sm:$0xff]  }
  0x17   :  { %v1510_v60 = vunpack.c.h.bf16 %v1672_v50 }
  0x18   :  { %v1054_v48 = vadd.f32 %v1474_v43, %v1053_v44  ;;  %v1317_v59 = vadd.f32 %v1316_v55, %v1190_v49  ;;  %v1203_v44 = vmul.f32 %v1498_v33, %v1498_v33  ;;  %v1509_v55 = vunpack.c.l.bf16 %v1672_v50 }
  0x1a   :  { %v1055_v53 = vadd.f32 %v1477_v47, %v1054_v48  ;;  %v1318_v0 = vadd.f32 %v1317_v59, %v1191_v54  ;;  %v1204_v48 = vmul.f32 %v1501_v37, %v1501_v37  ;;  %v1673_v59 = vld [vmem:[%s1906_s0 + $0x78] sm:$0xff]  }
  0x1b   :  { %v1514_v5 = vunpack.c.h.bf16 %v1673_v59 }
  0x1c   :  { %v1056_v57 = vadd.f32 %v1478_v52, %v1055_v53  ;;  %v1319_v4 = vadd.f32 %v1318_v0, %v1192_v58  ;;  %v1205_v53 = vmul.f32 %v1502_v42, %v1502_v42  ;;  %v1513_v0 = vunpack.c.l.bf16 %v1673_v59 }
  0x1e   :  { %v1057_v62 = vadd.f32 %v1481_v56, %v1056_v57  ;;  %v1320_v9 = vadd.f32 %v1319_v4, %v1193_v63  ;;  %v1206_v57 = vmul.f32 %v1505_v46, %v1505_v46  ;;  %v1674_v4 = vld [vmem:[%s1906_s0 + $0x80] sm:$0xff]  }
  0x1f   :  { %v1518_v14 = vunpack.c.h.bf16 %v1674_v4 }
  0x20   :  { %v1058_v2 = vadd.f32 %v1482_v61, %v1057_v62  ;;  %v1321_v13 = vadd.f32 %v1320_v9, %v1194_v3  ;;  %v1207_v62 = vmul.f32 %v1506_v51, %v1506_v51  ;;  %v1517_v9 = vunpack.c.l.bf16 %v1674_v4 }
  0x22   :  { %v1059_v7 = vadd.f32 %v1485_v1, %v1058_v2  ;;  %v1322_v18 = vadd.f32 %v1321_v13, %v1195_v8  ;;  %v1208_v2 = vmul.f32 %v1509_v55, %v1509_v55  ;;  %v1675_v13 = vld [vmem:[%s1906_s0 + $0x88] sm:$0xff]  }
  0x23   :  { %v1522_v23 = vunpack.c.h.bf16 %v1675_v13 }
  0x24   :  { %v1060_v11 = vadd.f32 %v1486_v6, %v1059_v7  ;;  %v1323_v22 = vadd.f32 %v1322_v18, %v1196_v12  ;;  %v1209_v7 = vmul.f32 %v1510_v60, %v1510_v60  ;;  %v1521_v18 = vunpack.c.l.bf16 %v1675_v13 }
  0x26   :  { %v1061_v16 = vadd.f32 %v1489_v10, %v1060_v11  ;;  %v1324_v27 = vadd.f32 %v1323_v22, %v1197_v17  ;;  %v1210_v11 = vmul.f32 %v1513_v0, %v1513_v0  ;;  %v1676_v22 = vld [vmem:[%s1906_s0 + $0x90] sm:$0xff]  }
  0x27   :  { %v1526_v32 = vunpack.c.h.bf16 %v1676_v22 }
  0x28   :  { %v1062_v20 = vadd.f32 %v1490_v15, %v1061_v16  ;;  %v1325_v31 = vadd.f32 %v1324_v27, %v1198_v21  ;;  %v1211_v16 = vmul.f32 %v1514_v5, %v1514_v5  ;;  %v1525_v27 = vunpack.c.l.bf16 %v1676_v22 }
  0x2a   :  { %v1063_v25 = vadd.f32 %v1493_v19, %v1062_v20  ;;  %v1326_v36 = vadd.f32 %v1325_v31, %v1199_v26  ;;  %v1212_v20 = vmul.f32 %v1517_v9, %v1517_v9  ;;  %v1677_v31 = vld [vmem:[%s1906_s0 + $0x98] sm:$0xff]  }
  0x2b   :  { %v1530_v41 = vunpack.c.h.bf16 %v1677_v31 }
  0x2c   :  { %v1064_v29 = vadd.f32 %v1494_v24, %v1063_v25  ;;  %v1327_v40 = vadd.f32 %v1326_v36, %v1200_v30  ;;  %v1213_v25 = vmul.f32 %v1518_v14, %v1518_v14  ;;  %v1529_v36 = vunpack.c.l.bf16 %v1677_v31 }
  0x2e   :  { %v1065_v34 = vadd.f32 %v1497_v28, %v1064_v29  ;;  %v1328_v45 = vadd.f32 %v1327_v40, %v1201_v35  ;;  %v1214_v29 = vmul.f32 %v1521_v18, %v1521_v18  ;;  %v1678_v40 = vld [vmem:[%s1906_s0 + $0xa0] sm:$0xff]  }
  0x2f   :  { %v1534_v50 = vunpack.c.h.bf16 %v1678_v40 }
  0x30   :  { %v1066_v38 = vadd.f32 %v1498_v33, %v1065_v34  ;;  %v1329_v49 = vadd.f32 %v1328_v45, %v1202_v39  ;;  %v1215_v34 = vmul.f32 %v1522_v23, %v1522_v23  ;;  %v1533_v45 = vunpack.c.l.bf16 %v1678_v40 }
  0x32   :  { %v1067_v43 = vadd.f32 %v1501_v37, %v1066_v38  ;;  %v1330_v54 = vadd.f32 %v1329_v49, %v1203_v44  ;;  %v1216_v38 = vmul.f32 %v1525_v27, %v1525_v27  ;;  %v1679_v49 = vld [vmem:[%s1906_s0 + $0xa8] sm:$0xff]  }
  0x33   :  { %v1538_v59 = vunpack.c.h.bf16 %v1679_v49 }
  0x34   :  { %v1068_v47 = vadd.f32 %v1502_v42, %v1067_v43  ;;  %v1331_v58 = vadd.f32 %v1330_v54, %v1204_v48  ;;  %v1217_v43 = vmul.f32 %v1526_v32, %v1526_v32  ;;  %v1537_v54 = vunpack.c.l.bf16 %v1679_v49 }
  0x36   :  { %v1069_v52 = vadd.f32 %v1505_v46, %v1068_v47  ;;  %v1332_v63 = vadd.f32 %v1331_v58, %v1205_v53  ;;  %v1218_v47 = vmul.f32 %v1529_v36, %v1529_v36  ;;  %v1680_v58 = vld [vmem:[%s1906_s0 + $0xb0] sm:$0xff]  }
  0x37   :  { %v1542_v4 = vunpack.c.h.bf16 %v1680_v58 }
  0x38   :  { %v1070_v56 = vadd.f32 %v1506_v51, %v1069_v52  ;;  %v1333_v3 = vadd.f32 %v1332_v63, %v1206_v57  ;;  %v1219_v52 = vmul.f32 %v1530_v41, %v1530_v41  ;;  %v1541_v63 = vunpack.c.l.bf16 %v1680_v58 }
  0x3a   :  { %v1071_v61 = vadd.f32 %v1509_v55, %v1070_v56  ;;  %v1334_v8 = vadd.f32 %v1333_v3, %v1207_v62  ;;  %v1220_v56 = vmul.f32 %v1533_v45, %v1533_v45  ;;  %v1681_v3 = vld [vmem:[%s1906_s0 + $0xb8] sm:$0xff]  }
  0x3b   :  { %v1546_v13 = vunpack.c.h.bf16 %v1681_v3 }
  0x3c   :  { %v1072_v1 = vadd.f32 %v1510_v60, %v1071_v61  ;;  %v1335_v12 = vadd.f32 %v1334_v8, %v1208_v2  ;;  %v1221_v61 = vmul.f32 %v1534_v50, %v1534_v50  ;;  %v1545_v8 = vunpack.c.l.bf16 %v1681_v3 }
  0x3e   :  { %v1073_v6 = vadd.f32 %v1513_v0, %v1072_v1  ;;  %v1336_v17 = vadd.f32 %v1335_v12, %v1209_v7  ;;  %v1222_v1 = vmul.f32 %v1537_v54, %v1537_v54  ;;  %v1682_v12 = vld [vmem:[%s1906_s0 + $0xc0] sm:$0xff]  }
  0x3f   :  { %v1550_v22 = vunpack.c.h.bf16 %v1682_v12 }
  0x40   :  { %v1074_v10 = vadd.f32 %v1514_v5, %v1073_v6  ;;  %v1337_v21 = vadd.f32 %v1336_v17, %v1210_v11  ;;  %v1223_v6 = vmul.f32 %v1538_v59, %v1538_v59  ;;  %v1549_v17 = vunpack.c.l.bf16 %v1682_v12 }
  0x42   :  { %v1075_v15 = vadd.f32 %v1517_v9, %v1074_v10  ;;  %v1338_v26 = vadd.f32 %v1337_v21, %v1211_v16  ;;  %v1224_v10 = vmul.f32 %v1541_v63, %v1541_v63  ;;  %v1683_v21 = vld [vmem:[%s1906_s0 + $0xc8] sm:$0xff]  }
  0x43   :  { %v1554_v31 = vunpack.c.h.bf16 %v1683_v21 }
  0x44   :  { %v1076_v19 = vadd.f32 %v1518_v14, %v1075_v15  ;;  %v1339_v30 = vadd.f32 %v1338_v26, %v1212_v20  ;;  %v1225_v15 = vmul.f32 %v1542_v4, %v1542_v4  ;;  %v1553_v26 = vunpack.c.l.bf16 %v1683_v21 }
  0x46   :  { %v1077_v24 = vadd.f32 %v1521_v18, %v1076_v19  ;;  %v1340_v35 = vadd.f32 %v1339_v30, %v1213_v25  ;;  %v1226_v19 = vmul.f32 %v1545_v8, %v1545_v8  ;;  %v1684_v30 = vld [vmem:[%s1906_s0 + $0xd0] sm:$0xff]  }
  0x47   :  { %v1558_v40 = vunpack.c.h.bf16 %v1684_v30 }
  0x48   :  { %v1078_v28 = vadd.f32 %v1522_v23, %v1077_v24  ;;  %v1341_v39 = vadd.f32 %v1340_v35, %v1214_v29  ;;  %v1227_v24 = vmul.f32 %v1546_v13, %v1546_v13  ;;  %v1557_v35 = vunpack.c.l.bf16 %v1684_v30 }
  0x4a   :  { %v1079_v33 = vadd.f32 %v1525_v27, %v1078_v28  ;;  %v1342_v44 = vadd.f32 %v1341_v39, %v1215_v34  ;;  %v1228_v28 = vmul.f32 %v1549_v17, %v1549_v17  ;;  %v1685_v39 = vld [vmem:[%s1906_s0 + $0xd8] sm:$0xff]  }
  0x4b   :  { %v1562_v49 = vunpack.c.h.bf16 %v1685_v39 }
  0x4c   :  { %v1080_v37 = vadd.f32 %v1526_v32, %v1079_v33  ;;  %v1343_v48 = vadd.f32 %v1342_v44, %v1216_v38  ;;  %v1229_v33 = vmul.f32 %v1550_v22, %v1550_v22  ;;  %v1561_v44 = vunpack.c.l.bf16 %v1685_v39 }
  0x4e   :  { %v1081_v42 = vadd.f32 %v1529_v36, %v1080_v37  ;;  %v1344_v53 = vadd.f32 %v1343_v48, %v1217_v43  ;;  %v1230_v37 = vmul.f32 %v1553_v26, %v1553_v26  ;;  %v1686_v48 = vld [vmem:[%s1906_s0 + $0xe0] sm:$0xff]  }
  0x4f   :  { %v1566_v58 = vunpack.c.h.bf16 %v1686_v48 }
  0x50   :  { %v1082_v46 = vadd.f32 %v1530_v41, %v1081_v42  ;;  %v1345_v57 = vadd.f32 %v1344_v53, %v1218_v47  ;;  %v1231_v42 = vmul.f32 %v1554_v31, %v1554_v31  ;;  %v1565_v53 = vunpack.c.l.bf16 %v1686_v48 }
  0x52   :  { %v1083_v51 = vadd.f32 %v1533_v45, %v1082_v46  ;;  %v1346_v62 = vadd.f32 %v1345_v57, %v1219_v52  ;;  %v1232_v46 = vmul.f32 %v1557_v35, %v1557_v35  ;;  %v1687_v57 = vld [vmem:[%s1906_s0 + $0xe8] sm:$0xff]  }
  0x53   :  { %v1570_v3 = vunpack.c.h.bf16 %v1687_v57 }
  0x54   :  { %v1084_v55 = vadd.f32 %v1534_v50, %v1083_v51  ;;  %v1347_v2 = vadd.f32 %v1346_v62, %v1220_v56  ;;  %v1233_v51 = vmul.f32 %v1558_v40, %v1558_v40  ;;  %v1569_v62 = vunpack.c.l.bf16 %v1687_v57 }
  0x56   :  { %v1085_v60 = vadd.f32 %v1537_v54, %v1084_v55  ;;  %v1348_v7 = vadd.f32 %v1347_v2, %v1221_v61  ;;  %v1234_v55 = vmul.f32 %v1561_v44, %v1561_v44  ;;  %v1688_v2 = vld [vmem:[%s1906_s0 + $0xf0] sm:$0xff]  }
  0x57   :  { %v1574_v12 = vunpack.c.h.bf16 %v1688_v2 }
  0x58   :  { %v1086_v0 = vadd.f32 %v1538_v59, %v1085_v60  ;;  %v1349_v11 = vadd.f32 %v1348_v7, %v1222_v1  ;;  %v1235_v60 = vmul.f32 %v1562_v49, %v1562_v49  ;;  %v1573_v7 = vunpack.c.l.bf16 %v1688_v2 }
  0x5a   :  { %v1087_v5 = vadd.f32 %v1541_v63, %v1086_v0  ;;  %v1350_v16 = vadd.f32 %v1349_v11, %v1223_v6  ;;  %v1236_v0 = vmul.f32 %v1565_v53, %v1565_v53  ;;  %v1689_v11 = vld [vmem:[%s1906_s0 + $0xf8] sm:$0xff]  }
  0x5b   :  { %v1578_v21 = vunpack.c.h.bf16 %v1689_v11 }
  0x5c   :  { %v1088_v9 = vadd.f32 %v1542_v4, %v1087_v5  ;;  %v1351_v20 = vadd.f32 %v1350_v16, %v1224_v10  ;;  %v1237_v5 = vmul.f32 %v1566_v58, %v1566_v58  ;;  %v1577_v16 = vunpack.c.l.bf16 %v1689_v11 }
  0x5e   :  { %v1089_v14 = vadd.f32 %v1545_v8, %v1088_v9  ;;  %v1352_v25 = vadd.f32 %v1351_v20, %v1225_v15  ;;  %v1238_v9 = vmul.f32 %v1569_v62, %v1569_v62  ;;  %v1690_v20 = vld [vmem:[%s1906_s0 + $0x100] sm:$0xff]  }
  0x5f   :  { %v1582_v30 = vunpack.c.h.bf16 %v1690_v20 }
  0x60   :  { %v1090_v18 = vadd.f32 %v1546_v13, %v1089_v14  ;;  %v1353_v29 = vadd.f32 %v1352_v25, %v1226_v19  ;;  %v1239_v14 = vmul.f32 %v1570_v3, %v1570_v3  ;;  %v1581_v25 = vunpack.c.l.bf16 %v1690_v20 }
  0x62   :  { %v1091_v23 = vadd.f32 %v1549_v17, %v1090_v18  ;;  %v1354_v34 = vadd.f32 %v1353_v29, %v1227_v24  ;;  %v1240_v18 = vmul.f32 %v1573_v7, %v1573_v7  ;;  %v1691_v29 = vld [vmem:[%s1906_s0 + $0x108] sm:$0xff]  }
  0x63   :  { %v1586_v39 = vunpack.c.h.bf16 %v1691_v29 }
  0x64   :  { %v1092_v27 = vadd.f32 %v1550_v22, %v1091_v23  ;;  %v1355_v38 = vadd.f32 %v1354_v34, %v1228_v28  ;;  %v1241_v23 = vmul.f32 %v1574_v12, %v1574_v12  ;;  %v1585_v34 = vunpack.c.l.bf16 %v1691_v29 }
  0x66   :  { %v1093_v32 = vadd.f32 %v1553_v26, %v1092_v27  ;;  %v1356_v43 = vadd.f32 %v1355_v38, %v1229_v33  ;;  %v1242_v27 = vmul.f32 %v1577_v16, %v1577_v16  ;;  %v1692_v38 = vld [vmem:[%s1906_s0 + $0x110] sm:$0xff]  }
  0x67   :  { %v1590_v48 = vunpack.c.h.bf16 %v1692_v38 }
  0x68   :  { %v1094_v36 = vadd.f32 %v1554_v31, %v1093_v32  ;;  %v1357_v47 = vadd.f32 %v1356_v43, %v1230_v37  ;;  %v1243_v32 = vmul.f32 %v1578_v21, %v1578_v21  ;;  %v1589_v43 = vunpack.c.l.bf16 %v1692_v38 }
  0x6a   :  { %v1095_v41 = vadd.f32 %v1557_v35, %v1094_v36  ;;  %v1358_v52 = vadd.f32 %v1357_v47, %v1231_v42  ;;  %v1244_v36 = vmul.f32 %v1581_v25, %v1581_v25  ;;  %v1693_v47 = vld [vmem:[%s1906_s0 + $0x118] sm:$0xff]  }
  0x6b   :  { %v1594_v57 = vunpack.c.h.bf16 %v1693_v47 }
  0x6c   :  { %v1096_v45 = vadd.f32 %v1558_v40, %v1095_v41  ;;  %v1359_v56 = vadd.f32 %v1358_v52, %v1232_v46  ;;  %v1245_v41 = vmul.f32 %v1582_v30, %v1582_v30  ;;  %v1593_v52 = vunpack.c.l.bf16 %v1693_v47 }
  0x6e   :  { %v1097_v50 = vadd.f32 %v1561_v44, %v1096_v45  ;;  %v1360_v61 = vadd.f32 %v1359_v56, %v1233_v51  ;;  %v1246_v45 = vmul.f32 %v1585_v34, %v1585_v34  ;;  %v1694_v56 = vld [vmem:[%s1906_s0 + $0x120] sm:$0xff]  }
  0x6f   :  { %v1598_v2 = vunpack.c.h.bf16 %v1694_v56 }
  0x70   :  { %v1098_v54 = vadd.f32 %v1562_v49, %v1097_v50  ;;  %v1361_v1 = vadd.f32 %v1360_v61, %v1234_v55  ;;  %v1247_v50 = vmul.f32 %v1586_v39, %v1586_v39  ;;  %v1597_v61 = vunpack.c.l.bf16 %v1694_v56 }
  0x72   :  { %v1099_v59 = vadd.f32 %v1565_v53, %v1098_v54  ;;  %v1362_v6 = vadd.f32 %v1361_v1, %v1235_v60  ;;  %v1248_v54 = vmul.f32 %v1589_v43, %v1589_v43  ;;  %v1695_v1 = vld [vmem:[%s1906_s0 + $0x128] sm:$0xff]  }
  0x73   :  { %v1602_v11 = vunpack.c.h.bf16 %v1695_v1 }
  0x74   :  { %v1100_v63 = vadd.f32 %v1566_v58, %v1099_v59  ;;  %v1363_v10 = vadd.f32 %v1362_v6, %v1236_v0  ;;  %v1249_v59 = vmul.f32 %v1590_v48, %v1590_v48  ;;  %v1601_v6 = vunpack.c.l.bf16 %v1695_v1 }
  0x76   :  { %v1101_v4 = vadd.f32 %v1569_v62, %v1100_v63  ;;  %v1364_v15 = vadd.f32 %v1363_v10, %v1237_v5  ;;  %v1250_v63 = vmul.f32 %v1593_v52, %v1593_v52  ;;  %v1696_v10 = vld [vmem:[%s1906_s0 + $0x130] sm:$0xff]  }
  0x77   :  { %v1606_v20 = vunpack.c.h.bf16 %v1696_v10 }
  0x78   :  { %v1102_v8 = vadd.f32 %v1570_v3, %v1101_v4  ;;  %v1365_v19 = vadd.f32 %v1364_v15, %v1238_v9  ;;  %v1251_v4 = vmul.f32 %v1594_v57, %v1594_v57  ;;  %v1605_v15 = vunpack.c.l.bf16 %v1696_v10 }
  0x7a   :  { %v1103_v13 = vadd.f32 %v1573_v7, %v1102_v8  ;;  %v1366_v24 = vadd.f32 %v1365_v19, %v1239_v14  ;;  %v1252_v8 = vmul.f32 %v1597_v61, %v1597_v61  ;;  %v1697_v19 = vld [vmem:[%s1906_s0 + $0x138] sm:$0xff]  }
  0x7b   :  { %v1610_v29 = vunpack.c.h.bf16 %v1697_v19 }
  0x7c   :  { %v1104_v17 = vadd.f32 %v1574_v12, %v1103_v13  ;;  %v1367_v28 = vadd.f32 %v1366_v24, %v1240_v18  ;;  %v1253_v13 = vmul.f32 %v1598_v2, %v1598_v2  ;;  %v1609_v24 = vunpack.c.l.bf16 %v1697_v19 }
  0x7e   :  { %v1105_v22 = vadd.f32 %v1577_v16, %v1104_v17  ;;  %v1368_v33 = vadd.f32 %v1367_v28, %v1241_v23  ;;  %v1254_v17 = vmul.f32 %v1601_v6, %v1601_v6  ;;  %v1698_v28 = vld [vmem:[%s1906_s0 + $0x140] sm:$0xff]  }
  0x7f   :  { %v1614_v38 = vunpack.c.h.bf16 %v1698_v28 }
  0x80   :  { %v1106_v26 = vadd.f32 %v1578_v21, %v1105_v22  ;;  %v1369_v37 = vadd.f32 %v1368_v33, %v1242_v27  ;;  %v1255_v22 = vmul.f32 %v1602_v11, %v1602_v11  ;;  %v1613_v33 = vunpack.c.l.bf16 %v1698_v28 }
  0x82   :  { %v1107_v31 = vadd.f32 %v1581_v25, %v1106_v26  ;;  %v1370_v42 = vadd.f32 %v1369_v37, %v1243_v32  ;;  %v1256_v26 = vmul.f32 %v1605_v15, %v1605_v15  ;;  %v1699_v37 = vld [vmem:[%s1906_s0 + $0x148] sm:$0xff]  }
  0x83   :  { %v1618_v47 = vunpack.c.h.bf16 %v1699_v37 }
  0x84   :  { %v1108_v35 = vadd.f32 %v1582_v30, %v1107_v31  ;;  %v1371_v46 = vadd.f32 %v1370_v42, %v1244_v36  ;;  %v1257_v31 = vmul.f32 %v1606_v20, %v1606_v20  ;;  %v1617_v42 = vunpack.c.l.bf16 %v1699_v37 }
  0x86   :  { %v1109_v40 = vadd.f32 %v1585_v34, %v1108_v35  ;;  %v1372_v51 = vadd.f32 %v1371_v46, %v1245_v41  ;;  %v1258_v35 = vmul.f32 %v1609_v24, %v1609_v24  ;;  %v1700_v46 = vld [vmem:[%s1906_s0 + $0x150] sm:$0xff]  }
  0x87   :  { %v1622_v56 = vunpack.c.h.bf16 %v1700_v46 }
  0x88   :  { %v1110_v44 = vadd.f32 %v1586_v39, %v1109_v40  ;;  %v1373_v55 = vadd.f32 %v1372_v51, %v1246_v45  ;;  %v1259_v40 = vmul.f32 %v1610_v29, %v1610_v29  ;;  %v1621_v51 = vunpack.c.l.bf16 %v1700_v46 }
  0x8a   :  { %v1111_v49 = vadd.f32 %v1589_v43, %v1110_v44  ;;  %v1374_v60 = vadd.f32 %v1373_v55, %v1247_v50  ;;  %v1260_v44 = vmul.f32 %v1613_v33, %v1613_v33  ;;  %v1701_v55 = vld [vmem:[%s1906_s0 + $0x158] sm:$0xff]  }
  0x8b   :  { %v1626_v1 = vunpack.c.h.bf16 %v1701_v55 }
  0x8c   :  { %v1112_v53 = vadd.f32 %v1590_v48, %v1111_v49  ;;  %v1375_v0 = vadd.f32 %v1374_v60, %v1248_v54  ;;  %v1261_v49 = vmul.f32 %v1614_v38, %v1614_v38  ;;  %v1625_v60 = vunpack.c.l.bf16 %v1701_v55 }
  0x8e   :  { %v1113_v58 = vadd.f32 %v1593_v52, %v1112_v53  ;;  %v1376_v5 = vadd.f32 %v1375_v0, %v1249_v59  ;;  %v1262_v53 = vmul.f32 %v1617_v42, %v1617_v42  ;;  %v1702_v0 = vld [vmem:[%s1906_s0 + $0x160] sm:$0xff]  }
  0x8f   :  { %v1630_v10 = vunpack.c.h.bf16 %v1702_v0 }
  0x90   :  { %v1114_v62 = vadd.f32 %v1594_v57, %v1113_v58  ;;  %v1377_v9 = vadd.f32 %v1376_v5, %v1250_v63  ;;  %v1263_v58 = vmul.f32 %v1618_v47, %v1618_v47  ;;  %v1629_v5 = vunpack.c.l.bf16 %v1702_v0 }
  0x92   :  { %v1115_v3 = vadd.f32 %v1597_v61, %v1114_v62  ;;  %v1378_v14 = vadd.f32 %v1377_v9, %v1251_v4  ;;  %v1264_v62 = vmul.f32 %v1621_v51, %v1621_v51  ;;  %v1703_v9 = vld [vmem:[%s1906_s0 + $0x168] sm:$0xff]  }
  0x93   :  { %v1634_v19 = vunpack.c.h.bf16 %v1703_v9 }
  0x94   :  { %v1116_v7 = vadd.f32 %v1598_v2, %v1115_v3  ;;  %v1379_v18 = vadd.f32 %v1378_v14, %v1252_v8  ;;  %v1265_v3 = vmul.f32 %v1622_v56, %v1622_v56  ;;  %v1633_v14 = vunpack.c.l.bf16 %v1703_v9 }
  0x96   :  { %v1117_v12 = vadd.f32 %v1601_v6, %v1116_v7  ;;  %v1380_v23 = vadd.f32 %v1379_v18, %v1253_v13  ;;  %v1266_v7 = vmul.f32 %v1625_v60, %v1625_v60  ;;  %v1704_v18 = vld [vmem:[%s1906_s0 + $0x170] sm:$0xff]  }
  0x97   :  { %v1638_v28 = vunpack.c.h.bf16 %v1704_v18 }
  0x98   :  { %v1118_v16 = vadd.f32 %v1602_v11, %v1117_v12  ;;  %v1381_v27 = vadd.f32 %v1380_v23, %v1254_v17  ;;  %v1267_v12 = vmul.f32 %v1626_v1, %v1626_v1  ;;  %v1637_v23 = vunpack.c.l.bf16 %v1704_v18 }
  0x9a   :  { %v1119_v21 = vadd.f32 %v1605_v15, %v1118_v16  ;;  %v1382_v32 = vadd.f32 %v1381_v27, %v1255_v22  ;;  %v1268_v16 = vmul.f32 %v1629_v5, %v1629_v5  ;;  %v1705_v27 = vld [vmem:[%s1906_s0 + $0x178] sm:$0xff]  }
  0x9b   :  { %v1642_v37 = vunpack.c.h.bf16 %v1705_v27 }
  0x9c   :  { %v1120_v25 = vadd.f32 %v1606_v20, %v1119_v21  ;;  %v1383_v36 = vadd.f32 %v1382_v32, %v1256_v26  ;;  %v1269_v21 = vmul.f32 %v1630_v10, %v1630_v10  ;;  %v1641_v32 = vunpack.c.l.bf16 %v1705_v27 }
  0x9e   :  { %v1121_v30 = vadd.f32 %v1609_v24, %v1120_v25  ;;  %v1384_v41 = vadd.f32 %v1383_v36, %v1257_v31  ;;  %v1270_v25 = vmul.f32 %v1633_v14, %v1633_v14  ;;  %v1706_v36 = vld [vmem:[%s1906_s0 + $0x180] sm:$0xff]  }
  0x9f   :  { %v1646_v46 = vunpack.c.h.bf16 %v1706_v36 }
  0xa0   :  { %v1122_v34 = vadd.f32 %v1610_v29, %v1121_v30  ;;  %v1385_v45 = vadd.f32 %v1384_v41, %v1258_v35  ;;  %v1271_v30 = vmul.f32 %v1634_v19, %v1634_v19  ;;  %v1645_v41 = vunpack.c.l.bf16 %v1706_v36 }
  0xa2   :  { %v1123_v39 = vadd.f32 %v1613_v33, %v1122_v34  ;;  %v1386_v50 = vadd.f32 %v1385_v45, %v1259_v40  ;;  %v1272_v34 = vmul.f32 %v1637_v23, %v1637_v23  ;;  %v1707_v45 = vld [vmem:[%s1906_s0 + $0x188] sm:$0xff]  }
  0xa3   :  { %v1650_v55 = vunpack.c.h.bf16 %v1707_v45 }
  0xa4   :  { %v1124_v43 = vadd.f32 %v1614_v38, %v1123_v39  ;;  %v1387_v54 = vadd.f32 %v1386_v50, %v1260_v44  ;;  %v1273_v39 = vmul.f32 %v1638_v28, %v1638_v28  ;;  %v1649_v50 = vunpack.c.l.bf16 %v1707_v45 }
  0xa6   :  { %v1125_v48 = vadd.f32 %v1617_v42, %v1124_v43  ;;  %v1388_v59 = vadd.f32 %v1387_v54, %v1261_v49  ;;  %v1274_v43 = vmul.f32 %v1641_v32, %v1641_v32  ;;  %v1708_v54 = vld [vmem:[%s1906_s0 + $0x190] sm:$0xff]  }
  0xa7   :  { %v1654_v0 = vunpack.c.h.bf16 %v1708_v54 }
  0xa8   :  { %v1126_v52 = vadd.f32 %v1618_v47, %v1125_v48  ;;  %v1389_v63 = vadd.f32 %v1388_v59, %v1262_v53  ;;  %v1275_v48 = vmul.f32 %v1642_v37, %v1642_v37  ;;  %v1653_v59 = vunpack.c.l.bf16 %v1708_v54 }
  0xaa   :  { %v1127_v57 = vadd.f32 %v1621_v51, %v1126_v52  ;;  %v1390_v4 = vadd.f32 %v1389_v63, %v1263_v58  ;;  %v1276_v52 = vmul.f32 %v1645_v41, %v1645_v41  ;;  %v1709_v63 = vld [vmem:[%s1906_s0 + $0x198] sm:$0xff]  }
  0xab   :  { %v1658_v9 = vunpack.c.h.bf16 %v1709_v63 }
  0xac   :  { %v1128_v61 = vadd.f32 %v1622_v56, %v1127_v57  ;;  %v1391_v8 = vadd.f32 %v1390_v4, %v1264_v62  ;;  %v1277_v57 = vmul.f32 %v1646_v46, %v1646_v46  ;;  %v1657_v4 = vunpack.c.l.bf16 %v1709_v63 }
  0xad   :  { %v1283_v18 = vmul.f32 %v1658_v9, %v1658_v9 }
  0xae   :  { %v1129_v2 = vadd.f32 %v1625_v60, %v1128_v61  ;;  %v1392_v13 = vadd.f32 %v1391_v8, %v1265_v3  ;;  %v1278_v61 = vmul.f32 %v1649_v50, %v1649_v50  ;;  %v120_v8 = vld [vmem:[%s1906_s0 + $0x1a0] sm:$0xf] }
  0xb0   :  { %v1130_v6 = vadd.f32 %v1626_v1, %v1129_v2  ;;  %v1393_v17 = vadd.f32 %v1392_v13, %v1266_v7  ;;  %v1279_v2 = vmul.f32 %v1650_v55, %v1650_v55  ;;  %v248_v13 = vunpack.c.l.bf16 %v120_v8 }
  0xb2   :  { %v1131_v11 = vadd.f32 %v1629_v5, %v1130_v6  ;;  %v1394_v22 = vadd.f32 %v1393_v17, %v1267_v12  ;;  %v1280_v6 = vmul.f32 %v1653_v59, %v1653_v59 }
  0xb4   :  { %v1132_v15 = vadd.f32 %v1630_v10, %v1131_v11  ;;  %v1395_v26 = vadd.f32 %v1394_v22, %v1268_v16  ;;  %v1281_v11 = vmul.f32 %v1654_v0, %v1654_v0 }
  0xb6   :  { %v1133_v20 = vadd.f32 %v1633_v14, %v1132_v15  ;;  %v1396_v31 = vadd.f32 %v1395_v26, %v1269_v21  ;;  %v1282_v15 = vmul.f32 %v1657_v4, %v1657_v4  ;;  %v1284_v21 = vmul.f32 %v248_v13, %v248_v13 }
  0xb8   :  { %v1134_v24 = vadd.f32 %v1634_v19, %v1133_v20  ;;  %v1397_v35 = vadd.f32 %v1396_v31, %v1270_v25  ;;  %v1043_v31 = vld [vmem:[%s1904_s1] sm:$0x1] }
  0xba   :  { %v1135_v29 = vadd.f32 %v1637_v23, %v1134_v24  ;;  %v1398_v40 = vadd.f32 %v1397_v35, %v1271_v30 }
  0xbc   :  { %v1136_v33 = vadd.f32 %v1638_v28, %v1135_v29  ;;  %v1399_v44 = vadd.f32 %v1398_v40, %v1272_v34 }
  0xbe   :  { %v1137_v38 = vadd.f32 %v1641_v32, %v1136_v33  ;;  %v1400_v49 = vadd.f32 %v1399_v44, %v1273_v39 }
  0xc0   :  { %v1138_v42 = vadd.f32 %v1642_v37, %v1137_v38  ;;  %v1401_v53 = vadd.f32 %v1400_v49, %v1274_v43  ;;  %v1179_v37 = vld [vmem:[%s1905_s2] sm:$0x1] }
  0xc2   :  { %v1139_v47 = vadd.f32 %v1645_v41, %v1138_v42  ;;  %v1402_v58 = vadd.f32 %v1401_v53, %v1275_v48 }
  0xc4   :  { %v1140_v51 = vadd.f32 %v1646_v46, %v1139_v47  ;;  %v1403_v62 = vadd.f32 %v1402_v58, %v1276_v52 }
  0xc6   :  { %v1141_v56 = vadd.f32 %v1649_v50, %v1140_v51  ;;  %v1404_v3 = vadd.f32 %v1403_v62, %v1277_v57 }
  0xc8   :  { %v1142_v60 = vadd.f32 %v1650_v55, %v1141_v56  ;;  %v1405_v7 = vadd.f32 %v1404_v3, %v1278_v61 }
  0xca   :  { %v1143_v1 = vadd.f32 %v1653_v59, %v1142_v60  ;;  %v1406_v12 = vadd.f32 %v1405_v7, %v1279_v2 }
  0xcc   :  { %v1144_v5 = vadd.f32 %v1654_v0, %v1143_v1  ;;  %v1407_v16 = vadd.f32 %v1406_v12, %v1280_v6 }
  0xce   :  { %v1145_v10 = vadd.f32 %v1657_v4, %v1144_v5  ;;  %v1408_v19 = vadd.f32 %v1407_v16, %v1281_v11 }
  0xd0   :  { %v1146_v14 = vadd.f32 %v1658_v9, %v1145_v10  ;;  %v1409_v22 = vadd.f32 %v1408_v19, %v1282_v15 }
  0xd2   :  { %v1147_v17 = vadd.f32 %v1146_v14, %v248_v13  ;;  %v1410_v24 = vadd.f32 %v1409_v22, %v1283_v18 }
  0xd4   :  { %v1171_v20 = vrot.slane %v1147_v17, 4  ;;  %v1411_v26 = vadd.f32 %v1410_v24, %v1284_v21 }
  0xd6   :  { %v1172_v23 = vadd.f32 %v1171_v20, %v1147_v17  ;;  %v1435_v28 = vrot.slane %v1411_v26, 4 }
  0xd8   :  { %v1173_v25 = vrot.slane %v1172_v23, 2  ;;  %v1436_v30 = vadd.f32 %v1435_v28, %v1411_v26 }
  0xda   :  { %v1174_v27 = vadd.f32 %v1173_v25, %v1172_v23  ;;  %v1437_v33 = vrot.slane %v1436_v30, 2 }
  0xdc   :  { %v1175_v29 = vrot.slane %v1174_v27, 1  ;;  %v1438_v35 = vadd.f32 %v1437_v33, %v1436_v30 }
  0xde   :  { %v1176_v32 = vadd.f32 %v1175_v29, %v1174_v27  ;;  %v1439_v36 = vrot.slane %v1438_v35, 1 }
  0xe0   :  { %v1177_v34 = vadd.f32 %v1176_v32, %v1043_v31  ;;  %v1440_v38 = vadd.f32 %v1439_v36, %v1438_v35 }
  0xe2   :  { %1178 = vst [vmem:[%s1904_s1] sm:$0x1] %v1177_v34  ;;  %v1441_v39 = vadd.f32 %v1440_v38, %v1179_v37 }
  0xe4   :  { %1442 = vst [vmem:[%s1905_s2] sm:$0x1] %v1441_v39 }

// kernel: deepspeech_forward.18
= control target key start
LH: loop header
LB: loop body
LE: loop exit
PB: predicated region body
PF: predicated region fallthrough
CT: control target
= control target key end

     0   :  { %s2436_s0 = inlined_call_operand.vmem [shape: bf16[1024,128], index: 0, kind: input, shape index: {}]   ;;  %s2437_s1 = inlined_call_operand.vmem [shape: f32[1,128], index: 1, kind: input, shape index: {}]   ;;  %s2438_s2 = inlined_call_operand.vmem [shape: f32[1,128], index: 2, kind: input, shape index: {}]   ;;  %s2439_s3 = inlined_call_operand.vmem [shape: bf16[1024,128], index: 3, kind: output, shape index: {}]  }
   0x1   :  { %v1051_v0 = vld [vmem:[%s2436_s0] sm:$0xff]   ;;  %v1626_v5 = vld [vmem:[%s2436_s0 + $0x8] sm:$0xff]   ;;  %v1627_v8 = vld [vmem:[%s2436_s0 + $0x10] sm:$0xff]  }
   0x2   :  { %v1782_v1 = vld [vmem:[%s2437_s1] ss:$0 sm:$0xff]  ;;  %v1052_v2 = vunpack.c.l.bf16 %v1051_v0  ;;  %v1053_v3 = vunpack.c.h.bf16 %v1051_v0  ;;  %v1056_v6 = vunpack.c.l.bf16 %v1626_v5  ;;  %v1057_v7 = vunpack.c.h.bf16 %v1626_v5  ;;  %v1628_v9 = vld [vmem:[%s2436_s0 + $0x18] sm:$0xff]   ;;  %v1630_v43 = vld [vmem:[%s2436_s0 + $0x28] sm:$0xff]  }
   0x3   :  { %v1787_v4 = vld [vmem:[%s2438_s2] ss:$0 sm:$0xff]  ;;  %v1060_v12 = vunpack.c.l.bf16 %v1627_v8  ;;  %v1061_v13 = vunpack.c.h.bf16 %v1627_v8  ;;  %v1064_v16 = vunpack.c.l.bf16 %v1628_v9  ;;  %v1065_v17 = vunpack.c.h.bf16 %v1628_v9  ;;  %v1631_v48 = vld [vmem:[%s2436_s0 + $0x30] sm:$0xff]   ;;  %v1632_v53 = vld [vmem:[%s2436_s0 + $0x38] sm:$0xff]  }
   0x4   :  { %v274_v10 = vmul.f32 %v1782_v1, %v1052_v2  ;;  %v275_v11 = vmul.f32 %v1782_v1, %v1053_v3  ;;  %v276_v14 = vmul.f32 %v1782_v1, %v1056_v6  ;;  %v277_v15 = vmul.f32 %v1782_v1, %v1057_v7  ;;  %v1629_v34 = vld [vmem:[%s2436_s0 + $0x20] sm:$0xff]  }
   0x5   :  { %v278_v20 = vmul.f32 %v1782_v1, %v1060_v12  ;;  %v279_v21 = vmul.f32 %v1782_v1, %v1061_v13  ;;  %v280_v24 = vmul.f32 %v1782_v1, %v1064_v16  ;;  %v281_v25 = vmul.f32 %v1782_v1, %v1065_v17  ;;  %v1633_v16 = vld [vmem:[%s2436_s0 + $0x40] sm:$0xff]  }
   0x6   :  { %v406_v18 = vadd.f32 %v1787_v4, %v274_v10  ;;  %v407_v19 = vadd.f32 %v1787_v4, %v275_v11  ;;  %v408_v22 = vadd.f32 %v1787_v4, %v276_v14  ;;  %v409_v23 = vadd.f32 %v1787_v4, %v277_v15 }
   0x7   :  { %v410_v28 = vadd.f32 %v1787_v4, %v278_v20  ;;  %v411_v29 = vadd.f32 %v1787_v4, %v279_v21  ;;  %v412_v32 = vadd.f32 %v1787_v4, %v280_v24  ;;  %v413_v33 = vadd.f32 %v1787_v4, %v281_v25 }
   0x8   :  { %v534_v26 = vmax.f32 %v406_v18, 0.0  ;;  %v535_v27 = vmax.f32 %v407_v19, 0.0  ;;  %v536_v30 = vmax.f32 %v408_v22, 0.0  ;;  %v537_v31 = vmax.f32 %v409_v23, 0.0 }
   0x9   :  { %v538_v37 = vmax.f32 %v410_v28, 0.0  ;;  %v539_v38 = vmax.f32 %v411_v29, 0.0  ;;  %v540_v41 = vmax.f32 %v412_v32, 0.0  ;;  %v541_v42 = vmax.f32 %v413_v33, 0.0  ;;  %v1634_v29 = vld [vmem:[%s2436_s0 + $0x48] sm:$0xff]  }
   0xa   :  { %v662_v35 = vmin.f32 %v534_v26, 20.0  ;;  %v663_v36 = vmin.f32 %v535_v27, 20.0  ;;  %v664_v39 = vmin.f32 %v536_v30, 20.0  ;;  %v665_v40 = vmin.f32 %v537_v31, 20.0 }
   0xb   :  { %v666_v45 = vmin.f32 %v538_v37, 20.0  ;;  %v667_v46 = vmin.f32 %v539_v38, 20.0  ;;  %v1068_v47 = vunpack.c.l.bf16 %v1629_v34  ;;  %v668_v50 = vmin.f32 %v540_v41, 20.0 }
   0xc   :  { %v1309_v44 = vpack.c.bf16 %v663_v36, %v662_v35  ;;  %v1314_v49 = vpack.c.bf16 %v665_v40, %v664_v39  ;;  %v669_v51 = vmin.f32 %v541_v42, 20.0  ;;  %v1069_v52 = vunpack.c.h.bf16 %v1629_v34  ;;  %v1635_v34 = vld [vmem:[%s2436_s0 + $0x50] sm:$0xff]   ;;  %v1636_v39 = vld [vmem:[%s2436_s0 + $0x58] sm:$0xff]  }
   0xd   :  { %v1319_v54 = vpack.c.bf16 %v667_v46, %v666_v45  ;;  %v282_v55 = vmul.f32 %v1782_v1, %v1068_v47  ;;  %v1072_v56 = vunpack.c.l.bf16 %v1630_v43  ;;  %v1073_v57 = vunpack.c.h.bf16 %v1630_v43 }
   0xe   :  { %1310 = vst [vmem:[%s2439_s3] sm:$0xff] %v1309_v44   ;;  %v1324_v58 = vpack.c.bf16 %v669_v51, %v668_v50  ;;  %v283_v59 = vmul.f32 %v1782_v1, %v1069_v52  ;;  %v1076_v60 = vunpack.c.l.bf16 %v1631_v48  ;;  %v1077_v61 = vunpack.c.h.bf16 %v1631_v48 }
   0xf   :  { %1689 = vst [vmem:[%s2439_s3 + $0x8] sm:$0xff] %v1314_v49   ;;  %v414_v62 = vadd.f32 %v1787_v4, %v282_v55  ;;  %v284_v63 = vmul.f32 %v1782_v1, %v1072_v56  ;;  %v285_v0 = vmul.f32 %v1782_v1, %v1073_v57  ;;  %v1080_v2 = vunpack.c.l.bf16 %v1632_v53 }
  0x10   :  { %1690 = vst [vmem:[%s2439_s3 + $0x10] sm:$0xff] %v1319_v54   ;;  %v415_v3 = vadd.f32 %v1787_v4, %v283_v59  ;;  %v286_v5 = vmul.f32 %v1782_v1, %v1076_v60  ;;  %v287_v6 = vmul.f32 %v1782_v1, %v1077_v61  ;;  %v1081_v7 = vunpack.c.h.bf16 %v1632_v53  ;;  %v1637_v60 = vld [vmem:[%s2436_s0 + $0x60] sm:$0xff]  }
  0x11   :  { %1691 = vst [vmem:[%s2439_s3 + $0x18] sm:$0xff] %v1324_v58   ;;  %v542_v8 = vmax.f32 %v414_v62, 0.0  ;;  %v416_v9 = vadd.f32 %v1787_v4, %v284_v63  ;;  %v417_v10 = vadd.f32 %v1787_v4, %v285_v0  ;;  %v288_v11 = vmul.f32 %v1782_v1, %v1080_v2 }
  0x12   :  { %v543_v12 = vmax.f32 %v415_v3, 0.0  ;;  %v418_v13 = vadd.f32 %v1787_v4, %v286_v5  ;;  %v419_v14 = vadd.f32 %v1787_v4, %v287_v6  ;;  %v289_v15 = vmul.f32 %v1782_v1, %v1081_v7 }
  0x13   :  { %v670_v17 = vmin.f32 %v542_v8, 20.0  ;;  %v544_v18 = vmax.f32 %v416_v9, 0.0  ;;  %v545_v19 = vmax.f32 %v417_v10, 0.0  ;;  %v420_v20 = vadd.f32 %v1787_v4, %v288_v11 }
  0x14   :  { %v671_v21 = vmin.f32 %v543_v12, 20.0  ;;  %v546_v22 = vmax.f32 %v418_v13, 0.0  ;;  %v547_v23 = vmax.f32 %v419_v14, 0.0  ;;  %v421_v24 = vadd.f32 %v1787_v4, %v289_v15  ;;  %v1638_v15 = vld [vmem:[%s2436_s0 + $0x68] sm:$0xff]  }
  0x15   :  { %v672_v25 = vmin.f32 %v544_v18, 20.0  ;;  %v673_v26 = vmin.f32 %v545_v19, 20.0  ;;  %v548_v27 = vmax.f32 %v420_v20, 0.0  ;;  %v1084_v28 = vunpack.c.l.bf16 %v1633_v16  ;;  %v1639_v20 = vld [vmem:[%s2436_s0 + $0x70] sm:$0xff]  }
  0x16   :  { %v1329_v30 = vpack.c.bf16 %v671_v21, %v670_v17  ;;  %v674_v31 = vmin.f32 %v546_v22, 20.0  ;;  %v675_v32 = vmin.f32 %v547_v23, 20.0  ;;  %v549_v33 = vmax.f32 %v421_v24, 0.0 }
  0x17   :  { %v1334_v35 = vpack.c.bf16 %v673_v26, %v672_v25  ;;  %v676_v36 = vmin.f32 %v548_v27, 20.0  ;;  %v1085_v37 = vunpack.c.h.bf16 %v1633_v16  ;;  %v290_v38 = vmul.f32 %v1782_v1, %v1084_v28  ;;  %v1640_v25 = vld [vmem:[%s2436_s0 + $0x78] sm:$0xff]  }
  0x18   :  { %1692 = vst [vmem:[%s2439_s3 + $0x20] sm:$0xff] %v1329_v30   ;;  %v1339_v40 = vpack.c.bf16 %v675_v32, %v674_v31  ;;  %v677_v41 = vmin.f32 %v549_v33, 20.0  ;;  %v1088_v42 = vunpack.c.l.bf16 %v1634_v29  ;;  %v1089_v43 = vunpack.c.h.bf16 %v1634_v29 }
  0x19   :  { %1693 = vst [vmem:[%s2439_s3 + $0x28] sm:$0xff] %v1334_v35   ;;  %v291_v44 = vmul.f32 %v1782_v1, %v1085_v37  ;;  %v422_v45 = vadd.f32 %v1787_v4, %v290_v38  ;;  %v1092_v46 = vunpack.c.l.bf16 %v1635_v34  ;;  %v1093_v47 = vunpack.c.h.bf16 %v1635_v34 }
  0x1a   :  { %1694 = vst [vmem:[%s2439_s3 + $0x30] sm:$0xff] %v1339_v40   ;;  %v1344_v48 = vpack.c.bf16 %v677_v41, %v676_v36  ;;  %v292_v49 = vmul.f32 %v1782_v1, %v1088_v42  ;;  %v293_v50 = vmul.f32 %v1782_v1, %v1089_v43  ;;  %v1096_v51 = vunpack.c.l.bf16 %v1636_v39 }
  0x1b   :  { %v423_v52 = vadd.f32 %v1787_v4, %v291_v44  ;;  %v550_v53 = vmax.f32 %v422_v45, 0.0  ;;  %v294_v54 = vmul.f32 %v1782_v1, %v1092_v46  ;;  %v295_v55 = vmul.f32 %v1782_v1, %v1093_v47  ;;  %v1641_v46 = vld [vmem:[%s2436_s0 + $0x80] sm:$0xff]  }
  0x1c   :  { %1695 = vst [vmem:[%s2439_s3 + $0x38] sm:$0xff] %v1344_v48   ;;  %v424_v56 = vadd.f32 %v1787_v4, %v292_v49  ;;  %v425_v57 = vadd.f32 %v1787_v4, %v293_v50  ;;  %v1097_v58 = vunpack.c.h.bf16 %v1636_v39  ;;  %v296_v59 = vmul.f32 %v1782_v1, %v1096_v51 }
  0x1d   :  { %v551_v61 = vmax.f32 %v423_v52, 0.0  ;;  %v678_v62 = vmin.f32 %v550_v53, 20.0  ;;  %v426_v63 = vadd.f32 %v1787_v4, %v294_v54  ;;  %v427_v0 = vadd.f32 %v1787_v4, %v295_v55 }
  0x1e   :  { %v552_v2 = vmax.f32 %v424_v56, 0.0  ;;  %v553_v3 = vmax.f32 %v425_v57, 0.0  ;;  %v297_v5 = vmul.f32 %v1782_v1, %v1097_v58  ;;  %v428_v6 = vadd.f32 %v1787_v4, %v296_v59  ;;  %v1642_v59 = vld [vmem:[%s2436_s0 + $0x88] sm:$0xff]  }
  0x1f   :  { %v679_v7 = vmin.f32 %v551_v61, 20.0  ;;  %v554_v8 = vmax.f32 %v426_v63, 0.0  ;;  %v555_v9 = vmax.f32 %v427_v0, 0.0  ;;  %v1100_v10 = vunpack.c.l.bf16 %v1637_v60 }
  0x20   :  { %v680_v11 = vmin.f32 %v552_v2, 20.0  ;;  %v681_v12 = vmin.f32 %v553_v3, 20.0  ;;  %v429_v13 = vadd.f32 %v1787_v4, %v297_v5  ;;  %v556_v14 = vmax.f32 %v428_v6, 0.0  ;;  %v1643_v6 = vld [vmem:[%s2436_s0 + $0x90] sm:$0xff]  }
  0x21   :  { %v1349_v16 = vpack.c.bf16 %v679_v7, %v678_v62  ;;  %v682_v17 = vmin.f32 %v554_v8, 20.0  ;;  %v683_v18 = vmin.f32 %v555_v9, 20.0  ;;  %v1101_v19 = vunpack.c.h.bf16 %v1637_v60 }
  0x22   :  { %v1354_v21 = vpack.c.bf16 %v681_v12, %v680_v11  ;;  %v557_v22 = vmax.f32 %v429_v13, 0.0  ;;  %v684_v23 = vmin.f32 %v556_v14, 20.0  ;;  %v298_v24 = vmul.f32 %v1782_v1, %v1100_v10  ;;  %v1644_v11 = vld [vmem:[%s2436_s0 + $0x98] sm:$0xff]  }
  0x23   :  { %1696 = vst [vmem:[%s2439_s3 + $0x40] sm:$0xff] %v1349_v16   ;;  %v1359_v26 = vpack.c.bf16 %v683_v18, %v682_v17  ;;  %v299_v27 = vmul.f32 %v1782_v1, %v1101_v19  ;;  %v1104_v28 = vunpack.c.l.bf16 %v1638_v15  ;;  %v1105_v29 = vunpack.c.h.bf16 %v1638_v15 }
  0x24   :  { %1697 = vst [vmem:[%s2439_s3 + $0x48] sm:$0xff] %v1354_v21   ;;  %v685_v30 = vmin.f32 %v557_v22, 20.0  ;;  %v430_v31 = vadd.f32 %v1787_v4, %v298_v24  ;;  %v1108_v32 = vunpack.c.l.bf16 %v1639_v20  ;;  %v1109_v33 = vunpack.c.h.bf16 %v1639_v20 }
  0x25   :  { %1698 = vst [vmem:[%s2439_s3 + $0x50] sm:$0xff] %v1359_v26   ;;  %v431_v34 = vadd.f32 %v1787_v4, %v299_v27  ;;  %v300_v35 = vmul.f32 %v1782_v1, %v1104_v28  ;;  %v301_v36 = vmul.f32 %v1782_v1, %v1105_v29  ;;  %v1112_v37 = vunpack.c.l.bf16 %v1640_v25 }
  0x26   :  { %v1364_v38 = vpack.c.bf16 %v685_v30, %v684_v23  ;;  %v558_v39 = vmax.f32 %v430_v31, 0.0  ;;  %v302_v40 = vmul.f32 %v1782_v1, %v1108_v32  ;;  %v303_v41 = vmul.f32 %v1782_v1, %v1109_v33  ;;  %v1645_v32 = vld [vmem:[%s2436_s0 + $0xa0] sm:$0xff]  }
  0x27   :  { %v559_v42 = vmax.f32 %v431_v34, 0.0  ;;  %v432_v43 = vadd.f32 %v1787_v4, %v300_v35  ;;  %v433_v44 = vadd.f32 %v1787_v4, %v301_v36  ;;  %v1113_v45 = vunpack.c.h.bf16 %v1640_v25 }
  0x28   :  { %1699 = vst [vmem:[%s2439_s3 + $0x58] sm:$0xff] %v1364_v38   ;;  %v686_v47 = vmin.f32 %v558_v39, 20.0  ;;  %v434_v48 = vadd.f32 %v1787_v4, %v302_v40  ;;  %v435_v49 = vadd.f32 %v1787_v4, %v303_v41  ;;  %v304_v50 = vmul.f32 %v1782_v1, %v1112_v37 }
  0x29   :  { %v687_v51 = vmin.f32 %v559_v42, 20.0  ;;  %v560_v52 = vmax.f32 %v432_v43, 0.0  ;;  %v561_v53 = vmax.f32 %v433_v44, 0.0  ;;  %v305_v54 = vmul.f32 %v1782_v1, %v1113_v45  ;;  %v1646_v45 = vld [vmem:[%s2436_s0 + $0xa8] sm:$0xff]  }
  0x2a   :  { %v562_v55 = vmax.f32 %v434_v48, 0.0  ;;  %v563_v56 = vmax.f32 %v435_v49, 0.0  ;;  %v436_v57 = vadd.f32 %v1787_v4, %v304_v50  ;;  %v1116_v58 = vunpack.c.l.bf16 %v1641_v46 }
  0x2b   :  { %v1369_v60 = vpack.c.bf16 %v687_v51, %v686_v47  ;;  %v688_v61 = vmin.f32 %v560_v52, 20.0  ;;  %v689_v62 = vmin.f32 %v561_v53, 20.0  ;;  %v437_v63 = vadd.f32 %v1787_v4, %v305_v54  ;;  %v1647_v54 = vld [vmem:[%s2436_s0 + $0xb0] sm:$0xff]  }
  0x2c   :  { %v690_v0 = vmin.f32 %v562_v55, 20.0  ;;  %v691_v2 = vmin.f32 %v563_v56, 20.0  ;;  %v564_v3 = vmax.f32 %v436_v57, 0.0  ;;  %v1117_v5 = vunpack.c.h.bf16 %v1641_v46 }
  0x2d   :  { %1700 = vst [vmem:[%s2439_s3 + $0x60] sm:$0xff] %v1369_v60   ;;  %v1374_v7 = vpack.c.bf16 %v689_v62, %v688_v61  ;;  %v565_v8 = vmax.f32 %v437_v63, 0.0  ;;  %v306_v9 = vmul.f32 %v1782_v1, %v1116_v58  ;;  %v1120_v10 = vunpack.c.l.bf16 %v1642_v59  ;;  %v1648_v63 = vld [vmem:[%s2436_s0 + $0xb8] sm:$0xff]  }
  0x2e   :  { %v1379_v12 = vpack.c.bf16 %v691_v2, %v690_v0  ;;  %v692_v13 = vmin.f32 %v564_v3, 20.0  ;;  %v307_v14 = vmul.f32 %v1782_v1, %v1117_v5  ;;  %v1121_v15 = vunpack.c.h.bf16 %v1642_v59 }
  0x2f   :  { %1701 = vst [vmem:[%s2439_s3 + $0x68] sm:$0xff] %v1374_v7   ;;  %v693_v16 = vmin.f32 %v565_v8, 20.0  ;;  %v438_v17 = vadd.f32 %v1787_v4, %v306_v9  ;;  %v308_v18 = vmul.f32 %v1782_v1, %v1120_v10  ;;  %v1124_v19 = vunpack.c.l.bf16 %v1643_v6 }
  0x30   :  { %1702 = vst [vmem:[%s2439_s3 + $0x70] sm:$0xff] %v1379_v12   ;;  %v439_v20 = vadd.f32 %v1787_v4, %v307_v14  ;;  %v309_v21 = vmul.f32 %v1782_v1, %v1121_v15  ;;  %v1125_v22 = vunpack.c.h.bf16 %v1643_v6  ;;  %v1128_v23 = vunpack.c.l.bf16 %v1644_v11  ;;  %v1649_v14 = vld [vmem:[%s2436_s0 + $0xc0] sm:$0xff]  }
  0x31   :  { %v1384_v24 = vpack.c.bf16 %v693_v16, %v692_v13  ;;  %v566_v25 = vmax.f32 %v438_v17, 0.0  ;;  %v440_v26 = vadd.f32 %v1787_v4, %v308_v18  ;;  %v310_v27 = vmul.f32 %v1782_v1, %v1124_v19 }
  0x32   :  { %v567_v28 = vmax.f32 %v439_v20, 0.0  ;;  %v441_v29 = vadd.f32 %v1787_v4, %v309_v21  ;;  %v311_v30 = vmul.f32 %v1782_v1, %v1125_v22  ;;  %v1129_v31 = vunpack.c.h.bf16 %v1644_v11 }
  0x33   :  { %1703 = vst [vmem:[%s2439_s3 + $0x78] sm:$0xff] %v1384_v24   ;;  %v694_v33 = vmin.f32 %v566_v25, 20.0  ;;  %v568_v34 = vmax.f32 %v440_v26, 0.0  ;;  %v442_v35 = vadd.f32 %v1787_v4, %v310_v27  ;;  %v312_v36 = vmul.f32 %v1782_v1, %v1128_v23 }
  0x34   :  { %v695_v37 = vmin.f32 %v567_v28, 20.0  ;;  %v569_v38 = vmax.f32 %v441_v29, 0.0  ;;  %v443_v39 = vadd.f32 %v1787_v4, %v311_v30  ;;  %v313_v40 = vmul.f32 %v1782_v1, %v1129_v31  ;;  %v1650_v31 = vld [vmem:[%s2436_s0 + $0xc8] sm:$0xff]  }
  0x35   :  { %v696_v41 = vmin.f32 %v568_v34, 20.0  ;;  %v570_v42 = vmax.f32 %v442_v35, 0.0  ;;  %v444_v43 = vadd.f32 %v1787_v4, %v312_v36  ;;  %v1132_v44 = vunpack.c.l.bf16 %v1645_v32 }
  0x36   :  { %v1389_v46 = vpack.c.bf16 %v695_v37, %v694_v33  ;;  %v697_v47 = vmin.f32 %v569_v38, 20.0  ;;  %v571_v48 = vmax.f32 %v443_v39, 0.0  ;;  %v445_v49 = vadd.f32 %v1787_v4, %v313_v40  ;;  %v1651_v40 = vld [vmem:[%s2436_s0 + $0xd0] sm:$0xff]  }
  0x37   :  { %v698_v50 = vmin.f32 %v570_v42, 20.0  ;;  %v572_v51 = vmax.f32 %v444_v43, 0.0  ;;  %v1133_v52 = vunpack.c.h.bf16 %v1645_v32  ;;  %v314_v53 = vmul.f32 %v1782_v1, %v1132_v44 }
  0x38   :  { %1704 = vst [vmem:[%s2439_s3 + $0x80] sm:$0xff] %v1389_v46   ;;  %v1394_v55 = vpack.c.bf16 %v697_v47, %v696_v41  ;;  %v699_v56 = vmin.f32 %v571_v48, 20.0  ;;  %v573_v57 = vmax.f32 %v445_v49, 0.0  ;;  %v1136_v58 = vunpack.c.l.bf16 %v1646_v45  ;;  %v1652_v49 = vld [vmem:[%s2436_s0 + $0xd8] sm:$0xff]  }
  0x39   :  { %v700_v59 = vmin.f32 %v572_v51, 20.0  ;;  %v315_v60 = vmul.f32 %v1782_v1, %v1133_v52  ;;  %v446_v61 = vadd.f32 %v1787_v4, %v314_v53  ;;  %v1137_v62 = vunpack.c.h.bf16 %v1646_v45 }
  0x3a   :  { %1705 = vst [vmem:[%s2439_s3 + $0x88] sm:$0xff] %v1394_v55   ;;  %v1399_v0 = vpack.c.bf16 %v699_v56, %v698_v50  ;;  %v701_v2 = vmin.f32 %v573_v57, 20.0  ;;  %v316_v3 = vmul.f32 %v1782_v1, %v1136_v58  ;;  %v1140_v5 = vunpack.c.l.bf16 %v1647_v54 }
  0x3b   :  { %v447_v6 = vadd.f32 %v1787_v4, %v315_v60  ;;  %v574_v7 = vmax.f32 %v446_v61, 0.0  ;;  %v317_v8 = vmul.f32 %v1782_v1, %v1137_v62  ;;  %v1141_v9 = vunpack.c.h.bf16 %v1647_v54  ;;  %v1653_v62 = vld [vmem:[%s2436_s0 + $0xe0] sm:$0xff]  }
  0x3c   :  { %1706 = vst [vmem:[%s2439_s3 + $0x90] sm:$0xff] %v1399_v0   ;;  %v1404_v10 = vpack.c.bf16 %v701_v2, %v700_v59  ;;  %v448_v11 = vadd.f32 %v1787_v4, %v316_v3  ;;  %v318_v12 = vmul.f32 %v1782_v1, %v1140_v5  ;;  %v1144_v13 = vunpack.c.l.bf16 %v1648_v63 }
  0x3d   :  { %v575_v15 = vmax.f32 %v447_v6, 0.0  ;;  %v702_v16 = vmin.f32 %v574_v7, 20.0  ;;  %v449_v17 = vadd.f32 %v1787_v4, %v317_v8  ;;  %v319_v18 = vmul.f32 %v1782_v1, %v1141_v9 }
  0x3e   :  { %1707 = vst [vmem:[%s2439_s3 + $0x98] sm:$0xff] %v1404_v10   ;;  %v576_v19 = vmax.f32 %v448_v11, 0.0  ;;  %v450_v20 = vadd.f32 %v1787_v4, %v318_v12  ;;  %v1145_v21 = vunpack.c.h.bf16 %v1648_v63  ;;  %v320_v22 = vmul.f32 %v1782_v1, %v1144_v13  ;;  %v1654_v13 = vld [vmem:[%s2436_s0 + $0xe8] sm:$0xff]  }
  0x3f   :  { %v703_v23 = vmin.f32 %v575_v15, 20.0  ;;  %v577_v24 = vmax.f32 %v449_v17, 0.0  ;;  %v451_v25 = vadd.f32 %v1787_v4, %v319_v18  ;;  %v1148_v26 = vunpack.c.l.bf16 %v1649_v14 }
  0x40   :  { %v704_v27 = vmin.f32 %v576_v19, 20.0  ;;  %v578_v28 = vmax.f32 %v450_v20, 0.0  ;;  %v321_v29 = vmul.f32 %v1782_v1, %v1145_v21  ;;  %v452_v30 = vadd.f32 %v1787_v4, %v320_v22 }
  0x41   :  { %v1409_v32 = vpack.c.bf16 %v703_v23, %v702_v16  ;;  %v705_v33 = vmin.f32 %v577_v24, 20.0  ;;  %v579_v34 = vmax.f32 %v451_v25, 0.0  ;;  %v1149_v35 = vunpack.c.h.bf16 %v1649_v14 }
  0x42   :  { %v706_v36 = vmin.f32 %v578_v28, 20.0  ;;  %v453_v37 = vadd.f32 %v1787_v4, %v321_v29  ;;  %v580_v38 = vmax.f32 %v452_v30, 0.0  ;;  %v322_v39 = vmul.f32 %v1782_v1, %v1148_v26  ;;  %v1655_v26 = vld [vmem:[%s2436_s0 + $0xf0] sm:$0xff]  }
  0x43   :  { %1708 = vst [vmem:[%s2439_s3 + $0xa0] sm:$0xff] %v1409_v32   ;;  %v1414_v41 = vpack.c.bf16 %v705_v33, %v704_v27  ;;  %v707_v42 = vmin.f32 %v579_v34, 20.0  ;;  %v323_v43 = vmul.f32 %v1782_v1, %v1149_v35  ;;  %v1152_v44 = vunpack.c.l.bf16 %v1650_v31  ;;  %v1656_v35 = vld [vmem:[%s2436_s0 + $0xf8] sm:$0xff]  }
  0x44   :  { %v581_v45 = vmax.f32 %v453_v37, 0.0  ;;  %v708_v46 = vmin.f32 %v580_v38, 20.0  ;;  %v454_v47 = vadd.f32 %v1787_v4, %v322_v39  ;;  %v1153_v48 = vunpack.c.h.bf16 %v1650_v31 }
  0x45   :  { %1709 = vst [vmem:[%s2439_s3 + $0xa8] sm:$0xff] %v1414_v41   ;;  %v1419_v50 = vpack.c.bf16 %v707_v42, %v706_v36  ;;  %v455_v51 = vadd.f32 %v1787_v4, %v323_v43  ;;  %v324_v52 = vmul.f32 %v1782_v1, %v1152_v44  ;;  %v1156_v53 = vunpack.c.l.bf16 %v1651_v40 }
  0x46   :  { %v709_v54 = vmin.f32 %v581_v45, 20.0  ;;  %v582_v55 = vmax.f32 %v454_v47, 0.0  ;;  %v325_v56 = vmul.f32 %v1782_v1, %v1153_v48  ;;  %v1157_v57 = vunpack.c.h.bf16 %v1651_v40  ;;  %v1657_v48 = vld [vmem:[%s2436_s0 + $0x100] sm:$0xff]  }
  0x47   :  { %1710 = vst [vmem:[%s2439_s3 + $0xb0] sm:$0xff] %v1419_v50   ;;  %v583_v58 = vmax.f32 %v455_v51, 0.0  ;;  %v456_v59 = vadd.f32 %v1787_v4, %v324_v52  ;;  %v326_v60 = vmul.f32 %v1782_v1, %v1156_v53  ;;  %v1160_v61 = vunpack.c.l.bf16 %v1652_v49 }
  0x48   :  { %v1424_v63 = vpack.c.bf16 %v709_v54, %v708_v46  ;;  %v710_v0 = vmin.f32 %v582_v55, 20.0  ;;  %v457_v2 = vadd.f32 %v1787_v4, %v325_v56  ;;  %v327_v3 = vmul.f32 %v1782_v1, %v1157_v57 }
  0x49   :  { %v711_v5 = vmin.f32 %v583_v58, 20.0  ;;  %v584_v6 = vmax.f32 %v456_v59, 0.0  ;;  %v458_v7 = vadd.f32 %v1787_v4, %v326_v60  ;;  %v1161_v8 = vunpack.c.h.bf16 %v1652_v49 }
  0x4a   :  { %1711 = vst [vmem:[%s2439_s3 + $0xb8] sm:$0xff] %v1424_v63   ;;  %v585_v9 = vmax.f32 %v457_v2, 0.0  ;;  %v459_v10 = vadd.f32 %v1787_v4, %v327_v3  ;;  %v328_v11 = vmul.f32 %v1782_v1, %v1160_v61  ;;  %v1164_v12 = vunpack.c.l.bf16 %v1653_v62  ;;  %v1658_v61 = vld [vmem:[%s2436_s0 + $0x108] sm:$0xff]  }
  0x4b   :  { %v1429_v14 = vpack.c.bf16 %v711_v5, %v710_v0  ;;  %v712_v15 = vmin.f32 %v584_v6, 20.0  ;;  %v586_v16 = vmax.f32 %v458_v7, 0.0  ;;  %v329_v17 = vmul.f32 %v1782_v1, %v1161_v8 }
  0x4c   :  { %v713_v18 = vmin.f32 %v585_v9, 20.0  ;;  %v587_v19 = vmax.f32 %v459_v10, 0.0  ;;  %v460_v20 = vadd.f32 %v1787_v4, %v328_v11  ;;  %v1165_v21 = vunpack.c.h.bf16 %v1653_v62 }
  0x4d   :  { %1712 = vst [vmem:[%s2439_s3 + $0xc0] sm:$0xff] %v1429_v14   ;;  %v714_v22 = vmin.f32 %v586_v16, 20.0  ;;  %v461_v23 = vadd.f32 %v1787_v4, %v329_v17  ;;  %v330_v24 = vmul.f32 %v1782_v1, %v1164_v12  ;;  %v1168_v25 = vunpack.c.l.bf16 %v1654_v13  ;;  %v1659_v12 = vld [vmem:[%s2436_s0 + $0x110] sm:$0xff]  }
  0x4e   :  { %v1434_v27 = vpack.c.bf16 %v713_v18, %v712_v15  ;;  %v715_v28 = vmin.f32 %v587_v19, 20.0  ;;  %v588_v29 = vmax.f32 %v460_v20, 0.0  ;;  %v331_v30 = vmul.f32 %v1782_v1, %v1165_v21 }
  0x4f   :  { %v589_v31 = vmax.f32 %v461_v23, 0.0  ;;  %v462_v32 = vadd.f32 %v1787_v4, %v330_v24  ;;  %v1169_v33 = vunpack.c.h.bf16 %v1654_v13  ;;  %v332_v34 = vmul.f32 %v1782_v1, %v1168_v25  ;;  %v1660_v25 = vld [vmem:[%s2436_s0 + $0x118] sm:$0xff]  }
  0x50   :  { %1713 = vst [vmem:[%s2439_s3 + $0xc8] sm:$0xff] %v1434_v27   ;;  %v1439_v36 = vpack.c.bf16 %v715_v28, %v714_v22  ;;  %v716_v37 = vmin.f32 %v588_v29, 20.0  ;;  %v463_v38 = vadd.f32 %v1787_v4, %v331_v30  ;;  %v1172_v39 = vunpack.c.l.bf16 %v1655_v26 }
  0x51   :  { %v717_v40 = vmin.f32 %v589_v31, 20.0  ;;  %v590_v41 = vmax.f32 %v462_v32, 0.0  ;;  %v333_v42 = vmul.f32 %v1782_v1, %v1169_v33  ;;  %v464_v43 = vadd.f32 %v1787_v4, %v332_v34  ;;  %v1661_v34 = vld [vmem:[%s2436_s0 + $0x120] sm:$0xff]  }
  0x52   :  { %1714 = vst [vmem:[%s2439_s3 + $0xd0] sm:$0xff] %v1439_v36   ;;  %v591_v44 = vmax.f32 %v463_v38, 0.0  ;;  %v1173_v45 = vunpack.c.h.bf16 %v1655_v26  ;;  %v334_v46 = vmul.f32 %v1782_v1, %v1172_v39  ;;  %v1176_v47 = vunpack.c.l.bf16 %v1656_v35 }
  0x53   :  { %v1444_v49 = vpack.c.bf16 %v717_v40, %v716_v37  ;;  %v718_v50 = vmin.f32 %v590_v41, 20.0  ;;  %v465_v51 = vadd.f32 %v1787_v4, %v333_v42  ;;  %v592_v52 = vmax.f32 %v464_v43, 0.0 }
  0x54   :  { %v719_v53 = vmin.f32 %v591_v44, 20.0  ;;  %v335_v54 = vmul.f32 %v1782_v1, %v1173_v45  ;;  %v466_v55 = vadd.f32 %v1787_v4, %v334_v46  ;;  %v1177_v56 = vunpack.c.h.bf16 %v1656_v35 }
  0x55   :  { %1715 = vst [vmem:[%s2439_s3 + $0xd8] sm:$0xff] %v1444_v49   ;;  %v593_v57 = vmax.f32 %v465_v51, 0.0  ;;  %v720_v58 = vmin.f32 %v592_v52, 20.0  ;;  %v336_v59 = vmul.f32 %v1782_v1, %v1176_v47  ;;  %v1180_v60 = vunpack.c.l.bf16 %v1657_v48  ;;  %v1662_v47 = vld [vmem:[%s2436_s0 + $0x128] sm:$0xff]  }
  0x56   :  { %v1449_v62 = vpack.c.bf16 %v719_v53, %v718_v50  ;;  %v467_v63 = vadd.f32 %v1787_v4, %v335_v54  ;;  %v594_v0 = vmax.f32 %v466_v55, 0.0  ;;  %v337_v2 = vmul.f32 %v1782_v1, %v1177_v56 }
  0x57   :  { %v721_v3 = vmin.f32 %v593_v57, 20.0  ;;  %v468_v5 = vadd.f32 %v1787_v4, %v336_v59  ;;  %v1181_v6 = vunpack.c.h.bf16 %v1657_v48  ;;  %v338_v7 = vmul.f32 %v1782_v1, %v1180_v60  ;;  %v1663_v60 = vld [vmem:[%s2436_s0 + $0x130] sm:$0xff]  }
  0x58   :  { %1716 = vst [vmem:[%s2439_s3 + $0xe0] sm:$0xff] %v1449_v62   ;;  %v595_v8 = vmax.f32 %v467_v63, 0.0  ;;  %v722_v9 = vmin.f32 %v594_v0, 20.0  ;;  %v469_v10 = vadd.f32 %v1787_v4, %v337_v2  ;;  %v1184_v11 = vunpack.c.l.bf16 %v1658_v61 }
  0x59   :  { %v1454_v13 = vpack.c.bf16 %v721_v3, %v720_v58  ;;  %v596_v14 = vmax.f32 %v468_v5, 0.0  ;;  %v339_v15 = vmul.f32 %v1782_v1, %v1181_v6  ;;  %v470_v16 = vadd.f32 %v1787_v4, %v338_v7 }
  0x5a   :  { %v723_v17 = vmin.f32 %v595_v8, 20.0  ;;  %v597_v18 = vmax.f32 %v469_v10, 0.0  ;;  %v1185_v19 = vunpack.c.h.bf16 %v1658_v61  ;;  %v340_v20 = vmul.f32 %v1782_v1, %v1184_v11  ;;  %v1664_v11 = vld [vmem:[%s2436_s0 + $0x138] sm:$0xff]  }
  0x5b   :  { %1717 = vst [vmem:[%s2439_s3 + $0xe8] sm:$0xff] %v1454_v13   ;;  %v724_v21 = vmin.f32 %v596_v14, 20.0  ;;  %v471_v22 = vadd.f32 %v1787_v4, %v339_v15  ;;  %v598_v23 = vmax.f32 %v470_v16, 0.0  ;;  %v1188_v24 = vunpack.c.l.bf16 %v1659_v12 }
  0x5c   :  { %v1459_v26 = vpack.c.bf16 %v723_v17, %v722_v9  ;;  %v725_v27 = vmin.f32 %v597_v18, 20.0  ;;  %v341_v28 = vmul.f32 %v1782_v1, %v1185_v19  ;;  %v472_v29 = vadd.f32 %v1787_v4, %v340_v20  ;;  %v1665_v20 = vld [vmem:[%s2436_s0 + $0x140] sm:$0xff]  }
  0x5d   :  { %v599_v30 = vmax.f32 %v471_v22, 0.0  ;;  %v726_v31 = vmin.f32 %v598_v23, 20.0  ;;  %v1189_v32 = vunpack.c.h.bf16 %v1659_v12  ;;  %v342_v33 = vmul.f32 %v1782_v1, %v1188_v24 }
  0x5e   :  { %1718 = vst [vmem:[%s2439_s3 + $0xf0] sm:$0xff] %v1459_v26   ;;  %v1464_v35 = vpack.c.bf16 %v725_v27, %v724_v21  ;;  %v473_v36 = vadd.f32 %v1787_v4, %v341_v28  ;;  %v600_v37 = vmax.f32 %v472_v29, 0.0  ;;  %v1192_v38 = vunpack.c.l.bf16 %v1660_v25 }
  0x5f   :  { %v727_v39 = vmin.f32 %v599_v30, 20.0  ;;  %v343_v40 = vmul.f32 %v1782_v1, %v1189_v32  ;;  %v474_v41 = vadd.f32 %v1787_v4, %v342_v33  ;;  %v1193_v42 = vunpack.c.h.bf16 %v1660_v25  ;;  %v1666_v33 = vld [vmem:[%s2436_s0 + $0x148] sm:$0xff]  }
  0x60   :  { %1719 = vst [vmem:[%s2439_s3 + $0xf8] sm:$0xff] %v1464_v35   ;;  %v601_v43 = vmax.f32 %v473_v36, 0.0  ;;  %v728_v44 = vmin.f32 %v600_v37, 20.0  ;;  %v344_v45 = vmul.f32 %v1782_v1, %v1192_v38  ;;  %v1196_v46 = vunpack.c.l.bf16 %v1661_v34 }
  0x61   :  { %v1469_v48 = vpack.c.bf16 %v727_v39, %v726_v31  ;;  %v475_v49 = vadd.f32 %v1787_v4, %v343_v40  ;;  %v602_v50 = vmax.f32 %v474_v41, 0.0  ;;  %v345_v51 = vmul.f32 %v1782_v1, %v1193_v42  ;;  %v2182_v41 = vld [vmem:[%s2437_s1] ss:$0 sm:$0xff] }
  0x62   :  { %v729_v52 = vmin.f32 %v601_v43, 20.0  ;;  %v476_v53 = vadd.f32 %v1787_v4, %v344_v45  ;;  %v1197_v54 = vunpack.c.h.bf16 %v1661_v34  ;;  %v346_v55 = vmul.f32 %v1782_v1, %v1196_v46  ;;  %v1667_v46 = vld [vmem:[%s2436_s0 + $0x150] sm:$0xff]  }
  0x63   :  { %1720 = vst [vmem:[%s2439_s3 + $0x100] sm:$0xff] %v1469_v48   ;;  %v603_v56 = vmax.f32 %v475_v49, 0.0  ;;  %v730_v57 = vmin.f32 %v602_v50, 20.0  ;;  %v477_v58 = vadd.f32 %v1787_v4, %v345_v51  ;;  %v1200_v59 = vunpack.c.l.bf16 %v1662_v47 }
  0x64   :  { %v1474_v61 = vpack.c.bf16 %v729_v52, %v728_v44  ;;  %v604_v62 = vmax.f32 %v476_v53, 0.0  ;;  %v347_v63 = vmul.f32 %v1782_v1, %v1197_v54  ;;  %v478_v0 = vadd.f32 %v1787_v4, %v346_v55 }
  0x65   :  { %v731_v2 = vmin.f32 %v603_v56, 20.0  ;;  %v605_v3 = vmax.f32 %v477_v58, 0.0  ;;  %v1201_v5 = vunpack.c.h.bf16 %v1662_v47  ;;  %v348_v6 = vmul.f32 %v1782_v1, %v1200_v59  ;;  %v1668_v59 = vld [vmem:[%s2436_s0 + $0x158] sm:$0xff]  }
  0x66   :  { %1721 = vst [vmem:[%s2439_s3 + $0x108] sm:$0xff] %v1474_v61   ;;  %v732_v7 = vmin.f32 %v604_v62, 20.0  ;;  %v479_v8 = vadd.f32 %v1787_v4, %v347_v63  ;;  %v606_v9 = vmax.f32 %v478_v0, 0.0  ;;  %v1204_v10 = vunpack.c.l.bf16 %v1663_v60 }
  0x67   :  { %v1479_v12 = vpack.c.bf16 %v731_v2, %v730_v57  ;;  %v733_v13 = vmin.f32 %v605_v3, 20.0  ;;  %v349_v14 = vmul.f32 %v1782_v1, %v1201_v5  ;;  %v480_v15 = vadd.f32 %v1787_v4, %v348_v6  ;;  %v1669_v6 = vld [vmem:[%s2436_s0 + $0x160] sm:$0xff]  }
  0x68   :  { %v607_v16 = vmax.f32 %v479_v8, 0.0  ;;  %v734_v17 = vmin.f32 %v606_v9, 20.0  ;;  %v1205_v18 = vunpack.c.h.bf16 %v1663_v60  ;;  %v350_v19 = vmul.f32 %v1782_v1, %v1204_v10 }
  0x69   :  { %1722 = vst [vmem:[%s2439_s3 + $0x110] sm:$0xff] %v1479_v12   ;;  %v1484_v21 = vpack.c.bf16 %v733_v13, %v732_v7  ;;  %v481_v22 = vadd.f32 %v1787_v4, %v349_v14  ;;  %v608_v23 = vmax.f32 %v480_v15, 0.0  ;;  %v1208_v24 = vunpack.c.l.bf16 %v1664_v11 }
  0x6a   :  { %v735_v25 = vmin.f32 %v607_v16, 20.0  ;;  %v351_v26 = vmul.f32 %v1782_v1, %v1205_v18  ;;  %v482_v27 = vadd.f32 %v1787_v4, %v350_v19  ;;  %v1209_v28 = vunpack.c.h.bf16 %v1664_v11  ;;  %v1670_v19 = vld [vmem:[%s2436_s0 + $0x168] sm:$0xff]  }
  0x6b   :  { %1723 = vst [vmem:[%s2439_s3 + $0x118] sm:$0xff] %v1484_v21   ;;  %v609_v29 = vmax.f32 %v481_v22, 0.0  ;;  %v736_v30 = vmin.f32 %v608_v23, 20.0  ;;  %v352_v31 = vmul.f32 %v1782_v1, %v1208_v24  ;;  %v1212_v32 = vunpack.c.l.bf16 %v1665_v20 }
  0x6c   :  { %v1489_v34 = vpack.c.bf16 %v735_v25, %v734_v17  ;;  %v483_v35 = vadd.f32 %v1787_v4, %v351_v26  ;;  %v610_v36 = vmax.f32 %v482_v27, 0.0  ;;  %v353_v37 = vmul.f32 %v1782_v1, %v1209_v28  ;;  %v2191_v1 = vld [vmem:[%s2438_s2] ss:$0 sm:$0xff] }
  0x6d   :  { %v737_v38 = vmin.f32 %v609_v29, 20.0  ;;  %v484_v39 = vadd.f32 %v1787_v4, %v352_v31  ;;  %v1213_v40 = vunpack.c.h.bf16 %v1665_v20  ;;  %v354_v42 = vmul.f32 %v2182_v41, %v1212_v32  ;;  %v1671_v32 = vld [vmem:[%s2436_s0 + $0x170] sm:$0xff]  }
  0x6e   :  { %1724 = vst [vmem:[%s2439_s3 + $0x120] sm:$0xff] %v1489_v34   ;;  %v611_v43 = vmax.f32 %v483_v35, 0.0  ;;  %v738_v44 = vmin.f32 %v610_v36, 20.0  ;;  %v485_v4 = vadd.f32 %v2191_v1, %v353_v37  ;;  %v1216_v45 = vunpack.c.l.bf16 %v1666_v33 }
  0x6f   :  { %v1494_v47 = vpack.c.bf16 %v737_v38, %v736_v30  ;;  %v612_v48 = vmax.f32 %v484_v39, 0.0  ;;  %v355_v49 = vmul.f32 %v2182_v41, %v1213_v40  ;;  %v486_v50 = vadd.f32 %v2191_v1, %v354_v42 }
  0x70   :  { %v739_v51 = vmin.f32 %v611_v43, 20.0  ;;  %v613_v52 = vmax.f32 %v485_v4, 0.0  ;;  %v1217_v53 = vunpack.c.h.bf16 %v1666_v33  ;;  %v356_v54 = vmul.f32 %v2182_v41, %v1216_v45  ;;  %v1672_v45 = vld [vmem:[%s2436_s0 + $0x178] sm:$0xff]  }
  0x71   :  { %1725 = vst [vmem:[%s2439_s3 + $0x128] sm:$0xff] %v1494_v47   ;;  %v740_v55 = vmin.f32 %v612_v48, 20.0  ;;  %v487_v56 = vadd.f32 %v2191_v1, %v355_v49  ;;  %v614_v57 = vmax.f32 %v486_v50, 0.0  ;;  %v1220_v58 = vunpack.c.l.bf16 %v1667_v46 }
  0x72   :  { %v1499_v60 = vpack.c.bf16 %v739_v51, %v738_v44  ;;  %v741_v61 = vmin.f32 %v613_v52, 20.0  ;;  %v357_v62 = vmul.f32 %v2182_v41, %v1217_v53  ;;  %v488_v63 = vadd.f32 %v2191_v1, %v356_v54  ;;  %v1673_v54 = vld [vmem:[%s2436_s0 + $0x180] sm:$0xff]  }
  0x73   :  { %v615_v0 = vmax.f32 %v487_v56, 0.0  ;;  %v742_v2 = vmin.f32 %v614_v57, 20.0  ;;  %v1221_v3 = vunpack.c.h.bf16 %v1667_v46  ;;  %v358_v5 = vmul.f32 %v2182_v41, %v1220_v58 }
  0x74   :  { %1726 = vst [vmem:[%s2439_s3 + $0x130] sm:$0xff] %v1499_v60   ;;  %v1504_v7 = vpack.c.bf16 %v741_v61, %v740_v55  ;;  %v489_v8 = vadd.f32 %v2191_v1, %v357_v62  ;;  %v616_v9 = vmax.f32 %v488_v63, 0.0  ;;  %v1224_v10 = vunpack.c.l.bf16 %v1668_v59 }
  0x75   :  { %v743_v11 = vmin.f32 %v615_v0, 20.0  ;;  %v359_v12 = vmul.f32 %v2182_v41, %v1221_v3  ;;  %v490_v13 = vadd.f32 %v2191_v1, %v358_v5  ;;  %v1225_v14 = vunpack.c.h.bf16 %v1668_v59  ;;  %v1674_v5 = vld [vmem:[%s2436_s0 + $0x188] sm:$0xff]  }
  0x76   :  { %1727 = vst [vmem:[%s2439_s3 + $0x138] sm:$0xff] %v1504_v7   ;;  %v617_v15 = vmax.f32 %v489_v8, 0.0  ;;  %v744_v16 = vmin.f32 %v616_v9, 20.0  ;;  %v360_v17 = vmul.f32 %v2182_v41, %v1224_v10  ;;  %v1228_v18 = vunpack.c.l.bf16 %v1669_v6 }
  0x77   :  { %v1509_v20 = vpack.c.bf16 %v743_v11, %v742_v2  ;;  %v491_v21 = vadd.f32 %v2191_v1, %v359_v12  ;;  %v618_v22 = vmax.f32 %v490_v13, 0.0  ;;  %v361_v23 = vmul.f32 %v2182_v41, %v1225_v14 }
  0x78   :  { %v745_v24 = vmin.f32 %v617_v15, 20.0  ;;  %v492_v25 = vadd.f32 %v2191_v1, %v360_v17  ;;  %v1229_v26 = vunpack.c.h.bf16 %v1669_v6  ;;  %v362_v27 = vmul.f32 %v2182_v41, %v1228_v18  ;;  %v1675_v18 = vld [vmem:[%s2436_s0 + $0x190] sm:$0xff]  }
  0x79   :  { %1728 = vst [vmem:[%s2439_s3 + $0x140] sm:$0xff] %v1509_v20   ;;  %v619_v28 = vmax.f32 %v491_v21, 0.0  ;;  %v746_v29 = vmin.f32 %v618_v22, 20.0  ;;  %v493_v30 = vadd.f32 %v2191_v1, %v361_v23  ;;  %v1232_v31 = vunpack.c.l.bf16 %v1670_v19 }
  0x7a   :  { %v1514_v33 = vpack.c.bf16 %v745_v24, %v744_v16  ;;  %v620_v34 = vmax.f32 %v492_v25, 0.0  ;;  %v363_v35 = vmul.f32 %v2182_v41, %v1229_v26  ;;  %v494_v36 = vadd.f32 %v2191_v1, %v362_v27 }
  0x7b   :  { %v747_v37 = vmin.f32 %v619_v28, 20.0  ;;  %v621_v38 = vmax.f32 %v493_v30, 0.0  ;;  %v1233_v39 = vunpack.c.h.bf16 %v1670_v19  ;;  %v364_v40 = vmul.f32 %v2182_v41, %v1232_v31  ;;  %v1676_v31 = vld [vmem:[%s2436_s0 + $0x198] sm:$0xff]  }
  0x7c   :  { %1729 = vst [vmem:[%s2439_s3 + $0x148] sm:$0xff] %v1514_v33   ;;  %v748_v42 = vmin.f32 %v620_v34, 20.0  ;;  %v495_v43 = vadd.f32 %v2191_v1, %v363_v35  ;;  %v622_v44 = vmax.f32 %v494_v36, 0.0  ;;  %v1236_v4 = vunpack.c.l.bf16 %v1671_v32 }
  0x7d   :  { %v1519_v46 = vpack.c.bf16 %v747_v37, %v746_v29  ;;  %v749_v47 = vmin.f32 %v621_v38, 20.0  ;;  %v365_v48 = vmul.f32 %v2182_v41, %v1233_v39  ;;  %v496_v49 = vadd.f32 %v2191_v1, %v364_v40  ;;  %v1677_v40 = vld [vmem:[%s2436_s0 + $0x1a0] sm:$0xff]  }
  0x7e   :  { %v623_v50 = vmax.f32 %v495_v43, 0.0  ;;  %v750_v51 = vmin.f32 %v622_v44, 20.0  ;;  %v1237_v52 = vunpack.c.h.bf16 %v1671_v32  ;;  %v366_v53 = vmul.f32 %v2182_v41, %v1236_v4 }
  0x7f   :  { %1730 = vst [vmem:[%s2439_s3 + $0x150] sm:$0xff] %v1519_v46   ;;  %v1524_v55 = vpack.c.bf16 %v749_v47, %v748_v42  ;;  %v497_v56 = vadd.f32 %v2191_v1, %v365_v48  ;;  %v624_v57 = vmax.f32 %v496_v49, 0.0  ;;  %v1240_v58 = vunpack.c.l.bf16 %v1672_v45 }
  0x80   :  { %v751_v59 = vmin.f32 %v623_v50, 20.0  ;;  %v367_v60 = vmul.f32 %v2182_v41, %v1237_v52  ;;  %v498_v61 = vadd.f32 %v2191_v1, %v366_v53  ;;  %v1241_v62 = vunpack.c.h.bf16 %v1672_v45  ;;  %v1678_v53 = vld [vmem:[%s2436_s0 + $0x1a8] sm:$0xff]  }
  0x81   :  { %1731 = vst [vmem:[%s2439_s3 + $0x158] sm:$0xff] %v1524_v55   ;;  %v625_v63 = vmax.f32 %v497_v56, 0.0  ;;  %v752_v0 = vmin.f32 %v624_v57, 20.0  ;;  %v368_v2 = vmul.f32 %v2182_v41, %v1240_v58  ;;  %v1244_v3 = vunpack.c.l.bf16 %v1673_v54 }
  0x82   :  { %v1529_v6 = vpack.c.bf16 %v751_v59, %v750_v51  ;;  %v499_v7 = vadd.f32 %v2191_v1, %v367_v60  ;;  %v626_v8 = vmax.f32 %v498_v61, 0.0  ;;  %v369_v9 = vmul.f32 %v2182_v41, %v1241_v62 }
  0x83   :  { %v753_v10 = vmin.f32 %v625_v63, 20.0  ;;  %v500_v11 = vadd.f32 %v2191_v1, %v368_v2  ;;  %v1245_v12 = vunpack.c.h.bf16 %v1673_v54  ;;  %v370_v13 = vmul.f32 %v2182_v41, %v1244_v3  ;;  %v1679_v3 = vld [vmem:[%s2436_s0 + $0x1b0] sm:$0xff]  }
  0x84   :  { %1732 = vst [vmem:[%s2439_s3 + $0x160] sm:$0xff] %v1529_v6   ;;  %v627_v14 = vmax.f32 %v499_v7, 0.0  ;;  %v754_v15 = vmin.f32 %v626_v8, 20.0  ;;  %v501_v16 = vadd.f32 %v2191_v1, %v369_v9  ;;  %v1248_v17 = vunpack.c.l.bf16 %v1674_v5 }
  0x85   :  { %v1534_v19 = vpack.c.bf16 %v753_v10, %v752_v0  ;;  %v628_v20 = vmax.f32 %v500_v11, 0.0  ;;  %v371_v21 = vmul.f32 %v2182_v41, %v1245_v12  ;;  %v502_v22 = vadd.f32 %v2191_v1, %v370_v13 }
  0x86   :  { %v755_v23 = vmin.f32 %v627_v14, 20.0  ;;  %v629_v24 = vmax.f32 %v501_v16, 0.0  ;;  %v1249_v25 = vunpack.c.h.bf16 %v1674_v5  ;;  %v372_v26 = vmul.f32 %v2182_v41, %v1248_v17  ;;  %v1680_v17 = vld [vmem:[%s2436_s0 + $0x1b8] sm:$0xff]  }
  0x87   :  { %1733 = vst [vmem:[%s2439_s3 + $0x168] sm:$0xff] %v1534_v19   ;;  %v756_v27 = vmin.f32 %v628_v20, 20.0  ;;  %v503_v28 = vadd.f32 %v2191_v1, %v371_v21  ;;  %v630_v29 = vmax.f32 %v502_v22, 0.0  ;;  %v1252_v30 = vunpack.c.l.bf16 %v1675_v18 }
  0x88   :  { %v1539_v32 = vpack.c.bf16 %v755_v23, %v754_v15  ;;  %v757_v33 = vmin.f32 %v629_v24, 20.0  ;;  %v373_v34 = vmul.f32 %v2182_v41, %v1249_v25  ;;  %v504_v35 = vadd.f32 %v2191_v1, %v372_v26  ;;  %v1681_v26 = vld [vmem:[%s2436_s0 + $0x1c0] sm:$0xff]  }
  0x89   :  { %v631_v36 = vmax.f32 %v503_v28, 0.0  ;;  %v758_v37 = vmin.f32 %v630_v29, 20.0  ;;  %v1253_v38 = vunpack.c.h.bf16 %v1675_v18  ;;  %v374_v39 = vmul.f32 %v2182_v41, %v1252_v30 }
  0x8a   :  { %1734 = vst [vmem:[%s2439_s3 + $0x170] sm:$0xff] %v1539_v32   ;;  %v1544_v42 = vpack.c.bf16 %v757_v33, %v756_v27  ;;  %v505_v43 = vadd.f32 %v2191_v1, %v373_v34  ;;  %v632_v44 = vmax.f32 %v504_v35, 0.0  ;;  %v1256_v4 = vunpack.c.l.bf16 %v1676_v31 }
  0x8b   :  { %v759_v45 = vmin.f32 %v631_v36, 20.0  ;;  %v375_v46 = vmul.f32 %v2182_v41, %v1253_v38  ;;  %v506_v47 = vadd.f32 %v2191_v1, %v374_v39  ;;  %v1257_v48 = vunpack.c.h.bf16 %v1676_v31  ;;  %v1682_v39 = vld [vmem:[%s2436_s0 + $0x1c8] sm:$0xff]  }
  0x8c   :  { %1735 = vst [vmem:[%s2439_s3 + $0x178] sm:$0xff] %v1544_v42   ;;  %v633_v49 = vmax.f32 %v505_v43, 0.0  ;;  %v760_v50 = vmin.f32 %v632_v44, 20.0  ;;  %v376_v51 = vmul.f32 %v2182_v41, %v1256_v4  ;;  %v1260_v52 = vunpack.c.l.bf16 %v1677_v40 }
  0x8d   :  { %v1549_v54 = vpack.c.bf16 %v759_v45, %v758_v37  ;;  %v507_v55 = vadd.f32 %v2191_v1, %v375_v46  ;;  %v634_v56 = vmax.f32 %v506_v47, 0.0  ;;  %v377_v57 = vmul.f32 %v2182_v41, %v1257_v48 }
  0x8e   :  { %v761_v58 = vmin.f32 %v633_v49, 20.0  ;;  %v508_v59 = vadd.f32 %v2191_v1, %v376_v51  ;;  %v1261_v60 = vunpack.c.h.bf16 %v1677_v40  ;;  %v378_v61 = vmul.f32 %v2182_v41, %v1260_v52  ;;  %v1683_v52 = vld [vmem:[%s2436_s0 + $0x1d0] sm:$0xff]  }
  0x8f   :  { %1736 = vst [vmem:[%s2439_s3 + $0x180] sm:$0xff] %v1549_v54   ;;  %v635_v62 = vmax.f32 %v507_v55, 0.0  ;;  %v762_v63 = vmin.f32 %v634_v56, 20.0  ;;  %v509_v0 = vadd.f32 %v2191_v1, %v377_v57  ;;  %v1264_v2 = vunpack.c.l.bf16 %v1678_v53 }
  0x90   :  { %v1554_v5 = vpack.c.bf16 %v761_v58, %v760_v50  ;;  %v636_v6 = vmax.f32 %v508_v59, 0.0  ;;  %v379_v7 = vmul.f32 %v2182_v41, %v1261_v60  ;;  %v510_v8 = vadd.f32 %v2191_v1, %v378_v61 }
  0x91   :  { %v763_v9 = vmin.f32 %v635_v62, 20.0  ;;  %v637_v10 = vmax.f32 %v509_v0, 0.0  ;;  %v1265_v11 = vunpack.c.h.bf16 %v1678_v53  ;;  %v380_v12 = vmul.f32 %v2182_v41, %v1264_v2  ;;  %v1684_v2 = vld [vmem:[%s2436_s0 + $0x1d8] sm:$0xff]  }
  0x92   :  { %1737 = vst [vmem:[%s2439_s3 + $0x188] sm:$0xff] %v1554_v5   ;;  %v764_v13 = vmin.f32 %v636_v6, 20.0  ;;  %v511_v14 = vadd.f32 %v2191_v1, %v379_v7  ;;  %v638_v15 = vmax.f32 %v510_v8, 0.0  ;;  %v1268_v16 = vunpack.c.l.bf16 %v1679_v3 }
  0x93   :  { %v1559_v18 = vpack.c.bf16 %v763_v9, %v762_v63  ;;  %v765_v19 = vmin.f32 %v637_v10, 20.0  ;;  %v381_v20 = vmul.f32 %v2182_v41, %v1265_v11  ;;  %v512_v21 = vadd.f32 %v2191_v1, %v380_v12  ;;  %v1685_v12 = vld [vmem:[%s2436_s0 + $0x1e0] sm:$0xff]  }
  0x94   :  { %v639_v22 = vmax.f32 %v511_v14, 0.0  ;;  %v766_v23 = vmin.f32 %v638_v15, 20.0  ;;  %v1269_v24 = vunpack.c.h.bf16 %v1679_v3  ;;  %v382_v25 = vmul.f32 %v2182_v41, %v1268_v16 }
  0x95   :  { %1738 = vst [vmem:[%s2439_s3 + $0x190] sm:$0xff] %v1559_v18   ;;  %v1564_v27 = vpack.c.bf16 %v765_v19, %v764_v13  ;;  %v513_v28 = vadd.f32 %v2191_v1, %v381_v20  ;;  %v640_v29 = vmax.f32 %v512_v21, 0.0  ;;  %v1272_v30 = vunpack.c.l.bf16 %v1680_v17 }
  0x96   :  { %v767_v31 = vmin.f32 %v639_v22, 20.0  ;;  %v383_v32 = vmul.f32 %v2182_v41, %v1269_v24  ;;  %v514_v33 = vadd.f32 %v2191_v1, %v382_v25  ;;  %v1273_v34 = vunpack.c.h.bf16 %v1680_v17  ;;  %v1686_v25 = vld [vmem:[%s2436_s0 + $0x1e8] sm:$0xff]  }
  0x97   :  { %1739 = vst [vmem:[%s2439_s3 + $0x198] sm:$0xff] %v1564_v27   ;;  %v641_v35 = vmax.f32 %v513_v28, 0.0  ;;  %v768_v36 = vmin.f32 %v640_v29, 20.0  ;;  %v384_v37 = vmul.f32 %v2182_v41, %v1272_v30  ;;  %v1276_v38 = vunpack.c.l.bf16 %v1681_v26 }
  0x98   :  { %v1569_v40 = vpack.c.bf16 %v767_v31, %v766_v23  ;;  %v515_v42 = vadd.f32 %v2191_v1, %v383_v32  ;;  %v642_v43 = vmax.f32 %v514_v33, 0.0  ;;  %v385_v44 = vmul.f32 %v2182_v41, %v1273_v34 }
  0x99   :  { %v769_v4 = vmin.f32 %v641_v35, 20.0  ;;  %v516_v45 = vadd.f32 %v2191_v1, %v384_v37  ;;  %v1277_v46 = vunpack.c.h.bf16 %v1681_v26  ;;  %v386_v47 = vmul.f32 %v2182_v41, %v1276_v38  ;;  %v1687_v38 = vld [vmem:[%s2436_s0 + $0x1f0] sm:$0xff]  }
  0x9a   :  { %1740 = vst [vmem:[%s2439_s3 + $0x1a0] sm:$0xff] %v1569_v40   ;;  %v643_v48 = vmax.f32 %v515_v42, 0.0  ;;  %v770_v49 = vmin.f32 %v642_v43, 20.0  ;;  %v517_v50 = vadd.f32 %v2191_v1, %v385_v44  ;;  %v1280_v51 = vunpack.c.l.bf16 %v1682_v39 }
  0x9b   :  { %v1574_v53 = vpack.c.bf16 %v769_v4, %v768_v36  ;;  %v644_v54 = vmax.f32 %v516_v45, 0.0  ;;  %v387_v55 = vmul.f32 %v2182_v41, %v1277_v46  ;;  %v518_v56 = vadd.f32 %v2191_v1, %v386_v47 }
  0x9c   :  { %v771_v57 = vmin.f32 %v643_v48, 20.0  ;;  %v645_v58 = vmax.f32 %v517_v50, 0.0  ;;  %v1281_v59 = vunpack.c.h.bf16 %v1682_v39  ;;  %v388_v60 = vmul.f32 %v2182_v41, %v1280_v51  ;;  %v1688_v51 = vld [vmem:[%s2436_s0 + $0x1f8] sm:$0xff]  }
  0x9d   :  { %1741 = vst [vmem:[%s2439_s3 + $0x1a8] sm:$0xff] %v1574_v53   ;;  %v772_v61 = vmin.f32 %v644_v54, 20.0  ;;  %v519_v62 = vadd.f32 %v2191_v1, %v387_v55  ;;  %v646_v63 = vmax.f32 %v518_v56, 0.0  ;;  %v1284_v0 = vunpack.c.l.bf16 %v1683_v52 }
  0x9e   :  { %v1579_v3 = vpack.c.bf16 %v771_v57, %v770_v49  ;;  %v773_v5 = vmin.f32 %v645_v58, 20.0  ;;  %v389_v6 = vmul.f32 %v2182_v41, %v1281_v59  ;;  %v520_v7 = vadd.f32 %v2191_v1, %v388_v60 }
  0x9f   :  { %v647_v8 = vmax.f32 %v519_v62, 0.0  ;;  %v774_v9 = vmin.f32 %v646_v63, 20.0  ;;  %v1285_v10 = vunpack.c.h.bf16 %v1683_v52  ;;  %v390_v11 = vmul.f32 %v2182_v41, %v1284_v0 }
  0xa0   :  { %1742 = vst [vmem:[%s2439_s3 + $0x1b0] sm:$0xff] %v1579_v3   ;;  %v1584_v13 = vpack.c.bf16 %v773_v5, %v772_v61  ;;  %v521_v14 = vadd.f32 %v2191_v1, %v389_v6  ;;  %v648_v15 = vmax.f32 %v520_v7, 0.0  ;;  %v1288_v16 = vunpack.c.l.bf16 %v1684_v2 }
  0xa1   :  { %v775_v17 = vmin.f32 %v647_v8, 20.0  ;;  %v391_v18 = vmul.f32 %v2182_v41, %v1285_v10  ;;  %v522_v19 = vadd.f32 %v2191_v1, %v390_v11  ;;  %v1289_v20 = vunpack.c.h.bf16 %v1684_v2 }
  0xa2   :  { %1743 = vst [vmem:[%s2439_s3 + $0x1b8] sm:$0xff] %v1584_v13   ;;  %v649_v21 = vmax.f32 %v521_v14, 0.0  ;;  %v776_v22 = vmin.f32 %v648_v15, 20.0  ;;  %v392_v23 = vmul.f32 %v2182_v41, %v1288_v16  ;;  %v1292_v24 = vunpack.c.l.bf16 %v1685_v12 }
  0xa3   :  { %v1589_v26 = vpack.c.bf16 %v775_v17, %v774_v9  ;;  %v523_v27 = vadd.f32 %v2191_v1, %v391_v18  ;;  %v650_v28 = vmax.f32 %v522_v19, 0.0  ;;  %v393_v29 = vmul.f32 %v2182_v41, %v1289_v20 }
  0xa4   :  { %v777_v30 = vmin.f32 %v649_v21, 20.0  ;;  %v524_v31 = vadd.f32 %v2191_v1, %v392_v23  ;;  %v1293_v32 = vunpack.c.h.bf16 %v1685_v12  ;;  %v394_v33 = vmul.f32 %v2182_v41, %v1292_v24 }
  0xa5   :  { %1744 = vst [vmem:[%s2439_s3 + $0x1c0] sm:$0xff] %v1589_v26   ;;  %v651_v34 = vmax.f32 %v523_v27, 0.0  ;;  %v778_v35 = vmin.f32 %v650_v28, 20.0  ;;  %v525_v36 = vadd.f32 %v2191_v1, %v393_v29  ;;  %v1296_v37 = vunpack.c.l.bf16 %v1686_v25 }
  0xa6   :  { %v1594_v39 = vpack.c.bf16 %v777_v30, %v776_v22  ;;  %v652_v40 = vmax.f32 %v524_v31, 0.0  ;;  %v395_v42 = vmul.f32 %v2182_v41, %v1293_v32  ;;  %v526_v43 = vadd.f32 %v2191_v1, %v394_v33 }
  0xa7   :  { %v779_v44 = vmin.f32 %v651_v34, 20.0  ;;  %v653_v4 = vmax.f32 %v525_v36, 0.0  ;;  %v1297_v45 = vunpack.c.h.bf16 %v1686_v25  ;;  %v396_v46 = vmul.f32 %v2182_v41, %v1296_v37 }
  0xa8   :  { %1745 = vst [vmem:[%s2439_s3 + $0x1c8] sm:$0xff] %v1594_v39   ;;  %v780_v47 = vmin.f32 %v652_v40, 20.0  ;;  %v527_v48 = vadd.f32 %v2191_v1, %v395_v42  ;;  %v654_v49 = vmax.f32 %v526_v43, 0.0  ;;  %v1300_v50 = vunpack.c.l.bf16 %v1687_v38 }
  0xa9   :  { %v1599_v52 = vpack.c.bf16 %v779_v44, %v778_v35  ;;  %v781_v53 = vmin.f32 %v653_v4, 20.0  ;;  %v397_v54 = vmul.f32 %v2182_v41, %v1297_v45  ;;  %v528_v55 = vadd.f32 %v2191_v1, %v396_v46 }
  0xaa   :  { %v655_v56 = vmax.f32 %v527_v48, 0.0  ;;  %v782_v57 = vmin.f32 %v654_v49, 20.0  ;;  %v1301_v58 = vunpack.c.h.bf16 %v1687_v38  ;;  %v398_v59 = vmul.f32 %v2182_v41, %v1300_v50 }
  0xab   :  { %1746 = vst [vmem:[%s2439_s3 + $0x1d0] sm:$0xff] %v1599_v52   ;;  %v1604_v60 = vpack.c.bf16 %v781_v53, %v780_v47  ;;  %v529_v61 = vadd.f32 %v2191_v1, %v397_v54  ;;  %v656_v62 = vmax.f32 %v528_v55, 0.0  ;;  %v1304_v63 = vunpack.c.l.bf16 %v1688_v51 }
  0xac   :  { %v783_v0 = vmin.f32 %v655_v56, 20.0  ;;  %v399_v2 = vmul.f32 %v2182_v41, %v1301_v58  ;;  %v530_v3 = vadd.f32 %v2191_v1, %v398_v59  ;;  %v1305_v5 = vunpack.c.h.bf16 %v1688_v51 }
  0xad   :  { %1747 = vst [vmem:[%s2439_s3 + $0x1d8] sm:$0xff] %v1604_v60   ;;  %v657_v6 = vmax.f32 %v529_v61, 0.0  ;;  %v784_v7 = vmin.f32 %v656_v62, 20.0  ;;  %v400_v8 = vmul.f32 %v2182_v41, %v1304_v63 }
  0xae   :  { %v1609_v9 = vpack.c.bf16 %v783_v0, %v782_v57  ;;  %v531_v10 = vadd.f32 %v2191_v1, %v399_v2  ;;  %v658_v11 = vmax.f32 %v530_v3, 0.0  ;;  %v401_v12 = vmul.f32 %v2182_v41, %v1305_v5 }
  0xaf   :  { %v785_v13 = vmin.f32 %v657_v6, 20.0  ;;  %v532_v14 = vadd.f32 %v2191_v1, %v400_v8 }
  0xb0   :  { %1748 = vst [vmem:[%s2439_s3 + $0x1e0] sm:$0xff] %v1609_v9   ;;  %v659_v15 = vmax.f32 %v531_v10, 0.0  ;;  %v786_v16 = vmin.f32 %v658_v11, 20.0  ;;  %v533_v17 = vadd.f32 %v2191_v1, %v401_v12 }
  0xb1   :  { %v1614_v18 = vpack.c.bf16 %v785_v13, %v784_v7  ;;  %v660_v19 = vmax.f32 %v532_v14, 0.0 }
  0xb2   :  { %v787_v20 = vmin.f32 %v659_v15, 20.0  ;;  %v661_v21 = vmax.f32 %v533_v17, 0.0 }
  0xb3   :  { %1749 = vst [vmem:[%s2439_s3 + $0x1e8] sm:$0xff] %v1614_v18   ;;  %v788_v41 = vmin.f32 %v660_v19, 20.0 }
  0xb4   :  { %v1619_v22 = vpack.c.bf16 %v787_v20, %v786_v16  ;;  %v789_v23 = vmin.f32 %v661_v21, 20.0 }
  0xb6   :  { %1750 = vst [vmem:[%s2439_s3 + $0x1f0] sm:$0xff] %v1619_v22   ;;  %v1624_v24 = vpack.c.bf16 %v789_v23, %v788_v41 }
  0xb8   :  { %1751 = vst [vmem:[%s2439_s3 + $0x1f8] sm:$0xff] %v1624_v24  }

// kernel: deepspeech_forward.16
= control target key start
LH: loop header
LB: loop body
LE: loop exit
PB: predicated region body
PF: predicated region fallthrough
CT: control target
= control target key end

     0   :  { %s3551_s9 = smov 0   ;;  %s3553_s10 = smov 0   ;;  %s3979_s0 = inlined_call_operand.vmem [shape: bf16[1024,512], index: 0, kind: input, shape index: {}]   ;;  %s3980_s1 = inlined_call_operand.vmem [shape: bf16[512,128], index: 1, kind: input, shape index: {}]   ;;  %s3981_s2 = inlined_call_operand.vmem [shape: bf16[1024,128], index: 2, kind: output, shape index: {}]  }
   0x1   :  { %s3555_s11 = smov 0  }
   0x2 LB: > { %s31_s12 = sadd.s32 1, %s3530_s10  ;;  %p2488_p0 = scmp.ge.s32.totalorder %s3534_s11, 1  ;;  %s3534_s11 = sphi %s3555_s11, %s12_s11   ;;  %s3530_s10 = sphi %s3553_s10, %s3983_s10   ;;  %s3526_s9 = sphi %s3551_s9, %s3982_s9  }
   0x3   : > { %p33_p1 = scmp.ge.s32.totalorder %s31_s12, 2  ;;  %p158_p2 = scmp.lt.s32.totalorder %s3534_s11, 3 }
   0x5   : > { %s3985_s12 = smov (%p33_p1, %s31_s12), 0  ;;  %p159_p3 = pnand %p2488_p0, %p158_p2 }
   0x6   : > { %s2489_s13 = sshll.u32 (!%p159_p3), %s3526_s9, 6 }
   0x7   : > { %162 = sbr.rel (%p159_p3) target bundleno = 689 (0x2b1), region = 28  ;;  %p198_p4 = scmp.lt.s32.totalorder (!%p159_p3), %s2489_s13, 127 }
   0xc   : > { %v3272_v0 = vld [vmem:[%s3980_s1 + $0x38] sm:$0xff]  ;;  %v3271_v4 = vld [vmem:[%s3980_s1 + $0x30] sm:$0xff]  ;;  %v3270_v8 = vld [vmem:[%s3980_s1 + $0x28] sm:$0xff]  ;;  %s3987_s13 = smov (!%p198_p4, %s2489_s13), 127 }
   0xd   : > { %v3280_v1 = vld [vmem:[%s3980_s1 + $0x78] sm:$0xff]  ;;  %1382 = vmatpush.bf16.msra.mxu0 %v3272_v0  ;;  %v3279_v5 = vld [vmem:[%s3980_s1 + $0x70] sm:$0xff]  ;;  %v3278_v9 = vld [vmem:[%s3980_s1 + $0x68] sm:$0xff]  ;;  %s3136_s14 = sshll.u32 %s3987_s13, 4  ;;  %s2493_s5 = sshll.u32 %s3987_s13, 2 }
   0xe   : > { %v3288_v2 = vld [vmem:[%s3980_s1 + $0xb8] sm:$0xff]  ;;  %1551 = vmatpush.bf16.msra.mxu1 %v3280_v1  ;;  %v3287_v6 = vld [vmem:[%s3980_s1 + $0xb0] sm:$0xff]  ;;  %v3286_v10 = vld [vmem:[%s3980_s1 + $0xa8] sm:$0xff]  ;;  %s3656_s21 = scalar_lea.vmem %s3979_s0, %s3136_s14  ;;  %s3760_s8 = scalar_lea.vmem %s3981_s2, %s2493_s5 }
   0xf   : > { %v3296_v3 = vld [vmem:[%s3980_s1 + $0xf8] sm:$0xff]  ;;  %1720 = vmatpush.bf16.msra.mxu2 %v3288_v2  ;;  %v3295_v7 = vld [vmem:[%s3980_s1 + $0xf0] sm:$0xff]  ;;  %v3294_v11 = vld [vmem:[%s3980_s1 + $0xe8] sm:$0xff] }
  0x10   : > { %1889 = vmatpush.bf16.msra.mxu3 %v3296_v3  ;;  %v3269_v12 = vld [vmem:[%s3980_s1 + $0x20] sm:$0xff]  ;;  %v3268_v16 = vld [vmem:[%s3980_s1 + $0x18] sm:$0xff]  ;;  %v3267_v20 = vld [vmem:[%s3980_s1 + $0x10] sm:$0xff] }
  0x11   : > { %1383 = vmatpush.bf16.msra.mxu0 %v3271_v4  ;;  %v3277_v13 = vld [vmem:[%s3980_s1 + $0x60] sm:$0xff]  ;;  %v3276_v17 = vld [vmem:[%s3980_s1 + $0x58] sm:$0xff]  ;;  %v3275_v21 = vld [vmem:[%s3980_s1 + $0x50] sm:$0xff] }
  0x12   : > { %1552 = vmatpush.bf16.msra.mxu1 %v3279_v5  ;;  %v3285_v14 = vld [vmem:[%s3980_s1 + $0xa0] sm:$0xff]  ;;  %v3284_v18 = vld [vmem:[%s3980_s1 + $0x98] sm:$0xff]  ;;  %v3283_v22 = vld [vmem:[%s3980_s1 + $0x90] sm:$0xff] }
  0x13   : > { %1721 = vmatpush.bf16.msra.mxu2 %v3287_v6  ;;  %v3293_v15 = vld [vmem:[%s3980_s1 + $0xe0] sm:$0xff]  ;;  %v3292_v19 = vld [vmem:[%s3980_s1 + $0xd8] sm:$0xff]  ;;  %v3291_v23 = vld [vmem:[%s3980_s1 + $0xd0] sm:$0xff] }
  0x14   : > { %1890 = vmatpush.bf16.msra.mxu3 %v3295_v7  ;;  %v3266_v24 = vld [vmem:[%s3980_s1 + $0x8] sm:$0xff]  ;;  %v3265_v28 = vld [vmem:[%s3980_s1] sm:$0xff]  ;;  %v3139_v33 = vld [vmem:[%s3656_s21 + $0xc] sm:$0xf0] }
  0x15   : > { %1384 = vmatpush.bf16.msra.mxu0 %v3270_v8  ;;  %v3274_v25 = vld [vmem:[%s3980_s1 + $0x48] sm:$0xff]  ;;  %v3273_v29 = vld [vmem:[%s3980_s1 + $0x40] sm:$0xff]  ;;  %v2498_v35 = vld [vmem:[%s3656_s21 + $0x10] sm:$0xf0] }
  0x16   : > { %1553 = vmatpush.bf16.msra.mxu1 %v3278_v9  ;;  %v3282_v26 = vld [vmem:[%s3980_s1 + $0x88] sm:$0xff]  ;;  %v3281_v30 = vld [vmem:[%s3980_s1 + $0x80] sm:$0xff]  ;;  %v3140_v37 = vld [vmem:[%s3656_s21 + $0x14] sm:$0xf0] }
  0x17   : > { %1722 = vmatpush.bf16.msra.mxu2 %v3286_v10  ;;  %v3290_v27 = vld [vmem:[%s3980_s1 + $0xc8] sm:$0xff]  ;;  %v3289_v31 = vld [vmem:[%s3980_s1 + $0xc0] sm:$0xff]  ;;  %v2506_v39 = vld [vmem:[%s3656_s21 + $0x18] sm:$0xf0] }
  0x18   : > { %1891 = vmatpush.bf16.msra.mxu3 %v3294_v11  ;;  %v2496_v32 = vld [vmem:[%s3656_s21] sm:$0xf]  ;;  %v3137_v34 = vld [vmem:[%s3656_s21 + $0x4] sm:$0xf]  ;;  %v2504_v36 = vld [vmem:[%s3656_s21 + $0x8] sm:$0xf] }
  0x19   : > { %1385 = vmatpush.bf16.msra.mxu0 %v3269_v12  ;;  %v3138_v38 = vld [vmem:[%s3656_s21 + $0xc] sm:$0xf]  ;;  %v2497_v40 = vor.u32 %v3139_v33, %v2496_v32  ;;  %v2501_v41 = vor.u32 %v3137_v34, %v2498_v35  ;;  %v2505_v42 = vor.u32 %v3140_v37, %v2504_v36  ;;  %v2512_v44 = vld [vmem:[%s3656_s21 + $0x20] sm:$0xf]  ;;  %v3143_v45 = vld [vmem:[%s3656_s21 + $0x2c] sm:$0xf0] }
  0x1a   : > { %1554 = vmatpush.bf16.msra.mxu1 %v3277_v13  ;;  %v2509_v43 = vor.u32 %v3138_v38, %v2506_v39  ;;  %v3141_v46 = vld [vmem:[%s3656_s21 + $0x24] sm:$0xf]  ;;  %v2514_v47 = vld [vmem:[%s3656_s21 + $0x30] sm:$0xf0]  ;;  %v2520_v48 = vld [vmem:[%s3656_s21 + $0x28] sm:$0xf]  ;;  %v2513_v52 = vor.u32 %v3143_v45, %v2512_v44 }
  0x1b   : > { %1723 = vmatpush.bf16.msra.mxu2 %v3285_v14  ;;  %v3144_v49 = vld [vmem:[%s3656_s21 + $0x34] sm:$0xf0]  ;;  %v3142_v50 = vld [vmem:[%s3656_s21 + $0x2c] sm:$0xf]  ;;  %v2522_v51 = vld [vmem:[%s3656_s21 + $0x38] sm:$0xf0]  ;;  %v2517_v53 = vor.u32 %v3141_v46, %v2514_v47 }
  0x1c   : > { %1892 = vmatpush.bf16.msra.mxu3 %v3293_v15  ;;  %v2521_v54 = vor.u32 %v3144_v49, %v2520_v48  ;;  %v2525_v55 = vor.u32 %v3142_v50, %v2522_v51  ;;  %v2528_v56 = vld [vmem:[%s3656_s21 + $0x40] sm:$0xf]  ;;  %v3147_v57 = vld [vmem:[%s3656_s21 + $0x4c] sm:$0xf0]  ;;  %v3145_v58 = vld [vmem:[%s3656_s21 + $0x44] sm:$0xf] }
  0x1d   : > { %1386 = vmatpush.bf16.msra.mxu0 %v3268_v16  ;;  %v2530_v59 = vld [vmem:[%s3656_s21 + $0x50] sm:$0xf0]  ;;  %v2536_v60 = vld [vmem:[%s3656_s21 + $0x48] sm:$0xf]  ;;  %v3148_v61 = vld [vmem:[%s3656_s21 + $0x54] sm:$0xf0]  ;;  %v2529_v0 = vor.u32 %v3147_v57, %v2528_v56 }
  0x1e   : > { %1555 = vmatpush.bf16.msra.mxu1 %v3276_v17  ;;  %v3146_v62 = vld [vmem:[%s3656_s21 + $0x4c] sm:$0xf]  ;;  %v2538_v63 = vld [vmem:[%s3656_s21 + $0x58] sm:$0xf0]  ;;  %v2533_v1 = vor.u32 %v3145_v58, %v2530_v59  ;;  %v2537_v2 = vor.u32 %v3148_v61, %v2536_v60  ;;  %v2544_v4 = vld [vmem:[%s3656_s21 + $0x60] sm:$0xf] }
  0x1f   : > { %1724 = vmatpush.bf16.msra.mxu2 %v3284_v18  ;;  %v2541_v3 = vor.u32 %v3146_v62, %v2538_v63  ;;  %v3151_v5 = vld [vmem:[%s3656_s21 + $0x6c] sm:$0xf0]  ;;  %v3149_v6 = vld [vmem:[%s3656_s21 + $0x64] sm:$0xf]  ;;  %v2546_v7 = vld [vmem:[%s3656_s21 + $0x70] sm:$0xf0] }
  0x20   : > { %1893 = vmatpush.bf16.msra.mxu3 %v3292_v19  ;;  %v2552_v8 = vld [vmem:[%s3656_s21 + $0x68] sm:$0xf]  ;;  %v3152_v9 = vld [vmem:[%s3656_s21 + $0x74] sm:$0xf0]  ;;  %v3150_v10 = vld [vmem:[%s3656_s21 + $0x6c] sm:$0xf]  ;;  %v2545_v12 = vor.u32 %v3151_v5, %v2544_v4  ;;  %v2549_v13 = vor.u32 %v3149_v6, %v2546_v7 }
  0x21   : > { %1387 = vmatpush.bf16.msra.mxu0 %v3267_v20  ;;  %v2554_v11 = vld [vmem:[%s3656_s21 + $0x78] sm:$0xf0]  ;;  %v2553_v14 = vor.u32 %v3152_v9, %v2552_v8  ;;  %v2560_v16 = vld [vmem:[%s3656_s21 + $0x80] sm:$0xf]  ;;  %v3155_v17 = vld [vmem:[%s3656_s21 + $0x8c] sm:$0xf0] }
  0x22   : > { %1556 = vmatpush.bf16.msra.mxu1 %v3275_v21  ;;  %v2557_v15 = vor.u32 %v3150_v10, %v2554_v11  ;;  %v3153_v18 = vld [vmem:[%s3656_s21 + $0x84] sm:$0xf]  ;;  %v2562_v19 = vld [vmem:[%s3656_s21 + $0x90] sm:$0xf0]  ;;  %v2568_v20 = vld [vmem:[%s3656_s21 + $0x88] sm:$0xf] }
  0x23   : > { %1725 = vmatpush.bf16.msra.mxu2 %v3283_v22  ;;  %v3156_v21 = vld [vmem:[%s3656_s21 + $0x94] sm:$0xf0]  ;;  %v3154_v22 = vld [vmem:[%s3656_s21 + $0x8c] sm:$0xf]  ;;  %v2584_v32 = vld [vmem:[%s3656_s21 + $0xa8] sm:$0xf] }
  0x24   : > { %1894 = vmatpush.bf16.msra.mxu3 %v3291_v23  ;;  %v2570_v23 = vld [vmem:[%s3656_s21 + $0x98] sm:$0xf0]  ;;  %v3160_v33 = vld [vmem:[%s3656_s21 + $0xb4] sm:$0xf0]  ;;  %v3158_v34 = vld [vmem:[%s3656_s21 + $0xac] sm:$0xf] }
  0x25   : > { %1388 = vmatpush.bf16.msra.mxu0 %v3266_v24  ;;  %v2561_v24 = vor.u32 %v3155_v17, %v2560_v16  ;;  %v2586_v35 = vld [vmem:[%s3656_s21 + $0xb8] sm:$0xf0]  ;;  %v2585_v38 = vor.u32 %v3160_v33, %v2584_v32  ;;  %v2600_v44 = vld [vmem:[%s3656_s21 + $0xc8] sm:$0xf]  ;;  %v3164_v45 = vld [vmem:[%s3656_s21 + $0xd4] sm:$0xf0] }
  0x26   : > { %1557 = vmatpush.bf16.msra.mxu1 %v3274_v25  ;;  %v2565_v25 = vor.u32 %v3153_v18, %v2562_v19  ;;  %v2589_v39 = vor.u32 %v3158_v34, %v2586_v35  ;;  %v3162_v46 = vld [vmem:[%s3656_s21 + $0xcc] sm:$0xf]  ;;  %v2602_v47 = vld [vmem:[%s3656_s21 + $0xd8] sm:$0xf0]  ;;  %v2601_v50 = vor.u32 %v3164_v45, %v2600_v44  ;;  %v2616_v56 = vld [vmem:[%s3656_s21 + $0xe8] sm:$0xf] }
  0x27   : > { %1726 = vmatpush.bf16.msra.mxu2 %v3282_v26  ;;  %v2569_v26 = vor.u32 %v3156_v21, %v2568_v20  ;;  %v2605_v51 = vor.u32 %v3162_v46, %v2602_v47  ;;  %v3168_v57 = vld [vmem:[%s3656_s21 + $0xf4] sm:$0xf0]  ;;  %v3166_v58 = vld [vmem:[%s3656_s21 + $0xec] sm:$0xf]  ;;  %v2618_v59 = vld [vmem:[%s3656_s21 + $0xf8] sm:$0xf0] }
  0x28   : > { %1895 = vmatpush.bf16.msra.mxu3 %v3290_v27  ;;  %v2573_v27 = vor.u32 %v3154_v22, %v2570_v23  ;;  %v2617_v62 = vor.u32 %v3168_v57, %v2616_v56  ;;  %v2621_v63 = vor.u32 %v3166_v58, %v2618_v59  ;;  %v2632_v4 = vld [vmem:[%s3656_s21 + $0x108] sm:$0xf]  ;;  %v3172_v5 = vld [vmem:[%s3656_s21 + $0x114] sm:$0xf0]  ;;  %v3170_v6 = vld [vmem:[%s3656_s21 + $0x10c] sm:$0xf] }
  0x29   : > { %1389 = vmatpush.bf16.msra.mxu0 %v3265_v28  ;;  %v2576_v28 = vld [vmem:[%s3656_s21 + $0xa0] sm:$0xf]  ;;  %v2634_v7 = vld [vmem:[%s3656_s21 + $0x118] sm:$0xf0]  ;;  %v3175_v20 = vld [vmem:[%s3656_s21 + $0x12c] sm:$0xf0] }
  0x2a   : > { %1558 = vmatpush.bf16.msra.mxu1 %v3273_v29  ;;  %v3159_v29 = vld [vmem:[%s3656_s21 + $0xac] sm:$0xf0]  ;;  %v2640_v19 = vld [vmem:[%s3656_s21 + $0x120] sm:$0xf]  ;;  %v3173_v21 = vld [vmem:[%s3656_s21 + $0x124] sm:$0xf] }
  0x2b   : > { %1727 = vmatpush.bf16.msra.mxu2 %v3281_v30  ;;  %v3157_v30 = vld [vmem:[%s3656_s21 + $0xa4] sm:$0xf]  ;;  %v2577_v36 = vor.u32 %v3159_v29, %v2576_v28  ;;  %v2642_v22 = vld [vmem:[%s3656_s21 + $0x130] sm:$0xf0]  ;;  %v2648_v23 = vld [vmem:[%s3656_s21 + $0x128] sm:$0xf] }
  0x2c   : > { %1896 = vmatpush.bf16.msra.mxu3 %v3289_v31  ;;  %1390 = vmatmul.bf16.vlgmr.msra.gmra.mxu0 %v2497_v40  ;;  %v2578_v31 = vld [vmem:[%s3656_s21 + $0xb0] sm:$0xf0]  ;;  %v2592_v40 = vld [vmem:[%s3656_s21 + $0xc0] sm:$0xf]  ;;  %v2645_v32 = vor.u32 %v3173_v21, %v2642_v22  ;;  %v3179_v47 = vld [vmem:[%s3656_s21 + $0x14c] sm:$0xf0] }
  0x2d   : > { %1559 = vmatmul.bf16.vlgmr.msra.gmra.mxu1 %v2501_v41  ;;  %v2581_v37 = vor.u32 %v3157_v30, %v2578_v31  ;;  %v3163_v41 = vld [vmem:[%s3656_s21 + $0xcc] sm:$0xf0]  ;;  %v2641_v31 = vor.u32 %v3175_v20, %v2640_v19  ;;  %v2656_v46 = vld [vmem:[%s3656_s21 + $0x140] sm:$0xf] }
  0x2e   : > { %1728 = vmatmul.bf16.vlgmr.msra.gmra.mxu2 %v2505_v42  ;;  %v3161_v42 = vld [vmem:[%s3656_s21 + $0xc4] sm:$0xf]  ;;  %v2593_v48 = vor.u32 %v3163_v41, %v2592_v40  ;;  %v2657_v58 = vor.u32 %v3179_v47, %v2656_v46 }
  0x2f   : > { %1897 = vmatmul.bf16.vlgmr.msra.gmra.mxu3 %v2509_v43  ;;  %v2594_v43 = vld [vmem:[%s3656_s21 + $0xd0] sm:$0xf0] }
  0x30   : > { %v2597_v49 = vor.u32 %v3161_v42, %v2594_v43 }
  0x3c   : > { %1395 = vmatmul.bf16.gmra.mxu0 %v2513_v52  ;;  %v2608_v52 = vld [vmem:[%s3656_s21 + $0xe0] sm:$0xf] }
  0x3d   : > { %1564 = vmatmul.bf16.gmra.mxu1 %v2517_v53  ;;  %v3167_v53 = vld [vmem:[%s3656_s21 + $0xec] sm:$0xf0] }
  0x3e   : > { %1733 = vmatmul.bf16.gmra.mxu2 %v2521_v54  ;;  %v3165_v54 = vld [vmem:[%s3656_s21 + $0xe4] sm:$0xf]  ;;  %v2609_v60 = vor.u32 %v3167_v53, %v2608_v52  ;;  %v3178_v52 = vld [vmem:[%s3656_s21 + $0x14c] sm:$0xf]  ;;  %v2666_v53 = vld [vmem:[%s3656_s21 + $0x158] sm:$0xf0] }
  0x3f   : > { %1902 = vmatmul.bf16.gmra.mxu3 %v2525_v55  ;;  %v2610_v55 = vld [vmem:[%s3656_s21 + $0xf0] sm:$0xf0] }
  0x40   : > { %v2613_v61 = vor.u32 %v3165_v54, %v2610_v55 }
  0x4c   : > { %1400 = vmatmul.bf16.gmra.mxu0 %v2529_v0  ;;  %v2624_v0 = vld [vmem:[%s3656_s21 + $0x100] sm:$0xf] }
  0x4d   : > { %1569 = vmatmul.bf16.gmra.mxu1 %v2533_v1  ;;  %v3171_v1 = vld [vmem:[%s3656_s21 + $0x10c] sm:$0xf0] }
  0x4e   : > { %1738 = vmatmul.bf16.gmra.mxu2 %v2537_v2  ;;  %v3169_v2 = vld [vmem:[%s3656_s21 + $0x104] sm:$0xf]  ;;  %v2625_v8 = vor.u32 %v3171_v1, %v2624_v0  ;;  %v2669_v0 = vor.u32 %v3178_v52, %v2666_v53 }
  0x4f   : > { %1907 = vmatmul.bf16.gmra.mxu3 %v2541_v3  ;;  %v2626_v3 = vld [vmem:[%s3656_s21 + $0x110] sm:$0xf0] }
  0x50   : > { %v2629_v9 = vor.u32 %v3169_v2, %v2626_v3 }
  0x5c   : > { %1405 = vmatmul.bf16.gmra.mxu0 %v2545_v12  ;;  %v2633_v12 = vor.u32 %v3172_v5, %v2632_v4 }
  0x5d   : > { %1574 = vmatmul.bf16.gmra.mxu1 %v2549_v13  ;;  %v2637_v13 = vor.u32 %v3170_v6, %v2634_v7 }
  0x5e   : > { %1743 = vmatmul.bf16.gmra.mxu2 %v2553_v14 }
  0x5f   : > { %1912 = vmatmul.bf16.gmra.mxu3 %v2557_v15 }
  0x6c   : > { %1410 = vmatmul.bf16.gmra.mxu0 %v2561_v24  ;;  %v3176_v24 = vld [vmem:[%s3656_s21 + $0x134] sm:$0xf0] }
  0x6d   : > { %1579 = vmatmul.bf16.gmra.mxu1 %v2565_v25  ;;  %v3174_v25 = vld [vmem:[%s3656_s21 + $0x12c] sm:$0xf] }
  0x6e   : > { %1748 = vmatmul.bf16.gmra.mxu2 %v2569_v26  ;;  %v2650_v26 = vld [vmem:[%s3656_s21 + $0x138] sm:$0xf0] }
  0x6f   : > { %1917 = vmatmul.bf16.gmra.mxu3 %v2573_v27 }
  0x7c   : > { %1415 = vmatmul.bf16.gmra.mxu0 %v2577_v36  ;;  %v2649_v36 = vor.u32 %v3176_v24, %v2648_v23 }
  0x7d   : > { %1584 = vmatmul.bf16.gmra.mxu1 %v2581_v37  ;;  %v2653_v37 = vor.u32 %v3174_v25, %v2650_v26 }
  0x7e   : > { %1753 = vmatmul.bf16.gmra.mxu2 %v2585_v38 }
  0x7f   : > { %1922 = vmatmul.bf16.gmra.mxu3 %v2589_v39 }
  0x8c   : > { %1420 = vmatmul.bf16.gmra.mxu0 %v2593_v48  ;;  %v3177_v48 = vld [vmem:[%s3656_s21 + $0x144] sm:$0xf] }
  0x8d   : > { %1589 = vmatmul.bf16.gmra.mxu1 %v2597_v49  ;;  %v2658_v49 = vld [vmem:[%s3656_s21 + $0x150] sm:$0xf0] }
  0x8e   : > { %1758 = vmatmul.bf16.gmra.mxu2 %v2601_v50  ;;  %v2664_v50 = vld [vmem:[%s3656_s21 + $0x148] sm:$0xf]  ;;  %v2661_v59 = vor.u32 %v3177_v48, %v2658_v49 }
  0x8f   : > { %1927 = vmatmul.bf16.gmra.mxu3 %v2605_v51  ;;  %v3180_v51 = vld [vmem:[%s3656_s21 + $0x154] sm:$0xf0] }
  0x9c   : > { %1425 = vmatmul.bf16.gmra.mxu0 %v2609_v60 }
  0x9d   : > { %1594 = vmatmul.bf16.gmra.mxu1 %v2613_v61 }
  0x9e   : > { %1763 = vmatmul.bf16.gmra.mxu2 %v2617_v62 }
  0x9f   : > { %1932 = vmatmul.bf16.gmra.mxu3 %v2621_v63  ;;  %v2665_v63 = vor.u32 %v3180_v51, %v2664_v50 }
  0xa9   : > { %v1391_v10 = vpop.f32.mrf.mxu0 }
  0xaa   : > { %v1560_v11 = vpop.f32.mrf.mxu1 }
  0xab   : > { %v1561_v18 = vadd.f32 %v1560_v11, %v1391_v10  ;;  %v3183_v10 = vld [vmem:[%s3656_s21 + $0x16c] sm:$0xf0]  ;;  %v3181_v11 = vld [vmem:[%s3656_s21 + $0x164] sm:$0xf] }
  0xac   : > { %1430 = vmatmul.bf16.gmra.mxu0 %v2625_v8 }
  0xad   : > { %1599 = vmatmul.bf16.gmra.mxu1 %v2629_v9  ;;  %v2672_v9 = vld [vmem:[%s3656_s21 + $0x160] sm:$0xf] }
  0xae   : > { %1768 = vmatmul.bf16.gmra.mxu2 %v2633_v12  ;;  %v2674_v12 = vld [vmem:[%s3656_s21 + $0x170] sm:$0xf0]  ;;  %v2673_v21 = vor.u32 %v3183_v10, %v2672_v9 }
  0xaf   : > { %1937 = vmatmul.bf16.gmra.mxu3 %v2637_v13  ;;  %v2680_v13 = vld [vmem:[%s3656_s21 + $0x168] sm:$0xf]  ;;  %v2677_v22 = vor.u32 %v3181_v11, %v2674_v12 }
  0xb1   : > { %v1729_v14 = vpop.f32.mrf.mxu2  ;;  %v1393_v16 = vpop.f32.mrf.mxu0 }
  0xb2   : > { %v1898_v15 = vpop.f32.mrf.mxu3  ;;  %v1562_v17 = vpop.f32.mrf.mxu1  ;;  %v1730_v27 = vadd.f32 %v1729_v14, %v1561_v18  ;;  %v3184_v14 = vld [vmem:[%s3656_s21 + $0x174] sm:$0xf0] }
  0xb3   : > { %v1563_v28 = vadd.f32 %v1562_v17, %v1393_v16  ;;  %v2682_v16 = vld [vmem:[%s3656_s21 + $0x178] sm:$0xf0]  ;;  %v2681_v26 = vor.u32 %v3184_v14, %v2680_v13 }
  0xb4   : > { %v1899_v38 = vadd.f32 %v1898_v15, %v1730_v27  ;;  %v3182_v15 = vld [vmem:[%s3656_s21 + $0x16c] sm:$0xf] }
  0xb5   : > { %v2685_v27 = vor.u32 %v3182_v15, %v2682_v16 }
  0xb9   : > { %v1731_v29 = vpop.f32.mrf.mxu2  ;;  %v1396_v34 = vpop.f32.mrf.mxu0 }
  0xba   : > { %v1900_v30 = vpop.f32.mrf.mxu3  ;;  %v1732_v33 = vadd.f32 %v1731_v29, %v1563_v28  ;;  %v1565_v35 = vpop.f32.mrf.mxu1 }
  0xbb   : > { %v1566_v45 = vadd.f32 %v1565_v35, %v1396_v34 }
  0xbc   : > { %v1901_v39 = vadd.f32 %v1900_v30, %v1732_v33  ;;  %1435 = vmatmul.bf16.gmra.mxu0 %v2641_v31 }
  0xbd   : > { %1604 = vmatmul.bf16.gmra.mxu1 %v2645_v32 }
  0xbe   : > { %v3300_v40 = vpack.c.bf16 %v1901_v39, %v1899_v38  ;;  %1773 = vmatmul.bf16.gmra.mxu2 %v2649_v36  ;;  %v2688_v36 = vld [vmem:[%s3656_s21 + $0x180] sm:$0xf]  ;;  %v3185_v38 = vld [vmem:[%s3656_s21 + $0x184] sm:$0xf]  ;;  %v2690_v39 = vld [vmem:[%s3656_s21 + $0x190] sm:$0xf0] }
  0xbf   : > { %1942 = vmatmul.bf16.gmra.mxu3 %v2653_v37  ;;  %v3187_v37 = vld [vmem:[%s3656_s21 + $0x18c] sm:$0xf0]  ;;  %v2693_v49 = vor.u32 %v3185_v38, %v2690_v39 }
  0xc0   : > { %3301 = vst [vmem:[%s3760_s8] sm:$0xff] %v3300_v40   ;;  %v2696_v40 = vld [vmem:[%s3656_s21 + $0x188] sm:$0xf]  ;;  %v2689_v48 = vor.u32 %v3187_v37, %v2688_v36 }
  0xc1   : > { %v1734_v41 = vpop.f32.mrf.mxu2  ;;  %v1398_v43 = vpop.f32.mrf.mxu0 }
  0xc2   : > { %v1903_v42 = vpop.f32.mrf.mxu3  ;;  %v1567_v44 = vpop.f32.mrf.mxu1  ;;  %v1735_v54 = vadd.f32 %v1734_v41, %v1566_v45  ;;  %v3188_v41 = vld [vmem:[%s3656_s21 + $0x194] sm:$0xf0] }
  0xc3   : > { %v1568_v55 = vadd.f32 %v1567_v44, %v1398_v43  ;;  %v2698_v43 = vld [vmem:[%s3656_s21 + $0x198] sm:$0xf0]  ;;  %v2697_v53 = vor.u32 %v3188_v41, %v2696_v40 }
  0xc4   : > { %v1904_v1 = vadd.f32 %v1903_v42, %v1735_v54  ;;  %v3186_v42 = vld [vmem:[%s3656_s21 + $0x18c] sm:$0xf] }
  0xc5   : > { %v2701_v54 = vor.u32 %v3186_v42, %v2698_v43 }
  0xc9   : > { %v1736_v56 = vpop.f32.mrf.mxu2  ;;  %v1401_v61 = vpop.f32.mrf.mxu0 }
  0xca   : > { %v1905_v57 = vpop.f32.mrf.mxu3  ;;  %v1737_v60 = vadd.f32 %v1736_v56, %v1568_v55  ;;  %v1570_v62 = vpop.f32.mrf.mxu1 }
  0xcb   : > { %v1571_v8 = vadd.f32 %v1570_v62, %v1401_v61 }
  0xcc   : > { %v1906_v2 = vadd.f32 %v1905_v57, %v1737_v60  ;;  %1440 = vmatmul.bf16.gmra.mxu0 %v2657_v58 }
  0xcd   : > { %1609 = vmatmul.bf16.gmra.mxu1 %v2661_v59 }
  0xce   : > { %v3305_v3 = vpack.c.bf16 %v1906_v2, %v1904_v1  ;;  %1778 = vmatmul.bf16.gmra.mxu2 %v2665_v63  ;;  %v2704_v63 = vld [vmem:[%s3656_s21 + $0x1a0] sm:$0xf]  ;;  %v3189_v1 = vld [vmem:[%s3656_s21 + $0x1a4] sm:$0xf]  ;;  %v2706_v2 = vld [vmem:[%s3656_s21 + $0x1b0] sm:$0xf0] }
  0xcf   : > { %1947 = vmatmul.bf16.gmra.mxu3 %v2669_v0  ;;  %v3191_v0 = vld [vmem:[%s3656_s21 + $0x1ac] sm:$0xf0]  ;;  %v2709_v12 = vor.u32 %v3189_v1, %v2706_v2 }
  0xd0   : > { %3457 = vst [vmem:[%s3760_s8 + $0x8] sm:$0xff] %v3305_v3   ;;  %v2712_v3 = vld [vmem:[%s3656_s21 + $0x1a8] sm:$0xf]  ;;  %v2705_v11 = vor.u32 %v3191_v0, %v2704_v63 }
  0xd1   : > { %v1739_v4 = vpop.f32.mrf.mxu2  ;;  %v1403_v6 = vpop.f32.mrf.mxu0 }
  0xd2   : > { %v1908_v5 = vpop.f32.mrf.mxu3  ;;  %v1572_v7 = vpop.f32.mrf.mxu1  ;;  %v1740_v17 = vadd.f32 %v1739_v4, %v1571_v8  ;;  %v3192_v4 = vld [vmem:[%s3656_s21 + $0x1b4] sm:$0xf0] }
  0xd3   : > { %v1573_v18 = vadd.f32 %v1572_v7, %v1403_v6  ;;  %v2714_v6 = vld [vmem:[%s3656_s21 + $0x1b8] sm:$0xf0]  ;;  %v2713_v16 = vor.u32 %v3192_v4, %v2712_v3 }
  0xd4   : > { %v1909_v28 = vadd.f32 %v1908_v5, %v1740_v17  ;;  %v3190_v5 = vld [vmem:[%s3656_s21 + $0x1ac] sm:$0xf] }
  0xd5   : > { %v2717_v17 = vor.u32 %v3190_v5, %v2714_v6 }
  0xd9   : > { %v1741_v19 = vpop.f32.mrf.mxu2  ;;  %v1406_v24 = vpop.f32.mrf.mxu0 }
  0xda   : > { %v1910_v20 = vpop.f32.mrf.mxu3  ;;  %v1742_v23 = vadd.f32 %v1741_v19, %v1573_v18  ;;  %v1575_v25 = vpop.f32.mrf.mxu1 }
  0xdb   : > { %v1576_v35 = vadd.f32 %v1575_v25, %v1406_v24 }
  0xdc   : > { %v1911_v29 = vadd.f32 %v1910_v20, %v1742_v23  ;;  %1445 = vmatmul.bf16.gmra.mxu0 %v2673_v21 }
  0xdd   : > { %1614 = vmatmul.bf16.gmra.mxu1 %v2677_v22 }
  0xde   : > { %v3310_v30 = vpack.c.bf16 %v1911_v29, %v1909_v28  ;;  %1783 = vmatmul.bf16.gmra.mxu2 %v2681_v26  ;;  %v2720_v26 = vld [vmem:[%s3656_s21 + $0x1c0] sm:$0xf]  ;;  %v3193_v28 = vld [vmem:[%s3656_s21 + $0x1c4] sm:$0xf]  ;;  %v2722_v29 = vld [vmem:[%s3656_s21 + $0x1d0] sm:$0xf0] }
  0xdf   : > { %1952 = vmatmul.bf16.gmra.mxu3 %v2685_v27  ;;  %v3195_v27 = vld [vmem:[%s3656_s21 + $0x1cc] sm:$0xf0]  ;;  %v2725_v39 = vor.u32 %v3193_v28, %v2722_v29 }
  0xe0   : > { %3458 = vst [vmem:[%s3760_s8 + $0x10] sm:$0xff] %v3310_v30   ;;  %v2728_v30 = vld [vmem:[%s3656_s21 + $0x1c8] sm:$0xf]  ;;  %v2721_v38 = vor.u32 %v3195_v27, %v2720_v26 }
  0xe1   : > { %v1744_v31 = vpop.f32.mrf.mxu2  ;;  %v1408_v33 = vpop.f32.mrf.mxu0 }
  0xe2   : > { %v1913_v32 = vpop.f32.mrf.mxu3  ;;  %v1577_v34 = vpop.f32.mrf.mxu1  ;;  %v1745_v44 = vadd.f32 %v1744_v31, %v1576_v35  ;;  %v3196_v31 = vld [vmem:[%s3656_s21 + $0x1d4] sm:$0xf0] }
  0xe3   : > { %v1578_v45 = vadd.f32 %v1577_v34, %v1408_v33  ;;  %v2730_v33 = vld [vmem:[%s3656_s21 + $0x1d8] sm:$0xf0]  ;;  %v2729_v43 = vor.u32 %v3196_v31, %v2728_v30 }
  0xe4   : > { %v1914_v55 = vadd.f32 %v1913_v32, %v1745_v44  ;;  %v3194_v32 = vld [vmem:[%s3656_s21 + $0x1cc] sm:$0xf] }
  0xe5   : > { %v2733_v44 = vor.u32 %v3194_v32, %v2730_v33 }
  0xe9   : > { %v1746_v46 = vpop.f32.mrf.mxu2  ;;  %v1411_v51 = vpop.f32.mrf.mxu0 }
  0xea   : > { %v1915_v47 = vpop.f32.mrf.mxu3  ;;  %v1747_v50 = vadd.f32 %v1746_v46, %v1578_v45  ;;  %v1580_v52 = vpop.f32.mrf.mxu1 }
  0xeb   : > { %v1581_v62 = vadd.f32 %v1580_v52, %v1411_v51 }
  0xec   : > { %v1916_v56 = vadd.f32 %v1915_v47, %v1747_v50  ;;  %1450 = vmatmul.bf16.gmra.mxu0 %v2689_v48 }
  0xed   : > { %1619 = vmatmul.bf16.gmra.mxu1 %v2693_v49 }
  0xee   : > { %v3315_v57 = vpack.c.bf16 %v1916_v56, %v1914_v55  ;;  %1788 = vmatmul.bf16.gmra.mxu2 %v2697_v53  ;;  %v2736_v53 = vld [vmem:[%s3656_s21 + $0x1e0] sm:$0xf]  ;;  %v3197_v55 = vld [vmem:[%s3656_s21 + $0x1e4] sm:$0xf]  ;;  %v2738_v56 = vld [vmem:[%s3656_s21 + $0x1f0] sm:$0xf0] }
  0xef   : > { %1957 = vmatmul.bf16.gmra.mxu3 %v2701_v54  ;;  %v3199_v54 = vld [vmem:[%s3656_s21 + $0x1ec] sm:$0xf0]  ;;  %v2741_v2 = vor.u32 %v3197_v55, %v2738_v56 }
  0xf0   : > { %3459 = vst [vmem:[%s3760_s8 + $0x18] sm:$0xff] %v3315_v57   ;;  %v2744_v57 = vld [vmem:[%s3656_s21 + $0x1e8] sm:$0xf]  ;;  %v2737_v1 = vor.u32 %v3199_v54, %v2736_v53 }
  0xf1   : > { %v1749_v58 = vpop.f32.mrf.mxu2  ;;  %v1413_v60 = vpop.f32.mrf.mxu0 }
  0xf2   : > { %v1918_v59 = vpop.f32.mrf.mxu3  ;;  %v1582_v61 = vpop.f32.mrf.mxu1  ;;  %v1750_v7 = vadd.f32 %v1749_v58, %v1581_v62  ;;  %v3200_v58 = vld [vmem:[%s3656_s21 + $0x1f4] sm:$0xf0] }
  0xf3   : > { %v1583_v8 = vadd.f32 %v1582_v61, %v1413_v60  ;;  %v2746_v60 = vld [vmem:[%s3656_s21 + $0x1f8] sm:$0xf0]  ;;  %v2745_v6 = vor.u32 %v3200_v58, %v2744_v57 }
  0xf4   : > { %v1919_v18 = vadd.f32 %v1918_v59, %v1750_v7  ;;  %v3198_v59 = vld [vmem:[%s3656_s21 + $0x1ec] sm:$0xf] }
  0xf5   : > { %v2749_v7 = vor.u32 %v3198_v59, %v2746_v60 }
  0xf9   : > { %v1751_v9 = vpop.f32.mrf.mxu2  ;;  %v1416_v14 = vpop.f32.mrf.mxu0 }
  0xfa   : > { %v1920_v10 = vpop.f32.mrf.mxu3  ;;  %v1752_v13 = vadd.f32 %v1751_v9, %v1583_v8  ;;  %v1585_v15 = vpop.f32.mrf.mxu1 }
  0xfb   : > { %v1586_v25 = vadd.f32 %v1585_v15, %v1416_v14 }
  0xfc   : > { %v1921_v19 = vadd.f32 %v1920_v10, %v1752_v13  ;;  %1455 = vmatmul.bf16.gmra.mxu0 %v2705_v11 }
  0xfd   : > { %1624 = vmatmul.bf16.gmra.mxu1 %v2709_v12 }
  0xfe   : > { %v3320_v20 = vpack.c.bf16 %v1921_v19, %v1919_v18  ;;  %1793 = vmatmul.bf16.gmra.mxu2 %v2713_v16  ;;  %v2752_v16 = vld [vmem:[%s3656_s21 + $0x200] sm:$0xf]  ;;  %v3201_v18 = vld [vmem:[%s3656_s21 + $0x204] sm:$0xf]  ;;  %v2754_v19 = vld [vmem:[%s3656_s21 + $0x210] sm:$0xf0] }
  0xff   : > { %1962 = vmatmul.bf16.gmra.mxu3 %v2717_v17  ;;  %v3203_v17 = vld [vmem:[%s3656_s21 + $0x20c] sm:$0xf0]  ;;  %v2757_v29 = vor.u32 %v3201_v18, %v2754_v19 }
 0x100   : > { %3460 = vst [vmem:[%s3760_s8 + $0x20] sm:$0xff] %v3320_v20   ;;  %v2760_v20 = vld [vmem:[%s3656_s21 + $0x208] sm:$0xf]  ;;  %v2753_v28 = vor.u32 %v3203_v17, %v2752_v16 }
 0x101   : > { %v1754_v21 = vpop.f32.mrf.mxu2  ;;  %v1418_v23 = vpop.f32.mrf.mxu0 }
 0x102   : > { %v1923_v22 = vpop.f32.mrf.mxu3  ;;  %v1587_v24 = vpop.f32.mrf.mxu1  ;;  %v1755_v34 = vadd.f32 %v1754_v21, %v1586_v25  ;;  %v3204_v21 = vld [vmem:[%s3656_s21 + $0x214] sm:$0xf0] }
 0x103   : > { %v1588_v35 = vadd.f32 %v1587_v24, %v1418_v23  ;;  %v2762_v23 = vld [vmem:[%s3656_s21 + $0x218] sm:$0xf0]  ;;  %v2761_v33 = vor.u32 %v3204_v21, %v2760_v20 }
 0x104   : > { %v1924_v45 = vadd.f32 %v1923_v22, %v1755_v34  ;;  %v3202_v22 = vld [vmem:[%s3656_s21 + $0x20c] sm:$0xf] }
 0x105   : > { %v2765_v34 = vor.u32 %v3202_v22, %v2762_v23 }
 0x109   : > { %v1756_v36 = vpop.f32.mrf.mxu2  ;;  %v1421_v41 = vpop.f32.mrf.mxu0 }
 0x10a   : > { %v1925_v37 = vpop.f32.mrf.mxu3  ;;  %v1757_v40 = vadd.f32 %v1756_v36, %v1588_v35  ;;  %v1590_v42 = vpop.f32.mrf.mxu1 }
 0x10b   : > { %v1591_v52 = vadd.f32 %v1590_v42, %v1421_v41 }
 0x10c   : > { %v1926_v46 = vadd.f32 %v1925_v37, %v1757_v40  ;;  %1460 = vmatmul.bf16.gmra.mxu0 %v2721_v38 }
 0x10d   : > { %1629 = vmatmul.bf16.gmra.mxu1 %v2725_v39 }
 0x10e   : > { %v3325_v47 = vpack.c.bf16 %v1926_v46, %v1924_v45  ;;  %1798 = vmatmul.bf16.gmra.mxu2 %v2729_v43  ;;  %v2768_v43 = vld [vmem:[%s3656_s21 + $0x220] sm:$0xf]  ;;  %v3205_v45 = vld [vmem:[%s3656_s21 + $0x224] sm:$0xf]  ;;  %v2770_v46 = vld [vmem:[%s3656_s21 + $0x230] sm:$0xf0] }
 0x10f   : > { %1967 = vmatmul.bf16.gmra.mxu3 %v2733_v44  ;;  %v3207_v44 = vld [vmem:[%s3656_s21 + $0x22c] sm:$0xf0]  ;;  %v2773_v56 = vor.u32 %v3205_v45, %v2770_v46 }
 0x110   : > { %3461 = vst [vmem:[%s3760_s8 + $0x28] sm:$0xff] %v3325_v47   ;;  %v2776_v47 = vld [vmem:[%s3656_s21 + $0x228] sm:$0xf]  ;;  %v2769_v55 = vor.u32 %v3207_v44, %v2768_v43 }
 0x111   : > { %v1759_v48 = vpop.f32.mrf.mxu2  ;;  %v1423_v50 = vpop.f32.mrf.mxu0 }
 0x112   : > { %v1928_v49 = vpop.f32.mrf.mxu3  ;;  %v1592_v51 = vpop.f32.mrf.mxu1  ;;  %v1760_v61 = vadd.f32 %v1759_v48, %v1591_v52  ;;  %v3208_v48 = vld [vmem:[%s3656_s21 + $0x234] sm:$0xf0] }
 0x113   : > { %v1593_v62 = vadd.f32 %v1592_v51, %v1423_v50  ;;  %v2778_v50 = vld [vmem:[%s3656_s21 + $0x238] sm:$0xf0]  ;;  %v2777_v60 = vor.u32 %v3208_v48, %v2776_v47 }
 0x114   : > { %v1929_v8 = vadd.f32 %v1928_v49, %v1760_v61  ;;  %v3206_v49 = vld [vmem:[%s3656_s21 + $0x22c] sm:$0xf] }
 0x115   : > { %v2781_v61 = vor.u32 %v3206_v49, %v2778_v50 }
 0x119   : > { %v1761_v63 = vpop.f32.mrf.mxu2  ;;  %v1426_v4 = vpop.f32.mrf.mxu0 }
 0x11a   : > { %v1930_v0 = vpop.f32.mrf.mxu3  ;;  %v1762_v3 = vadd.f32 %v1761_v63, %v1593_v62  ;;  %v1595_v5 = vpop.f32.mrf.mxu1 }
 0x11b   : > { %v1596_v15 = vadd.f32 %v1595_v5, %v1426_v4 }
 0x11c   : > { %v1931_v9 = vadd.f32 %v1930_v0, %v1762_v3  ;;  %1465 = vmatmul.bf16.gmra.mxu0 %v2737_v1 }
 0x11d   : > { %1634 = vmatmul.bf16.gmra.mxu1 %v2741_v2 }
 0x11e   : > { %v3330_v10 = vpack.c.bf16 %v1931_v9, %v1929_v8  ;;  %1803 = vmatmul.bf16.gmra.mxu2 %v2745_v6  ;;  %v2784_v6 = vld [vmem:[%s3656_s21 + $0x240] sm:$0xf]  ;;  %v3209_v8 = vld [vmem:[%s3656_s21 + $0x244] sm:$0xf]  ;;  %v2786_v9 = vld [vmem:[%s3656_s21 + $0x250] sm:$0xf0] }
 0x11f   : > { %1972 = vmatmul.bf16.gmra.mxu3 %v2749_v7  ;;  %v3211_v7 = vld [vmem:[%s3656_s21 + $0x24c] sm:$0xf0]  ;;  %v2789_v19 = vor.u32 %v3209_v8, %v2786_v9 }
 0x120   : > { %3462 = vst [vmem:[%s3760_s8 + $0x30] sm:$0xff] %v3330_v10   ;;  %v2792_v10 = vld [vmem:[%s3656_s21 + $0x248] sm:$0xf]  ;;  %v2785_v18 = vor.u32 %v3211_v7, %v2784_v6 }
 0x121   : > { %v1764_v11 = vpop.f32.mrf.mxu2  ;;  %v1428_v13 = vpop.f32.mrf.mxu0 }
 0x122   : > { %v1933_v12 = vpop.f32.mrf.mxu3  ;;  %v1597_v14 = vpop.f32.mrf.mxu1  ;;  %v1765_v24 = vadd.f32 %v1764_v11, %v1596_v15  ;;  %v3212_v11 = vld [vmem:[%s3656_s21 + $0x254] sm:$0xf0] }
 0x123   : > { %v1598_v25 = vadd.f32 %v1597_v14, %v1428_v13  ;;  %v2794_v13 = vld [vmem:[%s3656_s21 + $0x258] sm:$0xf0]  ;;  %v2793_v23 = vor.u32 %v3212_v11, %v2792_v10 }
 0x124   : > { %v1934_v35 = vadd.f32 %v1933_v12, %v1765_v24  ;;  %v3210_v12 = vld [vmem:[%s3656_s21 + $0x24c] sm:$0xf] }
 0x125   : > { %v2797_v24 = vor.u32 %v3210_v12, %v2794_v13 }
 0x129   : > { %v1766_v26 = vpop.f32.mrf.mxu2  ;;  %v1431_v31 = vpop.f32.mrf.mxu0 }
 0x12a   : > { %v1935_v27 = vpop.f32.mrf.mxu3  ;;  %v1767_v30 = vadd.f32 %v1766_v26, %v1598_v25  ;;  %v1600_v32 = vpop.f32.mrf.mxu1 }
 0x12b   : > { %v1601_v42 = vadd.f32 %v1600_v32, %v1431_v31 }
 0x12c   : > { %v1936_v36 = vadd.f32 %v1935_v27, %v1767_v30  ;;  %1470 = vmatmul.bf16.gmra.mxu0 %v2753_v28 }
 0x12d   : > { %1639 = vmatmul.bf16.gmra.mxu1 %v2757_v29 }
 0x12e   : > { %v3335_v37 = vpack.c.bf16 %v1936_v36, %v1934_v35  ;;  %1808 = vmatmul.bf16.gmra.mxu2 %v2761_v33  ;;  %v2800_v33 = vld [vmem:[%s3656_s21 + $0x260] sm:$0xf]  ;;  %v3213_v35 = vld [vmem:[%s3656_s21 + $0x264] sm:$0xf]  ;;  %v2802_v36 = vld [vmem:[%s3656_s21 + $0x270] sm:$0xf0] }
 0x12f   : > { %1977 = vmatmul.bf16.gmra.mxu3 %v2765_v34  ;;  %v3215_v34 = vld [vmem:[%s3656_s21 + $0x26c] sm:$0xf0]  ;;  %v2805_v46 = vor.u32 %v3213_v35, %v2802_v36 }
 0x130   : > { %3463 = vst [vmem:[%s3760_s8 + $0x38] sm:$0xff] %v3335_v37   ;;  %v2808_v37 = vld [vmem:[%s3656_s21 + $0x268] sm:$0xf]  ;;  %v2801_v45 = vor.u32 %v3215_v34, %v2800_v33 }
 0x131   : > { %v1769_v38 = vpop.f32.mrf.mxu2  ;;  %v1433_v40 = vpop.f32.mrf.mxu0 }
 0x132   : > { %v1938_v39 = vpop.f32.mrf.mxu3  ;;  %v1602_v41 = vpop.f32.mrf.mxu1  ;;  %v1770_v51 = vadd.f32 %v1769_v38, %v1601_v42  ;;  %v3216_v38 = vld [vmem:[%s3656_s21 + $0x274] sm:$0xf0] }
 0x133   : > { %v1603_v52 = vadd.f32 %v1602_v41, %v1433_v40  ;;  %v2810_v40 = vld [vmem:[%s3656_s21 + $0x278] sm:$0xf0]  ;;  %v2809_v50 = vor.u32 %v3216_v38, %v2808_v37 }
 0x134   : > { %v1939_v62 = vadd.f32 %v1938_v39, %v1770_v51  ;;  %v3214_v39 = vld [vmem:[%s3656_s21 + $0x26c] sm:$0xf] }
 0x135   : > { %v2813_v51 = vor.u32 %v3214_v39, %v2810_v40 }
 0x139   : > { %v1771_v53 = vpop.f32.mrf.mxu2  ;;  %v1436_v58 = vpop.f32.mrf.mxu0 }
 0x13a   : > { %v1940_v54 = vpop.f32.mrf.mxu3  ;;  %v1772_v57 = vadd.f32 %v1771_v53, %v1603_v52  ;;  %v1605_v59 = vpop.f32.mrf.mxu1 }
 0x13b   : > { %v1606_v5 = vadd.f32 %v1605_v59, %v1436_v58 }
 0x13c   : > { %v1941_v63 = vadd.f32 %v1940_v54, %v1772_v57  ;;  %1475 = vmatmul.bf16.gmra.mxu0 %v2769_v55 }
 0x13d   : > { %1644 = vmatmul.bf16.gmra.mxu1 %v2773_v56 }
 0x13e   : > { %v3340_v0 = vpack.c.bf16 %v1941_v63, %v1939_v62  ;;  %1813 = vmatmul.bf16.gmra.mxu2 %v2777_v60  ;;  %v2816_v60 = vld [vmem:[%s3656_s21 + $0x280] sm:$0xf]  ;;  %v3217_v62 = vld [vmem:[%s3656_s21 + $0x284] sm:$0xf]  ;;  %v2818_v63 = vld [vmem:[%s3656_s21 + $0x290] sm:$0xf0] }
 0x13f   : > { %1982 = vmatmul.bf16.gmra.mxu3 %v2781_v61  ;;  %v3219_v61 = vld [vmem:[%s3656_s21 + $0x28c] sm:$0xf0]  ;;  %v2821_v9 = vor.u32 %v3217_v62, %v2818_v63 }
 0x140   : > { %3464 = vst [vmem:[%s3760_s8 + $0x40] sm:$0xff] %v3340_v0   ;;  %v2824_v0 = vld [vmem:[%s3656_s21 + $0x288] sm:$0xf]  ;;  %v2817_v8 = vor.u32 %v3219_v61, %v2816_v60 }
 0x141   : > { %v1774_v1 = vpop.f32.mrf.mxu2  ;;  %v1438_v3 = vpop.f32.mrf.mxu0 }
 0x142   : > { %v1943_v2 = vpop.f32.mrf.mxu3  ;;  %v1607_v4 = vpop.f32.mrf.mxu1  ;;  %v1775_v14 = vadd.f32 %v1774_v1, %v1606_v5  ;;  %v3220_v1 = vld [vmem:[%s3656_s21 + $0x294] sm:$0xf0] }
 0x143   : > { %v1608_v15 = vadd.f32 %v1607_v4, %v1438_v3  ;;  %v2826_v3 = vld [vmem:[%s3656_s21 + $0x298] sm:$0xf0]  ;;  %v2825_v13 = vor.u32 %v3220_v1, %v2824_v0 }
 0x144   : > { %v1944_v25 = vadd.f32 %v1943_v2, %v1775_v14  ;;  %v3218_v2 = vld [vmem:[%s3656_s21 + $0x28c] sm:$0xf] }
 0x145   : > { %v2829_v14 = vor.u32 %v3218_v2, %v2826_v3 }
 0x149   : > { %v1776_v16 = vpop.f32.mrf.mxu2  ;;  %v1441_v21 = vpop.f32.mrf.mxu0 }
 0x14a   : > { %v1945_v17 = vpop.f32.mrf.mxu3  ;;  %v1777_v20 = vadd.f32 %v1776_v16, %v1608_v15  ;;  %v1610_v22 = vpop.f32.mrf.mxu1 }
 0x14b   : > { %v1611_v32 = vadd.f32 %v1610_v22, %v1441_v21 }
 0x14c   : > { %v1946_v26 = vadd.f32 %v1945_v17, %v1777_v20  ;;  %1480 = vmatmul.bf16.gmra.mxu0 %v2785_v18 }
 0x14d   : > { %1649 = vmatmul.bf16.gmra.mxu1 %v2789_v19 }
 0x14e   : > { %v3345_v27 = vpack.c.bf16 %v1946_v26, %v1944_v25  ;;  %1818 = vmatmul.bf16.gmra.mxu2 %v2793_v23  ;;  %v2832_v23 = vld [vmem:[%s3656_s21 + $0x2a0] sm:$0xf]  ;;  %v3221_v25 = vld [vmem:[%s3656_s21 + $0x2a4] sm:$0xf]  ;;  %v2834_v26 = vld [vmem:[%s3656_s21 + $0x2b0] sm:$0xf0] }
 0x14f   : > { %1987 = vmatmul.bf16.gmra.mxu3 %v2797_v24  ;;  %v3223_v24 = vld [vmem:[%s3656_s21 + $0x2ac] sm:$0xf0]  ;;  %v2837_v36 = vor.u32 %v3221_v25, %v2834_v26 }
 0x150   : > { %3465 = vst [vmem:[%s3760_s8 + $0x48] sm:$0xff] %v3345_v27   ;;  %v2840_v27 = vld [vmem:[%s3656_s21 + $0x2a8] sm:$0xf]  ;;  %v2833_v35 = vor.u32 %v3223_v24, %v2832_v23 }
 0x151   : > { %v1779_v28 = vpop.f32.mrf.mxu2  ;;  %v1443_v30 = vpop.f32.mrf.mxu0 }
 0x152   : > { %v1948_v29 = vpop.f32.mrf.mxu3  ;;  %v1612_v31 = vpop.f32.mrf.mxu1  ;;  %v1780_v41 = vadd.f32 %v1779_v28, %v1611_v32  ;;  %v3224_v28 = vld [vmem:[%s3656_s21 + $0x2b4] sm:$0xf0] }
 0x153   : > { %v1613_v42 = vadd.f32 %v1612_v31, %v1443_v30  ;;  %v2842_v30 = vld [vmem:[%s3656_s21 + $0x2b8] sm:$0xf0]  ;;  %v2841_v40 = vor.u32 %v3224_v28, %v2840_v27 }
 0x154   : > { %v1949_v52 = vadd.f32 %v1948_v29, %v1780_v41  ;;  %v3222_v29 = vld [vmem:[%s3656_s21 + $0x2ac] sm:$0xf] }
 0x155   : > { %v2845_v41 = vor.u32 %v3222_v29, %v2842_v30 }
 0x159   : > { %v1781_v43 = vpop.f32.mrf.mxu2  ;;  %v1446_v48 = vpop.f32.mrf.mxu0 }
 0x15a   : > { %v1950_v44 = vpop.f32.mrf.mxu3  ;;  %v1782_v47 = vadd.f32 %v1781_v43, %v1613_v42  ;;  %v1615_v49 = vpop.f32.mrf.mxu1 }
 0x15b   : > { %v1616_v59 = vadd.f32 %v1615_v49, %v1446_v48 }
 0x15c   : > { %v1951_v53 = vadd.f32 %v1950_v44, %v1782_v47  ;;  %1485 = vmatmul.bf16.gmra.mxu0 %v2801_v45 }
 0x15d   : > { %1654 = vmatmul.bf16.gmra.mxu1 %v2805_v46 }
 0x15e   : > { %v3350_v54 = vpack.c.bf16 %v1951_v53, %v1949_v52  ;;  %1823 = vmatmul.bf16.gmra.mxu2 %v2809_v50  ;;  %v2848_v50 = vld [vmem:[%s3656_s21 + $0x2c0] sm:$0xf]  ;;  %v3225_v52 = vld [vmem:[%s3656_s21 + $0x2c4] sm:$0xf]  ;;  %v2850_v53 = vld [vmem:[%s3656_s21 + $0x2d0] sm:$0xf0] }
 0x15f   : > { %1992 = vmatmul.bf16.gmra.mxu3 %v2813_v51  ;;  %v3227_v51 = vld [vmem:[%s3656_s21 + $0x2cc] sm:$0xf0]  ;;  %v2853_v63 = vor.u32 %v3225_v52, %v2850_v53 }
 0x160   : > { %3466 = vst [vmem:[%s3760_s8 + $0x50] sm:$0xff] %v3350_v54   ;;  %v2856_v54 = vld [vmem:[%s3656_s21 + $0x2c8] sm:$0xf]  ;;  %v2849_v62 = vor.u32 %v3227_v51, %v2848_v50 }
 0x161   : > { %v1784_v55 = vpop.f32.mrf.mxu2  ;;  %v1448_v57 = vpop.f32.mrf.mxu0 }
 0x162   : > { %v1953_v56 = vpop.f32.mrf.mxu3  ;;  %v1617_v58 = vpop.f32.mrf.mxu1  ;;  %v1785_v4 = vadd.f32 %v1784_v55, %v1616_v59  ;;  %v3228_v55 = vld [vmem:[%s3656_s21 + $0x2d4] sm:$0xf0] }
 0x163   : > { %v1618_v5 = vadd.f32 %v1617_v58, %v1448_v57  ;;  %v2858_v57 = vld [vmem:[%s3656_s21 + $0x2d8] sm:$0xf0]  ;;  %v2857_v3 = vor.u32 %v3228_v55, %v2856_v54 }
 0x164   : > { %v1954_v15 = vadd.f32 %v1953_v56, %v1785_v4  ;;  %v3226_v56 = vld [vmem:[%s3656_s21 + $0x2cc] sm:$0xf] }
 0x165   : > { %v2861_v4 = vor.u32 %v3226_v56, %v2858_v57 }
 0x169   : > { %v1786_v6 = vpop.f32.mrf.mxu2  ;;  %v1451_v11 = vpop.f32.mrf.mxu0 }
 0x16a   : > { %v1955_v7 = vpop.f32.mrf.mxu3  ;;  %v1787_v10 = vadd.f32 %v1786_v6, %v1618_v5  ;;  %v1620_v12 = vpop.f32.mrf.mxu1 }
 0x16b   : > { %v1621_v22 = vadd.f32 %v1620_v12, %v1451_v11 }
 0x16c   : > { %v1956_v16 = vadd.f32 %v1955_v7, %v1787_v10  ;;  %1490 = vmatmul.bf16.gmra.mxu0 %v2817_v8 }
 0x16d   : > { %1659 = vmatmul.bf16.gmra.mxu1 %v2821_v9 }
 0x16e   : > { %v3355_v17 = vpack.c.bf16 %v1956_v16, %v1954_v15  ;;  %1828 = vmatmul.bf16.gmra.mxu2 %v2825_v13  ;;  %v2864_v13 = vld [vmem:[%s3656_s21 + $0x2e0] sm:$0xf]  ;;  %v3229_v15 = vld [vmem:[%s3656_s21 + $0x2e4] sm:$0xf]  ;;  %v2866_v16 = vld [vmem:[%s3656_s21 + $0x2f0] sm:$0xf0] }
 0x16f   : > { %1997 = vmatmul.bf16.gmra.mxu3 %v2829_v14  ;;  %v3231_v14 = vld [vmem:[%s3656_s21 + $0x2ec] sm:$0xf0]  ;;  %v2869_v26 = vor.u32 %v3229_v15, %v2866_v16 }
 0x170   : > { %3467 = vst [vmem:[%s3760_s8 + $0x58] sm:$0xff] %v3355_v17   ;;  %v2872_v17 = vld [vmem:[%s3656_s21 + $0x2e8] sm:$0xf]  ;;  %v2865_v25 = vor.u32 %v3231_v14, %v2864_v13 }
 0x171   : > { %v1789_v18 = vpop.f32.mrf.mxu2  ;;  %v1453_v20 = vpop.f32.mrf.mxu0 }
 0x172   : > { %v1958_v19 = vpop.f32.mrf.mxu3  ;;  %v1622_v21 = vpop.f32.mrf.mxu1  ;;  %v1790_v31 = vadd.f32 %v1789_v18, %v1621_v22  ;;  %v3232_v18 = vld [vmem:[%s3656_s21 + $0x2f4] sm:$0xf0] }
 0x173   : > { %v1623_v32 = vadd.f32 %v1622_v21, %v1453_v20  ;;  %v2874_v20 = vld [vmem:[%s3656_s21 + $0x2f8] sm:$0xf0]  ;;  %v2873_v30 = vor.u32 %v3232_v18, %v2872_v17 }
 0x174   : > { %v1959_v42 = vadd.f32 %v1958_v19, %v1790_v31  ;;  %v3230_v19 = vld [vmem:[%s3656_s21 + $0x2ec] sm:$0xf] }
 0x175   : > { %v2877_v31 = vor.u32 %v3230_v19, %v2874_v20 }
 0x179   : > { %v1791_v33 = vpop.f32.mrf.mxu2  ;;  %v1456_v38 = vpop.f32.mrf.mxu0 }
 0x17a   : > { %v1960_v34 = vpop.f32.mrf.mxu3  ;;  %v1792_v37 = vadd.f32 %v1791_v33, %v1623_v32  ;;  %v1625_v39 = vpop.f32.mrf.mxu1 }
 0x17b   : > { %v1626_v49 = vadd.f32 %v1625_v39, %v1456_v38 }
 0x17c   : > { %v1961_v43 = vadd.f32 %v1960_v34, %v1792_v37  ;;  %1495 = vmatmul.bf16.gmra.mxu0 %v2833_v35 }
 0x17d   : > { %1664 = vmatmul.bf16.gmra.mxu1 %v2837_v36 }
 0x17e   : > { %v3360_v44 = vpack.c.bf16 %v1961_v43, %v1959_v42  ;;  %1833 = vmatmul.bf16.gmra.mxu2 %v2841_v40  ;;  %v2880_v40 = vld [vmem:[%s3656_s21 + $0x300] sm:$0xf]  ;;  %v3233_v42 = vld [vmem:[%s3656_s21 + $0x304] sm:$0xf]  ;;  %v2882_v43 = vld [vmem:[%s3656_s21 + $0x310] sm:$0xf0] }
 0x17f   : > { %2002 = vmatmul.bf16.gmra.mxu3 %v2845_v41  ;;  %v3235_v41 = vld [vmem:[%s3656_s21 + $0x30c] sm:$0xf0]  ;;  %v2885_v53 = vor.u32 %v3233_v42, %v2882_v43 }
 0x180   : > { %3468 = vst [vmem:[%s3760_s8 + $0x60] sm:$0xff] %v3360_v44   ;;  %v2888_v44 = vld [vmem:[%s3656_s21 + $0x308] sm:$0xf]  ;;  %v2881_v52 = vor.u32 %v3235_v41, %v2880_v40 }
 0x181   : > { %v1794_v45 = vpop.f32.mrf.mxu2  ;;  %v1458_v47 = vpop.f32.mrf.mxu0 }
 0x182   : > { %v1963_v46 = vpop.f32.mrf.mxu3  ;;  %v1627_v48 = vpop.f32.mrf.mxu1  ;;  %v1795_v58 = vadd.f32 %v1794_v45, %v1626_v49  ;;  %v3236_v45 = vld [vmem:[%s3656_s21 + $0x314] sm:$0xf0] }
 0x183   : > { %v1628_v59 = vadd.f32 %v1627_v48, %v1458_v47  ;;  %v2890_v47 = vld [vmem:[%s3656_s21 + $0x318] sm:$0xf0]  ;;  %v2889_v57 = vor.u32 %v3236_v45, %v2888_v44 }
 0x184   : > { %v1964_v5 = vadd.f32 %v1963_v46, %v1795_v58  ;;  %v3234_v46 = vld [vmem:[%s3656_s21 + $0x30c] sm:$0xf] }
 0x185   : > { %v2893_v58 = vor.u32 %v3234_v46, %v2890_v47 }
 0x189   : > { %v1796_v60 = vpop.f32.mrf.mxu2  ;;  %v1461_v1 = vpop.f32.mrf.mxu0 }
 0x18a   : > { %v1965_v61 = vpop.f32.mrf.mxu3  ;;  %v1797_v0 = vadd.f32 %v1796_v60, %v1628_v59  ;;  %v1630_v2 = vpop.f32.mrf.mxu1 }
 0x18b   : > { %v1631_v12 = vadd.f32 %v1630_v2, %v1461_v1 }
 0x18c   : > { %v1966_v6 = vadd.f32 %v1965_v61, %v1797_v0  ;;  %1500 = vmatmul.bf16.gmra.mxu0 %v2849_v62 }
 0x18d   : > { %1669 = vmatmul.bf16.gmra.mxu1 %v2853_v63 }
 0x18e   : > { %v3365_v7 = vpack.c.bf16 %v1966_v6, %v1964_v5  ;;  %1838 = vmatmul.bf16.gmra.mxu2 %v2857_v3  ;;  %v2896_v3 = vld [vmem:[%s3656_s21 + $0x320] sm:$0xf]  ;;  %v3237_v5 = vld [vmem:[%s3656_s21 + $0x324] sm:$0xf]  ;;  %v2898_v6 = vld [vmem:[%s3656_s21 + $0x330] sm:$0xf0] }
 0x18f   : > { %2007 = vmatmul.bf16.gmra.mxu3 %v2861_v4  ;;  %v3239_v4 = vld [vmem:[%s3656_s21 + $0x32c] sm:$0xf0]  ;;  %v2901_v16 = vor.u32 %v3237_v5, %v2898_v6 }
 0x190   : > { %3469 = vst [vmem:[%s3760_s8 + $0x68] sm:$0xff] %v3365_v7   ;;  %v2904_v7 = vld [vmem:[%s3656_s21 + $0x328] sm:$0xf]  ;;  %v2897_v15 = vor.u32 %v3239_v4, %v2896_v3 }
 0x191   : > { %v1799_v8 = vpop.f32.mrf.mxu2  ;;  %v1463_v10 = vpop.f32.mrf.mxu0 }
 0x192   : > { %v1968_v9 = vpop.f32.mrf.mxu3  ;;  %v1632_v11 = vpop.f32.mrf.mxu1  ;;  %v1800_v21 = vadd.f32 %v1799_v8, %v1631_v12  ;;  %v3240_v8 = vld [vmem:[%s3656_s21 + $0x334] sm:$0xf0] }
 0x193   : > { %v1633_v22 = vadd.f32 %v1632_v11, %v1463_v10  ;;  %v2906_v10 = vld [vmem:[%s3656_s21 + $0x338] sm:$0xf0]  ;;  %v2905_v20 = vor.u32 %v3240_v8, %v2904_v7 }
 0x194   : > { %v1969_v32 = vadd.f32 %v1968_v9, %v1800_v21  ;;  %v3238_v9 = vld [vmem:[%s3656_s21 + $0x32c] sm:$0xf] }
 0x195   : > { %v2909_v21 = vor.u32 %v3238_v9, %v2906_v10 }
 0x199   : > { %v1801_v23 = vpop.f32.mrf.mxu2  ;;  %v1466_v28 = vpop.f32.mrf.mxu0 }
 0x19a   : > { %v1970_v24 = vpop.f32.mrf.mxu3  ;;  %v1802_v27 = vadd.f32 %v1801_v23, %v1633_v22  ;;  %v1635_v29 = vpop.f32.mrf.mxu1 }
 0x19b   : > { %v1636_v39 = vadd.f32 %v1635_v29, %v1466_v28 }
 0x19c   : > { %v1971_v33 = vadd.f32 %v1970_v24, %v1802_v27  ;;  %1505 = vmatmul.bf16.gmra.mxu0 %v2865_v25 }
 0x19d   : > { %1674 = vmatmul.bf16.gmra.mxu1 %v2869_v26 }
 0x19e   : > { %v3370_v34 = vpack.c.bf16 %v1971_v33, %v1969_v32  ;;  %1843 = vmatmul.bf16.gmra.mxu2 %v2873_v30  ;;  %v2912_v30 = vld [vmem:[%s3656_s21 + $0x340] sm:$0xf]  ;;  %v3241_v32 = vld [vmem:[%s3656_s21 + $0x344] sm:$0xf]  ;;  %v2914_v33 = vld [vmem:[%s3656_s21 + $0x350] sm:$0xf0] }
 0x19f   : > { %2012 = vmatmul.bf16.gmra.mxu3 %v2877_v31  ;;  %v3243_v31 = vld [vmem:[%s3656_s21 + $0x34c] sm:$0xf0]  ;;  %v2917_v43 = vor.u32 %v3241_v32, %v2914_v33 }
 0x1a0   : > { %3470 = vst [vmem:[%s3760_s8 + $0x70] sm:$0xff] %v3370_v34   ;;  %v2920_v34 = vld [vmem:[%s3656_s21 + $0x348] sm:$0xf]  ;;  %v2913_v42 = vor.u32 %v3243_v31, %v2912_v30 }
 0x1a1   : > { %v1804_v35 = vpop.f32.mrf.mxu2  ;;  %v1468_v37 = vpop.f32.mrf.mxu0 }
 0x1a2   : > { %v1973_v36 = vpop.f32.mrf.mxu3  ;;  %v1637_v38 = vpop.f32.mrf.mxu1  ;;  %v1805_v48 = vadd.f32 %v1804_v35, %v1636_v39  ;;  %v3244_v35 = vld [vmem:[%s3656_s21 + $0x354] sm:$0xf0] }
 0x1a3   : > { %v1638_v49 = vadd.f32 %v1637_v38, %v1468_v37  ;;  %v2922_v37 = vld [vmem:[%s3656_s21 + $0x358] sm:$0xf0]  ;;  %v2921_v47 = vor.u32 %v3244_v35, %v2920_v34 }
 0x1a4   : > { %v1974_v59 = vadd.f32 %v1973_v36, %v1805_v48  ;;  %v3242_v36 = vld [vmem:[%s3656_s21 + $0x34c] sm:$0xf] }
 0x1a5   : > { %v2925_v48 = vor.u32 %v3242_v36, %v2922_v37 }
 0x1a9   : > { %v1806_v50 = vpop.f32.mrf.mxu2  ;;  %v1471_v55 = vpop.f32.mrf.mxu0 }
 0x1aa   : > { %v1975_v51 = vpop.f32.mrf.mxu3  ;;  %v1807_v54 = vadd.f32 %v1806_v50, %v1638_v49  ;;  %v1640_v56 = vpop.f32.mrf.mxu1 }
 0x1ab   : > { %v1641_v2 = vadd.f32 %v1640_v56, %v1471_v55 }
 0x1ac   : > { %v1976_v60 = vadd.f32 %v1975_v51, %v1807_v54  ;;  %1510 = vmatmul.bf16.gmra.mxu0 %v2881_v52 }
 0x1ad   : > { %1679 = vmatmul.bf16.gmra.mxu1 %v2885_v53 }
 0x1ae   : > { %v3375_v61 = vpack.c.bf16 %v1976_v60, %v1974_v59  ;;  %1848 = vmatmul.bf16.gmra.mxu2 %v2889_v57  ;;  %v2928_v57 = vld [vmem:[%s3656_s21 + $0x360] sm:$0xf]  ;;  %v3245_v59 = vld [vmem:[%s3656_s21 + $0x364] sm:$0xf]  ;;  %v2930_v60 = vld [vmem:[%s3656_s21 + $0x370] sm:$0xf0] }
 0x1af   : > { %2017 = vmatmul.bf16.gmra.mxu3 %v2893_v58  ;;  %v3247_v58 = vld [vmem:[%s3656_s21 + $0x36c] sm:$0xf0]  ;;  %v2933_v6 = vor.u32 %v3245_v59, %v2930_v60 }
 0x1b0   : > { %3471 = vst [vmem:[%s3760_s8 + $0x78] sm:$0xff] %v3375_v61   ;;  %v2936_v61 = vld [vmem:[%s3656_s21 + $0x368] sm:$0xf]  ;;  %v2929_v5 = vor.u32 %v3247_v58, %v2928_v57 }
 0x1b1   : > { %v1809_v62 = vpop.f32.mrf.mxu2  ;;  %v1473_v0 = vpop.f32.mrf.mxu0 }
 0x1b2   : > { %v1978_v63 = vpop.f32.mrf.mxu3  ;;  %v1642_v1 = vpop.f32.mrf.mxu1  ;;  %v1810_v11 = vadd.f32 %v1809_v62, %v1641_v2  ;;  %v3248_v62 = vld [vmem:[%s3656_s21 + $0x374] sm:$0xf0] }
 0x1b3   : > { %v1643_v12 = vadd.f32 %v1642_v1, %v1473_v0  ;;  %v2938_v0 = vld [vmem:[%s3656_s21 + $0x378] sm:$0xf0]  ;;  %v2937_v10 = vor.u32 %v3248_v62, %v2936_v61 }
 0x1b4   : > { %v1979_v22 = vadd.f32 %v1978_v63, %v1810_v11  ;;  %v3246_v63 = vld [vmem:[%s3656_s21 + $0x36c] sm:$0xf] }
 0x1b5   : > { %v2941_v11 = vor.u32 %v3246_v63, %v2938_v0 }
 0x1b9   : > { %v1811_v13 = vpop.f32.mrf.mxu2  ;;  %v1476_v18 = vpop.f32.mrf.mxu0 }
 0x1ba   : > { %v1980_v14 = vpop.f32.mrf.mxu3  ;;  %v1812_v17 = vadd.f32 %v1811_v13, %v1643_v12  ;;  %v1645_v19 = vpop.f32.mrf.mxu1 }
 0x1bb   : > { %v1646_v29 = vadd.f32 %v1645_v19, %v1476_v18 }
 0x1bc   : > { %v1981_v23 = vadd.f32 %v1980_v14, %v1812_v17  ;;  %1515 = vmatmul.bf16.gmra.mxu0 %v2897_v15 }
 0x1bd   : > { %1684 = vmatmul.bf16.gmra.mxu1 %v2901_v16 }
 0x1be   : > { %v3380_v24 = vpack.c.bf16 %v1981_v23, %v1979_v22  ;;  %1853 = vmatmul.bf16.gmra.mxu2 %v2905_v20  ;;  %v2944_v20 = vld [vmem:[%s3656_s21 + $0x380] sm:$0xf]  ;;  %v3249_v22 = vld [vmem:[%s3656_s21 + $0x384] sm:$0xf]  ;;  %v2946_v23 = vld [vmem:[%s3656_s21 + $0x390] sm:$0xf0] }
 0x1bf   : > { %2022 = vmatmul.bf16.gmra.mxu3 %v2909_v21  ;;  %v3251_v21 = vld [vmem:[%s3656_s21 + $0x38c] sm:$0xf0]  ;;  %v2949_v33 = vor.u32 %v3249_v22, %v2946_v23 }
 0x1c0   : > { %3472 = vst [vmem:[%s3760_s8 + $0x80] sm:$0xff] %v3380_v24   ;;  %v2952_v24 = vld [vmem:[%s3656_s21 + $0x388] sm:$0xf]  ;;  %v2945_v32 = vor.u32 %v3251_v21, %v2944_v20 }
 0x1c1   : > { %v1814_v25 = vpop.f32.mrf.mxu2  ;;  %v1478_v27 = vpop.f32.mrf.mxu0 }
 0x1c2   : > { %v1983_v26 = vpop.f32.mrf.mxu3  ;;  %v1647_v28 = vpop.f32.mrf.mxu1  ;;  %v1815_v38 = vadd.f32 %v1814_v25, %v1646_v29  ;;  %v3252_v25 = vld [vmem:[%s3656_s21 + $0x394] sm:$0xf0] }
 0x1c3   : > { %v1648_v39 = vadd.f32 %v1647_v28, %v1478_v27  ;;  %v2954_v27 = vld [vmem:[%s3656_s21 + $0x398] sm:$0xf0]  ;;  %v2953_v37 = vor.u32 %v3252_v25, %v2952_v24 }
 0x1c4   : > { %v1984_v49 = vadd.f32 %v1983_v26, %v1815_v38  ;;  %v3250_v26 = vld [vmem:[%s3656_s21 + $0x38c] sm:$0xf] }
 0x1c5   : > { %v2957_v38 = vor.u32 %v3250_v26, %v2954_v27 }
 0x1c9   : > { %v1816_v40 = vpop.f32.mrf.mxu2  ;;  %v1481_v45 = vpop.f32.mrf.mxu0 }
 0x1ca   : > { %v1985_v41 = vpop.f32.mrf.mxu3  ;;  %v1817_v44 = vadd.f32 %v1816_v40, %v1648_v39  ;;  %v1650_v46 = vpop.f32.mrf.mxu1 }
 0x1cb   : > { %v1651_v56 = vadd.f32 %v1650_v46, %v1481_v45 }
 0x1cc   : > { %v1986_v50 = vadd.f32 %v1985_v41, %v1817_v44  ;;  %1520 = vmatmul.bf16.gmra.mxu0 %v2913_v42 }
 0x1cd   : > { %1689 = vmatmul.bf16.gmra.mxu1 %v2917_v43 }
 0x1ce   : > { %v3385_v51 = vpack.c.bf16 %v1986_v50, %v1984_v49  ;;  %1858 = vmatmul.bf16.gmra.mxu2 %v2921_v47  ;;  %v2960_v47 = vld [vmem:[%s3656_s21 + $0x3a0] sm:$0xf]  ;;  %v3253_v49 = vld [vmem:[%s3656_s21 + $0x3a4] sm:$0xf]  ;;  %v2962_v50 = vld [vmem:[%s3656_s21 + $0x3b0] sm:$0xf0] }
 0x1cf   : > { %2027 = vmatmul.bf16.gmra.mxu3 %v2925_v48  ;;  %v3255_v48 = vld [vmem:[%s3656_s21 + $0x3ac] sm:$0xf0]  ;;  %v2965_v60 = vor.u32 %v3253_v49, %v2962_v50 }
 0x1d0   : > { %3473 = vst [vmem:[%s3760_s8 + $0x88] sm:$0xff] %v3385_v51   ;;  %v2968_v51 = vld [vmem:[%s3656_s21 + $0x3a8] sm:$0xf]  ;;  %v2961_v59 = vor.u32 %v3255_v48, %v2960_v47 }
 0x1d1   : > { %v1819_v52 = vpop.f32.mrf.mxu2  ;;  %v1483_v54 = vpop.f32.mrf.mxu0 }
 0x1d2   : > { %v1988_v53 = vpop.f32.mrf.mxu3  ;;  %v1652_v55 = vpop.f32.mrf.mxu1  ;;  %v1820_v1 = vadd.f32 %v1819_v52, %v1651_v56  ;;  %v3256_v52 = vld [vmem:[%s3656_s21 + $0x3b4] sm:$0xf0] }
 0x1d3   : > { %v1653_v2 = vadd.f32 %v1652_v55, %v1483_v54  ;;  %v2970_v54 = vld [vmem:[%s3656_s21 + $0x3b8] sm:$0xf0]  ;;  %v2969_v0 = vor.u32 %v3256_v52, %v2968_v51 }
 0x1d4   : > { %v1989_v12 = vadd.f32 %v1988_v53, %v1820_v1  ;;  %v3254_v53 = vld [vmem:[%s3656_s21 + $0x3ac] sm:$0xf] }
 0x1d5   : > { %v2973_v1 = vor.u32 %v3254_v53, %v2970_v54 }
 0x1d9   : > { %v1821_v3 = vpop.f32.mrf.mxu2  ;;  %v1486_v8 = vpop.f32.mrf.mxu0 }
 0x1da   : > { %v1990_v4 = vpop.f32.mrf.mxu3  ;;  %v1822_v7 = vadd.f32 %v1821_v3, %v1653_v2  ;;  %v1655_v9 = vpop.f32.mrf.mxu1 }
 0x1db   : > { %v1656_v19 = vadd.f32 %v1655_v9, %v1486_v8 }
 0x1dc   : > { %v1991_v13 = vadd.f32 %v1990_v4, %v1822_v7  ;;  %1525 = vmatmul.bf16.gmra.mxu0 %v2929_v5 }
 0x1dd   : > { %1694 = vmatmul.bf16.gmra.mxu1 %v2933_v6 }
 0x1de   : > { %v3390_v14 = vpack.c.bf16 %v1991_v13, %v1989_v12  ;;  %1863 = vmatmul.bf16.gmra.mxu2 %v2937_v10  ;;  %v2976_v10 = vld [vmem:[%s3656_s21 + $0x3c0] sm:$0xf]  ;;  %v3257_v12 = vld [vmem:[%s3656_s21 + $0x3c4] sm:$0xf]  ;;  %v2978_v13 = vld [vmem:[%s3656_s21 + $0x3d0] sm:$0xf0] }
 0x1df   : > { %2032 = vmatmul.bf16.gmra.mxu3 %v2941_v11  ;;  %v3259_v11 = vld [vmem:[%s3656_s21 + $0x3cc] sm:$0xf0]  ;;  %v2981_v23 = vor.u32 %v3257_v12, %v2978_v13 }
 0x1e0   : > { %3474 = vst [vmem:[%s3760_s8 + $0x90] sm:$0xff] %v3390_v14   ;;  %v2984_v14 = vld [vmem:[%s3656_s21 + $0x3c8] sm:$0xf]  ;;  %v2977_v22 = vor.u32 %v3259_v11, %v2976_v10 }
 0x1e1   : > { %v1824_v15 = vpop.f32.mrf.mxu2  ;;  %v1488_v17 = vpop.f32.mrf.mxu0 }
 0x1e2   : > { %v1993_v16 = vpop.f32.mrf.mxu3  ;;  %v1657_v18 = vpop.f32.mrf.mxu1  ;;  %v1825_v28 = vadd.f32 %v1824_v15, %v1656_v19  ;;  %v3260_v15 = vld [vmem:[%s3656_s21 + $0x3d4] sm:$0xf0] }
 0x1e3   : > { %v1658_v29 = vadd.f32 %v1657_v18, %v1488_v17  ;;  %v2986_v17 = vld [vmem:[%s3656_s21 + $0x3d8] sm:$0xf0]  ;;  %v2985_v27 = vor.u32 %v3260_v15, %v2984_v14 }
 0x1e4   : > { %v1994_v39 = vadd.f32 %v1993_v16, %v1825_v28  ;;  %v3258_v16 = vld [vmem:[%s3656_s21 + $0x3cc] sm:$0xf] }
 0x1e5   : > { %v2989_v28 = vor.u32 %v3258_v16, %v2986_v17 }
 0x1e9   : > { %v1826_v30 = vpop.f32.mrf.mxu2  ;;  %v1491_v35 = vpop.f32.mrf.mxu0 }
 0x1ea   : > { %v1995_v31 = vpop.f32.mrf.mxu3  ;;  %v1827_v34 = vadd.f32 %v1826_v30, %v1658_v29  ;;  %v1660_v36 = vpop.f32.mrf.mxu1 }
 0x1eb   : > { %v1661_v46 = vadd.f32 %v1660_v36, %v1491_v35 }
 0x1ec   : > { %v1996_v40 = vadd.f32 %v1995_v31, %v1827_v34  ;;  %1530 = vmatmul.bf16.gmra.mxu0 %v2945_v32 }
 0x1ed   : > { %1699 = vmatmul.bf16.gmra.mxu1 %v2949_v33 }
 0x1ee   : > { %v3395_v41 = vpack.c.bf16 %v1996_v40, %v1994_v39  ;;  %1868 = vmatmul.bf16.gmra.mxu2 %v2953_v37  ;;  %v2992_v37 = vld [vmem:[%s3656_s21 + $0x3e0] sm:$0xf]  ;;  %v3261_v39 = vld [vmem:[%s3656_s21 + $0x3e4] sm:$0xf]  ;;  %v2994_v40 = vld [vmem:[%s3656_s21 + $0x3f0] sm:$0xf0] }
 0x1ef   : > { %2037 = vmatmul.bf16.gmra.mxu3 %v2957_v38  ;;  %v3263_v38 = vld [vmem:[%s3656_s21 + $0x3ec] sm:$0xf0]  ;;  %v2997_v50 = vor.u32 %v3261_v39, %v2994_v40 }
 0x1f0   : > { %3475 = vst [vmem:[%s3760_s8 + $0x98] sm:$0xff] %v3395_v41   ;;  %v3000_v41 = vld [vmem:[%s3656_s21 + $0x3e8] sm:$0xf]  ;;  %v2993_v49 = vor.u32 %v3263_v38, %v2992_v37 }
 0x1f1   : > { %v1829_v42 = vpop.f32.mrf.mxu2  ;;  %v1493_v44 = vpop.f32.mrf.mxu0 }
 0x1f2   : > { %v1998_v43 = vpop.f32.mrf.mxu3  ;;  %v1662_v45 = vpop.f32.mrf.mxu1  ;;  %v1830_v55 = vadd.f32 %v1829_v42, %v1661_v46  ;;  %v3264_v42 = vld [vmem:[%s3656_s21 + $0x3f4] sm:$0xf0] }
 0x1f3   : > { %v1663_v56 = vadd.f32 %v1662_v45, %v1493_v44  ;;  %v3002_v44 = vld [vmem:[%s3656_s21 + $0x3f8] sm:$0xf0]  ;;  %v3001_v54 = vor.u32 %v3264_v42, %v3000_v41 }
 0x1f4   : > { %v1999_v2 = vadd.f32 %v1998_v43, %v1830_v55  ;;  %v3262_v43 = vld [vmem:[%s3656_s21 + $0x3ec] sm:$0xf] }
 0x1f5   : > { %v3005_v55 = vor.u32 %v3262_v43, %v3002_v44 }
 0x1f9   : > { %v1831_v57 = vpop.f32.mrf.mxu2  ;;  %v1496_v62 = vpop.f32.mrf.mxu0 }
 0x1fa   : > { %v2000_v58 = vpop.f32.mrf.mxu3  ;;  %v1832_v61 = vadd.f32 %v1831_v57, %v1663_v56  ;;  %v1665_v63 = vpop.f32.mrf.mxu1 }
 0x1fb   : > { %v1666_v9 = vadd.f32 %v1665_v63, %v1496_v62 }
 0x1fc   : > { %v2001_v3 = vadd.f32 %v2000_v58, %v1832_v61  ;;  %1535 = vmatmul.bf16.gmra.mxu0 %v2961_v59 }
 0x1fd   : > { %1704 = vmatmul.bf16.gmra.mxu1 %v2965_v60 }
 0x1fe   : > { %v3400_v4 = vpack.c.bf16 %v2001_v3, %v1999_v2  ;;  %1873 = vmatmul.bf16.gmra.mxu2 %v2969_v0 }
 0x1ff   : > { %2042 = vmatmul.bf16.gmra.mxu3 %v2973_v1 }
 0x200   : > { %3476 = vst [vmem:[%s3760_s8 + $0xa0] sm:$0xff] %v3400_v4  }
 0x201   : > { %v1834_v5 = vpop.f32.mrf.mxu2  ;;  %v1498_v7 = vpop.f32.mrf.mxu0 }
 0x202   : > { %v2003_v6 = vpop.f32.mrf.mxu3  ;;  %v1667_v8 = vpop.f32.mrf.mxu1  ;;  %v1835_v18 = vadd.f32 %v1834_v5, %v1666_v9 }
 0x203   : > { %v1668_v19 = vadd.f32 %v1667_v8, %v1498_v7 }
 0x204   : > { %v2004_v29 = vadd.f32 %v2003_v6, %v1835_v18 }
 0x209   : > { %v1836_v20 = vpop.f32.mrf.mxu2  ;;  %v1501_v25 = vpop.f32.mrf.mxu0 }
 0x20a   : > { %v2005_v21 = vpop.f32.mrf.mxu3  ;;  %v1837_v24 = vadd.f32 %v1836_v20, %v1668_v19  ;;  %v1670_v26 = vpop.f32.mrf.mxu1 }
 0x20b   : > { %v1671_v36 = vadd.f32 %v1670_v26, %v1501_v25 }
 0x20c   : > { %v2006_v30 = vadd.f32 %v2005_v21, %v1837_v24  ;;  %1540 = vmatmul.bf16.gmra.mxu0 %v2977_v22 }
 0x20d   : > { %1709 = vmatmul.bf16.gmra.mxu1 %v2981_v23 }
 0x20e   : > { %v3405_v31 = vpack.c.bf16 %v2006_v30, %v2004_v29  ;;  %1878 = vmatmul.bf16.gmra.mxu2 %v2985_v27 }
 0x20f   : > { %2047 = vmatmul.bf16.gmra.mxu3 %v2989_v28 }
 0x210   : > { %3477 = vst [vmem:[%s3760_s8 + $0xa8] sm:$0xff] %v3405_v31  }
 0x211   : > { %v1839_v32 = vpop.f32.mrf.mxu2  ;;  %v1503_v34 = vpop.f32.mrf.mxu0 }
 0x212   : > { %v2008_v33 = vpop.f32.mrf.mxu3  ;;  %v1672_v35 = vpop.f32.mrf.mxu1  ;;  %v1840_v45 = vadd.f32 %v1839_v32, %v1671_v36 }
 0x213   : > { %v1673_v46 = vadd.f32 %v1672_v35, %v1503_v34 }
 0x214   : > { %v2009_v56 = vadd.f32 %v2008_v33, %v1840_v45 }
 0x219   : > { %v1841_v47 = vpop.f32.mrf.mxu2  ;;  %v1506_v52 = vpop.f32.mrf.mxu0 }
 0x21a   : > { %v2010_v48 = vpop.f32.mrf.mxu3  ;;  %v1842_v51 = vadd.f32 %v1841_v47, %v1673_v46  ;;  %v1675_v53 = vpop.f32.mrf.mxu1 }
 0x21b   : > { %v1676_v63 = vadd.f32 %v1675_v53, %v1506_v52 }
 0x21c   : > { %v2011_v57 = vadd.f32 %v2010_v48, %v1842_v51  ;;  %1545 = vmatmul.bf16.gmra.mxu0 %v2993_v49 }
 0x21d   : > { %1714 = vmatmul.bf16.gmra.mxu1 %v2997_v50 }
 0x21e   : > { %v3410_v58 = vpack.c.bf16 %v2011_v57, %v2009_v56  ;;  %1883 = vmatmul.bf16.gmra.mxu2 %v3001_v54 }
 0x21f   : > { %2052 = vmatmul.bf16.gmra.mxu3 %v3005_v55 }
 0x220   : > { %3478 = vst [vmem:[%s3760_s8 + $0xb0] sm:$0xff] %v3410_v58  }
 0x221   : > { %v1844_v59 = vpop.f32.mrf.mxu2  ;;  %v1508_v61 = vpop.f32.mrf.mxu0 }
 0x222   : > { %v2013_v60 = vpop.f32.mrf.mxu3  ;;  %v1677_v62 = vpop.f32.mrf.mxu1  ;;  %v1845_v0 = vadd.f32 %v1844_v59, %v1676_v63 }
 0x223   : > { %v1678_v1 = vadd.f32 %v1677_v62, %v1508_v61 }
 0x224   : > { %v2014_v7 = vadd.f32 %v2013_v60, %v1845_v0 }
 0x229   : > { %v1846_v2 = vpop.f32.mrf.mxu2  ;;  %v1511_v5 = vpop.f32.mrf.mxu0 }
 0x22a   : > { %v2015_v3 = vpop.f32.mrf.mxu3  ;;  %v1847_v4 = vadd.f32 %v1846_v2, %v1678_v1  ;;  %v1680_v6 = vpop.f32.mrf.mxu1 }
 0x22b   : > { %v1681_v14 = vadd.f32 %v1680_v6, %v1511_v5 }
 0x22c   : > { %v2016_v8 = vadd.f32 %v2015_v3, %v1847_v4 }
 0x22e   : > { %v3415_v9 = vpack.c.bf16 %v2016_v8, %v2014_v7 }
 0x230   : > { %3479 = vst [vmem:[%s3760_s8 + $0xb8] sm:$0xff] %v3415_v9  }
 0x231   : > { %v1849_v10 = vpop.f32.mrf.mxu2  ;;  %v1513_v12 = vpop.f32.mrf.mxu0 }
 0x232   : > { %v2018_v11 = vpop.f32.mrf.mxu3  ;;  %v1682_v13 = vpop.f32.mrf.mxu1  ;;  %v1850_v15 = vadd.f32 %v1849_v10, %v1681_v14 }
 0x233   : > { %v1683_v16 = vadd.f32 %v1682_v13, %v1513_v12 }
 0x234   : > { %v2019_v22 = vadd.f32 %v2018_v11, %v1850_v15 }
 0x239   : > { %v1851_v17 = vpop.f32.mrf.mxu2  ;;  %v1516_v20 = vpop.f32.mrf.mxu0 }
 0x23a   : > { %v2020_v18 = vpop.f32.mrf.mxu3  ;;  %v1852_v19 = vadd.f32 %v1851_v17, %v1683_v16  ;;  %v1685_v21 = vpop.f32.mrf.mxu1 }
 0x23b   : > { %v1686_v29 = vadd.f32 %v1685_v21, %v1516_v20 }
 0x23c   : > { %v2021_v23 = vadd.f32 %v2020_v18, %v1852_v19 }
 0x23e   : > { %v3420_v24 = vpack.c.bf16 %v2021_v23, %v2019_v22 }
 0x240   : > { %3480 = vst [vmem:[%s3760_s8 + $0xc0] sm:$0xff] %v3420_v24  }
 0x241   : > { %v1854_v25 = vpop.f32.mrf.mxu2  ;;  %v1518_v27 = vpop.f32.mrf.mxu0 }
 0x242   : > { %v2023_v26 = vpop.f32.mrf.mxu3  ;;  %v1687_v28 = vpop.f32.mrf.mxu1  ;;  %v1855_v30 = vadd.f32 %v1854_v25, %v1686_v29 }
 0x243   : > { %v1688_v31 = vadd.f32 %v1687_v28, %v1518_v27 }
 0x244   : > { %v2024_v37 = vadd.f32 %v2023_v26, %v1855_v30 }
 0x249   : > { %v1856_v32 = vpop.f32.mrf.mxu2  ;;  %v1521_v35 = vpop.f32.mrf.mxu0 }
 0x24a   : > { %v2025_v33 = vpop.f32.mrf.mxu3  ;;  %v1857_v34 = vadd.f32 %v1856_v32, %v1688_v31  ;;  %v1690_v36 = vpop.f32.mrf.mxu1 }
 0x24b   : > { %v1691_v44 = vadd.f32 %v1690_v36, %v1521_v35 }
 0x24c   : > { %v2026_v38 = vadd.f32 %v2025_v33, %v1857_v34 }
 0x24e   : > { %v3425_v39 = vpack.c.bf16 %v2026_v38, %v2024_v37 }
 0x250   : > { %3481 = vst [vmem:[%s3760_s8 + $0xc8] sm:$0xff] %v3425_v39  }
 0x251   : > { %v1859_v40 = vpop.f32.mrf.mxu2  ;;  %v1523_v42 = vpop.f32.mrf.mxu0 }
 0x252   : > { %v2028_v41 = vpop.f32.mrf.mxu3  ;;  %v1692_v43 = vpop.f32.mrf.mxu1  ;;  %v1860_v45 = vadd.f32 %v1859_v40, %v1691_v44 }
 0x253   : > { %v1693_v46 = vadd.f32 %v1692_v43, %v1523_v42 }
 0x254   : > { %v2029_v52 = vadd.f32 %v2028_v41, %v1860_v45 }
 0x259   : > { %v1861_v47 = vpop.f32.mrf.mxu2  ;;  %v1526_v50 = vpop.f32.mrf.mxu0 }
 0x25a   : > { %v2030_v48 = vpop.f32.mrf.mxu3  ;;  %v1862_v49 = vadd.f32 %v1861_v47, %v1693_v46  ;;  %v1695_v51 = vpop.f32.mrf.mxu1 }
 0x25b   : > { %v1696_v59 = vadd.f32 %v1695_v51, %v1526_v50 }
 0x25c   : > { %v2031_v53 = vadd.f32 %v2030_v48, %v1862_v49 }
 0x25e   : > { %v3430_v54 = vpack.c.bf16 %v2031_v53, %v2029_v52 }
 0x260   : > { %3482 = vst [vmem:[%s3760_s8 + $0xd0] sm:$0xff] %v3430_v54  }
 0x261   : > { %v1864_v55 = vpop.f32.mrf.mxu2  ;;  %v1528_v57 = vpop.f32.mrf.mxu0 }
 0x262   : > { %v2033_v56 = vpop.f32.mrf.mxu3  ;;  %v1697_v58 = vpop.f32.mrf.mxu1  ;;  %v1865_v60 = vadd.f32 %v1864_v55, %v1696_v59 }
 0x263   : > { %v1698_v61 = vadd.f32 %v1697_v58, %v1528_v57 }
 0x264   : > { %v2034_v3 = vadd.f32 %v2033_v56, %v1865_v60 }
 0x269   : > { %v1866_v62 = vpop.f32.mrf.mxu2  ;;  %v1531_v1 = vpop.f32.mrf.mxu0 }
 0x26a   : > { %v2035_v63 = vpop.f32.mrf.mxu3  ;;  %v1867_v0 = vadd.f32 %v1866_v62, %v1698_v61  ;;  %v1700_v2 = vpop.f32.mrf.mxu1 }
 0x26b   : > { %v1701_v10 = vadd.f32 %v1700_v2, %v1531_v1 }
 0x26c   : > { %v2036_v4 = vadd.f32 %v2035_v63, %v1867_v0 }
 0x26e   : > { %v3435_v5 = vpack.c.bf16 %v2036_v4, %v2034_v3 }
 0x270   : > { %3483 = vst [vmem:[%s3760_s8 + $0xd8] sm:$0xff] %v3435_v5  }
 0x271   : > { %v1869_v6 = vpop.f32.mrf.mxu2  ;;  %v1533_v8 = vpop.f32.mrf.mxu0 }
 0x272   : > { %v2038_v7 = vpop.f32.mrf.mxu3  ;;  %v1702_v9 = vpop.f32.mrf.mxu1  ;;  %v1870_v11 = vadd.f32 %v1869_v6, %v1701_v10 }
 0x273   : > { %v1703_v12 = vadd.f32 %v1702_v9, %v1533_v8 }
 0x274   : > { %v2039_v18 = vadd.f32 %v2038_v7, %v1870_v11 }
 0x279   : > { %v1871_v13 = vpop.f32.mrf.mxu2  ;;  %v1536_v16 = vpop.f32.mrf.mxu0 }
 0x27a   : > { %v2040_v14 = vpop.f32.mrf.mxu3  ;;  %v1872_v15 = vadd.f32 %v1871_v13, %v1703_v12  ;;  %v1705_v17 = vpop.f32.mrf.mxu1 }
 0x27b   : > { %v1706_v25 = vadd.f32 %v1705_v17, %v1536_v16 }
 0x27c   : > { %v2041_v19 = vadd.f32 %v2040_v14, %v1872_v15 }
 0x27e   : > { %v3440_v20 = vpack.c.bf16 %v2041_v19, %v2039_v18 }
 0x280   : > { %3484 = vst [vmem:[%s3760_s8 + $0xe0] sm:$0xff] %v3440_v20  }
 0x281   : > { %v1874_v21 = vpop.f32.mrf.mxu2  ;;  %v1538_v23 = vpop.f32.mrf.mxu0 }
 0x282   : > { %v2043_v22 = vpop.f32.mrf.mxu3  ;;  %v1707_v24 = vpop.f32.mrf.mxu1  ;;  %v1875_v26 = vadd.f32 %v1874_v21, %v1706_v25 }
 0x283   : > { %v1708_v27 = vadd.f32 %v1707_v24, %v1538_v23 }
 0x284   : > { %v2044_v33 = vadd.f32 %v2043_v22, %v1875_v26 }
 0x289   : > { %v1876_v28 = vpop.f32.mrf.mxu2  ;;  %v1541_v31 = vpop.f32.mrf.mxu0 }
 0x28a   : > { %v2045_v29 = vpop.f32.mrf.mxu3  ;;  %v1877_v30 = vadd.f32 %v1876_v28, %v1708_v27  ;;  %v1710_v32 = vpop.f32.mrf.mxu1 }
 0x28b   : > { %v1711_v40 = vadd.f32 %v1710_v32, %v1541_v31 }
 0x28c   : > { %v2046_v34 = vadd.f32 %v2045_v29, %v1877_v30 }
 0x28e   : > { %v3445_v35 = vpack.c.bf16 %v2046_v34, %v2044_v33 }
 0x290   : > { %3485 = vst [vmem:[%s3760_s8 + $0xe8] sm:$0xff] %v3445_v35  }
 0x291   : > { %v1879_v36 = vpop.f32.mrf.mxu2  ;;  %v1543_v38 = vpop.f32.mrf.mxu0 }
 0x292   : > { %v2048_v37 = vpop.f32.mrf.mxu3  ;;  %v1712_v39 = vpop.f32.mrf.mxu1  ;;  %v1880_v41 = vadd.f32 %v1879_v36, %v1711_v40 }
 0x293   : > { %v1713_v42 = vadd.f32 %v1712_v39, %v1543_v38 }
 0x294   : > { %v2049_v48 = vadd.f32 %v2048_v37, %v1880_v41 }
 0x299   : > { %v1881_v43 = vpop.f32.mrf.mxu2  ;;  %v1546_v46 = vpop.f32.mrf.mxu0 }
 0x29a   : > { %v2050_v44 = vpop.f32.mrf.mxu3  ;;  %v1882_v45 = vadd.f32 %v1881_v43, %v1713_v42  ;;  %v1715_v47 = vpop.f32.mrf.mxu1 }
 0x29b   : > { %v1716_v53 = vadd.f32 %v1715_v47, %v1546_v46 }
 0x29c   : > { %v2051_v49 = vadd.f32 %v2050_v44, %v1882_v45 }
 0x29e   : > { %v3450_v50 = vpack.c.bf16 %v2051_v49, %v2049_v48 }
 0x2a0   : > { %3486 = vst [vmem:[%s3760_s8 + $0xf0] sm:$0xff] %v3450_v50  }
 0x2a1   : > { %v1884_v51 = vpop.f32.mrf.mxu2  ;;  %v1548_v54 = vpop.f32.mrf.mxu0 }
 0x2a2   : > { %v2053_v52 = vpop.f32.mrf.mxu3  ;;  %v1717_v55 = vpop.f32.mrf.mxu1  ;;  %v1885_v56 = vadd.f32 %v1884_v51, %v1716_v53 }
 0x2a3   : > { %v1718_v57 = vadd.f32 %v1717_v55, %v1548_v54 }
 0x2a4   : > { %v2054_v61 = vadd.f32 %v2053_v52, %v1885_v56 }
 0x2a9   : > { %v1886_v58 = vpop.f32.mrf.mxu2 }
 0x2aa   : > { %v1887_v59 = vadd.f32 %v1886_v58, %v1718_v57  ;;  %v2055_v60 = vpop.f32.mrf.mxu3 }
 0x2ac   : > { %v2056_v62 = vadd.f32 %v2055_v60, %v1887_v59 }
 0x2ae   : > { %v3455_v63 = vpack.c.bf16 %v2056_v62, %v2054_v61 }
 0x2b0   : > { %3487 = vst [vmem:[%s3760_s8 + $0xf8] sm:$0xff] %v3455_v63  }
 0x2b1 PF: > { %s12_s11 = sadd.s32 1, %s3534_s11   ;;  %s3982_s9 = smov %s3530_s10 }
 0x2b2   : > { %p9_p5 = scmp.ge.s32.totalorder %s12_s11, 4   ;;  %s3983_s10 = smov %s3985_s12 }
 0x2b4   :  { %11 = sbr.rel (!%p9_p5) target bundleno = 2 (0x2), region = 69 }

// kernel: deepspeech_forward.19
= control target key start
LH: loop header
LB: loop body
LE: loop exit
PB: predicated region body
PF: predicated region fallthrough
CT: control target
= control target key end

     0   :  { %s1037_s9 = smov 0   ;;  %s1039_s10 = smov 0   ;;  %s1156_s0 = inlined_call_operand.vmem [shape: bf16[24,7680], index: 0, kind: input, shape index: {}]   ;;  %s1157_s1 = inlined_call_operand.vmem [shape: bf16[7680,128], index: 1, kind: input, shape index: {}]   ;;  %s1158_s2 = inlined_call_operand.vmem [shape: bf16[24,128], index: 2, kind: output, shape index: {}]  }
   0x1   :  { %s1041_s11 = smov 0   ;;  %s1043_s12 = smov 0  }
   0x2   :  { %s1045_s13 = smov 0  }
   0x3 LB: > { %s24_s14 = sadd.s32 1, %s1015_s12  ;;  %p47_p1 = scmp.ne.s32.totalorder %s1007_s10, %s1003_s9  ;;  %s1019_s13 = sphi %s1045_s13, %s12_s13   ;;  %s1015_s12 = sphi %s1043_s12, %s1162_s12   ;;  %s1011_s11 = sphi %s1041_s11, %s1161_s11   ;;  %s1007_s10 = sphi %s1039_s10, %s1160_s10   ;;  %s1003_s9 = sphi %s1037_s9, %s1159_s9  }
   0x4   : > { %p25_p0 = scmp.ge.s32.totalorder %s24_s14, 15  ;;  %p48_p2 = scmp.eq.s32.totalorder %s1019_s13, 0 }
   0x5   : > { %s40_s16 = sadd.s32 1, %s1007_s10  ;;  %p740_p5 = scmp.ge.s32.totalorder %s1019_s13, 15 }
   0x6   : > { %s1164_s14 = smov (%p25_p0, %s24_s14), 0  ;;  %p49_p3 = por %p48_p2, %p47_p1 }
   0x7   : > { %s36_s15 = ssub.s32 %s1015_s12, %s1164_s14  ;;  %129 = sbr.rel (%p740_p5) target bundleno = 22 (0x16), region = 16 }
   0x8   : > { %p38_p4 = scmp.eq.s32.totalorder %s36_s15, 0 }
   0xa   : > { %s1072_s17 = scalar_select %p38_p4, %s1007_s10, %s40_s16  }
   0xc   : > { %132 = sbr.rel (!%p49_p3) target bundleno = 22 (0x16), region = 20  ;;  %s134_s18 = sand.u32 (%p49_p3), 1, %s1007_s10  }
   0xd   : > { %s896_s19 = sshll.u32 (%p49_p3), %s1015_s12, 4  ;;  %s938_s20 = smul.u32 (%p49_p3), 48, %s134_s18 }
   0xe   : > { %s142_s23 = scalar_lea.vmem (%p49_p3), %s1156_s0, %s896_s19 }
   0xf   : > { %v155_v0 = vld [vmem:[%s142_s23] sm:$0xff] (%p49_p3)  ;;  %v157_v1 = vld [vmem:[%s142_s23 + $0x8] sm:$0xff] (%p49_p3)  ;;  %v159_v2 = vld [vmem:[%s142_s23 + $0xf0] sm:$0xff] (%p49_p3)  ;;  %s136_s24 = scalar_lea.vmem (%p49_p3), [#allocation3], %s938_s20 }
  0x10   : > { %156 = vst [vmem:[%s136_s24] sm:$0xff] (%p49_p3), %v155_v0  ;;  %v161_v3 = vld [vmem:[%s142_s23 + $0xf8] sm:$0xff] (%p49_p3)  ;;  %v163_v4 = vld [vmem:[%s142_s23 + $0x1e0] sm:$0xff] (%p49_p3)  ;;  %v165_v5 = vld [vmem:[%s142_s23 + $0x1e8] sm:$0xff] (%p49_p3) }
  0x11   : > { %158 = vst [vmem:[%s136_s24 + $0x8] sm:$0xff] %v157_v1 }
  0x12   : > { %160 = vst [vmem:[%s136_s24 + $0x10] sm:$0xff] %v159_v2 }
  0x13   : > { %162 = vst [vmem:[%s136_s24 + $0x18] sm:$0xff] %v161_v3 }
  0x14   : > { %164 = vst [vmem:[%s136_s24 + $0x20] sm:$0xff] %v163_v4 }
  0x15   : > { %166 = vst [vmem:[%s136_s24 + $0x28] sm:$0xff] %v165_v5 }
  0x16 PF: > { %p743_p6 = scmp.ge.s32.totalorder %s1019_s13, 1  ;;  %p183_p7 = scmp.lt.s32.totalorder %s1019_s13, 16 }
  0x18   : > { %p184_p8 = pnand %p743_p6, %p183_p7 }
  0x19   : > { %s190_s25 = sand.u32 (!%p184_p8), 1, %s1003_s9   ;;  %s744_s26 = sshll.u32 (!%p184_p8), %s1011_s11, 6 }
  0x1a   : > { %187 = sbr.rel (%p184_p8) target bundleno = 239 (0xef), region = 47  ;;  %p225_p9 = scmp.lt.s32.totalorder (!%p184_p8), %s744_s26, 959 }
  0x1b   : > { %s939_s27 = smul.u32 (!%p184_p8), 48, %s190_s25  ;;  %p746_p10 = scmp.ne.s32.totalorder (!%p184_p8), %s1011_s11, 0 }
  0x1d   : > { %s1089_s4 = scalar_lea.vmem (!%p184_p8), [#allocation3], %s939_s27 }
  0x1f   : > { %s1166_s26 = smov (!%p225_p9, %s744_s26), 959  ;;  %245 = sbr.rel (%p746_p10) target bundleno = 40 (0x28), region = 55 }
  0x20   : > { %s745_s28 = sshll.u32 %s1166_s26, 2 }
  0x21   : > { %s1087_s3 = scalar_lea.vmem %s1157_s1, %s745_s28 }
  0x24   : > { %v1021_v6 = vmov 0.0  }
  0x25   : > { %246 = vst [vmem:[#allocation2 + $0x10] sm:$0xff] %v1021_v6 }
  0x26   : > { %247 = vst [vmem:[#allocation2] sm:$0xff] %v1021_v6 }
  0x27   : > { %248 = vst [vmem:[#allocation2 + $0x8] sm:$0xff] %v1021_v6 }
  0x28 PF: > { %v908_v7 = vld [vmem:[%s1087_s3 + $0x38] sm:$0xff]  ;;  %v907_v11 = vld [vmem:[%s1087_s3 + $0x30] sm:$0xff]  ;;  %v906_v15 = vld [vmem:[%s1087_s3 + $0x28] sm:$0xff]  ;;  %p891_p11 = scmp.ne.s32.totalorder %s1011_s11, 14 }
  0x29   : > { %v916_v8 = vld [vmem:[%s1087_s3 + $0x78] sm:$0xff]  ;;  %548 = vmatpush.bf16.msra.mxu0 %v908_v7  ;;  %v915_v12 = vld [vmem:[%s1087_s3 + $0x70] sm:$0xff]  ;;  %v914_v16 = vld [vmem:[%s1087_s3 + $0x68] sm:$0xff] }
  0x2a   : > { %v924_v9 = vld [vmem:[%s1087_s3 + $0xb8] sm:$0xff]  ;;  %566 = vmatpush.bf16.msra.mxu1 %v916_v8  ;;  %v923_v13 = vld [vmem:[%s1087_s3 + $0xb0] sm:$0xff]  ;;  %v922_v17 = vld [vmem:[%s1087_s3 + $0xa8] sm:$0xff] }
  0x2b   : > { %v932_v10 = vld [vmem:[%s1087_s3 + $0xf8] sm:$0xff]  ;;  %584 = vmatpush.bf16.msra.mxu2 %v924_v9  ;;  %v931_v14 = vld [vmem:[%s1087_s3 + $0xf0] sm:$0xff]  ;;  %v930_v18 = vld [vmem:[%s1087_s3 + $0xe8] sm:$0xff] }
  0x2c   : > { %602 = vmatpush.bf16.msra.mxu3 %v932_v10  ;;  %v905_v19 = vld [vmem:[%s1087_s3 + $0x20] sm:$0xff]  ;;  %v904_v23 = vld [vmem:[%s1087_s3 + $0x18] sm:$0xff]  ;;  %v903_v27 = vld [vmem:[%s1087_s3 + $0x10] sm:$0xff] }
  0x2d   : > { %549 = vmatpush.bf16.msra.mxu0 %v907_v11  ;;  %v913_v20 = vld [vmem:[%s1087_s3 + $0x60] sm:$0xff]  ;;  %v912_v24 = vld [vmem:[%s1087_s3 + $0x58] sm:$0xff]  ;;  %v911_v28 = vld [vmem:[%s1087_s3 + $0x50] sm:$0xff] }
  0x2e   : > { %567 = vmatpush.bf16.msra.mxu1 %v915_v12  ;;  %v921_v21 = vld [vmem:[%s1087_s3 + $0xa0] sm:$0xff]  ;;  %v920_v25 = vld [vmem:[%s1087_s3 + $0x98] sm:$0xff]  ;;  %v919_v29 = vld [vmem:[%s1087_s3 + $0x90] sm:$0xff] }
  0x2f   : > { %585 = vmatpush.bf16.msra.mxu2 %v923_v13  ;;  %v929_v22 = vld [vmem:[%s1087_s3 + $0xe0] sm:$0xff]  ;;  %v928_v26 = vld [vmem:[%s1087_s3 + $0xd8] sm:$0xff]  ;;  %v927_v30 = vld [vmem:[%s1087_s3 + $0xd0] sm:$0xff] }
  0x30   : > { %603 = vmatpush.bf16.msra.mxu3 %v931_v14  ;;  %v902_v31 = vld [vmem:[%s1087_s3 + $0x8] sm:$0xff]  ;;  %v901_v35 = vld [vmem:[%s1087_s3] sm:$0xff]  ;;  %v249_v5 = vld [vmem:[#allocation2 + $0x10] sm:$0xff] }
  0x31   : > { %550 = vmatpush.bf16.msra.mxu0 %v906_v15  ;;  %v910_v32 = vld [vmem:[%s1087_s3 + $0x48] sm:$0xff]  ;;  %v909_v36 = vld [vmem:[%s1087_s3 + $0x40] sm:$0xff] }
  0x32   : > { %568 = vmatpush.bf16.msra.mxu1 %v914_v16  ;;  %v918_v33 = vld [vmem:[%s1087_s3 + $0x88] sm:$0xff]  ;;  %v917_v37 = vld [vmem:[%s1087_s3 + $0x80] sm:$0xff] }
  0x33   : > { %586 = vmatpush.bf16.msra.mxu2 %v922_v17  ;;  %v926_v34 = vld [vmem:[%s1087_s3 + $0xc8] sm:$0xff]  ;;  %v925_v38 = vld [vmem:[%s1087_s3 + $0xc0] sm:$0xff] }
  0x34   : > { %604 = vmatpush.bf16.msra.mxu3 %v930_v18  ;;  %v749_v39 = vld [vmem:[%s1089_s4] sm:$0xf]  ;;  %v899_v40 = vld [vmem:[%s1089_s4 + $0xc] sm:$0xf0]  ;;  %v897_v41 = vld [vmem:[%s1089_s4 + $0x4] sm:$0xf] }
  0x35   : > { %551 = vmatpush.bf16.msra.mxu0 %v905_v19  ;;  %v751_v42 = vld [vmem:[%s1089_s4 + $0x10] sm:$0xf0]  ;;  %v757_v43 = vld [vmem:[%s1089_s4 + $0x8] sm:$0xf]  ;;  %v900_v44 = vld [vmem:[%s1089_s4 + $0x14] sm:$0xf0]  ;;  %v750_v47 = vor.u32 %v899_v40, %v749_v39 }
  0x36   : > { %569 = vmatpush.bf16.msra.mxu1 %v913_v20  ;;  %v898_v45 = vld [vmem:[%s1089_s4 + $0xc] sm:$0xf]  ;;  %v759_v46 = vld [vmem:[%s1089_s4 + $0x18] sm:$0xf0]  ;;  %v754_v48 = vor.u32 %v897_v41, %v751_v42  ;;  %v758_v49 = vor.u32 %v900_v44, %v757_v43  ;;  %v256_v51 = vld [vmem:[%s1089_s4 + $0x20] sm:$0xff] }
  0x37   : > { %587 = vmatpush.bf16.msra.mxu2 %v921_v21  ;;  %v762_v50 = vor.u32 %v898_v45, %v759_v46  ;;  %v257_v52 = vld [vmem:[%s1089_s4 + $0x28] sm:$0xff]  ;;  %v336_v53 = vunpack.c.l.b16 %v256_v51  ;;  %v337_v54 = vunpack.c.h.b16 %v256_v51 }
  0x38   : > { %605 = vmatpush.bf16.msra.mxu3 %v929_v22  ;;  %v338_v55 = vunpack.c.l.b16 %v257_v52  ;;  %v339_v56 = vunpack.c.h.b16 %v257_v52  ;;  %v250_v14 = vld [vmem:[#allocation2] sm:$0xff] }
  0x39   : > { %552 = vmatpush.bf16.msra.mxu0 %v904_v23  ;;  %v344_v57 = vpack.c.b16 %v336_v53, %v336_v53  ;;  %v345_v58 = vpack.c.b16 %v337_v54, %v337_v54  ;;  %v251_v23 = vld [vmem:[#allocation2 + $0x8] sm:$0xff] }
  0x3a   : > { %570 = vmatpush.bf16.msra.mxu1 %v912_v24  ;;  %v346_v59 = vpack.c.b16 %v338_v55, %v338_v55  ;;  %v347_v60 = vpack.c.b16 %v339_v56, %v339_v56 }
  0x3b   : > { %588 = vmatpush.bf16.msra.mxu2 %v920_v25 }
  0x3c   : > { %606 = vmatpush.bf16.msra.mxu3 %v928_v26 }
  0x3d   : > { %553 = vmatpush.bf16.msra.mxu0 %v903_v27 }
  0x3e   : > { %571 = vmatpush.bf16.msra.mxu1 %v911_v28 }
  0x3f   : > { %589 = vmatpush.bf16.msra.mxu2 %v919_v29 }
  0x40   : > { %607 = vmatpush.bf16.msra.mxu3 %v927_v30 }
  0x41   : > { %554 = vmatpush.bf16.msra.mxu0 %v902_v31 }
  0x42   : > { %572 = vmatpush.bf16.msra.mxu1 %v910_v32 }
  0x43   : > { %590 = vmatpush.bf16.msra.mxu2 %v918_v33 }
  0x44   : > { %608 = vmatpush.bf16.msra.mxu3 %v926_v34 }
  0x45   : > { %555 = vmatpush.bf16.msra.mxu0 %v901_v35 }
  0x46   : > { %573 = vmatpush.bf16.msra.mxu1 %v909_v36 }
  0x47   : > { %591 = vmatpush.bf16.msra.mxu2 %v917_v37 }
  0x48   : > { %609 = vmatpush.bf16.msra.mxu3 %v925_v38  ;;  %556 = vmatmul.bf16.vlgmr.msra.gmra.mxu0 %v750_v47 }
  0x49   : > { %574 = vmatmul.bf16.vlgmr.msra.gmra.mxu1 %v754_v48 }
  0x4a   : > { %592 = vmatmul.bf16.vlgmr.msra.gmra.mxu2 %v758_v49 }
  0x4b   : > { %610 = vmatmul.bf16.vlgmr.msra.gmra.mxu3 %v762_v50 }
  0x58   : > { %561 = vmatmul.bf16.gmra.mxu0 %v344_v57 }
  0x59   : > { %579 = vmatmul.bf16.gmra.mxu1 %v345_v58 }
  0x5a   : > { %597 = vmatmul.bf16.gmra.mxu2 %v346_v59 }
  0x5b   : > { %615 = vmatmul.bf16.gmra.mxu3 %v347_v60 }
  0xc5   : > { %v557_v61 = vpop.f32.mrf.mxu0 }
  0xc6   : > { %v575_v62 = vpop.f32.mrf.mxu1 }
  0xc7   : > { %v576_v63 = vadd.f32 %v575_v62, %v557_v61 }
  0xcd   : > { %v593_v0 = vpop.f32.mrf.mxu2  ;;  %v559_v3 = vpop.f32.mrf.mxu0 }
  0xce   : > { %v611_v1 = vpop.f32.mrf.mxu3  ;;  %v594_v2 = vadd.f32 %v593_v0, %v576_v63  ;;  %v577_v4 = vpop.f32.mrf.mxu1 }
  0xcf   : > { %v578_v8 = vadd.f32 %v577_v4, %v559_v3 }
  0xd0   : > { %v612_v6 = vadd.f32 %v611_v1, %v594_v2 }
  0xd2   : > { %v620_v7 = vadd.f32 %v612_v6, %v249_v5 }
  0xd4   : > { %623 = vst [vmem:[#allocation2 + $0x10] sm:$0xff] %v620_v7 }
  0xd5   : > { %v595_v9 = vpop.f32.mrf.mxu2  ;;  %v562_v12 = vpop.f32.mrf.mxu0 }
  0xd6   : > { %v613_v10 = vpop.f32.mrf.mxu3  ;;  %v596_v11 = vadd.f32 %v595_v9, %v578_v8  ;;  %v580_v13 = vpop.f32.mrf.mxu1 }
  0xd7   : > { %v581_v17 = vadd.f32 %v580_v13, %v562_v12 }
  0xd8   : > { %v614_v15 = vadd.f32 %v613_v10, %v596_v11 }
  0xda   : > { %v621_v16 = vadd.f32 %v614_v15, %v250_v14 }
  0xdc   : > { %624 = vst [vmem:[#allocation2] sm:$0xff] %v621_v16 }
  0xdd   : > { %v598_v18 = vpop.f32.mrf.mxu2  ;;  %v564_v21 = vpop.f32.mrf.mxu0 }
  0xde   : > { %v616_v19 = vpop.f32.mrf.mxu3  ;;  %v599_v20 = vadd.f32 %v598_v18, %v581_v17  ;;  %v582_v22 = vpop.f32.mrf.mxu1 }
  0xe0   : > { %v617_v24 = vadd.f32 %v616_v19, %v599_v20 }
  0xe2   : > { %v622_v25 = vadd.f32 %v617_v24, %v251_v23  ;;  %629 = sbr.rel (%p891_p11) target bundleno = 239 (0xef), region = 59 }
  0xe4   : > { %625 = vst [vmem:[#allocation2 + $0x8] sm:$0xff] %v622_v25 }
  0xe5   : > { %v600_v26 = vpop.f32.mrf.mxu2 }
  0xe6   : > { %v618_v27 = vpop.f32.mrf.mxu3 }
  0xe7   : > { %v630_v28 = vld [vmem:[#allocation2 + $0x10] sm:$0xff]  ;;  %v631_v29 = vld [vmem:[#allocation2] sm:$0xff] }
  0xe8   : > { %v936_v31 = vpack.c.bf16 %v631_v29, %v630_v28 }
  0xea   : > { %937 = vst [vmem:[%s1158_s2] sm:$0xff] %v936_v31  }
  0xeb   : > { %v632_v30 = vld [vmem:[#allocation2 + $0x8] sm:$0xff] }
  0xec   : > { %v635_v32 = vpack.c.bf16 %v632_v30, %v632_v30 }
  0xee   : > { %638 = vst [vmem:[%s1158_s2 + $0x8] sm:$0xf] %v635_v32 }
  0xef PF: > { %s12_s13 = sadd.s32 1, %s1019_s13   ;;  %s1159_s9 = smov %s1007_s10 }
  0xf0   : > { %p9_p12 = scmp.ge.s32.totalorder %s12_s13, 17   ;;  %s1160_s10 = smov %s1072_s17 }
  0xf1   : > { %s1161_s11 = smov %s1015_s12  ;;  %s1162_s12 = smov %s1164_s14 }
  0xf2   :  { %11 = sbr.rel (!%p9_p12) target bundleno = 3 (0x3), region = 97 }

// kernel: deepspeech_forward.20
= control target key start
LH: loop header
LB: loop body
LE: loop exit
PB: predicated region body
PF: predicated region fallthrough
CT: control target
= control target key end

     0   :  { %v23_v0 = vlaneseq  ;;  %v81_v1 = vmov 0.0   ;;  %s121_s1 = inlined_call_operand.vmem [shape: f32[1,128], index: 1, kind: output, shape index: {0}]   ;;  %s122_s2 = inlined_call_operand.vmem [shape: f32[1,128], index: 2, kind: output, shape index: {1}]   ;;  %s123_s0 = inlined_call_operand.vmem [shape: bf16[24,128], index: 0, kind: input, shape index: {}]  }
   0x1   :  { %14 = vst [vmem:[%s121_s1] sm:$0x1] %v81_v1  ;;  %v77_v2 = vld [vmem:[%s123_s0] sm:$0xff]   ;;  %v18_v3 = vld [vmem:[%s123_s0 + $0x8] sm:$0xf] }
   0x2   :  { %15 = vst [vmem:[%s122_s2] sm:$0x1] %v81_v1  ;;  %v78_v4 = vunpack.c.l.bf16 %v77_v2  ;;  %v79_v5 = vunpack.c.h.bf16 %v77_v2  ;;  %v24_v6 = vshrl.u32 %v23_v0, 7  ;;  %v21_v7 = vunpack.c.l.bf16 %v18_v3 }
   0x4   :  { %v26_v8 = vadd.s32 16, %v24_v6  ;;  %v44_v9 = vadd.f32 %v79_v5, %v78_v4  ;;  %v55_v10 = vmul.f32 %v78_v4, %v78_v4  ;;  %v56_v11 = vmul.f32 %v79_v5, %v79_v5 }
   0x6   :  { %vm33_vm0 = vcmp.lt.s32.totalorder %v26_v8, 20  ;;  %v58_v12 = vadd.f32 %v56_v11, %v55_v10 }
   0x7   :  { %v42_v13 = vsel %vm33_vm0, %v21_v7, 0.0 }
   0x8   :  { %v45_v14 = vadd.f32 %v44_v9, %v42_v13  ;;  %v57_v15 = vmul.f32 %v42_v13, %v42_v13  ;;  %v43_v26 = vld [vmem:[%s121_s1] sm:$0x1] }
   0x9   :  { %v54_v29 = vld [vmem:[%s122_s2] sm:$0x1] }
   0xa   :  { %v46_v16 = vrot.slane %v45_v14, 4  ;;  %v59_v17 = vadd.f32 %v58_v12, %v57_v15 }
   0xc   :  { %v47_v18 = vadd.f32 %v46_v16, %v45_v14  ;;  %v60_v19 = vrot.slane %v59_v17, 4 }
   0xe   :  { %v48_v20 = vrot.slane %v47_v18, 2  ;;  %v61_v21 = vadd.f32 %v60_v19, %v59_v17 }
  0x10   :  { %v49_v22 = vadd.f32 %v48_v20, %v47_v18  ;;  %v62_v23 = vrot.slane %v61_v21, 2 }
  0x12   :  { %v50_v24 = vrot.slane %v49_v22, 1  ;;  %v63_v25 = vadd.f32 %v62_v23, %v61_v21 }
  0x14   :  { %v51_v27 = vadd.f32 %v50_v24, %v49_v22  ;;  %v64_v28 = vrot.slane %v63_v25, 1 }
  0x16   :  { %v52_v30 = vadd.f32 %v51_v27, %v43_v26  ;;  %v65_v31 = vadd.f32 %v64_v28, %v63_v25 }
  0x18   :  { %53 = vst [vmem:[%s121_s1] sm:$0x1] %v52_v30  ;;  %v66_v32 = vadd.f32 %v65_v31, %v54_v29 }
  0x1a   :  { %67 = vst [vmem:[%s122_s2] sm:$0x1] %v66_v32 }

// kernel: deepspeech_forward.21
= control target key start
LH: loop header
LB: loop body
LE: loop exit
PB: predicated region body
PF: predicated region fallthrough
CT: control target
= control target key end

     0   :  { %s99_s0 = inlined_call_operand.vmem [shape: bf16[24,128], index: 0, kind: input, shape index: {}]   ;;  %s100_s1 = inlined_call_operand.vmem [shape: f32[1,128], index: 1, kind: input, shape index: {}]   ;;  %s101_s2 = inlined_call_operand.vmem [shape: f32[1,128], index: 2, kind: input, shape index: {}]   ;;  %s102_s3 = inlined_call_operand.vmem [shape: bf16[24,128], index: 3, kind: output, shape index: {}]  }
   0x1   :  { %v51_v0 = vld [vmem:[%s99_s0] sm:$0xff]   ;;  %v16_v5 = vld [vmem:[%s99_s0 + $0x8] sm:$0xf] }
   0x2   :  { %v59_v1 = vld [vmem:[%s100_s1] ss:$0 sm:$0xff]  ;;  %v52_v2 = vunpack.c.l.bf16 %v51_v0  ;;  %v53_v3 = vunpack.c.h.bf16 %v51_v0  ;;  %v19_v6 = vunpack.c.l.bf16 %v16_v5 }
   0x3   :  { %v60_v4 = vld [vmem:[%s101_s2] ss:$0 sm:$0xff] }
   0x4   :  { %v24_v7 = vmul.f32 %v59_v1, %v52_v2  ;;  %v25_v8 = vmul.f32 %v59_v1, %v53_v3  ;;  %v26_v9 = vmul.f32 %v59_v1, %v19_v6 }
   0x6   :  { %v31_v10 = vadd.f32 %v60_v4, %v24_v7  ;;  %v32_v11 = vadd.f32 %v60_v4, %v25_v8  ;;  %v33_v12 = vadd.f32 %v60_v4, %v26_v9 }
   0x8   :  { %v34_v13 = vmax.f32 %v31_v10, 0.0  ;;  %v35_v14 = vmax.f32 %v32_v11, 0.0  ;;  %v36_v15 = vmax.f32 %v33_v12, 0.0 }
   0xa   :  { %v37_v16 = vmin.f32 %v34_v13, 20.0  ;;  %v38_v17 = vmin.f32 %v35_v14, 20.0  ;;  %v39_v18 = vmin.f32 %v36_v15, 20.0 }
   0xc   :  { %v57_v19 = vpack.c.bf16 %v38_v17, %v37_v16  ;;  %v42_v20 = vpack.c.bf16 %v39_v18, %v39_v18 }
   0xe   :  { %58 = vst [vmem:[%s102_s3] sm:$0xff] %v57_v19  }
   0xf   :  { %45 = vst [vmem:[%s102_s3 + $0x8] sm:$0xf] %v42_v20 }

// kernel: deepspeech_forward.23
= control target key start
LH: loop header
LB: loop body
LE: loop exit
PB: predicated region body
PF: predicated region fallthrough
CT: control target
= control target key end

     0   :  { %s2301_s9 = smov 0   ;;  %s2303_s10 = smov 0   ;;  %s2887_s0 = inlined_call_operand.vmem [shape: bf16[16,8,1024], index: 0, kind: input, shape index: {}]   ;;  %s2888_s1 = inlined_call_operand.vmem [shape: bf16[2,128,512], index: 1, kind: input, shape index: {}]   ;;  %s2889_s2 = inlined_call_operand.vmem [shape: bf16[16,8,256], index: 2, kind: output, shape index: {}]  }
   0x1   :  { %s2305_s11 = smov 0   ;;  %s2307_s12 = smov 0  }
   0x2   :  { %s2309_s13 = smov 0   ;;  %s2311_s14 = smov 0  }
   0x3   :  { %s2313_s15 = smov 0  }
   0x4 LB: > { %s21_s16 = sadd.s32 1, %s2275_s13  ;;  %s24_s17 = sadd.s32 1, %s2279_s14  ;;  %s2283_s15 = sphi %s2313_s15, %s12_s15   ;;  %s2279_s14 = sphi %s2311_s14, %s2896_s14   ;;  %s2275_s13 = sphi %s2309_s13, %s2895_s13   ;;  %s2271_s12 = sphi %s2307_s12, %s2894_s12   ;;  %s2267_s11 = sphi %s2305_s11, %s2893_s11   ;;  %s2263_s10 = sphi %s2303_s10, %s2892_s10   ;;  %s2259_s9 = sphi %s2301_s9, %s2891_s9  }
   0x5   : > { %p22_p0 = scmp.ge.s32.totalorder %s21_s16, 2  ;;  %s1791_s18 = sadd.s32 4294967295, %s2283_s15  }
   0x6   : > { %s1793_s19 = sshll.u32 %s2275_s13, 1  ;;  %p48_p2 = scmp.ne.s32.totalorder %s2263_s10, %s2259_s9 }
   0x7   : > { %s2898_s16 = smov (%p22_p0, %s21_s16), 0  ;;  %s2900_s17 = smov (!%p22_p0, %s24_s17), %s2279_s14 }
   0x8   : > { %s29_s20 = ssub.s32 1, %s1793_s19  ;;  %s1794_s21 = sshll.u32 %s2898_s16, 1 }
   0x9   : > { %p26_p1 = scmp.ge.s32.totalorder %s2900_s17, 2  ;;  %s30_s22 = smul.u32 %s2279_s14, %s29_s20 }
   0xa   : > { %s33_s23 = ssub.s32 1, %s1794_s21  ;;  %p49_p3 = scmp.eq.s32.totalorder %s2283_s15, 0 }
   0xb   : > { %s2902_s17 = smov (%p26_p1, %s2900_s17), 0  ;;  %s31_s24 = sadd.s32 %s2275_s13, %s30_s22 }
   0xc   : > { %s34_s25 = smul.u32 %s33_s23, %s2902_s17  ;;  %s37_s26 = ssub.s32 %s2279_s14, %s2902_s17 }
   0xd   : > { %p50_p4 = por %p49_p3, %p48_p2  ;;  %p114_p5 = scmp.eq.s32.totalorder %s1791_s18, 3 }
   0xe   : > { %s35_s27 = sadd.s32 %s34_s25, %s2898_s16  ;;  %s41_s3 = sadd.s32 1, %s2263_s10 }
   0xf   : > { %s36_s28 = ssub.s32 %s31_s24, %s35_s27  ;;  %p2355_p6 = por %p114_p5, %p48_p2 }
  0x10   : > { %s38_s30 = sor.u32 %s37_s26, %s36_s28  ;;  %p1798_p8 = scmp.ge.s32.totalorder %s2283_s15, 4 }
  0x11   : > { %p39_p7 = scmp.eq.s32.totalorder %s38_s30, 0 }
  0x12   : > { %136 = sbr.rel (%p1798_p8) target bundleno = 46 (0x2e), region = 16 }
  0x13   : > { %s2361_s4 = scalar_select %p39_p7, %s2263_s10, %s41_s3  }
  0x17   : > { %139 = sbr.rel (!%p50_p4) target bundleno = 46 (0x2e), region = 20  ;;  %s141_s5 = sand.u32 (%p50_p4), 1, %s2263_s10  }
  0x18   : > { %s1802_s6 = sshll.u32 (%p50_p4), %s2279_s14, 2  ;;  %s1799_s7 = sshll.u32 (%p50_p4), %s141_s5, 7 }
  0x19   : > { %s2006_s8 = sshll.u32 (%p50_p4), %s31_s24, 6  ;;  %s143_s23 = scalar_lea.vmem (%p50_p4), [#allocation4], %s1799_s7 }
  0x1a   : > { %s151_s18 = sadd.s32 (%p50_p4), %s2006_s8, %s1802_s6 }
  0x1b   : > { %s1804_s19 = sshll.u32 (%p50_p4), %s151_s18, 2 }
  0x1c   : > { %s2369_s22 = scalar_lea.vmem %s2887_s0, %s1804_s19 }
  0x1d   : > { %v166_v0 = vld [vmem:[%s2369_s22] sm:$0xff]  ;;  %v168_v1 = vld [vmem:[%s2369_s22 + $0x8] sm:$0xff] }
  0x1e   : > { %v170_v2 = vld [vmem:[%s2369_s22 + $0x20] sm:$0xff]  ;;  %167 = vst [vmem:[%s143_s23] sm:$0xff] %v166_v0  ;;  %v172_v3 = vld [vmem:[%s2369_s22 + $0x28] sm:$0xff] }
  0x1f   : > { %169 = vst [vmem:[%s143_s23 + $0x8] sm:$0xff] %v168_v1  ;;  %v174_v4 = vld [vmem:[%s2369_s22 + $0x40] sm:$0xff]  ;;  %v176_v5 = vld [vmem:[%s2369_s22 + $0x48] sm:$0xff] }
  0x20   : > { %171 = vst [vmem:[%s143_s23 + $0x10] sm:$0xff] %v170_v2  ;;  %v178_v6 = vld [vmem:[%s2369_s22 + $0x60] sm:$0xff]  ;;  %v180_v7 = vld [vmem:[%s2369_s22 + $0x68] sm:$0xff] }
  0x21   : > { %173 = vst [vmem:[%s143_s23 + $0x18] sm:$0xff] %v172_v3  ;;  %v182_v8 = vld [vmem:[%s2369_s22 + $0x80] sm:$0xff]  ;;  %v184_v9 = vld [vmem:[%s2369_s22 + $0x88] sm:$0xff] }
  0x22   : > { %175 = vst [vmem:[%s143_s23 + $0x20] sm:$0xff] %v174_v4  ;;  %v186_v10 = vld [vmem:[%s2369_s22 + $0xa0] sm:$0xff]  ;;  %v188_v11 = vld [vmem:[%s2369_s22 + $0xa8] sm:$0xff] }
  0x23   : > { %177 = vst [vmem:[%s143_s23 + $0x28] sm:$0xff] %v176_v5  ;;  %v190_v12 = vld [vmem:[%s2369_s22 + $0xc0] sm:$0xff]  ;;  %v192_v13 = vld [vmem:[%s2369_s22 + $0xc8] sm:$0xff] }
  0x24   : > { %179 = vst [vmem:[%s143_s23 + $0x30] sm:$0xff] %v178_v6  ;;  %v194_v14 = vld [vmem:[%s2369_s22 + $0xe0] sm:$0xff]  ;;  %v196_v15 = vld [vmem:[%s2369_s22 + $0xe8] sm:$0xff] }
  0x25   : > { %181 = vst [vmem:[%s143_s23 + $0x38] sm:$0xff] %v180_v7 }
  0x26   : > { %183 = vst [vmem:[%s143_s23 + $0x40] sm:$0xff] %v182_v8 }
  0x27   : > { %185 = vst [vmem:[%s143_s23 + $0x48] sm:$0xff] %v184_v9 }
  0x28   : > { %187 = vst [vmem:[%s143_s23 + $0x50] sm:$0xff] %v186_v10 }
  0x29   : > { %189 = vst [vmem:[%s143_s23 + $0x58] sm:$0xff] %v188_v11 }
  0x2a   : > { %191 = vst [vmem:[%s143_s23 + $0x60] sm:$0xff] %v190_v12 }
  0x2b   : > { %193 = vst [vmem:[%s143_s23 + $0x68] sm:$0xff] %v192_v13 }
  0x2c   : > { %195 = vst [vmem:[%s143_s23 + $0x70] sm:$0xff] %v194_v14 }
  0x2d   : > { %197 = vst [vmem:[%s143_s23 + $0x78] sm:$0xff] %v196_v15 }
  0x2e PF: > { %p1805_p9 = scmp.ge.s32.totalorder %s2283_s15, 1  ;;  %p210_p10 = scmp.lt.s32.totalorder %s2283_s15, 5 }
  0x30   : > { %p211_p11 = pnand %p1805_p9, %p210_p10 }
  0x31   : > { %s217_s24 = sand.u32 (!%p211_p11), 1, %s2259_s9   ;;  %p248_p12 = scmp.lt.s32.totalorder (!%p211_p11), %s2271_s12, 1 }
  0x32   : > { %214 = sbr.rel (%p211_p11) target bundleno = 1491 (0x5d3), region = 47  ;;  %s1806_s25 = sshll.u32 (!%p211_p11), %s217_s24, 7 }
  0x33   : > { %s1807_s26 = sshll.u32 (!%p211_p11), %s217_s24, 5  ;;  %s2397_s6 = scalar_lea.vmem (!%p211_p11), [#allocation4], %s1806_s25 }
  0x34   : > { %s2399_s7 = scalar_lea.vmem (!%p211_p11), [#allocation5], %s1807_s26  ;;  %p1810_p13 = scmp.ne.s32.totalorder (!%p211_p11), %s2267_s11, 0 }
  0x37   : > { %s249_s27 = scalar_select %p248_p12, %s2271_s12, 1 }
  0x38   : > { %261 = sbr.rel (%p1810_p13) target bundleno = 64 (0x40), region = 55 }
  0x39   : > { %s2007_s28 = sshll.u32 %s249_s27, 8 }
  0x3a   : > { %s2395_s5 = scalar_lea.vmem %s2888_s1, %s2007_s28 }
  0x3d   : > { %v2285_v16 = vmov 0.0  }
  0x3e   : > { %262 = vst [vmem:[#allocation2] sm:$0xff] %v2285_v16 }
  0x3f   : > { %263 = vst [vmem:[#allocation3] sm:$0xff] %v2285_v16 }
  0x40 PF: > { %v1927_v17 = vld [vmem:[%s2395_s5 + $0xe0] sm:$0xf]  ;;  %v2038_v18 = vld [vmem:[%s2395_s5 + $0xec] sm:$0xf0]  ;;  %v2036_v19 = vld [vmem:[%s2395_s5 + $0xe4] sm:$0xf] }
  0x41   : > { %v2405_v20 = vor.u32 %v2038_v18, %v1927_v17  ;;  %v1929_v21 = vld [vmem:[%s2395_s5 + $0xf0] sm:$0xf0]  ;;  %v2037_v22 = vld [vmem:[%s2395_s5 + $0xec] sm:$0xf]  ;;  %v1937_v23 = vld [vmem:[%s2395_s5 + $0xf8] sm:$0xf0] }
  0x42   : > { %v2410_v24 = vor.u32 %v2036_v19, %v1929_v21  ;;  %v2412_v25 = vor.u32 %v2037_v22, %v1937_v23  ;;  %v1911_v26 = vld [vmem:[%s2395_s5 + $0xc0] sm:$0xf]  ;;  %v2034_v27 = vld [vmem:[%s2395_s5 + $0xcc] sm:$0xf0]  ;;  %v2032_v28 = vld [vmem:[%s2395_s5 + $0xc4] sm:$0xf] }
  0x43   : > { %468 = vmatpush.bf16.msra.mxu0 %v2405_v20  ;;  %v2418_v29 = vor.u32 %v2034_v27, %v1911_v26  ;;  %v1913_v30 = vld [vmem:[%s2395_s5 + $0xd0] sm:$0xf0]  ;;  %v2033_v31 = vld [vmem:[%s2395_s5 + $0xcc] sm:$0xf]  ;;  %v1921_v32 = vld [vmem:[%s2395_s5 + $0xd8] sm:$0xf0] }
  0x44   : > { %481 = vmatpush.bf16.msra.mxu1 %v2410_v24  ;;  %507 = vmatpush.bf16.msra.mxu3 %v2412_v25  ;;  %v2425_v33 = vor.u32 %v2032_v28, %v1913_v30  ;;  %v2427_v34 = vor.u32 %v2033_v31, %v1921_v32  ;;  %v1935_v35 = vld [vmem:[%s2395_s5 + $0xe8] sm:$0xf]  ;;  %v2039_v36 = vld [vmem:[%s2395_s5 + $0xf4] sm:$0xf0]  ;;  %v1895_v37 = vld [vmem:[%s2395_s5 + $0xa0] sm:$0xf] }
  0x45   : > { %v2432_v38 = vor.u32 %v2039_v36, %v1935_v35  ;;  %v2030_v39 = vld [vmem:[%s2395_s5 + $0xac] sm:$0xf0]  ;;  %v2028_v40 = vld [vmem:[%s2395_s5 + $0xa4] sm:$0xf]  ;;  %v1897_v41 = vld [vmem:[%s2395_s5 + $0xb0] sm:$0xf0] }
  0x46   : > { %v2029_v42 = vld [vmem:[%s2395_s5 + $0xac] sm:$0xf]  ;;  %v1905_v43 = vld [vmem:[%s2395_s5 + $0xb8] sm:$0xf0]  ;;  %v1919_v44 = vld [vmem:[%s2395_s5 + $0xc8] sm:$0xf]  ;;  %v2442_v45 = vor.u32 %v2030_v39, %v1895_v37  ;;  %v2449_v49 = vor.u32 %v2028_v40, %v1897_v41 }
  0x47   : > { %469 = vmatpush.bf16.msra.mxu0 %v2418_v29  ;;  %494 = vmatpush.bf16.msra.mxu2 %v2432_v38  ;;  %v2035_v46 = vld [vmem:[%s2395_s5 + $0xd4] sm:$0xf0]  ;;  %v1879_v47 = vld [vmem:[%s2395_s5 + $0x80] sm:$0xf]  ;;  %v2026_v48 = vld [vmem:[%s2395_s5 + $0x8c] sm:$0xf0]  ;;  %v2451_v50 = vor.u32 %v2029_v42, %v1905_v43 }
  0x48   : > { %482 = vmatpush.bf16.msra.mxu1 %v2425_v33  ;;  %508 = vmatpush.bf16.msra.mxu3 %v2427_v34  ;;  %v2453_v51 = vor.u32 %v2035_v46, %v1919_v44  ;;  %v2024_v52 = vld [vmem:[%s2395_s5 + $0x84] sm:$0xf]  ;;  %v1881_v53 = vld [vmem:[%s2395_s5 + $0x90] sm:$0xf0]  ;;  %v2025_v54 = vld [vmem:[%s2395_s5 + $0x8c] sm:$0xf]  ;;  %v2463_v58 = vor.u32 %v2026_v48, %v1879_v47 }
  0x49   : > { %v1889_v55 = vld [vmem:[%s2395_s5 + $0x98] sm:$0xf0]  ;;  %v1903_v56 = vld [vmem:[%s2395_s5 + $0xa8] sm:$0xf]  ;;  %v2031_v57 = vld [vmem:[%s2395_s5 + $0xb4] sm:$0xf0]  ;;  %v2471_v62 = vor.u32 %v2024_v52, %v1881_v53 }
  0x4a   : > { %v2465_v59 = vor.u32 %v2031_v57, %v1903_v56  ;;  %v1863_v60 = vld [vmem:[%s2395_s5 + $0x60] sm:$0xf]  ;;  %v2022_v61 = vld [vmem:[%s2395_s5 + $0x6c] sm:$0xf0]  ;;  %v2473_v63 = vor.u32 %v2025_v54, %v1889_v55  ;;  %v2020_v0 = vld [vmem:[%s2395_s5 + $0x64] sm:$0xf] }
  0x4b   : > { %470 = vmatpush.bf16.msra.mxu0 %v2442_v45  ;;  %495 = vmatpush.bf16.msra.mxu2 %v2453_v51  ;;  %v1887_v1 = vld [vmem:[%s2395_s5 + $0x88] sm:$0xf]  ;;  %v2027_v2 = vld [vmem:[%s2395_s5 + $0x94] sm:$0xf0]  ;;  %v1865_v3 = vld [vmem:[%s2395_s5 + $0x70] sm:$0xf0]  ;;  %v2483_v6 = vor.u32 %v2022_v61, %v1863_v60 }
  0x4c   : > { %483 = vmatpush.bf16.msra.mxu1 %v2449_v49  ;;  %509 = vmatpush.bf16.msra.mxu3 %v2451_v50  ;;  %v2021_v4 = vld [vmem:[%s2395_s5 + $0x6c] sm:$0xf]  ;;  %v1873_v5 = vld [vmem:[%s2395_s5 + $0x78] sm:$0xf0]  ;;  %v2485_v7 = vor.u32 %v2027_v2, %v1887_v1  ;;  %v1847_v8 = vld [vmem:[%s2395_s5 + $0x40] sm:$0xf]  ;;  %v2491_v10 = vor.u32 %v2020_v0, %v1865_v3 }
  0x4d   : > { %v2018_v9 = vld [vmem:[%s2395_s5 + $0x4c] sm:$0xf0]  ;;  %v2493_v11 = vor.u32 %v2021_v4, %v1873_v5  ;;  %v2016_v12 = vld [vmem:[%s2395_s5 + $0x44] sm:$0xf]  ;;  %v1871_v13 = vld [vmem:[%s2395_s5 + $0x68] sm:$0xf] }
  0x4e   : > { %v2023_v14 = vld [vmem:[%s2395_s5 + $0x74] sm:$0xf0]  ;;  %v1849_v15 = vld [vmem:[%s2395_s5 + $0x50] sm:$0xf0]  ;;  %v2017_v16 = vld [vmem:[%s2395_s5 + $0x4c] sm:$0xf]  ;;  %v2503_v18 = vor.u32 %v2018_v9, %v1847_v8 }
  0x4f   : > { %471 = vmatpush.bf16.msra.mxu0 %v2463_v58  ;;  %496 = vmatpush.bf16.msra.mxu2 %v2465_v59  ;;  %v1857_v17 = vld [vmem:[%s2395_s5 + $0x58] sm:$0xf0]  ;;  %v2505_v19 = vor.u32 %v2023_v14, %v1871_v13  ;;  %v1831_v21 = vld [vmem:[%s2395_s5 + $0x20] sm:$0xf]  ;;  %v2014_v22 = vld [vmem:[%s2395_s5 + $0x2c] sm:$0xf0]  ;;  %v2511_v23 = vor.u32 %v2016_v12, %v1849_v15 }
  0x50   : > { %484 = vmatpush.bf16.msra.mxu1 %v2471_v62  ;;  %510 = vmatpush.bf16.msra.mxu3 %v2473_v63  ;;  %v2513_v26 = vor.u32 %v2017_v16, %v1857_v17  ;;  %v2012_v27 = vld [vmem:[%s2395_s5 + $0x24] sm:$0xf]  ;;  %v1855_v28 = vld [vmem:[%s2395_s5 + $0x48] sm:$0xf]  ;;  %v2019_v30 = vld [vmem:[%s2395_s5 + $0x54] sm:$0xf0]  ;;  %v2523_v36 = vor.u32 %v2014_v22, %v1831_v21 }
  0x51   : > { %v1833_v31 = vld [vmem:[%s2395_s5 + $0x30] sm:$0xf0]  ;;  %v2013_v32 = vld [vmem:[%s2395_s5 + $0x2c] sm:$0xf]  ;;  %v1841_v35 = vld [vmem:[%s2395_s5 + $0x38] sm:$0xf0]  ;;  %v2525_v37 = vor.u32 %v2019_v30, %v1855_v28 }
  0x52   : > { %v1815_v39 = vld [vmem:[%s2395_s5] sm:$0xf]  ;;  %v2010_v40 = vld [vmem:[%s2395_s5 + $0xc] sm:$0xf0]  ;;  %v2531_v41 = vor.u32 %v2012_v27, %v1833_v31  ;;  %v2533_v42 = vor.u32 %v2013_v32, %v1841_v35  ;;  %v2008_v43 = vld [vmem:[%s2395_s5 + $0x4] sm:$0xf] }
  0x53   : > { %472 = vmatpush.bf16.msra.mxu0 %v2483_v6  ;;  %497 = vmatpush.bf16.msra.mxu2 %v2485_v7  ;;  %v1839_v44 = vld [vmem:[%s2395_s5 + $0x28] sm:$0xf]  ;;  %v2015_v46 = vld [vmem:[%s2395_s5 + $0x34] sm:$0xf0]  ;;  %v1817_v47 = vld [vmem:[%s2395_s5 + $0x10] sm:$0xf0]  ;;  %v2543_v53 = vor.u32 %v2010_v40, %v1815_v39 }
  0x54   : > { %485 = vmatpush.bf16.msra.mxu1 %v2491_v10  ;;  %511 = vmatpush.bf16.msra.mxu3 %v2493_v11  ;;  %v2009_v48 = vld [vmem:[%s2395_s5 + $0xc] sm:$0xf]  ;;  %v1825_v52 = vld [vmem:[%s2395_s5 + $0x18] sm:$0xf0]  ;;  %v306_v54 = vld [vmem:[#allocation2] sm:$0xff]  ;;  %v2545_v55 = vor.u32 %v2015_v46, %v1839_v44  ;;  %v2549_v56 = vor.u32 %v2008_v43, %v1817_v47  ;;  %s2040_s9 = smul.u32 112, %s2271_s12 }
  0x55   : > { %v2551_v57 = vor.u32 %v2009_v48, %v1825_v52  ;;  %v1823_v60 = vld [vmem:[%s2395_s5 + $0x8] sm:$0xf]  ;;  %v2011_v61 = vld [vmem:[%s2395_s5 + $0x14] sm:$0xf0]  ;;  %v307_v0 = vpack.c.bf16 %v306_v54, %v306_v54  ;;  %s2041_s18 = smul.u32 28, %s2271_s12  ;;  %s1961_s28 = sshll.u32 %s2271_s12, 4 }
  0x56   : > { %v2559_v1 = vor.u32 %v2011_v61, %v1823_v60  ;;  %s299_s8 = scalar_lea.vmem %s2397_s6, %s2040_s9 [#allocation4]  ;;  %s1945_s20 = smul.u32 80, %s2271_s12 }
  0x57   : > { %473 = vmatpush.bf16.msra.mxu0 %v2503_v18  ;;  %498 = vmatpush.bf16.msra.mxu2 %v2505_v19  ;;  %v300_v2 = vld [vmem:[%s299_s8] sm:$0xff]  ;;  %v301_v12 = vld [vmem:[%s299_s8 + $0x8] sm:$0xff]  ;;  %s592_s19 = scalar_lea.vmem %s2399_s7, %s2041_s18 [#allocation5]  ;;  %s1951_s22 = smul.u32 20, %s2271_s12 }
  0x58   : > { %486 = vmatpush.bf16.msra.mxu1 %v2511_v23  ;;  %512 = vmatpush.bf16.msra.mxu3 %v2513_v26  ;;  %v302_v3 = vunpack.c.l.bf16 %v300_v2  ;;  %v303_v4 = vunpack.c.h.bf16 %v300_v2  ;;  %v305_v16 = vunpack.c.h.bf16 %v301_v12  ;;  %v304_v40 = vunpack.c.l.bf16 %v301_v12  ;;  %s1688_s21 = scalar_lea.vmem %s2397_s6, %s1945_s20 [#allocation4]  ;;  %s1953_s24 = smul.u32 48, %s2271_s12 }
  0x59   : > { %s1692_s23 = scalar_lea.vmem %s2399_s7, %s1951_s22 [#allocation5]  ;;  %s1959_s26 = smul.u32 12, %s2271_s12 }
  0x5a   : > { %s1696_s25 = scalar_lea.vmem %s2397_s6, %s1953_s24 [#allocation4]  ;;  %s1703_s30 = scalar_lea.vmem %s2397_s6, %s1961_s28 [#allocation4] }
  0x5b   : > { %474 = vmatpush.bf16.msra.mxu0 %v2523_v36  ;;  %499 = vmatpush.bf16.msra.mxu2 %v2525_v37  ;;  %s1700_s27 = scalar_lea.vmem %s2399_s7, %s1959_s26 [#allocation5]  ;;  %s1967_s3 = sshll.u32 %s2271_s12, 2 }
  0x5c   : > { %487 = vmatpush.bf16.msra.mxu1 %v2531_v41  ;;  %513 = vmatpush.bf16.msra.mxu3 %v2533_v42  ;;  %s1706_s5 = scalar_lea.vmem %s2399_s7, %s1967_s3 [#allocation5]  ;;  %s1010_s9 = ssub.s32 4, %s2271_s12 }
  0x5d   : > { %s2042_s8 = sshll.u32 %s1010_s9, 4 }
  0x5e   : > { %s1013_s18 = scalar_lea.vmem %s2397_s6, %s2042_s8 [#allocation4] }
  0x5f   : > { %475 = vmatpush.bf16.msra.mxu0 %v2543_v53  ;;  %500 = vmatpush.bf16.msra.mxu2 %v2545_v55 }
  0x60   : > { %488 = vmatpush.bf16.msra.mxu1 %v2549_v56  ;;  %514 = vmatpush.bf16.msra.mxu3 %v2551_v57 }
  0x62   : > { %476 = vmatmul.bf16.vlgmr.msra.gmra.mxu0 %v307_v0 }
  0x63   : > { %607 = vmatpush.bf16.msrb.mxu0 %v2405_v20  ;;  %489 = vmatmul.bf16.vlgmr.msra.gmra.mxu1 %v307_v0 }
  0x64   : > { %620 = vmatpush.bf16.msrb.mxu1 %v2410_v24  ;;  %646 = vmatpush.bf16.msrb.mxu3 %v2412_v25 }
  0x65   : > { %515 = vmatmul.bf16.vlgmr.msra.gmra.mxu3 %v307_v0  ;;  %501 = vmatpush.bf16.msra.mxu2 %v2559_v1 }
  0x67   : > { %608 = vmatpush.bf16.msrb.mxu0 %v2418_v29 }
  0x68   : > { %621 = vmatpush.bf16.msrb.mxu1 %v2425_v33  ;;  %647 = vmatpush.bf16.msrb.mxu3 %v2427_v34 }
  0x69   : > { %633 = vmatpush.bf16.msrb.mxu2 %v2432_v38 }
  0x6a   : > { %502 = vmatmul.bf16.vlgmr.msra.gmra.mxu2 %v307_v0 }
  0x6b   : > { %609 = vmatpush.bf16.msrb.mxu0 %v2442_v45 }
  0x6c   : > { %622 = vmatpush.bf16.msrb.mxu1 %v2449_v49  ;;  %648 = vmatpush.bf16.msrb.mxu3 %v2451_v50 }
  0x6d   : > { %634 = vmatpush.bf16.msrb.mxu2 %v2453_v51 }
  0x6f   : > { %610 = vmatpush.bf16.msrb.mxu0 %v2463_v58 }
  0x70   : > { %623 = vmatpush.bf16.msrb.mxu1 %v2471_v62  ;;  %649 = vmatpush.bf16.msrb.mxu3 %v2473_v63 }
  0x71   : > { %635 = vmatpush.bf16.msrb.mxu2 %v2465_v59 }
  0x73   : > { %611 = vmatpush.bf16.msrb.mxu0 %v2483_v6 }
  0x74   : > { %624 = vmatpush.bf16.msrb.mxu1 %v2491_v10  ;;  %650 = vmatpush.bf16.msrb.mxu3 %v2493_v11 }
  0x75   : > { %636 = vmatpush.bf16.msrb.mxu2 %v2485_v7 }
  0x77   : > { %612 = vmatpush.bf16.msrb.mxu0 %v2503_v18 }
  0x78   : > { %625 = vmatpush.bf16.msrb.mxu1 %v2511_v23  ;;  %651 = vmatpush.bf16.msrb.mxu3 %v2513_v26 }
  0x79   : > { %637 = vmatpush.bf16.msrb.mxu2 %v2505_v19 }
  0x7b   : > { %613 = vmatpush.bf16.msrb.mxu0 %v2523_v36 }
  0x7c   : > { %626 = vmatpush.bf16.msrb.mxu1 %v2531_v41  ;;  %652 = vmatpush.bf16.msrb.mxu3 %v2533_v42 }
  0x7d   : > { %638 = vmatpush.bf16.msrb.mxu2 %v2525_v37 }
  0x7f   : > { %614 = vmatpush.bf16.msrb.mxu0 %v2543_v53 }
  0x80   : > { %627 = vmatpush.bf16.msrb.mxu1 %v2549_v56  ;;  %653 = vmatpush.bf16.msrb.mxu3 %v2551_v57 }
  0x81   : > { %639 = vmatpush.bf16.msrb.mxu2 %v2545_v55 }
  0x83   : > { %746 = vmatpush.bf16.msra.mxu0 %v2405_v20 }
  0x84   : > { %759 = vmatpush.bf16.msra.mxu1 %v2410_v24  ;;  %785 = vmatpush.bf16.msra.mxu3 %v2412_v25 }
  0x85   : > { %640 = vmatpush.bf16.msrb.mxu2 %v2559_v1 }
  0x87   : > { %747 = vmatpush.bf16.msra.mxu0 %v2418_v29 }
  0x88   : > { %760 = vmatpush.bf16.msra.mxu1 %v2425_v33  ;;  %786 = vmatpush.bf16.msra.mxu3 %v2427_v34 }
  0x89   : > { %772 = vmatpush.bf16.msra.mxu2 %v2432_v38 }
  0x8b   : > { %748 = vmatpush.bf16.msra.mxu0 %v2442_v45 }
  0x8c   : > { %761 = vmatpush.bf16.msra.mxu1 %v2449_v49  ;;  %787 = vmatpush.bf16.msra.mxu3 %v2451_v50 }
  0x8d   : > { %773 = vmatpush.bf16.msra.mxu2 %v2453_v51 }
  0x8f   : > { %749 = vmatpush.bf16.msra.mxu0 %v2463_v58 }
  0x90   : > { %762 = vmatpush.bf16.msra.mxu1 %v2471_v62  ;;  %788 = vmatpush.bf16.msra.mxu3 %v2473_v63 }
  0x91   : > { %774 = vmatpush.bf16.msra.mxu2 %v2465_v59 }
  0x93   : > { %750 = vmatpush.bf16.msra.mxu0 %v2483_v6 }
  0x94   : > { %763 = vmatpush.bf16.msra.mxu1 %v2491_v10  ;;  %789 = vmatpush.bf16.msra.mxu3 %v2493_v11 }
  0x95   : > { %775 = vmatpush.bf16.msra.mxu2 %v2485_v7 }
  0x97   : > { %751 = vmatpush.bf16.msra.mxu0 %v2503_v18 }
  0x98   : > { %764 = vmatpush.bf16.msra.mxu1 %v2511_v23  ;;  %790 = vmatpush.bf16.msra.mxu3 %v2513_v26 }
  0x99   : > { %776 = vmatpush.bf16.msra.mxu2 %v2505_v19 }
  0x9b   : > { %752 = vmatpush.bf16.msra.mxu0 %v2523_v36 }
  0x9c   : > { %765 = vmatpush.bf16.msra.mxu1 %v2531_v41  ;;  %791 = vmatpush.bf16.msra.mxu3 %v2533_v42 }
  0x9d   : > { %777 = vmatpush.bf16.msra.mxu2 %v2525_v37 }
  0x9f   : > { %753 = vmatpush.bf16.msra.mxu0 %v2543_v53 }
  0xa0   : > { %766 = vmatpush.bf16.msra.mxu1 %v2549_v56  ;;  %792 = vmatpush.bf16.msra.mxu3 %v2551_v57 }
  0xa1   : > { %778 = vmatpush.bf16.msra.mxu2 %v2545_v55 }
  0xa5   : > { %779 = vmatpush.bf16.msra.mxu2 %v2559_v1 }
  0xdf   : > { %v477_v5 = vpop.f32.mrf.mxu0 }
  0xe0   : > { %v520_v8 = vadd.f32 %v477_v5, %v302_v3  ;;  %v490_v9 = vpop.f32.mrf.mxu1 }
  0xe1   : > { %v521_v13 = vadd.f32 %v490_v9, %v303_v4 }
  0xe2   : > { %v1941_v14 = vmul.f32 -1.442695, %v520_v8 }
  0xe3   : > { %v1942_v15 = vmul.f32 -1.442695, %v521_v13 }
  0xe4   : > { %2101 = vpow2.f32 %v1941_v14 }
  0xe5   : > { %2103 = vpow2.f32 %v1942_v15 }
  0xe7   : > { %v479_v22 = vpop.f32.mrf.mxu0 }
  0xe8   : > { %v516_v17 = vpop.f32.mrf.mxu3  ;;  %v492_v27 = vpop.f32.mrf.mxu1 }
  0xe9   : > { %v523_v21 = vadd.f32 %v516_v17, %v305_v16 }
  0xea   : > { %v2102_v30 = vpop.eup %2101 }
  0xeb   : > { %v1943_v28 = vmul.f32 -1.442695, %v523_v21  ;;  %v2104_v32 = vpop.eup %2103  ;;  %v527_v35 = vadd.f32 1.0, %v2102_v30 }
  0xec   : > { %v546_v39 = vadd.f32 1.0, %v2104_v32 }
  0xed   : > { %v503_v31 = vpop.f32.mrf.mxu2  ;;  %2105 = vpow2.f32 %v1943_v28  ;;  %v539_v3 = vand.u32 2147483648, %v527_v35  ;;  %v537_v8 = vand.u32 2147483647, %v527_v35  ;;  %vm533_vm2 = vweird.f32 %v527_v35  ;;  %v582_v28 = vld [vmem:[#allocation3] sm:$0xff] }
  0xee   : > { %2107 = vrcp.f32 %v527_v35  ;;  %v522_v46 = vadd.f32 %v503_v31, %v304_v40  ;;  %v558_v4 = vand.u32 2147483648, %v546_v39  ;;  %v556_v12 = vand.u32 2147483647, %v546_v39 }
  0xef   : > { %2109 = vrcp.f32 %v546_v39  ;;  %vm552_vm3 = vweird.f32 %v546_v39  ;;  %v540_v17 = vor.u32 1.1754944e-38, %v539_v3  ;;  %vm538_vm6 = vcmp.eq.f32.partialorder %v537_v8, 8.507059e+37 }
  0xf0   : > { %v518_v43 = vpop.f32.mrf.mxu3  ;;  %v559_v22 = vor.u32 1.1754944e-38, %v558_v4  ;;  %vm557_vm7 = vcmp.eq.f32.partialorder %v556_v12, 8.507059e+37 }
  0xf3   : > { %v2106_v44 = vpop.eup %2105 }
  0xf4   : > { %v566_v47 = vadd.f32 1.0, %v2106_v44  ;;  %v2108_v52 = vpop.eup %2107 }
  0xf5   : > { %v505_v48 = vpop.f32.mrf.mxu2  ;;  %v2110_v54 = vpop.eup %2109  ;;  %v529_v60 = vmul.f32 %v2108_v52, %v527_v35  ;;  %vm534_vm0 = vweird.f32 %v2108_v52 }
  0xf6   : > { %2111 = vrcp.f32 %v566_v47  ;;  %v548_v61 = vmul.f32 %v2110_v54, %v546_v39  ;;  %vm553_vm1 = vweird.f32 %v2110_v54  ;;  %vm535_vm4 = vmor %vm533_vm2, %vm534_vm0  ;;  %v578_v48 = vand.u32 2147483648, %v566_v47 }
  0xf7   : > { %2113 = vtanh.f32 %v522_v46  ;;  %v530_v0 = vsub.f32 1.0, %v529_v60  ;;  %vm554_vm5 = vmor %vm552_vm3, %vm553_vm1  ;;  %vm572_vm9 = vweird.f32 %v566_v47 }
  0xf8   : > { %v549_v2 = vsub.f32 1.0, %v548_v61  ;;  %v579_v61 = vor.u32 1.1754944e-38, %v578_v48 }
  0xf9   : > { %v531_v5 = vmul.f32 %v2108_v52, %v530_v0 }
  0xfa   : > { %v550_v9 = vmul.f32 %v2110_v54, %v549_v2 }
  0xfb   : > { %v532_v14 = vadd.f32 %v2108_v52, %v531_v5 }
  0xfc   : > { %v2112_v13 = vpop.eup %2111  ;;  %v551_v21 = vadd.f32 %v2110_v54, %v550_v9 }
  0xfd   : > { %v2114_v15 = vpop.eup %2113  ;;  %v568_v16 = vmul.f32 %v2112_v13, %v566_v47  ;;  %v536_v27 = vsel %vm535_vm4, %v2108_v52, %v532_v14  ;;  %vm573_vm8 = vweird.f32 %v2112_v13  ;;  %v576_v52 = vand.u32 2147483647, %v566_v47  ;;  %v1946_v47 = vld [vmem:[%s1688_s21 + $0x10] sm:$0xff]  ;;  %v1947_v14 = vld [vmem:[%s1688_s21 + $0x18] sm:$0xff]  ;;  %s1975_s21 = smul.u32 4294967248, %s2271_s12 }
  0xfe   : > { %v541_v31 = vsel %vm538_vm6, %v540_v17, %v536_v27  ;;  %v555_v32 = vsel %vm554_vm5, %v2110_v54, %v551_v21  ;;  %vm574_vm10 = vmor %vm572_vm9, %vm573_vm8  ;;  %v601_v4 = vunpack.c.l.bf16 %v1946_v47  ;;  %v602_v5 = vunpack.c.h.bf16 %v1946_v47 }
  0xff   : > { %v569_v30 = vsub.f32 1.0, %v568_v16  ;;  %v560_v40 = vsel %vm557_vm7, %v559_v22, %v555_v32  ;;  %v584_v43 = vmul.f32 %v2114_v15, %v541_v31  ;;  %vm577_vm11 = vcmp.eq.f32.partialorder %v576_v52, 8.507059e+37  ;;  %s1714_s22 = scalar_lea.vmem %s2397_s6, %s1975_s21 [#allocation4] }
 0x100   : > { %v583_v35 = vmul.f32 %v582_v28, %v560_v40  ;;  %v604_v17 = vunpack.c.h.bf16 %v1947_v14  ;;  %v603_v48 = vunpack.c.l.bf16 %v1947_v14 }
 0x101   : > { %v570_v44 = vmul.f32 %v2112_v13, %v569_v30 }
 0x102   : > { %v2628_v39 = vadd.f32 %v584_v43, %v583_v35 }
 0x103   : > { %v571_v46 = vadd.f32 %v2112_v13, %v570_v44 }
 0x104   : > { %2115 = vtanh.f32 %v2628_v39 }
 0x105   : > { %v575_v60 = vsel %vm574_vm10, %v2112_v13, %v571_v46 }
 0x106   : > { %v580_v0 = vsel %vm577_vm11, %v579_v61, %v575_v60 }
 0x10a   : > { %v2116_v54 = vpop.eup %2115 }
 0x10b   : > { %v587_v2 = vmul.f32 %v2116_v54, %v580_v0 }
 0x10d   : > { %v590_v3 = vpack.c.bf16 %v587_v2, %v587_v2 }
 0x10f   : > { %593 = vst [vmem:[%s592_s19] sm:$0xf] %v590_v3  ;;  %615 = vmatmul.bf16.vlgmr.msrb.gmra.mxu0 %v590_v3  ;;  %628 = vmatmul.bf16.vlgmr.msrb.gmra.mxu1 %v590_v3  ;;  %s1974_s19 = sshll.u32 %s1010_s9, 2  ;;  %s2000_s9 = sshll.u32 (%p2355_p6), %s2267_s11, 1 }
 0x110   : > { %641 = vmatmul.bf16.vlgmr.msrb.gmra.mxu2 %v590_v3  ;;  %654 = vmatmul.bf16.vlgmr.msrb.gmra.mxu3 %v590_v3  ;;  %s1146_s20 = scalar_lea.vmem %s2399_s7, %s1974_s19 [#allocation5]  ;;  %s1573_s8 = ssub.s32 (%p2355_p6), 1, %s2000_s9 }
 0x111   : > { %884 = vmatpush.bf16.msrb.mxu0 %v2405_v20  ;;  %897 = vmatpush.bf16.msrb.mxu1 %v2410_v24 }
 0x112   : > { %910 = vmatpush.bf16.msrb.mxu2 %v2432_v38  ;;  %923 = vmatpush.bf16.msrb.mxu3 %v2412_v25 }
 0x115   : > { %885 = vmatpush.bf16.msrb.mxu0 %v2418_v29  ;;  %898 = vmatpush.bf16.msrb.mxu1 %v2425_v33 }
 0x116   : > { %911 = vmatpush.bf16.msrb.mxu2 %v2453_v51  ;;  %924 = vmatpush.bf16.msrb.mxu3 %v2427_v34 }
 0x119   : > { %886 = vmatpush.bf16.msrb.mxu0 %v2442_v45  ;;  %899 = vmatpush.bf16.msrb.mxu1 %v2449_v49 }
 0x11a   : > { %912 = vmatpush.bf16.msrb.mxu2 %v2465_v59  ;;  %925 = vmatpush.bf16.msrb.mxu3 %v2451_v50 }
 0x11d   : > { %887 = vmatpush.bf16.msrb.mxu0 %v2463_v58  ;;  %900 = vmatpush.bf16.msrb.mxu1 %v2471_v62 }
 0x11e   : > { %913 = vmatpush.bf16.msrb.mxu2 %v2485_v7  ;;  %926 = vmatpush.bf16.msrb.mxu3 %v2473_v63 }
 0x121   : > { %888 = vmatpush.bf16.msrb.mxu0 %v2483_v6  ;;  %901 = vmatpush.bf16.msrb.mxu1 %v2491_v10 }
 0x122   : > { %914 = vmatpush.bf16.msrb.mxu2 %v2505_v19  ;;  %927 = vmatpush.bf16.msrb.mxu3 %v2493_v11 }
 0x125   : > { %889 = vmatpush.bf16.msrb.mxu0 %v2503_v18  ;;  %902 = vmatpush.bf16.msrb.mxu1 %v2511_v23 }
 0x126   : > { %915 = vmatpush.bf16.msrb.mxu2 %v2525_v37  ;;  %928 = vmatpush.bf16.msrb.mxu3 %v2513_v26 }
 0x129   : > { %890 = vmatpush.bf16.msrb.mxu0 %v2523_v36  ;;  %903 = vmatpush.bf16.msrb.mxu1 %v2531_v41 }
 0x12a   : > { %916 = vmatpush.bf16.msrb.mxu2 %v2545_v55  ;;  %929 = vmatpush.bf16.msrb.mxu3 %v2533_v42 }
 0x12d   : > { %891 = vmatpush.bf16.msrb.mxu0 %v2543_v53  ;;  %904 = vmatpush.bf16.msrb.mxu1 %v2549_v56 }
 0x12e   : > { %917 = vmatpush.bf16.msrb.mxu2 %v2559_v1  ;;  %930 = vmatpush.bf16.msrb.mxu3 %v2551_v57 }
 0x18c   : > { %v616_v8 = vpop.f32.mrf.mxu0  ;;  %v629_v9 = vpop.f32.mrf.mxu1 }
 0x18d   : > { %v659_v12 = vadd.f32 %v616_v8, %v601_v4  ;;  %v660_v13 = vadd.f32 %v629_v9, %v602_v5 }
 0x18f   : > { %v1948_v15 = vmul.f32 -1.442695, %v659_v12  ;;  %v1949_v16 = vmul.f32 -1.442695, %v660_v13 }
 0x191   : > { %2117 = vpow2.f32 %v1948_v15 }
 0x192   : > { %2119 = vpow2.f32 %v1949_v16 }
 0x193   : > { %v642_v21 = vpop.f32.mrf.mxu2  ;;  %v655_v22 = vpop.f32.mrf.mxu3 }
 0x194   : > { %v662_v27 = vadd.f32 %v655_v22, %v604_v17  ;;  %v618_v28 = vpop.f32.mrf.mxu0  ;;  %v631_v30 = vpop.f32.mrf.mxu1  ;;  %v661_v54 = vadd.f32 %v642_v21, %v603_v48 }
 0x196   : > { %v1950_v31 = vmul.f32 -1.442695, %v662_v27 }
 0x197   : > { %v2118_v32 = vpop.eup %2117 }
 0x198   : > { %v2120_v40 = vpop.eup %2119  ;;  %v666_v43 = vadd.f32 1.0, %v2118_v32  ;;  %2121 = vpow2.f32 %v1950_v31 }
 0x199   : > { %v685_v44 = vadd.f32 1.0, %v2120_v40 }
 0x19a   : > { %2123 = vrcp.f32 %v666_v43  ;;  %v678_v5 = vand.u32 2147483648, %v666_v43  ;;  %v676_v12 = vand.u32 2147483647, %v666_v43  ;;  %vm672_vm14 = vweird.f32 %v666_v43 }
 0x19b   : > { %2125 = vrcp.f32 %v685_v44  ;;  %v644_v35 = vpop.f32.mrf.mxu2  ;;  %v657_v46 = vpop.f32.mrf.mxu3  ;;  %v697_v8 = vand.u32 2147483648, %v685_v44  ;;  %v695_v15 = vand.u32 2147483647, %v685_v44  ;;  %vm691_vm15 = vweird.f32 %v685_v44 }
 0x19c   : > { %v679_v17 = vor.u32 1.1754944e-38, %v678_v5  ;;  %vm677_vm2 = vcmp.eq.f32.partialorder %v676_v12, 8.507059e+37 }
 0x19d   : > { %v698_v27 = vor.u32 1.1754944e-38, %v697_v8  ;;  %vm696_vm3 = vcmp.eq.f32.partialorder %v695_v15, 8.507059e+37 }
 0x19e   : > { %v2122_v52 = vpop.eup %2121 }
 0x19f   : > { %v705_v60 = vadd.f32 1.0, %v2122_v52 }
 0x1a0   : > { %v2124_v61 = vpop.eup %2123 }
 0x1a1   : > { %v2126_v0 = vpop.eup %2125  ;;  %v668_v2 = vmul.f32 %v2124_v61, %v666_v43  ;;  %2127 = vrcp.f32 %v705_v60  ;;  %vm673_vm12 = vweird.f32 %v2124_v61  ;;  %vm711_vm5 = vweird.f32 %v705_v60 }
 0x1a2   : > { %v687_v3 = vmul.f32 %v2126_v0, %v685_v44  ;;  %2129 = vtanh.f32 %v661_v54  ;;  %vm692_vm13 = vweird.f32 %v2126_v0  ;;  %vm674_vm0 = vmor %vm672_vm14, %vm673_vm12  ;;  %v715_v54 = vand.u32 2147483647, %v705_v60 }
 0x1a3   : > { %v669_v47 = vsub.f32 1.0, %v668_v2  ;;  %vm693_vm1 = vmor %vm691_vm15, %vm692_vm13 }
 0x1a4   : > { %v688_v4 = vsub.f32 1.0, %v687_v3  ;;  %vm716_vm7 = vcmp.eq.f32.partialorder %v715_v54, 8.507059e+37 }
 0x1a5   : > { %v670_v9 = vmul.f32 %v2124_v61, %v669_v47 }
 0x1a6   : > { %v689_v13 = vmul.f32 %v2126_v0, %v688_v4 }
 0x1a7   : > { %v2128_v14 = vpop.eup %2127  ;;  %v671_v16 = vadd.f32 %v2124_v61, %v670_v9 }
 0x1a8   : > { %v690_v21 = vadd.f32 %v2126_v0, %v689_v13  ;;  %v707_v22 = vmul.f32 %v2128_v14, %v705_v60  ;;  %v2130_v30 = vpop.eup %2129  ;;  %vm712_vm4 = vweird.f32 %v2128_v14 }
 0x1a9   : > { %v675_v28 = vsel %vm674_vm0, %v2124_v61, %v671_v16  ;;  %v717_v61 = vand.u32 2147483648, %v705_v60  ;;  %vm713_vm6 = vmor %vm711_vm5, %vm712_vm4  ;;  %v1954_v60 = vld [vmem:[%s1696_s25 + $0x20] sm:$0xff] }
 0x1aa   : > { %v680_v31 = vsel %vm677_vm2, %v679_v17, %v675_v28  ;;  %v694_v32 = vsel %vm693_vm1, %v2126_v0, %v690_v21  ;;  %v708_v40 = vsub.f32 1.0, %v707_v22  ;;  %v740_v5 = vunpack.c.l.bf16 %v1954_v60 }
 0x1ab   : > { %v699_v35 = vsel %vm696_vm3, %v698_v27, %v694_v32  ;;  %v723_v46 = vmul.f32 %v2130_v30, %v680_v31  ;;  %v718_v2 = vor.u32 1.1754944e-38, %v717_v61  ;;  %v741_v8 = vunpack.c.h.bf16 %v1954_v60 }
 0x1ac   : > { %v722_v48 = vmul.f32 %v699_v35, %v2628_v39  ;;  %v709_v43 = vmul.f32 %v2128_v14, %v708_v40 }
 0x1ae   : > { %v2668_v44 = vadd.f32 %v723_v46, %v722_v48  ;;  %v710_v52 = vadd.f32 %v2128_v14, %v709_v43 }
 0x1b0   : > { %2131 = vtanh.f32 %v2668_v44  ;;  %v714_v0 = vsel %vm713_vm6, %v2128_v14, %v710_v52  ;;  %v1955_v14 = vld [vmem:[%s1696_s25 + $0x28] sm:$0xff]  ;;  %s1983_s25 = smul.u32 4294967216, %s2271_s12 }
 0x1b1   : > { %v719_v47 = vsel %vm716_vm7, %v718_v2, %v714_v0  ;;  %v743_v21 = vunpack.c.h.bf16 %v1955_v14  ;;  %v742_v61 = vunpack.c.l.bf16 %v1955_v14 }
 0x1b2   : > { %s1722_s26 = scalar_lea.vmem %s2397_s6, %s1983_s25 [#allocation4] }
 0x1b6   : > { %v2132_v3 = vpop.eup %2131 }
 0x1b7   : > { %v726_v4 = vmul.f32 %v2132_v3, %v719_v47 }
 0x1b9   : > { %v729_v39 = vpack.c.bf16 %v726_v4, %v726_v4 }
 0x1bb   : > { %1952 = vst [vmem:[%s1692_s23 + $0x4] sm:$0xf] %v729_v39  ;;  %754 = vmatmul.bf16.vlgmr.msra.gmra.mxu0 %v729_v39  ;;  %767 = vmatmul.bf16.vlgmr.msra.gmra.mxu1 %v729_v39  ;;  %s1981_s23 = smul.u32 4294967284, %s2271_s12 }
 0x1bc   : > { %780 = vmatmul.bf16.vlgmr.msra.gmra.mxu2 %v729_v39  ;;  %793 = vmatmul.bf16.vlgmr.msra.gmra.mxu3 %v729_v39 }
 0x1bd   : > { %1022 = vmatpush.bf16.msra.mxu0 %v2405_v20  ;;  %1035 = vmatpush.bf16.msra.mxu1 %v2410_v24  ;;  %s1718_s24 = scalar_lea.vmem %s2399_s7, %s1981_s23 [#allocation5] }
 0x1be   : > { %1048 = vmatpush.bf16.msra.mxu2 %v2432_v38  ;;  %1061 = vmatpush.bf16.msra.mxu3 %v2412_v25 }
 0x1c1   : > { %1023 = vmatpush.bf16.msra.mxu0 %v2418_v29  ;;  %1036 = vmatpush.bf16.msra.mxu1 %v2425_v33 }
 0x1c2   : > { %1049 = vmatpush.bf16.msra.mxu2 %v2453_v51  ;;  %1062 = vmatpush.bf16.msra.mxu3 %v2427_v34 }
 0x1c5   : > { %1024 = vmatpush.bf16.msra.mxu0 %v2442_v45  ;;  %1037 = vmatpush.bf16.msra.mxu1 %v2449_v49 }
 0x1c6   : > { %1050 = vmatpush.bf16.msra.mxu2 %v2465_v59  ;;  %1063 = vmatpush.bf16.msra.mxu3 %v2451_v50 }
 0x1c9   : > { %1025 = vmatpush.bf16.msra.mxu0 %v2463_v58  ;;  %1038 = vmatpush.bf16.msra.mxu1 %v2471_v62 }
 0x1ca   : > { %1051 = vmatpush.bf16.msra.mxu2 %v2485_v7  ;;  %1064 = vmatpush.bf16.msra.mxu3 %v2473_v63 }
 0x1cd   : > { %1026 = vmatpush.bf16.msra.mxu0 %v2483_v6  ;;  %1039 = vmatpush.bf16.msra.mxu1 %v2491_v10 }
 0x1ce   : > { %1052 = vmatpush.bf16.msra.mxu2 %v2505_v19  ;;  %1065 = vmatpush.bf16.msra.mxu3 %v2493_v11 }
 0x1d1   : > { %1027 = vmatpush.bf16.msra.mxu0 %v2503_v18  ;;  %1040 = vmatpush.bf16.msra.mxu1 %v2511_v23 }
 0x1d2   : > { %1053 = vmatpush.bf16.msra.mxu2 %v2525_v37  ;;  %1066 = vmatpush.bf16.msra.mxu3 %v2513_v26 }
 0x1d5   : > { %1028 = vmatpush.bf16.msra.mxu0 %v2523_v36  ;;  %1041 = vmatpush.bf16.msra.mxu1 %v2531_v41 }
 0x1d6   : > { %1054 = vmatpush.bf16.msra.mxu2 %v2545_v55  ;;  %1067 = vmatpush.bf16.msra.mxu3 %v2533_v42 }
 0x1d9   : > { %1029 = vmatpush.bf16.msra.mxu0 %v2543_v53  ;;  %1042 = vmatpush.bf16.msra.mxu1 %v2549_v56 }
 0x1da   : > { %1055 = vmatpush.bf16.msra.mxu2 %v2559_v1  ;;  %1068 = vmatpush.bf16.msra.mxu3 %v2551_v57 }
 0x238   : > { %v755_v9 = vpop.f32.mrf.mxu0  ;;  %v768_v12 = vpop.f32.mrf.mxu1 }
 0x239   : > { %v798_v13 = vadd.f32 %v755_v9, %v740_v5  ;;  %v799_v15 = vadd.f32 %v768_v12, %v741_v8 }
 0x23b   : > { %v1956_v16 = vmul.f32 -1.442695, %v798_v13  ;;  %v1957_v17 = vmul.f32 -1.442695, %v799_v15 }
 0x23d   : > { %2133 = vpow2.f32 %v1956_v16 }
 0x23e   : > { %2135 = vpow2.f32 %v1957_v17 }
 0x23f   : > { %v781_v22 = vpop.f32.mrf.mxu2  ;;  %v794_v27 = vpop.f32.mrf.mxu3 }
 0x240   : > { %v801_v28 = vadd.f32 %v794_v27, %v743_v21  ;;  %v757_v30 = vpop.f32.mrf.mxu0  ;;  %v770_v31 = vpop.f32.mrf.mxu1  ;;  %v800_v3 = vadd.f32 %v781_v22, %v742_v61 }
 0x242   : > { %v1958_v32 = vmul.f32 -1.442695, %v801_v28 }
 0x243   : > { %v2134_v40 = vpop.eup %2133 }
 0x244   : > { %v2136_v35 = vpop.eup %2135  ;;  %v805_v46 = vadd.f32 1.0, %v2134_v40  ;;  %2137 = vpow2.f32 %v1958_v32 }
 0x245   : > { %v824_v48 = vadd.f32 1.0, %v2136_v35 }
 0x246   : > { %2139 = vrcp.f32 %v805_v46  ;;  %v817_v8 = vand.u32 2147483648, %v805_v46  ;;  %v815_v13 = vand.u32 2147483647, %v805_v46  ;;  %vm811_vm10 = vweird.f32 %v805_v46 }
 0x247   : > { %2141 = vrcp.f32 %v824_v48  ;;  %v783_v43 = vpop.f32.mrf.mxu2  ;;  %v796_v52 = vpop.f32.mrf.mxu3  ;;  %v836_v9 = vand.u32 2147483648, %v824_v48  ;;  %v834_v16 = vand.u32 2147483647, %v824_v48  ;;  %vm830_vm11 = vweird.f32 %v824_v48 }
 0x248   : > { %v818_v21 = vor.u32 1.1754944e-38, %v817_v8  ;;  %vm816_vm14 = vcmp.eq.f32.partialorder %v815_v13, 8.507059e+37 }
 0x249   : > { %v837_v28 = vor.u32 1.1754944e-38, %v836_v9  ;;  %vm835_vm15 = vcmp.eq.f32.partialorder %v834_v16, 8.507059e+37 }
 0x24a   : > { %v2138_v54 = vpop.eup %2137 }
 0x24b   : > { %v844_v0 = vadd.f32 1.0, %v2138_v54 }
 0x24c   : > { %v2140_v2 = vpop.eup %2139 }
 0x24d   : > { %v2142_v47 = vpop.eup %2141  ;;  %v807_v4 = vmul.f32 %v2140_v2, %v805_v46  ;;  %2143 = vrcp.f32 %v844_v0  ;;  %vm812_vm8 = vweird.f32 %v2140_v2  ;;  %vm850_vm1 = vweird.f32 %v844_v0 }
 0x24e   : > { %v826_v39 = vmul.f32 %v2142_v47, %v824_v48  ;;  %2145 = vtanh.f32 %v800_v3  ;;  %vm831_vm9 = vweird.f32 %v2142_v47  ;;  %vm813_vm12 = vmor %vm811_vm10, %vm812_vm8  ;;  %v854_v3 = vand.u32 2147483647, %v844_v0 }
 0x24f   : > { %v808_v60 = vsub.f32 1.0, %v807_v4  ;;  %vm832_vm13 = vmor %vm830_vm11, %vm831_vm9 }
 0x250   : > { %v827_v5 = vsub.f32 1.0, %v826_v39  ;;  %vm855_vm3 = vcmp.eq.f32.partialorder %v854_v3, 8.507059e+37 }
 0x251   : > { %v809_v12 = vmul.f32 %v2140_v2, %v808_v60 }
 0x252   : > { %v828_v15 = vmul.f32 %v2142_v47, %v827_v5 }
 0x253   : > { %v2144_v14 = vpop.eup %2143  ;;  %v810_v17 = vadd.f32 %v2140_v2, %v809_v12 }
 0x254   : > { %v829_v22 = vadd.f32 %v2142_v47, %v828_v15  ;;  %v846_v27 = vmul.f32 %v2144_v14, %v844_v0  ;;  %v2146_v31 = vpop.eup %2145  ;;  %vm851_vm0 = vweird.f32 %v2144_v14 }
 0x255   : > { %v814_v30 = vsel %vm813_vm12, %v2140_v2, %v810_v17  ;;  %v856_v2 = vand.u32 2147483648, %v844_v0  ;;  %vm852_vm2 = vmor %vm850_vm1, %vm851_vm0  ;;  %v1962_v0 = vld [vmem:[%s1703_s30 + $0x30] sm:$0xff] }
 0x256   : > { %v819_v32 = vsel %vm816_vm14, %v818_v21, %v814_v30  ;;  %v833_v40 = vsel %vm832_vm13, %v2142_v47, %v829_v22  ;;  %v847_v35 = vsub.f32 1.0, %v846_v27  ;;  %v878_v8 = vunpack.c.l.bf16 %v1962_v0 }
 0x257   : > { %v838_v43 = vsel %vm835_vm15, %v837_v28, %v833_v40  ;;  %v862_v52 = vmul.f32 %v2146_v31, %v819_v32  ;;  %v857_v4 = vor.u32 1.1754944e-38, %v856_v2  ;;  %v879_v9 = vunpack.c.h.bf16 %v1962_v0 }
 0x258   : > { %v861_v61 = vmul.f32 %v838_v43, %v2668_v44  ;;  %v848_v46 = vmul.f32 %v2144_v14, %v847_v35 }
 0x25a   : > { %v2708_v48 = vadd.f32 %v862_v52, %v861_v61  ;;  %v849_v54 = vadd.f32 %v2144_v14, %v848_v46 }
 0x25c   : > { %2147 = vtanh.f32 %v2708_v48  ;;  %v853_v47 = vsel %vm852_vm2, %v2144_v14, %v849_v54  ;;  %v1963_v14 = vld [vmem:[%s1703_s30 + $0x38] sm:$0xff]  ;;  %s1991_s30 = smul.u32 4294967184, %s2271_s12 }
 0x25d   : > { %v858_v60 = vsel %vm855_vm3, %v857_v4, %v853_v47  ;;  %v881_v22 = vunpack.c.h.bf16 %v1963_v14  ;;  %v880_v2 = vunpack.c.l.bf16 %v1963_v14 }
 0x25e   : > { %s1730_s3 = scalar_lea.vmem %s2397_s6, %s1991_s30 [#allocation4]  ;;  %s1997_s6 = smul.u32 4294967268, %s2271_s12 }
 0x262   : > { %v2148_v39 = vpop.eup %2147 }
 0x263   : > { %v865_v5 = vmul.f32 %v2148_v39, %v858_v60 }
 0x265   : > { %v868_v44 = vpack.c.bf16 %v865_v5, %v865_v5 }
 0x267   : > { %1960 = vst [vmem:[%s1700_s27 + $0x8] sm:$0xf] %v868_v44  ;;  %892 = vmatmul.bf16.vlgmr.msrb.gmra.mxu0 %v868_v44  ;;  %905 = vmatmul.bf16.vlgmr.msrb.gmra.mxu1 %v868_v44  ;;  %s1989_s27 = smul.u32 4294967276, %s2271_s12 }
 0x268   : > { %918 = vmatmul.bf16.vlgmr.msrb.gmra.mxu2 %v868_v44  ;;  %931 = vmatmul.bf16.vlgmr.msrb.gmra.mxu3 %v868_v44 }
 0x269   : > { %1161 = vmatpush.bf16.msrb.mxu0 %v2405_v20  ;;  %1174 = vmatpush.bf16.msrb.mxu1 %v2410_v24  ;;  %s1726_s28 = scalar_lea.vmem %s2399_s7, %s1989_s27 [#allocation5] }
 0x26a   : > { %1187 = vmatpush.bf16.msrb.mxu2 %v2432_v38  ;;  %1200 = vmatpush.bf16.msrb.mxu3 %v2412_v25 }
 0x26d   : > { %1162 = vmatpush.bf16.msrb.mxu0 %v2418_v29  ;;  %1175 = vmatpush.bf16.msrb.mxu1 %v2425_v33 }
 0x26e   : > { %1188 = vmatpush.bf16.msrb.mxu2 %v2453_v51  ;;  %1201 = vmatpush.bf16.msrb.mxu3 %v2427_v34 }
 0x271   : > { %1163 = vmatpush.bf16.msrb.mxu0 %v2442_v45  ;;  %1176 = vmatpush.bf16.msrb.mxu1 %v2449_v49 }
 0x272   : > { %1189 = vmatpush.bf16.msrb.mxu2 %v2465_v59  ;;  %1202 = vmatpush.bf16.msrb.mxu3 %v2451_v50 }
 0x275   : > { %1164 = vmatpush.bf16.msrb.mxu0 %v2463_v58  ;;  %1177 = vmatpush.bf16.msrb.mxu1 %v2471_v62 }
 0x276   : > { %1190 = vmatpush.bf16.msrb.mxu2 %v2485_v7  ;;  %1203 = vmatpush.bf16.msrb.mxu3 %v2473_v63 }
 0x279   : > { %1165 = vmatpush.bf16.msrb.mxu0 %v2483_v6  ;;  %1178 = vmatpush.bf16.msrb.mxu1 %v2491_v10 }
 0x27a   : > { %1191 = vmatpush.bf16.msrb.mxu2 %v2505_v19  ;;  %1204 = vmatpush.bf16.msrb.mxu3 %v2493_v11 }
 0x27d   : > { %1166 = vmatpush.bf16.msrb.mxu0 %v2503_v18  ;;  %1179 = vmatpush.bf16.msrb.mxu1 %v2511_v23 }
 0x27e   : > { %1192 = vmatpush.bf16.msrb.mxu2 %v2525_v37  ;;  %1205 = vmatpush.bf16.msrb.mxu3 %v2513_v26 }
 0x281   : > { %1167 = vmatpush.bf16.msrb.mxu0 %v2523_v36  ;;  %1180 = vmatpush.bf16.msrb.mxu1 %v2531_v41 }
 0x282   : > { %1193 = vmatpush.bf16.msrb.mxu2 %v2545_v55  ;;  %1206 = vmatpush.bf16.msrb.mxu3 %v2533_v42 }
 0x285   : > { %1168 = vmatpush.bf16.msrb.mxu0 %v2543_v53  ;;  %1181 = vmatpush.bf16.msrb.mxu1 %v2549_v56 }
 0x286   : > { %1194 = vmatpush.bf16.msrb.mxu2 %v2559_v1  ;;  %1207 = vmatpush.bf16.msrb.mxu3 %v2551_v57 }
 0x2e4   : > { %v893_v12 = vpop.f32.mrf.mxu0  ;;  %v906_v13 = vpop.f32.mrf.mxu1 }
 0x2e5   : > { %v936_v15 = vadd.f32 %v893_v12, %v878_v8  ;;  %v937_v16 = vadd.f32 %v906_v13, %v879_v9 }
 0x2e7   : > { %v1964_v17 = vmul.f32 -1.442695, %v936_v15  ;;  %v1965_v21 = vmul.f32 -1.442695, %v937_v16 }
 0x2e9   : > { %2149 = vpow2.f32 %v1964_v17 }
 0x2ea   : > { %2151 = vpow2.f32 %v1965_v21 }
 0x2eb   : > { %v919_v27 = vpop.f32.mrf.mxu2  ;;  %v932_v28 = vpop.f32.mrf.mxu3 }
 0x2ec   : > { %v939_v30 = vadd.f32 %v932_v28, %v881_v22  ;;  %v895_v31 = vpop.f32.mrf.mxu0  ;;  %v908_v32 = vpop.f32.mrf.mxu1  ;;  %v938_v39 = vadd.f32 %v919_v27, %v880_v2 }
 0x2ee   : > { %v1966_v40 = vmul.f32 -1.442695, %v939_v30 }
 0x2ef   : > { %v2150_v35 = vpop.eup %2149 }
 0x2f0   : > { %v2152_v43 = vpop.eup %2151  ;;  %v943_v52 = vadd.f32 1.0, %v2150_v35  ;;  %2153 = vpow2.f32 %v1966_v40 }
 0x2f1   : > { %v962_v61 = vadd.f32 1.0, %v2152_v43 }
 0x2f2   : > { %2155 = vrcp.f32 %v943_v52  ;;  %v955_v9 = vand.u32 2147483648, %v943_v52  ;;  %v953_v15 = vand.u32 2147483647, %v943_v52  ;;  %vm949_vm6 = vweird.f32 %v943_v52 }
 0x2f3   : > { %2157 = vrcp.f32 %v962_v61  ;;  %v921_v46 = vpop.f32.mrf.mxu2  ;;  %v934_v54 = vpop.f32.mrf.mxu3  ;;  %v974_v12 = vand.u32 2147483648, %v962_v61  ;;  %v972_v17 = vand.u32 2147483647, %v962_v61  ;;  %vm968_vm7 = vweird.f32 %v962_v61 }
 0x2f4   : > { %v956_v22 = vor.u32 1.1754944e-38, %v955_v9  ;;  %vm954_vm10 = vcmp.eq.f32.partialorder %v953_v15, 8.507059e+37 }
 0x2f5   : > { %v975_v30 = vor.u32 1.1754944e-38, %v974_v12  ;;  %vm973_vm11 = vcmp.eq.f32.partialorder %v972_v17, 8.507059e+37 }
 0x2f6   : > { %v2154_v3 = vpop.eup %2153 }
 0x2f7   : > { %v982_v47 = vadd.f32 1.0, %v2154_v3 }
 0x2f8   : > { %v2156_v4 = vpop.eup %2155 }
 0x2f9   : > { %v2158_v60 = vpop.eup %2157  ;;  %v945_v5 = vmul.f32 %v2156_v4, %v943_v52  ;;  %2159 = vrcp.f32 %v982_v47  ;;  %vm950_vm4 = vweird.f32 %v2156_v4  ;;  %vm988_vm13 = vweird.f32 %v982_v47 }
 0x2fa   : > { %v964_v44 = vmul.f32 %v2158_v60, %v962_v61  ;;  %2161 = vtanh.f32 %v938_v39  ;;  %vm969_vm5 = vweird.f32 %v2158_v60  ;;  %vm951_vm8 = vmor %vm949_vm6, %vm950_vm4  ;;  %v992_v39 = vand.u32 2147483647, %v982_v47 }
 0x2fb   : > { %v946_v0 = vsub.f32 1.0, %v945_v5  ;;  %vm970_vm9 = vmor %vm968_vm7, %vm969_vm5 }
 0x2fc   : > { %v965_v8 = vsub.f32 1.0, %v964_v44  ;;  %vm993_vm15 = vcmp.eq.f32.partialorder %v992_v39, 8.507059e+37 }
 0x2fd   : > { %v947_v13 = vmul.f32 %v2156_v4, %v946_v0 }
 0x2fe   : > { %v966_v16 = vmul.f32 %v2158_v60, %v965_v8 }
 0x2ff   : > { %v2160_v14 = vpop.eup %2159  ;;  %v948_v21 = vadd.f32 %v2156_v4, %v947_v13 }
 0x300   : > { %v967_v27 = vadd.f32 %v2158_v60, %v966_v16  ;;  %v984_v28 = vmul.f32 %v2160_v14, %v982_v47  ;;  %v2162_v32 = vpop.eup %2161  ;;  %vm989_vm12 = vweird.f32 %v2160_v14 }
 0x301   : > { %v952_v31 = vsel %vm951_vm8, %v2156_v4, %v948_v21  ;;  %v994_v4 = vand.u32 2147483648, %v982_v47  ;;  %vm990_vm14 = vmor %vm988_vm13, %vm989_vm12  ;;  %v1014_v47 = vld [vmem:[%s1013_s18] sm:$0xff] }
 0x302   : > { %v957_v40 = vsel %vm954_vm10, %v956_v22, %v952_v31  ;;  %v971_v35 = vsel %vm970_vm9, %v2158_v60, %v967_v27  ;;  %v985_v43 = vsub.f32 1.0, %v984_v28  ;;  %v1016_v9 = vunpack.c.l.bf16 %v1014_v47 }
 0x303   : > { %v976_v46 = vsel %vm973_vm11, %v975_v30, %v971_v35  ;;  %v1000_v54 = vmul.f32 %v2162_v32, %v957_v40  ;;  %v995_v5 = vor.u32 1.1754944e-38, %v994_v4  ;;  %v1017_v12 = vunpack.c.h.bf16 %v1014_v47 }
 0x304   : > { %v999_v2 = vmul.f32 %v976_v46, %v2708_v48  ;;  %v986_v52 = vmul.f32 %v2160_v14, %v985_v43 }
 0x306   : > { %v2748_v61 = vadd.f32 %v1000_v54, %v999_v2  ;;  %v987_v3 = vadd.f32 %v2160_v14, %v986_v52 }
 0x308   : > { %2163 = vtanh.f32 %v2748_v61  ;;  %v991_v60 = vsel %vm990_vm14, %v2160_v14, %v987_v3  ;;  %v1015_v14 = vld [vmem:[%s1013_s18 + $0x8] sm:$0xff]  ;;  %s1574_s18 = smul.u32 (%p2355_p6), %s2271_s12, %s1573_s8 }
 0x309   : > { %v996_v0 = vsel %vm993_vm15, %v995_v5, %v991_v60  ;;  %v1019_v27 = vunpack.c.h.bf16 %v1015_v14  ;;  %v1018_v4 = vunpack.c.l.bf16 %v1015_v14 }
 0x30a   : > { %s1575_s19 = sadd.s32 (%p2355_p6), %s2267_s11, %s1574_s18 }
 0x30e   : > { %v2164_v44 = vpop.eup %2163 }
 0x30f   : > { %v1003_v8 = vmul.f32 %v2164_v44, %v996_v0 }
 0x311   : > { %v1006_v48 = vpack.c.bf16 %v1003_v8, %v1003_v8 }
 0x313   : > { %1968 = vst [vmem:[%s1706_s5 + $0xc] sm:$0xf] %v1006_v48  ;;  %1030 = vmatmul.bf16.vlgmr.msra.gmra.mxu0 %v1006_v48  ;;  %1043 = vmatmul.bf16.vlgmr.msra.gmra.mxu1 %v1006_v48  ;;  %s1734_s5 = scalar_lea.vmem %s2399_s7, %s1997_s6 [#allocation5] }
 0x314   : > { %1056 = vmatmul.bf16.vlgmr.msra.gmra.mxu2 %v1006_v48  ;;  %1069 = vmatmul.bf16.vlgmr.msra.gmra.mxu3 %v1006_v48 }
 0x315   : > { %1300 = vmatpush.bf16.msra.mxu0 %v2405_v20  ;;  %1313 = vmatpush.bf16.msra.mxu1 %v2410_v24 }
 0x316   : > { %1326 = vmatpush.bf16.msra.mxu2 %v2432_v38  ;;  %1339 = vmatpush.bf16.msra.mxu3 %v2412_v25 }
 0x319   : > { %1301 = vmatpush.bf16.msra.mxu0 %v2418_v29  ;;  %1314 = vmatpush.bf16.msra.mxu1 %v2425_v33 }
 0x31a   : > { %1327 = vmatpush.bf16.msra.mxu2 %v2453_v51  ;;  %1340 = vmatpush.bf16.msra.mxu3 %v2427_v34 }
 0x31d   : > { %1302 = vmatpush.bf16.msra.mxu0 %v2442_v45  ;;  %1315 = vmatpush.bf16.msra.mxu1 %v2449_v49 }
 0x31e   : > { %1328 = vmatpush.bf16.msra.mxu2 %v2465_v59  ;;  %1341 = vmatpush.bf16.msra.mxu3 %v2451_v50 }
 0x321   : > { %1303 = vmatpush.bf16.msra.mxu0 %v2463_v58  ;;  %1316 = vmatpush.bf16.msra.mxu1 %v2471_v62 }
 0x322   : > { %1329 = vmatpush.bf16.msra.mxu2 %v2485_v7  ;;  %1342 = vmatpush.bf16.msra.mxu3 %v2473_v63 }
 0x325   : > { %1304 = vmatpush.bf16.msra.mxu0 %v2483_v6  ;;  %1317 = vmatpush.bf16.msra.mxu1 %v2491_v10 }
 0x326   : > { %1330 = vmatpush.bf16.msra.mxu2 %v2505_v19  ;;  %1343 = vmatpush.bf16.msra.mxu3 %v2493_v11 }
 0x329   : > { %1305 = vmatpush.bf16.msra.mxu0 %v2503_v18  ;;  %1318 = vmatpush.bf16.msra.mxu1 %v2511_v23 }
 0x32a   : > { %1331 = vmatpush.bf16.msra.mxu2 %v2525_v37  ;;  %1344 = vmatpush.bf16.msra.mxu3 %v2513_v26 }
 0x32d   : > { %1306 = vmatpush.bf16.msra.mxu0 %v2523_v36  ;;  %1319 = vmatpush.bf16.msra.mxu1 %v2531_v41 }
 0x32e   : > { %1332 = vmatpush.bf16.msra.mxu2 %v2545_v55  ;;  %1345 = vmatpush.bf16.msra.mxu3 %v2533_v42 }
 0x331   : > { %1307 = vmatpush.bf16.msra.mxu0 %v2543_v53  ;;  %1320 = vmatpush.bf16.msra.mxu1 %v2549_v56 }
 0x332   : > { %1333 = vmatpush.bf16.msra.mxu2 %v2559_v1  ;;  %1346 = vmatpush.bf16.msra.mxu3 %v2551_v57 }
 0x390   : > { %v1031_v13 = vpop.f32.mrf.mxu0  ;;  %v1044_v15 = vpop.f32.mrf.mxu1 }
 0x391   : > { %v1074_v16 = vadd.f32 %v1031_v13, %v1016_v9  ;;  %v1075_v17 = vadd.f32 %v1044_v15, %v1017_v12 }
 0x393   : > { %v1971_v21 = vmul.f32 -1.442695, %v1074_v16  ;;  %v1972_v22 = vmul.f32 -1.442695, %v1075_v17 }
 0x395   : > { %2165 = vpow2.f32 %v1971_v21 }
 0x396   : > { %2167 = vpow2.f32 %v1972_v22 }
 0x397   : > { %v1057_v28 = vpop.f32.mrf.mxu2  ;;  %v1070_v30 = vpop.f32.mrf.mxu3 }
 0x398   : > { %v1077_v31 = vadd.f32 %v1070_v30, %v1019_v27  ;;  %v1033_v32 = vpop.f32.mrf.mxu0  ;;  %v1046_v40 = vpop.f32.mrf.mxu1  ;;  %v1076_v44 = vadd.f32 %v1057_v28, %v1018_v4 }
 0x39a   : > { %v1973_v35 = vmul.f32 -1.442695, %v1077_v31 }
 0x39b   : > { %v2166_v43 = vpop.eup %2165 }
 0x39c   : > { %v2168_v46 = vpop.eup %2167  ;;  %v1081_v54 = vadd.f32 1.0, %v2166_v43  ;;  %2169 = vpow2.f32 %v1973_v35 }
 0x39d   : > { %v1100_v2 = vadd.f32 1.0, %v2168_v46 }
 0x39e   : > { %2171 = vrcp.f32 %v1081_v54  ;;  %v1093_v12 = vand.u32 2147483648, %v1081_v54  ;;  %v1091_v16 = vand.u32 2147483647, %v1081_v54  ;;  %vm1087_vm2 = vweird.f32 %v1081_v54 }
 0x39f   : > { %2173 = vrcp.f32 %v1100_v2  ;;  %v1059_v52 = vpop.f32.mrf.mxu2  ;;  %v1072_v3 = vpop.f32.mrf.mxu3  ;;  %v1112_v13 = vand.u32 2147483648, %v1100_v2  ;;  %v1110_v21 = vand.u32 2147483647, %v1100_v2  ;;  %vm1106_vm3 = vweird.f32 %v1100_v2 }
 0x3a0   : > { %v1094_v27 = vor.u32 1.1754944e-38, %v1093_v12  ;;  %vm1092_vm6 = vcmp.eq.f32.partialorder %v1091_v16, 8.507059e+37 }
 0x3a1   : > { %v1113_v31 = vor.u32 1.1754944e-38, %v1112_v13  ;;  %vm1111_vm7 = vcmp.eq.f32.partialorder %v1110_v21, 8.507059e+37 }
 0x3a2   : > { %v2170_v39 = vpop.eup %2169 }
 0x3a3   : > { %v1120_v60 = vadd.f32 1.0, %v2170_v39 }
 0x3a4   : > { %v2172_v5 = vpop.eup %2171 }
 0x3a5   : > { %v2174_v0 = vpop.eup %2173  ;;  %v1083_v8 = vmul.f32 %v2172_v5, %v1081_v54  ;;  %2175 = vrcp.f32 %v1120_v60  ;;  %vm1088_vm0 = vweird.f32 %v2172_v5  ;;  %vm1126_vm9 = vweird.f32 %v1120_v60 }
 0x3a6   : > { %v1102_v48 = vmul.f32 %v2174_v0, %v1100_v2  ;;  %2177 = vtanh.f32 %v1076_v44  ;;  %vm1107_vm1 = vweird.f32 %v2174_v0  ;;  %vm1089_vm4 = vmor %vm1087_vm2, %vm1088_vm0  ;;  %v1130_v44 = vand.u32 2147483647, %v1120_v60 }
 0x3a7   : > { %v1084_v47 = vsub.f32 1.0, %v1083_v8  ;;  %vm1108_vm5 = vmor %vm1106_vm3, %vm1107_vm1 }
 0x3a8   : > { %v1103_v9 = vsub.f32 1.0, %v1102_v48  ;;  %vm1131_vm11 = vcmp.eq.f32.partialorder %v1130_v44, 8.507059e+37 }
 0x3a9   : > { %v1085_v15 = vmul.f32 %v2172_v5, %v1084_v47 }
 0x3aa   : > { %v1104_v17 = vmul.f32 %v2174_v0, %v1103_v9 }
 0x3ab   : > { %v2176_v14 = vpop.eup %2175  ;;  %v1086_v22 = vadd.f32 %v2172_v5, %v1085_v15 }
 0x3ac   : > { %v1105_v28 = vadd.f32 %v2174_v0, %v1104_v17  ;;  %v1122_v30 = vmul.f32 %v2176_v14, %v1120_v60  ;;  %v2178_v40 = vpop.eup %2177  ;;  %vm1127_vm8 = vweird.f32 %v2176_v14 }
 0x3ad   : > { %v1090_v32 = vsel %vm1089_vm4, %v2172_v5, %v1086_v22  ;;  %v1132_v5 = vand.u32 2147483648, %v1120_v60  ;;  %vm1128_vm10 = vmor %vm1126_vm9, %vm1127_vm8 }
 0x3ae   : > { %v1095_v35 = vsel %vm1092_vm6, %v1094_v27, %v1090_v32  ;;  %v1109_v43 = vsel %vm1108_vm5, %v2174_v0, %v1105_v28  ;;  %v1123_v46 = vsub.f32 1.0, %v1122_v30 }
 0x3af   : > { %v1114_v52 = vsel %vm1111_vm7, %v1113_v31, %v1109_v43  ;;  %v1138_v3 = vmul.f32 %v2178_v40, %v1095_v35  ;;  %v1133_v8 = vor.u32 1.1754944e-38, %v1132_v5 }
 0x3b0   : > { %v1137_v4 = vmul.f32 %v1114_v52, %v2748_v61  ;;  %v1124_v54 = vmul.f32 %v2176_v14, %v1123_v46 }
 0x3b2   : > { %v2790_v2 = vadd.f32 %v1138_v3, %v1137_v4  ;;  %v1125_v39 = vadd.f32 %v2176_v14, %v1124_v54 }
 0x3b4   : > { %2179 = vtanh.f32 %v2790_v2  ;;  %v1129_v0 = vsel %vm1128_vm10, %v2176_v14, %v1125_v39 }
 0x3b5   : > { %v1134_v47 = vsel %vm1131_vm11, %v1133_v8, %v1129_v0 }
 0x3ba   : > { %v2180_v48 = vpop.eup %2179 }
 0x3bb   : > { %v1141_v61 = vmul.f32 %v2180_v48, %v1134_v47 }
 0x3bd   : > { %v1144_v9 = vpack.c.bf16 %v1141_v61, %v1141_v61 }
 0x3bf   : > { %1147 = vst [vmem:[%s1146_s20] sm:$0xf] %v1144_v9  ;;  %1169 = vmatmul.bf16.vlgmr.msrb.gmra.mxu0 %v1144_v9  ;;  %1182 = vmatmul.bf16.vlgmr.msrb.gmra.mxu1 %v1144_v9  ;;  %s2043_s20 = sshll.u32 (%p2355_p6), %s1575_s19, 4 }
 0x3c0   : > { %1195 = vmatmul.bf16.vlgmr.msrb.gmra.mxu2 %v1144_v9  ;;  %1208 = vmatmul.bf16.vlgmr.msrb.gmra.mxu3 %v1144_v9  ;;  %s1578_s21 = sadd.s32 (%p2355_p6), %s2271_s12, %s2043_s20 }
 0x3c1   : > { %1439 = vmatpush.bf16.msrb.mxu0 %v2405_v20  ;;  %1452 = vmatpush.bf16.msrb.mxu1 %v2410_v24  ;;  %v1976_v20 = vld [vmem:[%s1714_s22 + $0x50] sm:$0xff]  ;;  %s2003_s29 = sshll.u32 (%p2355_p6), %s1578_s21, 2 }
 0x3c2   : > { %1465 = vmatpush.bf16.msrb.mxu2 %v2432_v38  ;;  %1478 = vmatpush.bf16.msrb.mxu3 %v2412_v25  ;;  %v1155_v24 = vunpack.c.l.bf16 %v1976_v20  ;;  %v1156_v25 = vunpack.c.h.bf16 %v1976_v20  ;;  %v1984_v20 = vld [vmem:[%s1722_s26 + $0x60] sm:$0xff] }
 0x3c5   : > { %1440 = vmatpush.bf16.msrb.mxu0 %v2418_v29  ;;  %1453 = vmatpush.bf16.msrb.mxu1 %v2425_v33 }
 0x3c6   : > { %1466 = vmatpush.bf16.msrb.mxu2 %v2453_v51  ;;  %1479 = vmatpush.bf16.msrb.mxu3 %v2427_v34 }
 0x3c9   : > { %1441 = vmatpush.bf16.msrb.mxu0 %v2442_v45  ;;  %1454 = vmatpush.bf16.msrb.mxu1 %v2449_v49  ;;  %v1977_v45 = vld [vmem:[%s1714_s22 + $0x58] sm:$0xff] }
 0x3ca   : > { %1467 = vmatpush.bf16.msrb.mxu2 %v2465_v59  ;;  %1480 = vmatpush.bf16.msrb.mxu3 %v2451_v50  ;;  %v1158_v51 = vunpack.c.h.bf16 %v1977_v45 }
 0x3cd   : > { %1442 = vmatpush.bf16.msrb.mxu0 %v2463_v58  ;;  %1455 = vmatpush.bf16.msrb.mxu1 %v2471_v62 }
 0x3ce   : > { %1468 = vmatpush.bf16.msrb.mxu2 %v2485_v7  ;;  %1481 = vmatpush.bf16.msrb.mxu3 %v2473_v63 }
 0x3d1   : > { %1443 = vmatpush.bf16.msrb.mxu0 %v2483_v6  ;;  %1456 = vmatpush.bf16.msrb.mxu1 %v2491_v10 }
 0x3d2   : > { %1469 = vmatpush.bf16.msrb.mxu2 %v2505_v19  ;;  %1482 = vmatpush.bf16.msrb.mxu3 %v2493_v11 }
 0x3d5   : > { %1444 = vmatpush.bf16.msrb.mxu0 %v2503_v18  ;;  %1457 = vmatpush.bf16.msrb.mxu1 %v2511_v23 }
 0x3d6   : > { %1470 = vmatpush.bf16.msrb.mxu2 %v2525_v37  ;;  %1483 = vmatpush.bf16.msrb.mxu3 %v2513_v26 }
 0x3d9   : > { %1445 = vmatpush.bf16.msrb.mxu0 %v2523_v36  ;;  %1458 = vmatpush.bf16.msrb.mxu1 %v2531_v41  ;;  %v1157_v36 = vunpack.c.l.bf16 %v1977_v45  ;;  %v1985_v45 = vld [vmem:[%s1722_s26 + $0x68] sm:$0xff] }
 0x3da   : > { %1471 = vmatpush.bf16.msrb.mxu2 %v2545_v55  ;;  %1484 = vmatpush.bf16.msrb.mxu3 %v2533_v42 }
 0x3dd   : > { %1446 = vmatpush.bf16.msrb.mxu0 %v2543_v53  ;;  %1459 = vmatpush.bf16.msrb.mxu1 %v2549_v56 }
 0x3de   : > { %1472 = vmatpush.bf16.msrb.mxu2 %v2559_v1  ;;  %1485 = vmatpush.bf16.msrb.mxu3 %v2551_v57 }
 0x43c   : > { %v1170_v29 = vpop.f32.mrf.mxu0  ;;  %v1183_v33 = vpop.f32.mrf.mxu1 }
 0x43d   : > { %v1213_v34 = vadd.f32 %v1170_v29, %v1155_v24  ;;  %v1214_v38 = vadd.f32 %v1183_v33, %v1156_v25  ;;  %v1294_v24 = vunpack.c.l.bf16 %v1984_v20  ;;  %v1295_v25 = vunpack.c.h.bf16 %v1984_v20  ;;  %v1992_v20 = vld [vmem:[%s1730_s3 + $0x70] sm:$0xff] }
 0x43f   : > { %v1978_v49 = vmul.f32 -1.442695, %v1213_v34  ;;  %v1979_v50 = vmul.f32 -1.442695, %v1214_v38 }
 0x441   : > { %2181 = vpow2.f32 %v1978_v49 }
 0x442   : > { %2183 = vpow2.f32 %v1979_v50 }
 0x443   : > { %v1196_v58 = vpop.f32.mrf.mxu2  ;;  %v1209_v59 = vpop.f32.mrf.mxu3 }
 0x444   : > { %v1216_v62 = vadd.f32 %v1209_v59, %v1158_v51  ;;  %v1172_v63 = vpop.f32.mrf.mxu0  ;;  %v1185_v6 = vpop.f32.mrf.mxu1  ;;  %v1215_v53 = vadd.f32 %v1196_v58, %v1157_v36  ;;  %v1297_v51 = vunpack.c.h.bf16 %v1985_v45  ;;  %v1296_v36 = vunpack.c.l.bf16 %v1985_v45  ;;  %v1993_v45 = vld [vmem:[%s1730_s3 + $0x78] sm:$0xff] }
 0x446   : > { %v1980_v7 = vmul.f32 -1.442695, %v1216_v62 }
 0x447   : > { %v2182_v10 = vpop.eup %2181 }
 0x448   : > { %v2184_v11 = vpop.eup %2183  ;;  %v1220_v18 = vadd.f32 1.0, %v2182_v10  ;;  %2185 = vpow2.f32 %v1980_v7 }
 0x449   : > { %v1239_v19 = vadd.f32 1.0, %v2184_v11 }
 0x44a   : > { %2187 = vrcp.f32 %v1220_v18  ;;  %v1232_v12 = vand.u32 2147483648, %v1220_v18  ;;  %v1230_v16 = vand.u32 2147483647, %v1220_v18  ;;  %vm1226_vm14 = vweird.f32 %v1220_v18 }
 0x44b   : > { %2189 = vrcp.f32 %v1239_v19  ;;  %v1198_v23 = vpop.f32.mrf.mxu2  ;;  %v1211_v26 = vpop.f32.mrf.mxu3  ;;  %v1251_v13 = vand.u32 2147483648, %v1239_v19  ;;  %v1249_v21 = vand.u32 2147483647, %v1239_v19  ;;  %vm1245_vm15 = vweird.f32 %v1239_v19 }
 0x44c   : > { %v1233_v27 = vor.u32 1.1754944e-38, %v1232_v12  ;;  %vm1231_vm2 = vcmp.eq.f32.partialorder %v1230_v16, 8.507059e+37 }
 0x44d   : > { %v1252_v31 = vor.u32 1.1754944e-38, %v1251_v13  ;;  %vm1250_vm3 = vcmp.eq.f32.partialorder %v1249_v21, 8.507059e+37 }
 0x44e   : > { %v2186_v37 = vpop.eup %2185 }
 0x44f   : > { %v1259_v41 = vadd.f32 1.0, %v2186_v37 }
 0x450   : > { %v2188_v42 = vpop.eup %2187 }
 0x451   : > { %v2190_v55 = vpop.eup %2189  ;;  %v1222_v56 = vmul.f32 %v2188_v42, %v1220_v18  ;;  %2191 = vrcp.f32 %v1259_v41  ;;  %vm1227_vm12 = vweird.f32 %v2188_v42  ;;  %v1271_v44 = vand.u32 2147483648, %v1259_v41 }
 0x452   : > { %v1241_v57 = vmul.f32 %v2190_v55, %v1239_v19  ;;  %2193 = vtanh.f32 %v1215_v53  ;;  %vm1246_vm13 = vweird.f32 %v2190_v55  ;;  %vm1228_vm0 = vmor %vm1226_vm14, %vm1227_vm12  ;;  %vm1265_vm5 = vweird.f32 %v1259_v41 }
 0x453   : > { %v1223_v1 = vsub.f32 1.0, %v1222_v56  ;;  %vm1247_vm1 = vmor %vm1245_vm15, %vm1246_vm13  ;;  %v1269_v0 = vand.u32 2147483647, %v1259_v41  ;;  %v1272_v48 = vor.u32 1.1754944e-38, %v1271_v44 }
 0x454   : > { %v1242_v60 = vsub.f32 1.0, %v1241_v57 }
 0x455   : > { %v1224_v15 = vmul.f32 %v2188_v42, %v1223_v1  ;;  %vm1270_vm7 = vcmp.eq.f32.partialorder %v1269_v0, 8.507059e+37 }
 0x456   : > { %v1243_v17 = vmul.f32 %v2190_v55, %v1242_v60 }
 0x457   : > { %v2192_v14 = vpop.eup %2191  ;;  %v1225_v22 = vadd.f32 %v2188_v42, %v1224_v15 }
 0x458   : > { %v1244_v28 = vadd.f32 %v2190_v55, %v1243_v17  ;;  %v1261_v30 = vmul.f32 %v2192_v14, %v1259_v41  ;;  %v2194_v40 = vpop.eup %2193  ;;  %vm1266_vm4 = vweird.f32 %v2192_v14 }
 0x459   : > { %v1229_v32 = vsel %vm1228_vm0, %v2188_v42, %v1225_v22  ;;  %vm1267_vm6 = vmor %vm1265_vm5, %vm1266_vm4 }
 0x45a   : > { %v1234_v35 = vsel %vm1231_vm2, %v1233_v27, %v1229_v32  ;;  %v1248_v43 = vsel %vm1247_vm1, %v2190_v55, %v1244_v28  ;;  %v1262_v46 = vsub.f32 1.0, %v1261_v30 }
 0x45b   : > { %v1253_v52 = vsel %vm1250_vm3, %v1252_v31, %v1248_v43  ;;  %v1277_v3 = vmul.f32 %v2194_v40, %v1234_v35 }
 0x45c   : > { %v1276_v4 = vmul.f32 %v1253_v52, %v2790_v2  ;;  %v1263_v54 = vmul.f32 %v2192_v14, %v1262_v46 }
 0x45e   : > { %v2831_v39 = vadd.f32 %v1277_v3, %v1276_v4  ;;  %v1264_v5 = vadd.f32 %v2192_v14, %v1263_v54 }
 0x460   : > { %2195 = vtanh.f32 %v2831_v39  ;;  %v1268_v8 = vsel %vm1267_vm6, %v2192_v14, %v1264_v5 }
 0x461   : > { %v1273_v2 = vsel %vm1270_vm7, %v1272_v48, %v1268_v8 }
 0x466   : > { %v2196_v47 = vpop.eup %2195 }
 0x467   : > { %v1280_v61 = vmul.f32 %v2196_v47, %v1273_v2 }
 0x469   : > { %v1283_v9 = vpack.c.bf16 %v1280_v61, %v1280_v61 }
 0x46b   : > { %1982 = vst [vmem:[%s1718_s24 + $0x14] sm:$0xf] %v1283_v9  ;;  %1308 = vmatmul.bf16.vlgmr.msra.gmra.mxu0 %v1283_v9  ;;  %1321 = vmatmul.bf16.vlgmr.msra.gmra.mxu1 %v1283_v9  ;;  %s1580_s24 = scalar_lea.vmem (%p2355_p6), %s2889_s2, %s2003_s29 }
 0x46c   : > { %1334 = vmatmul.bf16.vlgmr.msra.gmra.mxu2 %v1283_v9  ;;  %1347 = vmatmul.bf16.vlgmr.msra.gmra.mxu3 %v1283_v9 }
 0x4e8   : > { %v1309_v29 = vpop.f32.mrf.mxu0  ;;  %v1322_v33 = vpop.f32.mrf.mxu1 }
 0x4e9   : > { %v1352_v34 = vadd.f32 %v1309_v29, %v1294_v24  ;;  %v1353_v38 = vadd.f32 %v1322_v33, %v1295_v25  ;;  %v1433_v24 = vunpack.c.l.bf16 %v1992_v20  ;;  %v1434_v25 = vunpack.c.h.bf16 %v1992_v20 }
 0x4eb   : > { %v1986_v49 = vmul.f32 -1.442695, %v1352_v34  ;;  %v1987_v50 = vmul.f32 -1.442695, %v1353_v38 }
 0x4ed   : > { %2197 = vpow2.f32 %v1986_v49 }
 0x4ee   : > { %2199 = vpow2.f32 %v1987_v50 }
 0x4ef   : > { %v1335_v58 = vpop.f32.mrf.mxu2  ;;  %v1348_v59 = vpop.f32.mrf.mxu3 }
 0x4f0   : > { %v1355_v62 = vadd.f32 %v1348_v59, %v1297_v51  ;;  %v1311_v63 = vpop.f32.mrf.mxu0  ;;  %v1324_v6 = vpop.f32.mrf.mxu1  ;;  %v1354_v53 = vadd.f32 %v1335_v58, %v1296_v36  ;;  %v1436_v51 = vunpack.c.h.bf16 %v1993_v45  ;;  %v1435_v36 = vunpack.c.l.bf16 %v1993_v45 }
 0x4f2   : > { %v1988_v7 = vmul.f32 -1.442695, %v1355_v62 }
 0x4f3   : > { %v2198_v10 = vpop.eup %2197 }
 0x4f4   : > { %v2200_v11 = vpop.eup %2199  ;;  %v1359_v18 = vadd.f32 1.0, %v2198_v10  ;;  %2201 = vpow2.f32 %v1988_v7 }
 0x4f5   : > { %v1378_v19 = vadd.f32 1.0, %v2200_v11 }
 0x4f6   : > { %2203 = vrcp.f32 %v1359_v18  ;;  %v1371_v12 = vand.u32 2147483648, %v1359_v18  ;;  %v1369_v16 = vand.u32 2147483647, %v1359_v18  ;;  %vm1365_vm10 = vweird.f32 %v1359_v18 }
 0x4f7   : > { %2205 = vrcp.f32 %v1378_v19  ;;  %v1337_v23 = vpop.f32.mrf.mxu2  ;;  %v1350_v26 = vpop.f32.mrf.mxu3  ;;  %v1390_v13 = vand.u32 2147483648, %v1378_v19  ;;  %v1388_v21 = vand.u32 2147483647, %v1378_v19  ;;  %vm1384_vm11 = vweird.f32 %v1378_v19 }
 0x4f8   : > { %v1372_v27 = vor.u32 1.1754944e-38, %v1371_v12  ;;  %vm1370_vm14 = vcmp.eq.f32.partialorder %v1369_v16, 8.507059e+37 }
 0x4f9   : > { %v1391_v31 = vor.u32 1.1754944e-38, %v1390_v13  ;;  %vm1389_vm15 = vcmp.eq.f32.partialorder %v1388_v21, 8.507059e+37 }
 0x4fa   : > { %v2202_v37 = vpop.eup %2201 }
 0x4fb   : > { %v1398_v41 = vadd.f32 1.0, %v2202_v37 }
 0x4fc   : > { %v2204_v42 = vpop.eup %2203 }
 0x4fd   : > { %v2206_v55 = vpop.eup %2205  ;;  %v1361_v56 = vmul.f32 %v2204_v42, %v1359_v18  ;;  %2207 = vrcp.f32 %v1398_v41  ;;  %vm1366_vm8 = vweird.f32 %v2204_v42  ;;  %v1410_v0 = vand.u32 2147483648, %v1398_v41 }
 0x4fe   : > { %v1380_v57 = vmul.f32 %v2206_v55, %v1378_v19  ;;  %2209 = vtanh.f32 %v1354_v53  ;;  %vm1385_vm9 = vweird.f32 %v2206_v55  ;;  %vm1367_vm12 = vmor %vm1365_vm10, %vm1366_vm8  ;;  %vm1404_vm1 = vweird.f32 %v1398_v41 }
 0x4ff   : > { %v1362_v1 = vsub.f32 1.0, %v1361_v56  ;;  %vm1386_vm13 = vmor %vm1384_vm11, %vm1385_vm9  ;;  %v1408_v8 = vand.u32 2147483647, %v1398_v41  ;;  %v1411_v47 = vor.u32 1.1754944e-38, %v1410_v0 }
 0x500   : > { %v1381_v60 = vsub.f32 1.0, %v1380_v57 }
 0x501   : > { %v1363_v15 = vmul.f32 %v2204_v42, %v1362_v1  ;;  %vm1409_vm3 = vcmp.eq.f32.partialorder %v1408_v8, 8.507059e+37 }
 0x502   : > { %v1382_v17 = vmul.f32 %v2206_v55, %v1381_v60 }
 0x503   : > { %v2208_v14 = vpop.eup %2207  ;;  %v1364_v22 = vadd.f32 %v2204_v42, %v1363_v15 }
 0x504   : > { %v1383_v28 = vadd.f32 %v2206_v55, %v1382_v17  ;;  %v1400_v30 = vmul.f32 %v2208_v14, %v1398_v41  ;;  %v2210_v40 = vpop.eup %2209  ;;  %vm1405_vm0 = vweird.f32 %v2208_v14 }
 0x505   : > { %v1368_v32 = vsel %vm1367_vm12, %v2204_v42, %v1364_v22  ;;  %vm1406_vm2 = vmor %vm1404_vm1, %vm1405_vm0 }
 0x506   : > { %v1373_v35 = vsel %vm1370_vm14, %v1372_v27, %v1368_v32  ;;  %v1387_v43 = vsel %vm1386_vm13, %v2206_v55, %v1383_v28  ;;  %v1401_v46 = vsub.f32 1.0, %v1400_v30 }
 0x507   : > { %v1392_v52 = vsel %vm1389_vm15, %v1391_v31, %v1387_v43  ;;  %v1416_v3 = vmul.f32 %v2210_v40, %v1373_v35 }
 0x508   : > { %v1415_v4 = vmul.f32 %v1392_v52, %v2831_v39  ;;  %v1402_v54 = vmul.f32 %v2208_v14, %v1401_v46 }
 0x50a   : > { %v2839_v5 = vadd.f32 %v1416_v3, %v1415_v4  ;;  %v1403_v44 = vadd.f32 %v2208_v14, %v1402_v54 }
 0x50c   : > { %2211 = vtanh.f32 %v2839_v5  ;;  %v1407_v48 = vsel %vm1406_vm2, %v2208_v14, %v1403_v44 }
 0x50d   : > { %v1412_v39 = vsel %vm1409_vm3, %v1411_v47, %v1407_v48 }
 0x512   : > { %v2212_v2 = vpop.eup %2211 }
 0x513   : > { %v1419_v61 = vmul.f32 %v2212_v2, %v1412_v39 }
 0x515   : > { %v1422_v9 = vpack.c.bf16 %v1419_v61, %v1419_v61 }
 0x517   : > { %1990 = vst [vmem:[%s1726_s28 + $0x18] sm:$0xf] %v1422_v9  ;;  %1447 = vmatmul.bf16.vlgmr.msrb.gmra.mxu0 %v1422_v9  ;;  %1460 = vmatmul.bf16.vlgmr.msrb.gmra.mxu1 %v1422_v9 }
 0x518   : > { %1473 = vmatmul.bf16.vlgmr.msrb.gmra.mxu2 %v1422_v9  ;;  %1486 = vmatmul.bf16.vlgmr.msrb.gmra.mxu3 %v1422_v9 }
 0x594   : > { %v1448_v29 = vpop.f32.mrf.mxu0  ;;  %v1461_v33 = vpop.f32.mrf.mxu1 }
 0x595   : > { %v1491_v34 = vadd.f32 %v1448_v29, %v1433_v24  ;;  %v1492_v38 = vadd.f32 %v1461_v33, %v1434_v25 }
 0x597   : > { %v1994_v49 = vmul.f32 -1.442695, %v1491_v34  ;;  %v1995_v50 = vmul.f32 -1.442695, %v1492_v38 }
 0x599   : > { %2213 = vpow2.f32 %v1994_v49 }
 0x59a   : > { %2215 = vpow2.f32 %v1995_v50 }
 0x59b   : > { %v1474_v58 = vpop.f32.mrf.mxu2  ;;  %v1487_v59 = vpop.f32.mrf.mxu3 }
 0x59c   : > { %v1494_v62 = vadd.f32 %v1487_v59, %v1436_v51  ;;  %v1450_v63 = vpop.f32.mrf.mxu0  ;;  %v1463_v6 = vpop.f32.mrf.mxu1  ;;  %v1493_v53 = vadd.f32 %v1474_v58, %v1435_v36 }
 0x59e   : > { %v1996_v7 = vmul.f32 -1.442695, %v1494_v62 }
 0x59f   : > { %v2214_v10 = vpop.eup %2213 }
 0x5a0   : > { %v2216_v11 = vpop.eup %2215  ;;  %v1498_v18 = vadd.f32 1.0, %v2214_v10  ;;  %2217 = vpow2.f32 %v1996_v7 }
 0x5a1   : > { %v1517_v19 = vadd.f32 1.0, %v2216_v11 }
 0x5a2   : > { %2219 = vrcp.f32 %v1498_v18  ;;  %v1510_v12 = vand.u32 2147483648, %v1498_v18  ;;  %v1508_v16 = vand.u32 2147483647, %v1498_v18  ;;  %vm1504_vm6 = vweird.f32 %v1498_v18 }
 0x5a3   : > { %2221 = vrcp.f32 %v1517_v19  ;;  %v1476_v23 = vpop.f32.mrf.mxu2  ;;  %v1489_v26 = vpop.f32.mrf.mxu3  ;;  %v1529_v13 = vand.u32 2147483648, %v1517_v19  ;;  %v1527_v21 = vand.u32 2147483647, %v1517_v19  ;;  %vm1523_vm7 = vweird.f32 %v1517_v19 }
 0x5a4   : > { %v1511_v27 = vor.u32 1.1754944e-38, %v1510_v12  ;;  %vm1509_vm10 = vcmp.eq.f32.partialorder %v1508_v16, 8.507059e+37 }
 0x5a5   : > { %v1530_v31 = vor.u32 1.1754944e-38, %v1529_v13  ;;  %vm1528_vm11 = vcmp.eq.f32.partialorder %v1527_v21, 8.507059e+37 }
 0x5a6   : > { %v2218_v37 = vpop.eup %2217 }
 0x5a7   : > { %v1537_v41 = vadd.f32 1.0, %v2218_v37 }
 0x5a8   : > { %v2220_v42 = vpop.eup %2219 }
 0x5a9   : > { %v2222_v55 = vpop.eup %2221  ;;  %v1500_v56 = vmul.f32 %v2220_v42, %v1498_v18  ;;  %2223 = vrcp.f32 %v1537_v41  ;;  %vm1505_vm4 = vweird.f32 %v2220_v42  ;;  %v1549_v8 = vand.u32 2147483648, %v1537_v41 }
 0x5aa   : > { %v1519_v57 = vmul.f32 %v2222_v55, %v1517_v19  ;;  %2225 = vtanh.f32 %v1493_v53  ;;  %vm1524_vm5 = vweird.f32 %v2222_v55  ;;  %vm1506_vm8 = vmor %vm1504_vm6, %vm1505_vm4  ;;  %vm1543_vm13 = vweird.f32 %v1537_v41 }
 0x5ab   : > { %v1501_v1 = vsub.f32 1.0, %v1500_v56  ;;  %vm1525_vm9 = vmor %vm1523_vm7, %vm1524_vm5  ;;  %v1547_v48 = vand.u32 2147483647, %v1537_v41  ;;  %v1550_v2 = vor.u32 1.1754944e-38, %v1549_v8 }
 0x5ac   : > { %v1520_v60 = vsub.f32 1.0, %v1519_v57 }
 0x5ad   : > { %v1502_v15 = vmul.f32 %v2220_v42, %v1501_v1  ;;  %vm1548_vm15 = vcmp.eq.f32.partialorder %v1547_v48, 8.507059e+37 }
 0x5ae   : > { %v1521_v17 = vmul.f32 %v2222_v55, %v1520_v60 }
 0x5af   : > { %v2224_v14 = vpop.eup %2223  ;;  %v1503_v22 = vadd.f32 %v2220_v42, %v1502_v15 }
 0x5b0   : > { %v1522_v28 = vadd.f32 %v2222_v55, %v1521_v17  ;;  %v1539_v30 = vmul.f32 %v2224_v14, %v1537_v41  ;;  %v2226_v40 = vpop.eup %2225  ;;  %vm1544_vm12 = vweird.f32 %v2224_v14 }
 0x5b1   : > { %v1507_v32 = vsel %vm1506_vm8, %v2220_v42, %v1503_v22  ;;  %vm1545_vm14 = vmor %vm1543_vm13, %vm1544_vm12 }
 0x5b2   : > { %v1512_v35 = vsel %vm1509_vm10, %v1511_v27, %v1507_v32  ;;  %v1526_v43 = vsel %vm1525_vm9, %v2222_v55, %v1522_v28  ;;  %v1540_v46 = vsub.f32 1.0, %v1539_v30 }
 0x5b3   : > { %v1531_v52 = vsel %vm1528_vm11, %v1530_v31, %v1526_v43  ;;  %v1555_v3 = vmul.f32 %v2226_v40, %v1512_v35 }
 0x5b4   : > { %v1554_v4 = vmul.f32 %v1531_v52, %v2839_v5  ;;  %v1541_v54 = vmul.f32 %v2224_v14, %v1540_v46 }
 0x5b6   : > { %v1556_v44 = vadd.f32 %v1555_v3, %v1554_v4  ;;  %v1542_v0 = vadd.f32 %v2224_v14, %v1541_v54 }
 0x5b8   : > { %2227 = vtanh.f32 %v1556_v44  ;;  %1559 = vst [vmem:[#allocation3] sm:$0xff] %v1556_v44  ;;  %v1546_v47 = vsel %vm1545_vm14, %v2224_v14, %v1542_v0 }
 0x5b9   : > { %v1551_v61 = vsel %vm1548_vm15, %v1550_v2, %v1546_v47 }
 0x5be   : > { %v2228_v39 = vpop.eup %2227 }
 0x5bf   : > { %v1558_v9 = vmul.f32 %v2228_v39, %v1551_v61  ;;  %1571 = sbr.rel (!%p2355_p6) target bundleno = 1491 (0x5d3), region = 59 }
 0x5c1   : > { %1560 = vst [vmem:[#allocation2] sm:$0xff] %v1558_v9  ;;  %v1561_v5 = vpack.c.bf16 %v1558_v9, %v1558_v9 }
 0x5c3   : > { %1998 = vst [vmem:[%s1734_s5 + $0x1c] sm:$0xf] %v1561_v5 }
 0x5ca   : > { %v1597_v20 = vld [vmem:[%s2399_s7] sm:$0xf]  ;;  %v1599_v24 = vld [vmem:[%s2399_s7 + $0x4] sm:$0xf]  ;;  %v1601_v25 = vld [vmem:[%s2399_s7 + $0x8] sm:$0xf] }
 0x5cb   : > { %1598 = vst [vmem:[%s1580_s24] sm:$0xf] %v1597_v20  ;;  %v1603_v29 = vld [vmem:[%s2399_s7 + $0xc] sm:$0xf]  ;;  %v1605_v33 = vld [vmem:[%s2399_s7 + $0x10] sm:$0xf] }
 0x5cc   : > { %1600 = vst [vmem:[%s1580_s24 + $0x8] sm:$0xf] %v1599_v24  ;;  %v1607_v34 = vld [vmem:[%s2399_s7 + $0x14] sm:$0xf]  ;;  %v1609_v38 = vld [vmem:[%s2399_s7 + $0x18] sm:$0xf] }
 0x5cd   : > { %1602 = vst [vmem:[%s1580_s24 + $0x10] sm:$0xf] %v1601_v25  ;;  %v1611_v45 = vld [vmem:[%s2399_s7 + $0x1c] sm:$0xf] }
 0x5ce   : > { %1604 = vst [vmem:[%s1580_s24 + $0x18] sm:$0xf] %v1603_v29 }
 0x5cf   : > { %1606 = vst [vmem:[%s1580_s24 + $0x20] sm:$0xf] %v1605_v33 }
 0x5d0   : > { %1608 = vst [vmem:[%s1580_s24 + $0x28] sm:$0xf] %v1607_v34 }
 0x5d1   : > { %1610 = vst [vmem:[%s1580_s24 + $0x30] sm:$0xf] %v1609_v38 }
 0x5d2   : > { %1612 = vst [vmem:[%s1580_s24 + $0x38] sm:$0xf] %v1611_v45 }
 0x5d3 PF: > { %s12_s15 = sadd.s32 1, %s2283_s15   ;;  %s2891_s9 = smov %s2263_s10 }
 0x5d4   : > { %p9_p0 = scmp.ge.s32.totalorder %s12_s15, 6   ;;  %s2892_s10 = smov %s2361_s4 }
 0x5d5   : > { %s2893_s11 = smov %s2275_s13  ;;  %s2894_s12 = smov %s2279_s14 }
 0x5d6   : > { %s2895_s13 = smov %s2898_s16  ;;  %s2896_s14 = smov %s2902_s17 }
 0x5d7   :  { %11 = sbr.rel (!%p9_p0) target bundleno = 4 (0x4), region = 150 }

// kernel: deepspeech_forward.24
= control target key start
LH: loop header
LB: loop body
LE: loop exit
PB: predicated region body
PF: predicated region fallthrough
CT: control target
= control target key end

     0   :  { %s417_s1 = inlined_call_operand.vmem [shape: bf16[128,128], index: 1, kind: input, shape index: {}]   ;;  %s418_s0 = inlined_call_operand.vmem [shape: bf16[80,128], index: 0, kind: input, shape index: {}]   ;;  %s419_s2 = inlined_call_operand.vmem [shape: bf16[80,128], index: 2, kind: output, shape index: {}]  }
   0x1   :  { %v294_v0 = vld [vmem:[%s417_s1 + $0x38] sm:$0xff]  ;;  %v293_v1 = vld [vmem:[%s417_s1 + $0x30] sm:$0xff]  ;;  %v292_v2 = vld [vmem:[%s417_s1 + $0x28] sm:$0xff] }
   0x2   :  { %326 = vmatpush.bf16.msra.mxu3 %v294_v0  ;;  %325 = vmatpush.bf16.msra.mxu2 %v294_v0  ;;  %v291_v3 = vld [vmem:[%s417_s1 + $0x20] sm:$0xff]  ;;  %v290_v4 = vld [vmem:[%s417_s1 + $0x18] sm:$0xff]  ;;  %v289_v5 = vld [vmem:[%s417_s1 + $0x10] sm:$0xff] }
   0x3   :  { %139 = vmatpush.bf16.msra.mxu0 %v294_v0  ;;  %324 = vmatpush.bf16.msra.mxu1 %v294_v0  ;;  %v288_v6 = vld [vmem:[%s417_s1 + $0x8] sm:$0xff]  ;;  %v287_v7 = vld [vmem:[%s417_s1] sm:$0xff]  ;;  %v285_v8 = vld [vmem:[%s418_s0 + $0x18] sm:$0xff] }
   0x4   :  { %v284_v9 = vld [vmem:[%s418_s0 + $0x10] sm:$0xff]  ;;  %v282_v10 = vld [vmem:[%s418_s0] sm:$0xff]  ;;  %v283_v11 = vld [vmem:[%s418_s0 + $0x8] sm:$0xff] }
   0x5   :  { %v286_v12 = vld [vmem:[%s418_s0 + $0x20] sm:$0xff] }
   0x6   :  { %329 = vmatpush.bf16.msra.mxu3 %v293_v1  ;;  %328 = vmatpush.bf16.msra.mxu2 %v293_v1 }
   0x7   :  { %140 = vmatpush.bf16.msra.mxu0 %v293_v1  ;;  %327 = vmatpush.bf16.msra.mxu1 %v293_v1 }
   0xa   :  { %332 = vmatpush.bf16.msra.mxu3 %v292_v2  ;;  %331 = vmatpush.bf16.msra.mxu2 %v292_v2 }
   0xb   :  { %141 = vmatpush.bf16.msra.mxu0 %v292_v2  ;;  %330 = vmatpush.bf16.msra.mxu1 %v292_v2 }
   0xe   :  { %335 = vmatpush.bf16.msra.mxu3 %v291_v3  ;;  %334 = vmatpush.bf16.msra.mxu2 %v291_v3 }
   0xf   :  { %142 = vmatpush.bf16.msra.mxu0 %v291_v3  ;;  %333 = vmatpush.bf16.msra.mxu1 %v291_v3 }
  0x12   :  { %338 = vmatpush.bf16.msra.mxu3 %v290_v4  ;;  %337 = vmatpush.bf16.msra.mxu2 %v290_v4 }
  0x13   :  { %143 = vmatpush.bf16.msra.mxu0 %v290_v4  ;;  %336 = vmatpush.bf16.msra.mxu1 %v290_v4 }
  0x16   :  { %341 = vmatpush.bf16.msra.mxu3 %v289_v5  ;;  %340 = vmatpush.bf16.msra.mxu2 %v289_v5 }
  0x17   :  { %144 = vmatpush.bf16.msra.mxu0 %v289_v5  ;;  %339 = vmatpush.bf16.msra.mxu1 %v289_v5 }
  0x1a   :  { %344 = vmatpush.bf16.msra.mxu3 %v288_v6  ;;  %343 = vmatpush.bf16.msra.mxu2 %v288_v6 }
  0x1b   :  { %145 = vmatpush.bf16.msra.mxu0 %v288_v6  ;;  %342 = vmatpush.bf16.msra.mxu1 %v288_v6 }
  0x1e   :  { %347 = vmatpush.bf16.msra.mxu3 %v287_v7  ;;  %346 = vmatpush.bf16.msra.mxu2 %v287_v7 }
  0x1f   :  { %146 = vmatpush.bf16.msra.mxu0 %v287_v7  ;;  %345 = vmatpush.bf16.msra.mxu1 %v287_v7 }
  0x21   :  { %162 = vmatmul.bf16.vlgmr.msra.gmra.mxu3 %v285_v8  ;;  %157 = vmatmul.bf16.vlgmr.msra.gmra.mxu2 %v284_v9 }
  0x22   :  { %147 = vmatmul.bf16.vlgmr.msra.gmra.mxu0 %v282_v10  ;;  %152 = vmatmul.bf16.vlgmr.msra.gmra.mxu1 %v283_v11 }
  0x31   :  { %167 = vmatmul.bf16.gmra.mxu3 %v286_v12 }
  0x9f   :  { %v148_v13 = vpop.f32.mrf.mxu0  ;;  %v153_v14 = vpop.f32.mrf.mxu1 }
  0xa4   :  { %v163_v15 = vpop.f32.mrf.mxu3  ;;  %v158_v16 = vpop.f32.mrf.mxu2 }
  0xa7   :  { %v150_v17 = vpop.f32.mrf.mxu0  ;;  %v155_v18 = vpop.f32.mrf.mxu1 }
  0xa8   :  { %v298_v19 = vpack.c.bf16 %v150_v17, %v148_v13  ;;  %v303_v20 = vpack.c.bf16 %v155_v18, %v153_v14 }
  0xaa   :  { %299 = vst [vmem:[%s419_s2] sm:$0xff] %v298_v19  }
  0xab   :  { %320 = vst [vmem:[%s419_s2 + $0x8] sm:$0xff] %v303_v20  }
  0xac   :  { %v165_v21 = vpop.f32.mrf.mxu3  ;;  %v160_v22 = vpop.f32.mrf.mxu2 }
  0xad   :  { %v313_v23 = vpack.c.bf16 %v165_v21, %v163_v15  ;;  %v308_v24 = vpack.c.bf16 %v160_v22, %v158_v16 }
  0xaf   :  { %322 = vst [vmem:[%s419_s2 + $0x18] sm:$0xff] %v313_v23  }
  0xb0   :  { %321 = vst [vmem:[%s419_s2 + $0x10] sm:$0xff] %v308_v24  }
  0xb4   :  { %v168_v25 = vpop.f32.mrf.mxu3 }
  0xbc   :  { %v170_v26 = vpop.f32.mrf.mxu3 }
  0xbd   :  { %v318_v27 = vpack.c.bf16 %v170_v26, %v168_v25 }
  0xbf   :  { %323 = vst [vmem:[%s419_s2 + $0x20] sm:$0xff] %v318_v27  }

// kernel: deepspeech_forward.22
= control target key start
LH: loop header
LB: loop body
LE: loop exit
PB: predicated region body
PF: predicated region fallthrough
CT: control target
= control target key end

     0   :  { %s1623_s9 = smov 0   ;;  %s1625_s10 = smov 0   ;;  %s1957_s0 = inlined_call_operand.vmem [shape: bf16[128,128], index: 0, kind: input, shape index: {}]   ;;  %s1958_s1 = inlined_call_operand.vmem [shape: bf16[128,1024], index: 1, kind: input, shape index: {}]   ;;  %s1959_s2 = inlined_call_operand.vmem [shape: bf16[128,1024], index: 2, kind: output, shape index: {}]  }
   0x1   :  { %s1627_s11 = smov 0   ;;  %s1629_s12 = smov 0  }
   0x2   :  { %s1631_s13 = smov 0  }
   0x3 LB: > { %s27_s14 = sadd.s32 1, %s1602_s12  ;;  %s1310_s15 = sadd.s32 4294967295, %s1606_s13   ;;  %s1606_s13 = sphi %s1631_s13, %s12_s13   ;;  %s1602_s12 = sphi %s1629_s12, %s1964_s12   ;;  %s1598_s11 = sphi %s1627_s11, %s1963_s11   ;;  %s1594_s10 = sphi %s1625_s10, %s1962_s10   ;;  %s1590_s9 = sphi %s1623_s9, %s1961_s9  }
   0x4   : > { %p29_p0 = scmp.ge.s32.totalorder %s27_s14, 2  ;;  %p75_p1 = scmp.ne.s32.totalorder %s1594_s10, %s1590_s9 }
   0x5   : > { %p76_p2 = scmp.eq.s32.totalorder %s1606_s13, 0  ;;  %p107_p4 = scmp.eq.s32.totalorder %s1310_s15, 1 }
   0x6   : > { %s1966_s14 = smov (%p29_p0, %s27_s14), 0  ;;  %s68_s17 = sadd.s32 1, %s1594_s10 }
   0x7   : > { %p77_p3 = por %p76_p2, %p75_p1  ;;  %s64_s16 = ssub.s32 %s1602_s12, %s1966_s14 }
   0x8   : > { %p66_p5 = scmp.eq.s32.totalorder %s64_s16, 0  ;;  %p1658_p6 = por %p107_p4, %p75_p1 }
   0x9   : > { %p1314_p7 = scmp.ge.s32.totalorder %s1606_s13, 2 }
   0xa   : > { %s1663_s19 = scalar_select %p66_p5, %s1594_s10, %s68_s17  }
   0xb   : > { %141 = sbr.rel (%p1314_p7) target bundleno = 52 (0x34), region = 20 }
  0x10   : > { %144 = sbr.rel (!%p77_p3) target bundleno = 52 (0x34), region = 24  ;;  %s146_s20 = sand.u32 (%p77_p3), 1, %s1594_s10  }
  0x11   : > { %s1486_s21 = sshll.u32 (%p77_p3), %s1602_s12, 4  ;;  %s1315_s22 = sshll.u32 (%p77_p3), %s146_s20, 8 }
  0x12   : > { %s1671_s25 = scalar_lea.vmem (%p77_p3), %s1958_s1, %s1486_s21  ;;  %s1676_s26 = scalar_lea.vmem (%p77_p3), [#allocation3], %s1315_s22 }
  0x13   : > { %v167_v0 = vld [vmem:[%s1671_s25] sm:$0xff] (%p77_p3)  ;;  %v169_v1 = vld [vmem:[%s1671_s25 + $0x8] sm:$0xff] (%p77_p3) }
  0x14   : > { %v171_v2 = vld [vmem:[%s1671_s25 + $0x20] sm:$0xff] (%p77_p3)  ;;  %168 = vst [vmem:[%s1676_s26] sm:$0xff] (%p77_p3), %v167_v0  ;;  %v173_v3 = vld [vmem:[%s1671_s25 + $0x28] sm:$0xff] (%p77_p3) }
  0x15   : > { %170 = vst [vmem:[%s1676_s26 + $0x8] sm:$0xff] %v169_v1  ;;  %v175_v4 = vld [vmem:[%s1671_s25 + $0x40] sm:$0xff]  ;;  %v177_v5 = vld [vmem:[%s1671_s25 + $0x48] sm:$0xff] }
  0x16   : > { %172 = vst [vmem:[%s1676_s26 + $0x10] sm:$0xff] %v171_v2  ;;  %v179_v6 = vld [vmem:[%s1671_s25 + $0x60] sm:$0xff]  ;;  %v181_v7 = vld [vmem:[%s1671_s25 + $0x68] sm:$0xff] }
  0x17   : > { %174 = vst [vmem:[%s1676_s26 + $0x18] sm:$0xff] %v173_v3  ;;  %v183_v8 = vld [vmem:[%s1671_s25 + $0x80] sm:$0xff]  ;;  %v185_v9 = vld [vmem:[%s1671_s25 + $0x88] sm:$0xff] }
  0x18   : > { %176 = vst [vmem:[%s1676_s26 + $0x20] sm:$0xff] %v175_v4  ;;  %v187_v10 = vld [vmem:[%s1671_s25 + $0xa0] sm:$0xff]  ;;  %v189_v11 = vld [vmem:[%s1671_s25 + $0xa8] sm:$0xff] }
  0x19   : > { %178 = vst [vmem:[%s1676_s26 + $0x28] sm:$0xff] %v177_v5  ;;  %v191_v12 = vld [vmem:[%s1671_s25 + $0xc0] sm:$0xff]  ;;  %v193_v13 = vld [vmem:[%s1671_s25 + $0xc8] sm:$0xff] }
  0x1a   : > { %180 = vst [vmem:[%s1676_s26 + $0x30] sm:$0xff] %v179_v6  ;;  %v195_v14 = vld [vmem:[%s1671_s25 + $0xe0] sm:$0xff]  ;;  %v197_v15 = vld [vmem:[%s1671_s25 + $0xe8] sm:$0xff] }
  0x1b   : > { %182 = vst [vmem:[%s1676_s26 + $0x38] sm:$0xff] %v181_v7  ;;  %v199_v16 = vld [vmem:[%s1671_s25 + $0x100] sm:$0xff]  ;;  %v201_v17 = vld [vmem:[%s1671_s25 + $0x108] sm:$0xff] }
  0x1c   : > { %184 = vst [vmem:[%s1676_s26 + $0x40] sm:$0xff] %v183_v8  ;;  %v203_v18 = vld [vmem:[%s1671_s25 + $0x120] sm:$0xff]  ;;  %v205_v19 = vld [vmem:[%s1671_s25 + $0x128] sm:$0xff] }
  0x1d   : > { %186 = vst [vmem:[%s1676_s26 + $0x48] sm:$0xff] %v185_v9  ;;  %v207_v20 = vld [vmem:[%s1671_s25 + $0x140] sm:$0xff]  ;;  %v209_v21 = vld [vmem:[%s1671_s25 + $0x148] sm:$0xff] }
  0x1e   : > { %188 = vst [vmem:[%s1676_s26 + $0x50] sm:$0xff] %v187_v10  ;;  %v211_v22 = vld [vmem:[%s1671_s25 + $0x160] sm:$0xff]  ;;  %v213_v23 = vld [vmem:[%s1671_s25 + $0x168] sm:$0xff] }
  0x1f   : > { %190 = vst [vmem:[%s1676_s26 + $0x58] sm:$0xff] %v189_v11  ;;  %v215_v24 = vld [vmem:[%s1671_s25 + $0x180] sm:$0xff]  ;;  %v217_v25 = vld [vmem:[%s1671_s25 + $0x188] sm:$0xff] }
  0x20   : > { %192 = vst [vmem:[%s1676_s26 + $0x60] sm:$0xff] %v191_v12  ;;  %v219_v26 = vld [vmem:[%s1671_s25 + $0x1a0] sm:$0xff]  ;;  %v221_v27 = vld [vmem:[%s1671_s25 + $0x1a8] sm:$0xff] }
  0x21   : > { %194 = vst [vmem:[%s1676_s26 + $0x68] sm:$0xff] %v193_v13  ;;  %v223_v28 = vld [vmem:[%s1671_s25 + $0x1c0] sm:$0xff]  ;;  %v225_v29 = vld [vmem:[%s1671_s25 + $0x1c8] sm:$0xff] }
  0x22   : > { %196 = vst [vmem:[%s1676_s26 + $0x70] sm:$0xff] %v195_v14  ;;  %v227_v30 = vld [vmem:[%s1671_s25 + $0x1e0] sm:$0xff]  ;;  %v229_v31 = vld [vmem:[%s1671_s25 + $0x1e8] sm:$0xff] }
  0x23   : > { %198 = vst [vmem:[%s1676_s26 + $0x78] sm:$0xff] %v197_v15 }
  0x24   : > { %200 = vst [vmem:[%s1676_s26 + $0x80] sm:$0xff] %v199_v16 }
  0x25   : > { %202 = vst [vmem:[%s1676_s26 + $0x88] sm:$0xff] %v201_v17 }
  0x26   : > { %204 = vst [vmem:[%s1676_s26 + $0x90] sm:$0xff] %v203_v18 }
  0x27   : > { %206 = vst [vmem:[%s1676_s26 + $0x98] sm:$0xff] %v205_v19 }
  0x28   : > { %208 = vst [vmem:[%s1676_s26 + $0xa0] sm:$0xff] %v207_v20 }
  0x29   : > { %210 = vst [vmem:[%s1676_s26 + $0xa8] sm:$0xff] %v209_v21 }
  0x2a   : > { %212 = vst [vmem:[%s1676_s26 + $0xb0] sm:$0xff] %v211_v22 }
  0x2b   : > { %214 = vst [vmem:[%s1676_s26 + $0xb8] sm:$0xff] %v213_v23 }
  0x2c   : > { %216 = vst [vmem:[%s1676_s26 + $0xc0] sm:$0xff] %v215_v24 }
  0x2d   : > { %218 = vst [vmem:[%s1676_s26 + $0xc8] sm:$0xff] %v217_v25 }
  0x2e   : > { %220 = vst [vmem:[%s1676_s26 + $0xd0] sm:$0xff] %v219_v26 }
  0x2f   : > { %222 = vst [vmem:[%s1676_s26 + $0xd8] sm:$0xff] %v221_v27 }
  0x30   : > { %224 = vst [vmem:[%s1676_s26 + $0xe0] sm:$0xff] %v223_v28 }
  0x31   : > { %226 = vst [vmem:[%s1676_s26 + $0xe8] sm:$0xff] %v225_v29 }
  0x32   : > { %228 = vst [vmem:[%s1676_s26 + $0xf0] sm:$0xff] %v227_v30 }
  0x33   : > { %230 = vst [vmem:[%s1676_s26 + $0xf8] sm:$0xff] %v229_v31 }
  0x34 PF: > { %p1318_p8 = scmp.ge.s32.totalorder %s1606_s13, 1  ;;  %p235_p9 = scmp.lt.s32.totalorder %s1606_s13, 3 }
  0x36   : > { %p236_p10 = pnand %p1318_p8, %p235_p9 }
  0x37   : > { %s242_s27 = sand.u32 (!%p236_p10), 1, %s1590_s9  }
  0x38   : > { %239 = sbr.rel (%p236_p10) target bundleno = 360 (0x168), region = 47  ;;  %s1742_s28 = sshll.u32 (!%p236_p10), %s242_s27, 8 }
  0x39   : > { %s1745_s29 = scalar_lea.vmem (!%p236_p10), [#allocation3], %s1742_s28  ;;  %s1836_s25 = scalar_lea.vmem (!%p236_p10), [#allocation4], %s1742_s28 }
  0x3d   : > { %v1467_v32 = vld [vmem:[%s1745_s29 + $0xe0] sm:$0xf]  ;;  %v1525_v33 = vld [vmem:[%s1745_s29 + $0xec] sm:$0xf0]  ;;  %v1523_v34 = vld [vmem:[%s1745_s29 + $0xe4] sm:$0xf] }
  0x3e   : > { %v1468_v35 = vor.u32 %v1525_v33, %v1467_v32  ;;  %v1469_v36 = vld [vmem:[%s1745_s29 + $0xf0] sm:$0xf0]  ;;  %v1475_v37 = vld [vmem:[%s1745_s29 + $0xe8] sm:$0xf]  ;;  %v1526_v38 = vld [vmem:[%s1745_s29 + $0xf4] sm:$0xf0] }
  0x3f   : > { %v1472_v39 = vor.u32 %v1523_v34, %v1469_v36  ;;  %v1476_v40 = vor.u32 %v1526_v38, %v1475_v37  ;;  %v1524_v41 = vld [vmem:[%s1745_s29 + $0xec] sm:$0xf]  ;;  %v1477_v42 = vld [vmem:[%s1745_s29 + $0xf8] sm:$0xf0]  ;;  %v1451_v43 = vld [vmem:[%s1745_s29 + $0xc0] sm:$0xf] }
  0x40   : > { %671 = vmatpush.bf16.msra.mxu0 %v1468_v35  ;;  %v1480_v44 = vor.u32 %v1524_v41, %v1477_v42  ;;  %v1521_v45 = vld [vmem:[%s1745_s29 + $0xcc] sm:$0xf0]  ;;  %v1519_v46 = vld [vmem:[%s1745_s29 + $0xc4] sm:$0xf]  ;;  %v1453_v47 = vld [vmem:[%s1745_s29 + $0xd0] sm:$0xf0] }
  0x41   : > { %720 = vmatpush.bf16.msra.mxu1 %v1472_v39  ;;  %769 = vmatpush.bf16.msra.mxu2 %v1476_v40  ;;  %v1452_v48 = vor.u32 %v1521_v45, %v1451_v43  ;;  %v1456_v49 = vor.u32 %v1519_v46, %v1453_v47  ;;  %v1459_v50 = vld [vmem:[%s1745_s29 + $0xc8] sm:$0xf]  ;;  %v1522_v51 = vld [vmem:[%s1745_s29 + $0xd4] sm:$0xf0]  ;;  %v1520_v52 = vld [vmem:[%s1745_s29 + $0xcc] sm:$0xf] }
  0x42   : > { %818 = vmatpush.bf16.msra.mxu3 %v1480_v44  ;;  %v1460_v53 = vor.u32 %v1522_v51, %v1459_v50  ;;  %v1461_v54 = vld [vmem:[%s1745_s29 + $0xd8] sm:$0xf0]  ;;  %v1435_v55 = vld [vmem:[%s1745_s29 + $0xa0] sm:$0xf]  ;;  %v1517_v56 = vld [vmem:[%s1745_s29 + $0xac] sm:$0xf0] }
  0x43   : > { %v1464_v57 = vor.u32 %v1520_v52, %v1461_v54  ;;  %v1515_v58 = vld [vmem:[%s1745_s29 + $0xa4] sm:$0xf]  ;;  %v1437_v59 = vld [vmem:[%s1745_s29 + $0xb0] sm:$0xf0]  ;;  %v1443_v60 = vld [vmem:[%s1745_s29 + $0xa8] sm:$0xf]  ;;  %v1436_v61 = vor.u32 %v1517_v56, %v1435_v55 }
  0x44   : > { %672 = vmatpush.bf16.msra.mxu0 %v1452_v48  ;;  %v1518_v62 = vld [vmem:[%s1745_s29 + $0xb4] sm:$0xf0]  ;;  %v1516_v63 = vld [vmem:[%s1745_s29 + $0xac] sm:$0xf]  ;;  %v1445_v0 = vld [vmem:[%s1745_s29 + $0xb8] sm:$0xf0]  ;;  %v1440_v1 = vor.u32 %v1515_v58, %v1437_v59 }
  0x45   : > { %721 = vmatpush.bf16.msra.mxu1 %v1456_v49  ;;  %770 = vmatpush.bf16.msra.mxu2 %v1460_v53  ;;  %v1444_v2 = vor.u32 %v1518_v62, %v1443_v60  ;;  %v1419_v3 = vld [vmem:[%s1745_s29 + $0x80] sm:$0xf]  ;;  %v1513_v4 = vld [vmem:[%s1745_s29 + $0x8c] sm:$0xf0]  ;;  %v1511_v5 = vld [vmem:[%s1745_s29 + $0x84] sm:$0xf]  ;;  %v1448_v6 = vor.u32 %v1516_v63, %v1445_v0 }
  0x46   : > { %819 = vmatpush.bf16.msra.mxu3 %v1464_v57  ;;  %v1421_v7 = vld [vmem:[%s1745_s29 + $0x90] sm:$0xf0]  ;;  %v1427_v8 = vld [vmem:[%s1745_s29 + $0x88] sm:$0xf]  ;;  %v1514_v9 = vld [vmem:[%s1745_s29 + $0x94] sm:$0xf0]  ;;  %v1420_v12 = vor.u32 %v1513_v4, %v1419_v3 }
  0x47   : > { %v1512_v10 = vld [vmem:[%s1745_s29 + $0x8c] sm:$0xf]  ;;  %v1429_v11 = vld [vmem:[%s1745_s29 + $0x98] sm:$0xf0]  ;;  %v1424_v13 = vor.u32 %v1511_v5, %v1421_v7  ;;  %v1428_v14 = vor.u32 %v1514_v9, %v1427_v8  ;;  %v1403_v15 = vld [vmem:[%s1745_s29 + $0x60] sm:$0xf] }
  0x48   : > { %673 = vmatpush.bf16.msra.mxu0 %v1436_v61  ;;  %v1509_v16 = vld [vmem:[%s1745_s29 + $0x6c] sm:$0xf0]  ;;  %v1507_v17 = vld [vmem:[%s1745_s29 + $0x64] sm:$0xf]  ;;  %v1432_v18 = vor.u32 %v1512_v10, %v1429_v11  ;;  %v1405_v19 = vld [vmem:[%s1745_s29 + $0x70] sm:$0xf0] }
  0x49   : > { %722 = vmatpush.bf16.msra.mxu1 %v1440_v1  ;;  %771 = vmatpush.bf16.msra.mxu2 %v1444_v2  ;;  %v1411_v20 = vld [vmem:[%s1745_s29 + $0x68] sm:$0xf]  ;;  %v1510_v21 = vld [vmem:[%s1745_s29 + $0x74] sm:$0xf0]  ;;  %v1508_v22 = vld [vmem:[%s1745_s29 + $0x6c] sm:$0xf]  ;;  %v1404_v24 = vor.u32 %v1509_v16, %v1403_v15  ;;  %v1408_v25 = vor.u32 %v1507_v17, %v1405_v19 }
  0x4a   : > { %820 = vmatpush.bf16.msra.mxu3 %v1448_v6  ;;  %v1413_v23 = vld [vmem:[%s1745_s29 + $0x78] sm:$0xf0]  ;;  %v1412_v26 = vor.u32 %v1510_v21, %v1411_v20  ;;  %v1387_v27 = vld [vmem:[%s1745_s29 + $0x40] sm:$0xf]  ;;  %v1505_v28 = vld [vmem:[%s1745_s29 + $0x4c] sm:$0xf0] }
  0x4b   : > { %v1503_v29 = vld [vmem:[%s1745_s29 + $0x44] sm:$0xf]  ;;  %v1416_v30 = vor.u32 %v1508_v22, %v1413_v23  ;;  %v1389_v31 = vld [vmem:[%s1745_s29 + $0x50] sm:$0xf0]  ;;  %v1395_v32 = vld [vmem:[%s1745_s29 + $0x48] sm:$0xf]  ;;  %v1388_v36 = vor.u32 %v1505_v28, %v1387_v27 }
  0x4c   : > { %674 = vmatpush.bf16.msra.mxu0 %v1420_v12  ;;  %v1506_v33 = vld [vmem:[%s1745_s29 + $0x54] sm:$0xf0]  ;;  %v1504_v34 = vld [vmem:[%s1745_s29 + $0x4c] sm:$0xf]  ;;  %v1397_v35 = vld [vmem:[%s1745_s29 + $0x58] sm:$0xf0]  ;;  %v1392_v37 = vor.u32 %v1503_v29, %v1389_v31 }
  0x4d   : > { %723 = vmatpush.bf16.msra.mxu1 %v1424_v13  ;;  %772 = vmatpush.bf16.msra.mxu2 %v1428_v14  ;;  %v1396_v38 = vor.u32 %v1506_v33, %v1395_v32  ;;  %v1371_v39 = vld [vmem:[%s1745_s29 + $0x20] sm:$0xf]  ;;  %v1501_v40 = vld [vmem:[%s1745_s29 + $0x2c] sm:$0xf0]  ;;  %v1499_v41 = vld [vmem:[%s1745_s29 + $0x24] sm:$0xf]  ;;  %v1400_v42 = vor.u32 %v1504_v34, %v1397_v35 }
  0x4e   : > { %821 = vmatpush.bf16.msra.mxu3 %v1432_v18  ;;  %v1373_v43 = vld [vmem:[%s1745_s29 + $0x30] sm:$0xf0]  ;;  %v1379_v44 = vld [vmem:[%s1745_s29 + $0x28] sm:$0xf]  ;;  %v1502_v45 = vld [vmem:[%s1745_s29 + $0x34] sm:$0xf0]  ;;  %v1372_v48 = vor.u32 %v1501_v40, %v1371_v39 }
  0x4f   : > { %v1500_v46 = vld [vmem:[%s1745_s29 + $0x2c] sm:$0xf]  ;;  %v1381_v47 = vld [vmem:[%s1745_s29 + $0x38] sm:$0xf0]  ;;  %v1376_v49 = vor.u32 %v1499_v41, %v1373_v43  ;;  %v1380_v50 = vor.u32 %v1502_v45, %v1379_v44  ;;  %v1355_v51 = vld [vmem:[%s1745_s29] sm:$0xf] }
  0x50   : > { %675 = vmatpush.bf16.msra.mxu0 %v1404_v24  ;;  %v1497_v52 = vld [vmem:[%s1745_s29 + $0xc] sm:$0xf0]  ;;  %v1495_v53 = vld [vmem:[%s1745_s29 + $0x4] sm:$0xf]  ;;  %v1384_v54 = vor.u32 %v1500_v46, %v1381_v47  ;;  %v1357_v55 = vld [vmem:[%s1745_s29 + $0x10] sm:$0xf0] }
  0x51   : > { %724 = vmatpush.bf16.msra.mxu1 %v1408_v25  ;;  %773 = vmatpush.bf16.msra.mxu2 %v1412_v26  ;;  %v1363_v56 = vld [vmem:[%s1745_s29 + $0x8] sm:$0xf]  ;;  %v1498_v57 = vld [vmem:[%s1745_s29 + $0x14] sm:$0xf0]  ;;  %v1496_v58 = vld [vmem:[%s1745_s29 + $0xc] sm:$0xf]  ;;  %v1356_v60 = vor.u32 %v1497_v52, %v1355_v51  ;;  %v1360_v61 = vor.u32 %v1495_v53, %v1357_v55 }
  0x52   : > { %822 = vmatpush.bf16.msra.mxu3 %v1416_v30  ;;  %v1365_v59 = vld [vmem:[%s1745_s29 + $0x18] sm:$0xf0]  ;;  %v1364_v62 = vor.u32 %v1498_v57, %v1363_v56  ;;  %v1487_v0 = vld [vmem:[%s1957_s0] sm:$0xff]  ;;  %v1488_v1 = vld [vmem:[%s1957_s0 + $0x8] sm:$0xff]  ;;  %s1527_s26 = sshll.u32 (%p1658_p6), %s1598_s11, 4 }
  0x53   : > { %v1368_v63 = vor.u32 %v1496_v58, %v1365_v59  ;;  %v1489_v2 = vld [vmem:[%s1957_s0 + $0x10] sm:$0xff]  ;;  %v1490_v3 = vld [vmem:[%s1957_s0 + $0x18] sm:$0xff]  ;;  %v1491_v4 = vld [vmem:[%s1957_s0 + $0x20] sm:$0xff]  ;;  %s1878_s29 = scalar_lea.vmem (%p1658_p6), %s1959_s2, %s1527_s26 }
  0x54   : > { %676 = vmatpush.bf16.msra.mxu0 %v1388_v36  ;;  %v1492_v5 = vld [vmem:[%s1957_s0 + $0x28] sm:$0xff]  ;;  %v1493_v6 = vld [vmem:[%s1957_s0 + $0x30] sm:$0xff]  ;;  %v1494_v7 = vld [vmem:[%s1957_s0 + $0x38] sm:$0xff] }
  0x55   : > { %725 = vmatpush.bf16.msra.mxu1 %v1392_v37  ;;  %774 = vmatpush.bf16.msra.mxu2 %v1396_v38 }
  0x56   : > { %823 = vmatpush.bf16.msra.mxu3 %v1400_v42 }
  0x58   : > { %677 = vmatpush.bf16.msra.mxu0 %v1372_v48 }
  0x59   : > { %726 = vmatpush.bf16.msra.mxu1 %v1376_v49  ;;  %775 = vmatpush.bf16.msra.mxu2 %v1380_v50 }
  0x5a   : > { %824 = vmatpush.bf16.msra.mxu3 %v1384_v54 }
  0x5c   : > { %678 = vmatpush.bf16.msra.mxu0 %v1356_v60 }
  0x5d   : > { %727 = vmatpush.bf16.msra.mxu1 %v1360_v61  ;;  %776 = vmatpush.bf16.msra.mxu2 %v1364_v62 }
  0x5e   : > { %825 = vmatpush.bf16.msra.mxu3 %v1368_v63 }
  0x5f   : > { %679 = vmatmul.bf16.vlgmr.msra.gmra.mxu0 %v1487_v0 }
  0x60   : > { %728 = vmatmul.bf16.vlgmr.msra.gmra.mxu1 %v1487_v0  ;;  %777 = vmatmul.bf16.vlgmr.msra.gmra.mxu2 %v1487_v0 }
  0x61   : > { %826 = vmatmul.bf16.vlgmr.msra.gmra.mxu3 %v1487_v0 }
  0x6f   : > { %684 = vmatmul.bf16.gmra.mxu0 %v1488_v1 }
  0x70   : > { %733 = vmatmul.bf16.gmra.mxu1 %v1488_v1  ;;  %782 = vmatmul.bf16.gmra.mxu2 %v1488_v1 }
  0x71   : > { %831 = vmatmul.bf16.gmra.mxu3 %v1488_v1 }
  0x7f   : > { %689 = vmatmul.bf16.gmra.mxu0 %v1489_v2 }
  0x80   : > { %738 = vmatmul.bf16.gmra.mxu1 %v1489_v2  ;;  %787 = vmatmul.bf16.gmra.mxu2 %v1489_v2 }
  0x81   : > { %836 = vmatmul.bf16.gmra.mxu3 %v1489_v2 }
  0x8f   : > { %694 = vmatmul.bf16.gmra.mxu0 %v1490_v3 }
  0x90   : > { %743 = vmatmul.bf16.gmra.mxu1 %v1490_v3  ;;  %792 = vmatmul.bf16.gmra.mxu2 %v1490_v3 }
  0x91   : > { %841 = vmatmul.bf16.gmra.mxu3 %v1490_v3 }
  0x9f   : > { %699 = vmatmul.bf16.gmra.mxu0 %v1491_v4 }
  0xa0   : > { %748 = vmatmul.bf16.gmra.mxu1 %v1491_v4  ;;  %797 = vmatmul.bf16.gmra.mxu2 %v1491_v4 }
  0xa1   : > { %846 = vmatmul.bf16.gmra.mxu3 %v1491_v4 }
  0xaf   : > { %704 = vmatmul.bf16.gmra.mxu0 %v1492_v5 }
  0xb0   : > { %753 = vmatmul.bf16.gmra.mxu1 %v1492_v5  ;;  %802 = vmatmul.bf16.gmra.mxu2 %v1492_v5 }
  0xb1   : > { %851 = vmatmul.bf16.gmra.mxu3 %v1492_v5 }
  0xbf   : > { %709 = vmatmul.bf16.gmra.mxu0 %v1493_v6 }
  0xc0   : > { %758 = vmatmul.bf16.gmra.mxu1 %v1493_v6  ;;  %807 = vmatmul.bf16.gmra.mxu2 %v1493_v6 }
  0xc1   : > { %856 = vmatmul.bf16.gmra.mxu3 %v1493_v6 }
  0xcf   : > { %714 = vmatmul.bf16.gmra.mxu0 %v1494_v7 }
  0xd0   : > { %763 = vmatmul.bf16.gmra.mxu1 %v1494_v7  ;;  %812 = vmatmul.bf16.gmra.mxu2 %v1494_v7 }
  0xd1   : > { %861 = vmatmul.bf16.gmra.mxu3 %v1494_v7 }
  0xdc   : > { %v680_v8 = vpop.f32.mrf.mxu0 }
  0xdd   : > { %v729_v9 = vpop.f32.mrf.mxu1 }
  0xde   : > { %v1062_v10 = vpack.c.bf16 %v729_v9, %v680_v8 }
  0xe0   : > { %1094 = vst [vmem:[%s1836_s25] sm:$0xff] %v1062_v10 }
  0xe3   : > { %v778_v11 = vpop.f32.mrf.mxu2 }
  0xe4   : > { %v827_v12 = vpop.f32.mrf.mxu3  ;;  %v682_v13 = vpop.f32.mrf.mxu0 }
  0xe5   : > { %v1063_v14 = vpack.c.bf16 %v827_v12, %v778_v11  ;;  %v731_v15 = vpop.f32.mrf.mxu1 }
  0xe6   : > { %v1064_v16 = vpack.c.bf16 %v731_v15, %v682_v13 }
  0xe7   : > { %1095 = vst [vmem:[%s1836_s25 + $0x8] sm:$0xff] %v1063_v14 }
  0xe8   : > { %1096 = vst [vmem:[%s1836_s25 + $0x10] sm:$0xff] %v1064_v16 }
  0xeb   : > { %v780_v17 = vpop.f32.mrf.mxu2 }
  0xec   : > { %v829_v18 = vpop.f32.mrf.mxu3  ;;  %v685_v19 = vpop.f32.mrf.mxu0 }
  0xed   : > { %v1065_v20 = vpack.c.bf16 %v829_v18, %v780_v17  ;;  %v734_v21 = vpop.f32.mrf.mxu1 }
  0xee   : > { %v1066_v22 = vpack.c.bf16 %v734_v21, %v685_v19 }
  0xef   : > { %1097 = vst [vmem:[%s1836_s25 + $0x18] sm:$0xff] %v1065_v20 }
  0xf0   : > { %1098 = vst [vmem:[%s1836_s25 + $0x20] sm:$0xff] %v1066_v22 }
  0xf3   : > { %v783_v23 = vpop.f32.mrf.mxu2 }
  0xf4   : > { %v832_v24 = vpop.f32.mrf.mxu3  ;;  %v687_v25 = vpop.f32.mrf.mxu0 }
  0xf5   : > { %v1067_v26 = vpack.c.bf16 %v832_v24, %v783_v23  ;;  %v736_v27 = vpop.f32.mrf.mxu1 }
  0xf6   : > { %v1068_v28 = vpack.c.bf16 %v736_v27, %v687_v25 }
  0xf7   : > { %1099 = vst [vmem:[%s1836_s25 + $0x28] sm:$0xff] %v1067_v26 }
  0xf8   : > { %1100 = vst [vmem:[%s1836_s25 + $0x30] sm:$0xff] %v1068_v28 }
  0xfb   : > { %v785_v29 = vpop.f32.mrf.mxu2 }
  0xfc   : > { %v834_v30 = vpop.f32.mrf.mxu3  ;;  %v690_v31 = vpop.f32.mrf.mxu0 }
  0xfd   : > { %v1069_v32 = vpack.c.bf16 %v834_v30, %v785_v29  ;;  %v739_v33 = vpop.f32.mrf.mxu1 }
  0xfe   : > { %v1070_v34 = vpack.c.bf16 %v739_v33, %v690_v31 }
  0xff   : > { %1101 = vst [vmem:[%s1836_s25 + $0x38] sm:$0xff] %v1069_v32 }
 0x100   : > { %1102 = vst [vmem:[%s1836_s25 + $0x40] sm:$0xff] %v1070_v34 }
 0x103   : > { %v788_v35 = vpop.f32.mrf.mxu2 }
 0x104   : > { %v837_v36 = vpop.f32.mrf.mxu3  ;;  %v692_v37 = vpop.f32.mrf.mxu0 }
 0x105   : > { %v1071_v38 = vpack.c.bf16 %v837_v36, %v788_v35  ;;  %v741_v39 = vpop.f32.mrf.mxu1 }
 0x106   : > { %v1072_v40 = vpack.c.bf16 %v741_v39, %v692_v37 }
 0x107   : > { %1103 = vst [vmem:[%s1836_s25 + $0x48] sm:$0xff] %v1071_v38 }
 0x108   : > { %1104 = vst [vmem:[%s1836_s25 + $0x50] sm:$0xff] %v1072_v40  ;;  %v1151_v40 = vld [vmem:[%s1836_s25] sm:$0xff] (%p1658_p6) }
 0x109   : > { %1152 = vst [vmem:[%s1878_s29] sm:$0xff] (%p1658_p6), %v1151_v40 }
 0x10b   : > { %v790_v41 = vpop.f32.mrf.mxu2 }
 0x10c   : > { %v839_v42 = vpop.f32.mrf.mxu3  ;;  %v695_v43 = vpop.f32.mrf.mxu0 }
 0x10d   : > { %v1073_v44 = vpack.c.bf16 %v839_v42, %v790_v41  ;;  %v744_v45 = vpop.f32.mrf.mxu1  ;;  %v1153_v41 = vld [vmem:[%s1836_s25 + $0x8] sm:$0xff] (%p1658_p6)  ;;  %v1155_v42 = vld [vmem:[%s1836_s25 + $0x10] sm:$0xff] (%p1658_p6) }
 0x10e   : > { %v1074_v46 = vpack.c.bf16 %v744_v45, %v695_v43  ;;  %v1157_v43 = vld [vmem:[%s1836_s25 + $0x18] sm:$0xff] (%p1658_p6)  ;;  %1154 = vst [vmem:[%s1878_s29 + $0x8] sm:$0xff] (%p1658_p6), %v1153_v41  ;;  %v1161_v45 = vld [vmem:[%s1836_s25 + $0x28] sm:$0xff] (%p1658_p6) }
 0x10f   : > { %1105 = vst [vmem:[%s1836_s25 + $0x58] sm:$0xff] %v1073_v44  ;;  %v1159_v44 = vld [vmem:[%s1836_s25 + $0x20] sm:$0xff] (%p1658_p6) }
 0x110   : > { %1106 = vst [vmem:[%s1836_s25 + $0x60] sm:$0xff] %v1074_v46  ;;  %v1163_v46 = vld [vmem:[%s1836_s25 + $0x30] sm:$0xff] (%p1658_p6) }
 0x111   : > { %1156 = vst [vmem:[%s1878_s29 + $0x20] sm:$0xff] (%p1658_p6), %v1155_v42 }
 0x112   : > { %1158 = vst [vmem:[%s1878_s29 + $0x28] sm:$0xff] (%p1658_p6), %v1157_v43 }
 0x113   : > { %v793_v47 = vpop.f32.mrf.mxu2  ;;  %1160 = vst [vmem:[%s1878_s29 + $0x40] sm:$0xff] (%p1658_p6), %v1159_v44 }
 0x114   : > { %v842_v48 = vpop.f32.mrf.mxu3  ;;  %v697_v49 = vpop.f32.mrf.mxu0  ;;  %1162 = vst [vmem:[%s1878_s29 + $0x48] sm:$0xff] (%p1658_p6), %v1161_v45 }
 0x115   : > { %v1075_v50 = vpack.c.bf16 %v842_v48, %v793_v47  ;;  %v746_v51 = vpop.f32.mrf.mxu1  ;;  %v1165_v47 = vld [vmem:[%s1836_s25 + $0x38] sm:$0xff] (%p1658_p6)  ;;  %v1167_v48 = vld [vmem:[%s1836_s25 + $0x40] sm:$0xff] (%p1658_p6)  ;;  %1164 = vst [vmem:[%s1878_s29 + $0x60] sm:$0xff] (%p1658_p6), %v1163_v46 }
 0x116   : > { %v1076_v52 = vpack.c.bf16 %v746_v51, %v697_v49  ;;  %v1169_v49 = vld [vmem:[%s1836_s25 + $0x48] sm:$0xff] (%p1658_p6)  ;;  %1166 = vst [vmem:[%s1878_s29 + $0x68] sm:$0xff] (%p1658_p6), %v1165_v47  ;;  %v1173_v51 = vld [vmem:[%s1836_s25 + $0x58] sm:$0xff] (%p1658_p6) }
 0x117   : > { %1107 = vst [vmem:[%s1836_s25 + $0x68] sm:$0xff] %v1075_v50  ;;  %v1171_v50 = vld [vmem:[%s1836_s25 + $0x50] sm:$0xff] (%p1658_p6) }
 0x118   : > { %1108 = vst [vmem:[%s1836_s25 + $0x70] sm:$0xff] %v1076_v52  ;;  %v1175_v52 = vld [vmem:[%s1836_s25 + $0x60] sm:$0xff] (%p1658_p6) }
 0x119   : > { %1168 = vst [vmem:[%s1878_s29 + $0x80] sm:$0xff] (%p1658_p6), %v1167_v48 }
 0x11a   : > { %1170 = vst [vmem:[%s1878_s29 + $0x88] sm:$0xff] (%p1658_p6), %v1169_v49 }
 0x11b   : > { %v795_v53 = vpop.f32.mrf.mxu2  ;;  %1172 = vst [vmem:[%s1878_s29 + $0xa0] sm:$0xff] (%p1658_p6), %v1171_v50 }
 0x11c   : > { %v844_v54 = vpop.f32.mrf.mxu3  ;;  %v700_v55 = vpop.f32.mrf.mxu0  ;;  %1174 = vst [vmem:[%s1878_s29 + $0xa8] sm:$0xff] (%p1658_p6), %v1173_v51 }
 0x11d   : > { %v1077_v56 = vpack.c.bf16 %v844_v54, %v795_v53  ;;  %v749_v57 = vpop.f32.mrf.mxu1  ;;  %1176 = vst [vmem:[%s1878_s29 + $0xc0] sm:$0xff] (%p1658_p6), %v1175_v52 }
 0x11e   : > { %v1078_v58 = vpack.c.bf16 %v749_v57, %v700_v55  ;;  %v1177_v53 = vld [vmem:[%s1836_s25 + $0x68] sm:$0xff] (%p1658_p6) }
 0x11f   : > { %1109 = vst [vmem:[%s1836_s25 + $0x78] sm:$0xff] %v1077_v56  ;;  %v1179_v54 = vld [vmem:[%s1836_s25 + $0x70] sm:$0xff] (%p1658_p6) }
 0x120   : > { %1110 = vst [vmem:[%s1836_s25 + $0x80] sm:$0xff] %v1078_v58 }
 0x121   : > { %1178 = vst [vmem:[%s1878_s29 + $0xc8] sm:$0xff] (%p1658_p6), %v1177_v53 }
 0x122   : > { %1180 = vst [vmem:[%s1878_s29 + $0xe0] sm:$0xff] (%p1658_p6), %v1179_v54 }
 0x123   : > { %v798_v59 = vpop.f32.mrf.mxu2 }
 0x124   : > { %v847_v60 = vpop.f32.mrf.mxu3  ;;  %v702_v61 = vpop.f32.mrf.mxu0 }
 0x125   : > { %v1079_v62 = vpack.c.bf16 %v847_v60, %v798_v59  ;;  %v751_v63 = vpop.f32.mrf.mxu1 }
 0x126   : > { %v1080_v0 = vpack.c.bf16 %v751_v63, %v702_v61  ;;  %v1181_v55 = vld [vmem:[%s1836_s25 + $0x78] sm:$0xff] (%p1658_p6) }
 0x127   : > { %1111 = vst [vmem:[%s1836_s25 + $0x88] sm:$0xff] %v1079_v62  ;;  %v1183_v56 = vld [vmem:[%s1836_s25 + $0x80] sm:$0xff] (%p1658_p6) }
 0x128   : > { %1112 = vst [vmem:[%s1836_s25 + $0x90] sm:$0xff] %v1080_v0 }
 0x129   : > { %1182 = vst [vmem:[%s1878_s29 + $0xe8] sm:$0xff] (%p1658_p6), %v1181_v55 }
 0x12a   : > { %1184 = vst [vmem:[%s1878_s29 + $0x100] sm:$0xff] (%p1658_p6), %v1183_v56 }
 0x12b   : > { %v800_v1 = vpop.f32.mrf.mxu2 }
 0x12c   : > { %v849_v2 = vpop.f32.mrf.mxu3  ;;  %v705_v3 = vpop.f32.mrf.mxu0 }
 0x12d   : > { %v1081_v4 = vpack.c.bf16 %v849_v2, %v800_v1  ;;  %v754_v5 = vpop.f32.mrf.mxu1 }
 0x12e   : > { %v1082_v6 = vpack.c.bf16 %v754_v5, %v705_v3  ;;  %v1185_v57 = vld [vmem:[%s1836_s25 + $0x88] sm:$0xff] (%p1658_p6) }
 0x12f   : > { %1113 = vst [vmem:[%s1836_s25 + $0x98] sm:$0xff] %v1081_v4  ;;  %v1187_v58 = vld [vmem:[%s1836_s25 + $0x90] sm:$0xff] (%p1658_p6) }
 0x130   : > { %1114 = vst [vmem:[%s1836_s25 + $0xa0] sm:$0xff] %v1082_v6 }
 0x131   : > { %1186 = vst [vmem:[%s1878_s29 + $0x108] sm:$0xff] (%p1658_p6), %v1185_v57 }
 0x132   : > { %1188 = vst [vmem:[%s1878_s29 + $0x120] sm:$0xff] (%p1658_p6), %v1187_v58 }
 0x133   : > { %v803_v7 = vpop.f32.mrf.mxu2 }
 0x134   : > { %v852_v8 = vpop.f32.mrf.mxu3  ;;  %v707_v9 = vpop.f32.mrf.mxu0 }
 0x135   : > { %v1083_v10 = vpack.c.bf16 %v852_v8, %v803_v7  ;;  %v756_v11 = vpop.f32.mrf.mxu1 }
 0x136   : > { %v1084_v12 = vpack.c.bf16 %v756_v11, %v707_v9  ;;  %v1189_v59 = vld [vmem:[%s1836_s25 + $0x98] sm:$0xff] (%p1658_p6) }
 0x137   : > { %1115 = vst [vmem:[%s1836_s25 + $0xa8] sm:$0xff] %v1083_v10  ;;  %v1191_v60 = vld [vmem:[%s1836_s25 + $0xa0] sm:$0xff] (%p1658_p6) }
 0x138   : > { %1116 = vst [vmem:[%s1836_s25 + $0xb0] sm:$0xff] %v1084_v12 }
 0x139   : > { %1190 = vst [vmem:[%s1878_s29 + $0x128] sm:$0xff] (%p1658_p6), %v1189_v59 }
 0x13a   : > { %1192 = vst [vmem:[%s1878_s29 + $0x140] sm:$0xff] (%p1658_p6), %v1191_v60 }
 0x13b   : > { %v805_v13 = vpop.f32.mrf.mxu2 }
 0x13c   : > { %v854_v14 = vpop.f32.mrf.mxu3  ;;  %v710_v15 = vpop.f32.mrf.mxu0 }
 0x13d   : > { %v1085_v16 = vpack.c.bf16 %v854_v14, %v805_v13  ;;  %v759_v17 = vpop.f32.mrf.mxu1 }
 0x13e   : > { %v1086_v18 = vpack.c.bf16 %v759_v17, %v710_v15  ;;  %v1193_v61 = vld [vmem:[%s1836_s25 + $0xa8] sm:$0xff] (%p1658_p6) }
 0x13f   : > { %1117 = vst [vmem:[%s1836_s25 + $0xb8] sm:$0xff] %v1085_v16  ;;  %v1195_v62 = vld [vmem:[%s1836_s25 + $0xb0] sm:$0xff] (%p1658_p6) }
 0x140   : > { %1118 = vst [vmem:[%s1836_s25 + $0xc0] sm:$0xff] %v1086_v18 }
 0x141   : > { %1194 = vst [vmem:[%s1878_s29 + $0x148] sm:$0xff] (%p1658_p6), %v1193_v61 }
 0x142   : > { %1196 = vst [vmem:[%s1878_s29 + $0x160] sm:$0xff] (%p1658_p6), %v1195_v62 }
 0x143   : > { %v808_v19 = vpop.f32.mrf.mxu2 }
 0x144   : > { %v857_v20 = vpop.f32.mrf.mxu3  ;;  %v712_v21 = vpop.f32.mrf.mxu0 }
 0x145   : > { %v1087_v22 = vpack.c.bf16 %v857_v20, %v808_v19  ;;  %v761_v23 = vpop.f32.mrf.mxu1 }
 0x146   : > { %v1088_v24 = vpack.c.bf16 %v761_v23, %v712_v21  ;;  %v1197_v63 = vld [vmem:[%s1836_s25 + $0xb8] sm:$0xff] (%p1658_p6) }
 0x147   : > { %1119 = vst [vmem:[%s1836_s25 + $0xc8] sm:$0xff] %v1087_v22  ;;  %v1199_v0 = vld [vmem:[%s1836_s25 + $0xc0] sm:$0xff] (%p1658_p6) }
 0x148   : > { %1120 = vst [vmem:[%s1836_s25 + $0xd0] sm:$0xff] %v1088_v24 }
 0x149   : > { %1198 = vst [vmem:[%s1878_s29 + $0x168] sm:$0xff] (%p1658_p6), %v1197_v63 }
 0x14a   : > { %1200 = vst [vmem:[%s1878_s29 + $0x180] sm:$0xff] (%p1658_p6), %v1199_v0 }
 0x14b   : > { %v810_v25 = vpop.f32.mrf.mxu2 }
 0x14c   : > { %v859_v26 = vpop.f32.mrf.mxu3  ;;  %v715_v27 = vpop.f32.mrf.mxu0 }
 0x14d   : > { %v1089_v28 = vpack.c.bf16 %v859_v26, %v810_v25  ;;  %v764_v29 = vpop.f32.mrf.mxu1 }
 0x14e   : > { %v1090_v30 = vpack.c.bf16 %v764_v29, %v715_v27  ;;  %v1201_v1 = vld [vmem:[%s1836_s25 + $0xc8] sm:$0xff] (%p1658_p6) }
 0x14f   : > { %1121 = vst [vmem:[%s1836_s25 + $0xd8] sm:$0xff] %v1089_v28  ;;  %v1203_v2 = vld [vmem:[%s1836_s25 + $0xd0] sm:$0xff] (%p1658_p6) }
 0x150   : > { %1122 = vst [vmem:[%s1836_s25 + $0xe0] sm:$0xff] %v1090_v30 }
 0x151   : > { %1202 = vst [vmem:[%s1878_s29 + $0x188] sm:$0xff] (%p1658_p6), %v1201_v1 }
 0x152   : > { %1204 = vst [vmem:[%s1878_s29 + $0x1a0] sm:$0xff] (%p1658_p6), %v1203_v2 }
 0x153   : > { %v813_v31 = vpop.f32.mrf.mxu2 }
 0x154   : > { %v862_v32 = vpop.f32.mrf.mxu3  ;;  %v717_v33 = vpop.f32.mrf.mxu0 }
 0x155   : > { %v1091_v34 = vpack.c.bf16 %v862_v32, %v813_v31  ;;  %v766_v35 = vpop.f32.mrf.mxu1 }
 0x156   : > { %v1092_v36 = vpack.c.bf16 %v766_v35, %v717_v33  ;;  %v1205_v3 = vld [vmem:[%s1836_s25 + $0xd8] sm:$0xff] (%p1658_p6) }
 0x157   : > { %1123 = vst [vmem:[%s1836_s25 + $0xe8] sm:$0xff] %v1091_v34  ;;  %v1207_v4 = vld [vmem:[%s1836_s25 + $0xe0] sm:$0xff] (%p1658_p6) }
 0x158   : > { %1124 = vst [vmem:[%s1836_s25 + $0xf0] sm:$0xff] %v1092_v36 }
 0x159   : > { %1206 = vst [vmem:[%s1878_s29 + $0x1a8] sm:$0xff] (%p1658_p6), %v1205_v3 }
 0x15a   : > { %1208 = vst [vmem:[%s1878_s29 + $0x1c0] sm:$0xff] (%p1658_p6), %v1207_v4 }
 0x15b   : > { %v815_v37 = vpop.f32.mrf.mxu2  ;;  %1132 = sbr.rel (!%p1658_p6) target bundleno = 360 (0x168), region = 63 }
 0x15c   : > { %v864_v38 = vpop.f32.mrf.mxu3 }
 0x15d   : > { %v1093_v39 = vpack.c.bf16 %v864_v38, %v815_v37 }
 0x15e   : > { %v1209_v5 = vld [vmem:[%s1836_s25 + $0xe8] sm:$0xff] (%p1658_p6) }
 0x15f   : > { %1125 = vst [vmem:[%s1836_s25 + $0xf8] sm:$0xff] %v1093_v39  ;;  %v1211_v6 = vld [vmem:[%s1836_s25 + $0xf0] sm:$0xff] (%p1658_p6) }
 0x160   : > { %1210 = vst [vmem:[%s1878_s29 + $0x1c8] sm:$0xff] %v1209_v5 }
 0x161   : > { %1212 = vst [vmem:[%s1878_s29 + $0x1e0] sm:$0xff] %v1211_v6 }
 0x166   : > { %v1213_v7 = vld [vmem:[%s1836_s25 + $0xf8] sm:$0xff] }
 0x167   : > { %1214 = vst [vmem:[%s1878_s29 + $0x1e8] sm:$0xff] %v1213_v7 }
 0x168 PF: > { %s12_s13 = sadd.s32 1, %s1606_s13   ;;  %s1961_s9 = smov %s1594_s10 }
 0x169   : > { %p9_p11 = scmp.ge.s32.totalorder %s12_s13, 4   ;;  %s1962_s10 = smov %s1663_s19 }
 0x16a   : > { %s1963_s11 = smov %s1602_s12  ;;  %s1964_s12 = smov %s1966_s14 }
 0x16b   :  { %11 = sbr.rel (!%p9_p11) target bundleno = 3 (0x3), region = 120 }

// kernel: deepspeech_forward.25
= control target key start
LH: loop header
LB: loop body
LE: loop exit
PB: predicated region body
PF: predicated region fallthrough
CT: control target
= control target key end

     0   :  { %v37_v0 = vlaneseq  ;;  %v298_v1 = vmov 0.0   ;;  %s347_s1 = inlined_call_operand.vmem [shape: f32[1,128], index: 1, kind: output, shape index: {0}]   ;;  %s348_s2 = inlined_call_operand.vmem [shape: f32[1,128], index: 2, kind: output, shape index: {1}]   ;;  %s349_s0 = inlined_call_operand.vmem [shape: bf16[80,128], index: 0, kind: input, shape index: {}]  }
   0x1   :  { %14 = vst [vmem:[%s347_s1] sm:$0x1] %v298_v1  ;;  %v274_v3 = vld [vmem:[%s349_s0] sm:$0xff]   ;;  %v293_v4 = vld [vmem:[%s349_s0 + $0x8] sm:$0xff]   ;;  %v294_v17 = vld [vmem:[%s349_s0 + $0x10] sm:$0xff]  }
   0x2   :  { %15 = vst [vmem:[%s348_s2] sm:$0x1] %v298_v1  ;;  %v38_v2 = vshrl.u32 %v37_v0, 7  ;;  %v275_v13 = vunpack.c.l.bf16 %v274_v3  ;;  %v276_v14 = vunpack.c.h.bf16 %v274_v3  ;;  %v279_v15 = vunpack.c.l.bf16 %v293_v4  ;;  %v295_v28 = vld [vmem:[%s349_s0 + $0x18] sm:$0xff]   ;;  %v296_v41 = vld [vmem:[%s349_s0 + $0x20] sm:$0xff]  }
   0x3   :  { %v280_v20 = vunpack.c.h.bf16 %v293_v4  ;;  %v283_v23 = vunpack.c.l.bf16 %v294_v17  ;;  %v284_v27 = vunpack.c.h.bf16 %v294_v17  ;;  %v287_v38 = vunpack.c.l.bf16 %v295_v28 }
   0x4   :  { %v39_v5 = vadd.s32 8, %v38_v2  ;;  %v40_v6 = vadd.s32 16, %v38_v2  ;;  %v41_v7 = vadd.s32 24, %v38_v2  ;;  %v42_v8 = vadd.s32 32, %v38_v2 }
   0x5   :  { %v43_v9 = vadd.s32 40, %v38_v2  ;;  %v63_v10 = vand.u32 7, %v38_v2  ;;  %v44_v18 = vadd.s32 48, %v38_v2  ;;  %v45_v21 = vadd.s32 56, %v38_v2 }
   0x6   :  { %v70_v11 = vand.u32 7, %v39_v5  ;;  %v77_v12 = vand.u32 7, %v40_v6  ;;  %v84_v16 = vand.u32 7, %v41_v7  ;;  %v91_v19 = vand.u32 7, %v42_v8 }
   0x7   :  { %vm179_vm0 = vcmp.lt.s32.totalorder %v63_v10, 2  ;;  %v98_v22 = vand.u32 7, %v43_v9  ;;  %v46_v29 = vadd.s32 64, %v38_v2  ;;  %v105_v30 = vand.u32 7, %v44_v18 }
   0x8   :  { %vm180_vm1 = vcmp.lt.s32.totalorder %v70_v11, 2  ;;  %vm181_vm2 = vcmp.lt.s32.totalorder %v77_v12, 2  ;;  %vm182_vm3 = vcmp.lt.s32.totalorder %v84_v16, 2  ;;  %v209_v24 = vsel %vm179_vm0, %v275_v13, 0.0 }
   0x9   :  { %v210_v25 = vsel %vm180_vm1, %v276_v14, 0.0  ;;  %v211_v26 = vsel %vm181_vm2, %v279_v15, 0.0  ;;  %vm183_vm4 = vcmp.lt.s32.totalorder %v91_v19, 2  ;;  %v47_v31 = vadd.s32 72, %v38_v2  ;;  %v219_v19 = vld [vmem:[%s347_s1] sm:$0x1] }
   0xa   :  { %v112_v32 = vand.u32 7, %v45_v21  ;;  %v212_v33 = vsel %vm182_vm3, %v280_v20, 0.0  ;;  %v220_v34 = vadd.f32 %v210_v25, %v209_v24  ;;  %vm184_vm5 = vcmp.lt.s32.totalorder %v98_v22, 2 }
   0xb   :  { %v238_v35 = vmul.f32 %v209_v24, %v209_v24  ;;  %v239_v36 = vmul.f32 %v210_v25, %v210_v25  ;;  %v240_v37 = vmul.f32 %v211_v26, %v211_v26  ;;  %v213_v39 = vsel %vm183_vm4, %v283_v23, 0.0  ;;  %v237_v24 = vld [vmem:[%s348_s2] sm:$0x1] }
   0xc   :  { %v221_v40 = vadd.f32 %v220_v34, %v211_v26  ;;  %v119_v42 = vand.u32 7, %v46_v29  ;;  %vm185_vm6 = vcmp.lt.s32.totalorder %v105_v30, 2  ;;  %v241_v43 = vmul.f32 %v212_v33, %v212_v33 }
   0xd   :  { %v248_v44 = vadd.f32 %v239_v36, %v238_v35  ;;  %v288_v45 = vunpack.c.h.bf16 %v295_v28  ;;  %v214_v46 = vsel %vm184_vm5, %v284_v27, 0.0  ;;  %v126_v48 = vand.u32 7, %v47_v31 }
   0xe   :  { %v222_v47 = vadd.f32 %v221_v40, %v212_v33  ;;  %vm186_vm7 = vcmp.lt.s32.totalorder %v112_v32, 2  ;;  %v242_v49 = vmul.f32 %v213_v39, %v213_v39  ;;  %v291_v51 = vunpack.c.l.bf16 %v296_v41 }
   0xf   :  { %v249_v50 = vadd.f32 %v248_v44, %v240_v37  ;;  %v215_v52 = vsel %vm185_vm6, %v287_v38, 0.0  ;;  %vm187_vm8 = vcmp.lt.s32.totalorder %v119_v42, 2  ;;  %v243_v54 = vmul.f32 %v214_v46, %v214_v46 }
  0x10   :  { %v223_v53 = vadd.f32 %v222_v47, %v213_v39  ;;  %v292_v56 = vunpack.c.h.bf16 %v296_v41  ;;  %v216_v57 = vsel %vm186_vm7, %v288_v45, 0.0  ;;  %vm188_vm9 = vcmp.lt.s32.totalorder %v126_v48, 2 }
  0x11   :  { %v250_v55 = vadd.f32 %v249_v50, %v241_v43  ;;  %v244_v59 = vmul.f32 %v215_v52, %v215_v52  ;;  %v217_v61 = vsel %vm187_vm8, %v291_v51, 0.0  ;;  %v245_v63 = vmul.f32 %v216_v57, %v216_v57 }
  0x12   :  { %v224_v58 = vadd.f32 %v223_v53, %v214_v46  ;;  %v218_v1 = vsel %vm188_vm9, %v292_v56, 0.0  ;;  %v246_v3 = vmul.f32 %v217_v61, %v217_v61 }
  0x13   :  { %v251_v60 = vadd.f32 %v250_v55, %v242_v49  ;;  %v247_v6 = vmul.f32 %v218_v1, %v218_v1 }
  0x14   :  { %v225_v62 = vadd.f32 %v224_v58, %v215_v52 }
  0x15   :  { %v252_v0 = vadd.f32 %v251_v60, %v243_v54 }
  0x16   :  { %v226_v2 = vadd.f32 %v225_v62, %v216_v57 }
  0x17   :  { %v253_v4 = vadd.f32 %v252_v0, %v244_v59 }
  0x18   :  { %v227_v5 = vadd.f32 %v226_v2, %v217_v61 }
  0x19   :  { %v254_v7 = vadd.f32 %v253_v4, %v245_v63 }
  0x1a   :  { %v228_v8 = vadd.f32 %v227_v5, %v218_v1 }
  0x1b   :  { %v255_v9 = vadd.f32 %v254_v7, %v246_v3 }
  0x1c   :  { %v229_v10 = vrot.slane %v228_v8, 4 }
  0x1d   :  { %v256_v11 = vadd.f32 %v255_v9, %v247_v6 }
  0x1e   :  { %v230_v12 = vadd.f32 %v229_v10, %v228_v8 }
  0x1f   :  { %v257_v13 = vrot.slane %v256_v11, 4 }
  0x20   :  { %v231_v14 = vrot.slane %v230_v12, 2 }
  0x21   :  { %v258_v15 = vadd.f32 %v257_v13, %v256_v11 }
  0x22   :  { %v232_v16 = vadd.f32 %v231_v14, %v230_v12 }
  0x23   :  { %v259_v17 = vrot.slane %v258_v15, 2 }
  0x24   :  { %v233_v18 = vrot.slane %v232_v16, 1 }
  0x25   :  { %v260_v20 = vadd.f32 %v259_v17, %v258_v15 }
  0x26   :  { %v234_v21 = vadd.f32 %v233_v18, %v232_v16 }
  0x27   :  { %v261_v22 = vrot.slane %v260_v20, 1 }
  0x28   :  { %v235_v23 = vadd.f32 %v234_v21, %v219_v19 }
  0x29   :  { %v262_v25 = vadd.f32 %v261_v22, %v260_v20 }
  0x2a   :  { %236 = vst [vmem:[%s347_s1] sm:$0x1] %v235_v23 }
  0x2b   :  { %v263_v26 = vadd.f32 %v262_v25, %v237_v24 }
  0x2d   :  { %264 = vst [vmem:[%s348_s2] sm:$0x1] %v263_v26 }

// kernel: deepspeech_forward.26
= control target key start
LH: loop header
LB: loop body
LE: loop exit
PB: predicated region body
PF: predicated region fallthrough
CT: control target
= control target key end

     0   :  { %s197_s0 = inlined_call_operand.vmem [shape: bf16[80,128], index: 0, kind: input, shape index: {}]   ;;  %s198_s1 = inlined_call_operand.vmem [shape: f32[1,128], index: 1, kind: input, shape index: {}]   ;;  %s199_s2 = inlined_call_operand.vmem [shape: f32[1,128], index: 2, kind: input, shape index: {}]   ;;  %s200_s3 = inlined_call_operand.vmem [shape: bf16[80,128], index: 3, kind: output, shape index: {}]  }
   0x1   :  { %v87_v0 = vld [vmem:[%s197_s0] sm:$0xff]   ;;  %v131_v5 = vld [vmem:[%s197_s0 + $0x8] sm:$0xff]   ;;  %v132_v8 = vld [vmem:[%s197_s0 + $0x10] sm:$0xff]  }
   0x2   :  { %v139_v1 = vld [vmem:[%s198_s1] ss:$0 sm:$0xff]  ;;  %v88_v2 = vunpack.c.l.bf16 %v87_v0  ;;  %v89_v3 = vunpack.c.h.bf16 %v87_v0  ;;  %v92_v6 = vunpack.c.l.bf16 %v131_v5  ;;  %v93_v7 = vunpack.c.h.bf16 %v131_v5  ;;  %v133_v9 = vld [vmem:[%s197_s0 + $0x18] sm:$0xff]  }
   0x3   :  { %v140_v4 = vld [vmem:[%s199_s2] ss:$0 sm:$0xff]  ;;  %v96_v12 = vunpack.c.l.bf16 %v132_v8  ;;  %v97_v13 = vunpack.c.h.bf16 %v132_v8  ;;  %v100_v16 = vunpack.c.l.bf16 %v133_v9  ;;  %v101_v17 = vunpack.c.h.bf16 %v133_v9 }
   0x4   :  { %v38_v10 = vmul.f32 %v139_v1, %v88_v2  ;;  %v39_v11 = vmul.f32 %v139_v1, %v89_v3  ;;  %v40_v14 = vmul.f32 %v139_v1, %v92_v6  ;;  %v41_v15 = vmul.f32 %v139_v1, %v93_v7  ;;  %v134_v18 = vld [vmem:[%s197_s0 + $0x20] sm:$0xff]  }
   0x5   :  { %v42_v21 = vmul.f32 %v139_v1, %v96_v12  ;;  %v43_v22 = vmul.f32 %v139_v1, %v97_v13  ;;  %v44_v25 = vmul.f32 %v139_v1, %v100_v16  ;;  %v45_v26 = vmul.f32 %v139_v1, %v101_v17 }
   0x6   :  { %v52_v19 = vadd.f32 %v140_v4, %v38_v10  ;;  %v53_v20 = vadd.f32 %v140_v4, %v39_v11  ;;  %v54_v23 = vadd.f32 %v140_v4, %v40_v14  ;;  %v55_v24 = vadd.f32 %v140_v4, %v41_v15 }
   0x7   :  { %v56_v28 = vadd.f32 %v140_v4, %v42_v21  ;;  %v57_v29 = vadd.f32 %v140_v4, %v43_v22  ;;  %v104_v30 = vunpack.c.l.bf16 %v134_v18  ;;  %v58_v32 = vadd.f32 %v140_v4, %v44_v25 }
   0x8   :  { %v109_v27 = vpack.c.bf16 %v53_v20, %v52_v19  ;;  %v114_v31 = vpack.c.bf16 %v55_v24, %v54_v23  ;;  %v59_v33 = vadd.f32 %v140_v4, %v45_v26  ;;  %v105_v34 = vunpack.c.h.bf16 %v134_v18 }
   0x9   :  { %v119_v35 = vpack.c.bf16 %v57_v29, %v56_v28  ;;  %v46_v36 = vmul.f32 %v139_v1, %v104_v30 }
   0xa   :  { %110 = vst [vmem:[%s200_s3] sm:$0xff] %v109_v27   ;;  %v124_v37 = vpack.c.bf16 %v59_v33, %v58_v32  ;;  %v47_v38 = vmul.f32 %v139_v1, %v105_v34 }
   0xb   :  { %135 = vst [vmem:[%s200_s3 + $0x8] sm:$0xff] %v114_v31   ;;  %v60_v39 = vadd.f32 %v140_v4, %v46_v36 }
   0xc   :  { %136 = vst [vmem:[%s200_s3 + $0x10] sm:$0xff] %v119_v35   ;;  %v61_v40 = vadd.f32 %v140_v4, %v47_v38 }
   0xd   :  { %137 = vst [vmem:[%s200_s3 + $0x18] sm:$0xff] %v124_v37  }
   0xe   :  { %v129_v41 = vpack.c.bf16 %v61_v40, %v60_v39 }
  0x10   :  { %138 = vst [vmem:[%s200_s3 + $0x20] sm:$0xff] %v129_v41  }

// kernel: deepspeech_forward.31
= control target key start
LH: loop header
LB: loop body
LE: loop exit
PB: predicated region body
PF: predicated region fallthrough
CT: control target
= control target key end

     0   :  { %s393_s1 = inlined_call_operand.vmem [shape: bf16[128,128], index: 1, kind: input, shape index: {}]   ;;  %s394_s0 = inlined_call_operand.vmem [shape: bf16[80,128], index: 0, kind: input, shape index: {}]   ;;  %s395_s2 = inlined_call_operand.vmem [shape: f32[80,128], index: 2, kind: output, shape index: {}]  }
   0x1   :  { %v284_v0 = vld [vmem:[%s393_s1 + $0x38] sm:$0xff]  ;;  %v283_v1 = vld [vmem:[%s393_s1 + $0x30] sm:$0xff]  ;;  %v282_v2 = vld [vmem:[%s393_s1 + $0x28] sm:$0xff] }
   0x2   :  { %287 = vmatpush.bf16.msra.mxu3 %v284_v0  ;;  %286 = vmatpush.bf16.msra.mxu2 %v284_v0  ;;  %v281_v3 = vld [vmem:[%s393_s1 + $0x20] sm:$0xff]  ;;  %v280_v4 = vld [vmem:[%s393_s1 + $0x18] sm:$0xff]  ;;  %v279_v5 = vld [vmem:[%s393_s1 + $0x10] sm:$0xff] }
   0x3   :  { %139 = vmatpush.bf16.msra.mxu0 %v284_v0  ;;  %285 = vmatpush.bf16.msra.mxu1 %v284_v0  ;;  %v278_v6 = vld [vmem:[%s393_s1 + $0x8] sm:$0xff]  ;;  %v277_v7 = vld [vmem:[%s393_s1] sm:$0xff]  ;;  %v275_v8 = vld [vmem:[%s394_s0 + $0x18] sm:$0xff] }
   0x4   :  { %v274_v9 = vld [vmem:[%s394_s0 + $0x10] sm:$0xff]  ;;  %v272_v10 = vld [vmem:[%s394_s0] sm:$0xff]  ;;  %v273_v11 = vld [vmem:[%s394_s0 + $0x8] sm:$0xff] }
   0x5   :  { %v276_v12 = vld [vmem:[%s394_s0 + $0x20] sm:$0xff] }
   0x6   :  { %290 = vmatpush.bf16.msra.mxu3 %v283_v1  ;;  %289 = vmatpush.bf16.msra.mxu2 %v283_v1 }
   0x7   :  { %140 = vmatpush.bf16.msra.mxu0 %v283_v1  ;;  %288 = vmatpush.bf16.msra.mxu1 %v283_v1 }
   0xa   :  { %293 = vmatpush.bf16.msra.mxu3 %v282_v2  ;;  %292 = vmatpush.bf16.msra.mxu2 %v282_v2 }
   0xb   :  { %141 = vmatpush.bf16.msra.mxu0 %v282_v2  ;;  %291 = vmatpush.bf16.msra.mxu1 %v282_v2 }
   0xe   :  { %296 = vmatpush.bf16.msra.mxu3 %v281_v3  ;;  %295 = vmatpush.bf16.msra.mxu2 %v281_v3 }
   0xf   :  { %142 = vmatpush.bf16.msra.mxu0 %v281_v3  ;;  %294 = vmatpush.bf16.msra.mxu1 %v281_v3 }
  0x12   :  { %299 = vmatpush.bf16.msra.mxu3 %v280_v4  ;;  %298 = vmatpush.bf16.msra.mxu2 %v280_v4 }
  0x13   :  { %143 = vmatpush.bf16.msra.mxu0 %v280_v4  ;;  %297 = vmatpush.bf16.msra.mxu1 %v280_v4 }
  0x16   :  { %302 = vmatpush.bf16.msra.mxu3 %v279_v5  ;;  %301 = vmatpush.bf16.msra.mxu2 %v279_v5 }
  0x17   :  { %144 = vmatpush.bf16.msra.mxu0 %v279_v5  ;;  %300 = vmatpush.bf16.msra.mxu1 %v279_v5 }
  0x1a   :  { %305 = vmatpush.bf16.msra.mxu3 %v278_v6  ;;  %304 = vmatpush.bf16.msra.mxu2 %v278_v6 }
  0x1b   :  { %145 = vmatpush.bf16.msra.mxu0 %v278_v6  ;;  %303 = vmatpush.bf16.msra.mxu1 %v278_v6 }
  0x1e   :  { %308 = vmatpush.bf16.msra.mxu3 %v277_v7  ;;  %307 = vmatpush.bf16.msra.mxu2 %v277_v7 }
  0x1f   :  { %146 = vmatpush.bf16.msra.mxu0 %v277_v7  ;;  %306 = vmatpush.bf16.msra.mxu1 %v277_v7 }
  0x21   :  { %162 = vmatmul.bf16.vlgmr.msra.gmra.mxu3 %v275_v8  ;;  %157 = vmatmul.bf16.vlgmr.msra.gmra.mxu2 %v274_v9 }
  0x22   :  { %147 = vmatmul.bf16.vlgmr.msra.gmra.mxu0 %v272_v10  ;;  %152 = vmatmul.bf16.vlgmr.msra.gmra.mxu1 %v273_v11 }
  0x31   :  { %167 = vmatmul.bf16.gmra.mxu3 %v276_v12 }
  0x9f   :  { %v148_v13 = vpop.f32.mrf.mxu0  ;;  %v153_v14 = vpop.f32.mrf.mxu1 }
  0xa0   :  { %206 = vst [vmem:[%s395_s2] sm:$0xff] %v148_v13 }
  0xa1   :  { %208 = vst [vmem:[%s395_s2 + $0x10] sm:$0xff] %v153_v14 }
  0xa4   :  { %v163_v15 = vpop.f32.mrf.mxu3  ;;  %v158_v16 = vpop.f32.mrf.mxu2 }
  0xa5   :  { %212 = vst [vmem:[%s395_s2 + $0x30] sm:$0xff] %v163_v15 }
  0xa6   :  { %210 = vst [vmem:[%s395_s2 + $0x20] sm:$0xff] %v158_v16 }
  0xa7   :  { %v150_v17 = vpop.f32.mrf.mxu0  ;;  %v155_v18 = vpop.f32.mrf.mxu1 }
  0xa8   :  { %207 = vst [vmem:[%s395_s2 + $0x8] sm:$0xff] %v150_v17 }
  0xa9   :  { %209 = vst [vmem:[%s395_s2 + $0x18] sm:$0xff] %v155_v18 }
  0xac   :  { %v165_v19 = vpop.f32.mrf.mxu3  ;;  %v160_v20 = vpop.f32.mrf.mxu2 }
  0xad   :  { %213 = vst [vmem:[%s395_s2 + $0x38] sm:$0xff] %v165_v19 }
  0xae   :  { %211 = vst [vmem:[%s395_s2 + $0x28] sm:$0xff] %v160_v20 }
  0xb4   :  { %v168_v21 = vpop.f32.mrf.mxu3 }
  0xb5   :  { %214 = vst [vmem:[%s395_s2 + $0x40] sm:$0xff] %v168_v21 }
  0xbc   :  { %v170_v22 = vpop.f32.mrf.mxu3 }
  0xbd   :  { %215 = vst [vmem:[%s395_s2 + $0x48] sm:$0xff] %v170_v22 }

</bundles_post_ra>
